<compile_context>
chip_gen: v5e
topology: v5e:2x2
jax: 0.10.0
libtpu: 0.0.40
codegen_flags: <defaults>
</compile_context>

<pallas_src>
import math

import jax
import jax.numpy as jnp
from jax.experimental import pallas as pl
from jax.experimental.pallas import tpu as pltpu


_LN_EPS = 1e-5  # torch.nn.LayerNorm default eps


def _layer_norm(x, gamma, beta):
    """LayerNorm over the last axis. gamma/beta are (1, D) and broadcast."""
    mean = jnp.mean(x, axis=-1, keepdims=True)
    var = jnp.mean(jnp.square(x - mean), axis=-1, keepdims=True)
    return (x - mean) * jax.lax.rsqrt(var + _LN_EPS) * gamma + beta


def _gelu_tanh(x):
    # TODO(synk): torch nn.GELU() is the exact erf GELU; the tanh approximation is
    # used here (and in the reference) for a guaranteed Mosaic lowering.
    c = math.sqrt(2.0 / math.pi)
    return 0.5 * x * (1.0 + jnp.tanh(c * (x + 0.044715 * x * x * x)))


def _mha_2d(q_in, kv_in, prm, num_heads, return_attn=False):
    """nn.MultiheadAttention (batch_first, eval mode) on a single example (2-D tiles)."""
    wq, bq, wk, bk, wv, bv, wo, bo = prm
    D = q_in.shape[-1]
    hd = D // num_heads
    scale = 1.0 / math.sqrt(hd)
    q = jnp.dot(q_in, wq, preferred_element_type=jnp.float32) + bq
    k = jnp.dot(kv_in, wk, preferred_element_type=jnp.float32) + bk
    v = jnp.dot(kv_in, wv, preferred_element_type=jnp.float32) + bv
    out_acc = None
    attn_acc = None
    for h in range(num_heads):                       # static unroll over heads
        sl = slice(h * hd, (h + 1) * hd)
        qh, kh, vh = q[:, sl], k[:, sl], v[:, sl]
        s = jax.lax.dot_general(qh, kh, (((1,), (1,)), ((), ())),
                                preferred_element_type=jnp.float32) * scale
        s = s - jnp.max(s, axis=-1, keepdims=True)
        e = jnp.exp(s)
        p = e / jnp.sum(e, axis=-1, keepdims=True)
        # TODO(synk): attention-weight dropout omitted (inference / eval mode).
        oh = jnp.dot(p, vh, preferred_element_type=jnp.float32)              # (Lq, hd)
        contrib = jnp.dot(oh, wo[sl, :], preferred_element_type=jnp.float32)  # (Lq, D)
        out_acc = contrib if out_acc is None else out_acc + contrib
        if return_attn:
            attn_acc = p if attn_acc is None else attn_acc + p
    out = out_acc + bo
    if return_attn:
        return out, attn_acc * (1.0 / num_heads)     # average over heads (torch default)
    return out


# ---------------------------------------------------------------------------
# Single fused kernel for the whole decoder layer
# ---------------------------------------------------------------------------
def _make_layer_kernel(num_heads, batch_block):
    def kernel(*refs):
        it = iter(refs)
        x_ref = next(it)
        mem_ref = next(it)

        def take(n):
            return [next(it)[...] for _ in range(n)]

        t2p = take(8)                                 # wq,bq,wk,bk,wv,bv,wo,bo
        p2t = take(8)
        spa_w, spa_b = take(2)
        dst = take(8)
        fin = take(8)
        g2, be2, g3, be3, g4, be4, g5, be5 = take(8)  # norm2..norm5
        w1, b1, w2, b2 = take(4)                      # MLP
        out_ref = next(it)
        attn_ref = next(it)

        for b in range(batch_block):                  # static unroll over batch block
            x = x_ref[b]                              # (Lq, D)
            mem = mem_ref[b]                          # (Lkv, D)

            # keys = norm2(mem + t2p_cross_attn(q=mem, k=x, v=x))
            dk = _mha_2d(mem, x, t2p, num_heads)
            keys = _layer_norm(mem + dk, g2, be2)

            # x3 = norm3(x + p2t(q=x, kv=mem) + distill(q=spa_proj(x), kv=mem))
            dx1 = _mha_2d(x, mem, p2t, num_heads)
            xq = jnp.dot(x, spa_w, preferred_element_type=jnp.float32) + spa_b
            dx2, attn2 = _mha_2d(xq, mem, dst, 1, return_attn=True)
            x3 = _layer_norm(x + dx1 + dx2, g3, be3)

            # x4 = x3 + final_cross_attn(q=x3, kv=keys); out = norm5(x4 + MLP(norm4(x4)))
            dx3 = _mha_2d(x3, keys, fin, num_heads)
            x4 = x3 + dx3
            h = _layer_norm(x4, g4, be4)
            h = jnp.dot(h, w1, preferred_element_type=jnp.float32) + b1
            h = _gelu_tanh(h)
            m = jnp.dot(h, w2, preferred_element_type=jnp.float32) + b2
            # TODO(synk): self.dropout on the MLP output omitted (inference / eval mode).
            out_ref[b] = _layer_norm(x4 + m, g5, be5).astype(out_ref.dtype)
            attn_ref[b] = attn2.astype(attn_ref.dtype)

    return kernel


def semi_attention_decoder_layer_forward(x, mem, params, *, num_heads, mask=None,
                                         batch_block=None):
    """Matches SemiAttentionDecoderLayer.forward (eval mode). Returns (out, attn2)."""
    del mask  # the reference forward never uses `mask`
    B, Lq, D = x.shape
    Lkv = mem.shape[1]
    Dh = params["mlp"]["w1"].shape[1]
    cb = B if batch_block is None else batch_block
    assert B % cb == 0 and D % num_heads == 0
    grid = (B // cb,)

    bmap = lambda i: (i, 0, 0)
    cmap = lambda i: (0, 0)
    wDD = pl.BlockSpec((D, D), cmap)
    b1D = pl.BlockSpec((1, D), cmap)

    arrays = [x, mem]
    in_specs = [pl.BlockSpec((cb, Lq, D), bmap),
                pl.BlockSpec((cb, Lkv, D), bmap)]

    def add_mha(prm):
        arrays.extend([prm["wq"], prm["bq"], prm["wk"], prm["bk"],
                       prm["wv"], prm["bv"], prm["wo"], prm["bo"]])
        in_specs.extend([wDD, b1D] * 4)

    add_mha(params["t2p_cross_attn"])
    add_mha(params["p2t_cross_attn"])
    arrays.extend([params["spa_proj"]["w"], params["spa_proj"]["b"]])
    in_specs.extend([wDD, b1D])
    add_mha(params["distill_attn"])
    add_mha(params["final_cross_attn"])
    for n in ("norm2", "norm3", "norm4", "norm5"):
        arrays.extend([params[n]["gamma"], params[n]["beta"]])
        in_specs.extend([b1D, b1D])
    arrays.extend([params["mlp"]["w1"], params["mlp"]["b1"],
                   params["mlp"]["w2"], params["mlp"]["b2"]])
    in_specs.extend([pl.BlockSpec((D, Dh), cmap), pl.BlockSpec((1, Dh), cmap),
                     pl.BlockSpec((Dh, D), cmap), b1D])

    out_shape = (jax.ShapeDtypeStruct((B, Lq, D), x.dtype),
                 jax.ShapeDtypeStruct((B, Lq, Lkv), jnp.float32))
    out_specs = [pl.BlockSpec((cb, Lq, D), bmap),
                 pl.BlockSpec((cb, Lq, Lkv), bmap)]

    out, attn2 = pl.pallas_call(
        _make_layer_kernel(num_heads, cb),
        out_shape=out_shape,
        grid_spec=pltpu.PrefetchScalarGridSpec(
            num_scalar_prefetch=0, grid=grid,
            in_specs=in_specs, out_specs=out_specs),
        compiler_params=pltpu.CompilerParams(
            dimension_semantics=("parallel",)),
    )(*arrays)
    return out, attn2


# ---------------------------------------------------------------------------
# Plain-JAX reference (same math, same parameter layout)
# ---------------------------------------------------------------------------
_HP = jax.lax.Precision.HIGHEST


def _ref_mha(q_in, kv_in, prm, num_heads, pre=None):
    if pre is not None:
        q_in = jnp.matmul(q_in, pre[0], precision=_HP) + pre[1]
    q = jnp.matmul(q_in, prm["wq"], precision=_HP) + prm["bq"]
    k = jnp.matmul(kv_in, prm["wk"], precision=_HP) + prm["bk"]
    v = jnp.matmul(kv_in, prm["wv"], precision=_HP) + prm["bv"]
    B, Lq, D = q.shape
    Lkv = k.shape[1]
    hd = D // num_heads
    qh = q.reshape(B, Lq, num_heads, hd).transpose(0, 2, 1, 3)
    kh = k.reshape(B, Lkv, num_heads, hd).transpose(0, 2, 1, 3)
    vh = v.reshape(B, Lkv, num_heads, hd).transpose(0, 2, 1, 3)
    s = jnp.einsum("bhqd,bhkd->bhqk", qh, kh, precision=_HP) / math.sqrt(hd)
    p = jax.nn.softmax(s, axis=-1)
    ctx = jnp.einsum("bhqk,bhkd->bhqd", p, vh, precision=_HP)
    ctx = ctx.transpose(0, 2, 1, 3).reshape(B, Lq, D)
    out = jnp.matmul(ctx, prm["wo"], precision=_HP) + prm["bo"]
    return out, jnp.mean(p, axis=1)


def _ref_forward(x, mem, params, num_heads):
    dk, _ = _ref_mha(mem, x, params["t2p_cross_attn"], num_heads)
    keys = _layer_norm(mem + dk, params["norm2"]["gamma"], params["norm2"]["beta"])
    dx1, _ = _ref_mha(x, mem, params["p2t_cross_attn"], num_heads)
    dx2, attn2 = _ref_mha(x, mem, params["distill_attn"], 1,
                          pre=(params["spa_proj"]["w"], params["spa_proj"]["b"]))
    x3 = _layer_norm(x + dx1 + dx2, params["norm3"]["gamma"], params["norm3"]["beta"])
    dx3, _ = _ref_mha(x3, keys, params["final_cross_attn"], num_heads)
    x4 = x3 + dx3
    h = _layer_norm(x4, params["norm4"]["gamma"], params["norm4"]["beta"])
    h = jnp.matmul(h, params["mlp"]["w1"], precision=_HP) + params["mlp"]["b1"]
    m = jnp.matmul(_gelu_tanh(h), params["mlp"]["w2"], precision=_HP) + params["mlp"]["b2"]
    out = _layer_norm(x4 + m, params["norm5"]["gamma"], params["norm5"]["beta"])
    return out, attn2


# ---------------------------------------------------------------------------
if __name__ == "__main__":
    B, Lq, Lkv, D, H = 2, 8, 16, 32, 4   # batch, query len, memory len, d_model, nhead
    root = jax.random.PRNGKey(0)
    key_params, key_x, key_mem = jax.random.split(root, 3)

    def _w(k, shape, s=0.08):
        return (s * jax.random.normal(k, shape)).astype(jnp.float32)

    def init_mha(k):
        ks = jax.random.split(k, 8)
        return {"wq": _w(ks[0], (D, D)), "bq": _w(ks[1], (1, D)),
                "wk": _w(ks[2], (D, D)), "bk": _w(ks[3], (1, D)),
                "wv": _w(ks[4], (D, D)), "bv": _w(ks[5], (1, D)),
                "wo": _w(ks[6], (D, D)), "bo": _w(ks[7], (1, D))}

    def init_ln(k):
        k1, k2 = jax.random.split(k)
        return {"gamma": (1.0 + 0.05 * jax.random.normal(k1, (1, D))).astype(jnp.float32),
                "beta": (0.05 * jax.random.normal(k2, (1, D))).astype(jnp.float32)}

    keys = jax.random.split(key_params, 14)
    params = {
        "t2p_cross_attn": init_mha(keys[0]),
        "p2t_cross_attn": init_mha(keys[1]),
        "distill_attn": init_mha(keys[2]),
        "final_cross_attn": init_mha(keys[3]),
        "spa_proj": {"w": _w(keys[4], (D, D)), "b": _w(keys[5], (1, D))},
        "norm2": init_ln(keys[6]), "norm3": init_ln(keys[7]),
        "norm4": init_ln(keys[8]), "norm5": init_ln(keys[9]),
        "mlp": {"w1": _w(keys[10], (D, 4 * D)), "b1": _w(keys[11], (1, 4 * D)),
                "w2": _w(keys[12], (4 * D, D)), "b2": _w(keys[13], (1, D))},
    }
    x = jax.random.normal(key_x, (B, Lq, D), dtype=jnp.float32)
    mem = jax.random.normal(key_mem, (B, Lkv, D), dtype=jnp.float32)

    out, attn2 = semi_attention_decoder_layer_forward(x, mem, params, num_heads=H)
    out = jax.block_until_ready(out)
    attn2 = jax.block_until_ready(attn2)

    ref_out, ref_attn2 = _ref_forward(x, mem, params, H)
    assert out.shape == (B, Lq, D)
    assert attn2.shape == (B, Lq, Lkv)
    assert jnp.allclose(out, ref_out, atol=1e-2, rtol=1e-2), "output mismatch vs reference"
    assert jnp.allclose(attn2, ref_attn2, atol=1e-2, rtol=1e-2), "attn2 mismatch vs reference"

    print("KERNEL_OK")
</pallas_src>

<mosaic_0001>
module attributes {stable_mosaic.version = 11 : i64} {
  func.func @kernel(%arg0: i32, %arg1: memref<2x8x32xf32, #tpu.memory_space<vmem>>, %arg2: memref<2x16x32xf32, #tpu.memory_space<vmem>>, %arg3: memref<32x32xf32, #tpu.memory_space<vmem>>, %arg4: memref<1x32xf32, #tpu.memory_space<vmem>>, %arg5: memref<32x32xf32, #tpu.memory_space<vmem>>, %arg6: memref<1x32xf32, #tpu.memory_space<vmem>>, %arg7: memref<32x32xf32, #tpu.memory_space<vmem>>, %arg8: memref<1x32xf32, #tpu.memory_space<vmem>>, %arg9: memref<32x32xf32, #tpu.memory_space<vmem>>, %arg10: memref<1x32xf32, #tpu.memory_space<vmem>>, %arg11: memref<32x32xf32, #tpu.memory_space<vmem>>, %arg12: memref<1x32xf32, #tpu.memory_space<vmem>>, %arg13: memref<32x32xf32, #tpu.memory_space<vmem>>, %arg14: memref<1x32xf32, #tpu.memory_space<vmem>>, %arg15: memref<32x32xf32, #tpu.memory_space<vmem>>, %arg16: memref<1x32xf32, #tpu.memory_space<vmem>>, %arg17: memref<32x32xf32, #tpu.memory_space<vmem>>, %arg18: memref<1x32xf32, #tpu.memory_space<vmem>>, %arg19: memref<32x32xf32, #tpu.memory_space<vmem>>, %arg20: memref<1x32xf32, #tpu.memory_space<vmem>>, %arg21: memref<32x32xf32, #tpu.memory_space<vmem>>, %arg22: memref<1x32xf32, #tpu.memory_space<vmem>>, %arg23: memref<32x32xf32, #tpu.memory_space<vmem>>, %arg24: memref<1x32xf32, #tpu.memory_space<vmem>>, %arg25: memref<32x32xf32, #tpu.memory_space<vmem>>, %arg26: memref<1x32xf32, #tpu.memory_space<vmem>>, %arg27: memref<32x32xf32, #tpu.memory_space<vmem>>, %arg28: memref<1x32xf32, #tpu.memory_space<vmem>>, %arg29: memref<32x32xf32, #tpu.memory_space<vmem>>, %arg30: memref<1x32xf32, #tpu.memory_space<vmem>>, %arg31: memref<32x32xf32, #tpu.memory_space<vmem>>, %arg32: memref<1x32xf32, #tpu.memory_space<vmem>>, %arg33: memref<32x32xf32, #tpu.memory_space<vmem>>, %arg34: memref<1x32xf32, #tpu.memory_space<vmem>>, %arg35: memref<32x32xf32, #tpu.memory_space<vmem>>, %arg36: memref<1x32xf32, #tpu.memory_space<vmem>>, %arg37: memref<1x32xf32, #tpu.memory_space<vmem>>, %arg38: memref<1x32xf32, #tpu.memory_space<vmem>>, %arg39: memref<1x32xf32, #tpu.memory_space<vmem>>, %arg40: memref<1x32xf32, #tpu.memory_space<vmem>>, %arg41: memref<1x32xf32, #tpu.memory_space<vmem>>, %arg42: memref<1x32xf32, #tpu.memory_space<vmem>>, %arg43: memref<1x32xf32, #tpu.memory_space<vmem>>, %arg44: memref<1x32xf32, #tpu.memory_space<vmem>>, %arg45: memref<32x128xf32, #tpu.memory_space<vmem>>, %arg46: memref<1x128xf32, #tpu.memory_space<vmem>>, %arg47: memref<128x32xf32, #tpu.memory_space<vmem>>, %arg48: memref<1x32xf32, #tpu.memory_space<vmem>>, %arg49: memref<2x8x32xf32, #tpu.memory_space<vmem>>, %arg50: memref<2x8x16xf32, #tpu.memory_space<vmem>>) attributes {dimension_semantics = [#tpu.dimension_semantics<parallel>], iteration_bounds = array<i64: 1>, scalar_prefetch = 0 : i64, scratch_operands = 0 : i64, tpu.core_type = #tpu.core_type<tc>, window_params = [{transform_indices = @transform_0, window_bounds = array<i64: 2, 8, 32>}, {transform_indices = @transform_1, window_bounds = array<i64: 2, 16, 32>}, {pipeline_mode = #tpu.pipeline_mode<synchronous>, transform_indices = @transform_2, window_bounds = array<i64: 32, 32>}, {pipeline_mode = #tpu.pipeline_mode<synchronous>, transform_indices = @transform_3, window_bounds = array<i64: 1, 32>}, {pipeline_mode = #tpu.pipeline_mode<synchronous>, transform_indices = @transform_4, window_bounds = array<i64: 32, 32>}, {pipeline_mode = #tpu.pipeline_mode<synchronous>, transform_indices = @transform_5, window_bounds = array<i64: 1, 32>}, {pipeline_mode = #tpu.pipeline_mode<synchronous>, transform_indices = @transform_6, window_bounds = array<i64: 32, 32>}, {pipeline_mode = #tpu.pipeline_mode<synchronous>, transform_indices = @transform_7, window_bounds = array<i64: 1, 32>}, {pipeline_mode = #tpu.pipeline_mode<synchronous>, transform_indices = @transform_8, window_bounds = array<i64: 32, 32>}, {pipeline_mode = #tpu.pipeline_mode<synchronous>, transform_indices = @transform_9, window_bounds = array<i64: 1, 32>}, {pipeline_mode = #tpu.pipeline_mode<synchronous>, transform_indices = @transform_10, window_bounds = array<i64: 32, 32>}, {pipeline_mode = #tpu.pipeline_mode<synchronous>, transform_indices = @transform_11, window_bounds = array<i64: 1, 32>}, {pipeline_mode = #tpu.pipeline_mode<synchronous>, transform_indices = @transform_12, window_bounds = array<i64: 32, 32>}, {pipeline_mode = #tpu.pipeline_mode<synchronous>, transform_indices = @transform_13, window_bounds = array<i64: 1, 32>}, {pipeline_mode = #tpu.pipeline_mode<synchronous>, transform_indices = @transform_14, window_bounds = array<i64: 32, 32>}, {pipeline_mode = #tpu.pipeline_mode<synchronous>, transform_indices = @transform_15, window_bounds = array<i64: 1, 32>}, {pipeline_mode = #tpu.pipeline_mode<synchronous>, transform_indices = @transform_16, window_bounds = array<i64: 32, 32>}, {pipeline_mode = #tpu.pipeline_mode<synchronous>, transform_indices = @transform_17, window_bounds = array<i64: 1, 32>}, {pipeline_mode = #tpu.pipeline_mode<synchronous>, transform_indices = @transform_18, window_bounds = array<i64: 32, 32>}, {pipeline_mode = #tpu.pipeline_mode<synchronous>, transform_indices = @transform_19, window_bounds = array<i64: 1, 32>}, {pipeline_mode = #tpu.pipeline_mode<synchronous>, transform_indices = @transform_20, window_bounds = array<i64: 32, 32>}, {pipeline_mode = #tpu.pipeline_mode<synchronous>, transform_indices = @transform_21, window_bounds = array<i64: 1, 32>}, {pipeline_mode = #tpu.pipeline_mode<synchronous>, transform_indices = @transform_22, window_bounds = array<i64: 32, 32>}, {pipeline_mode = #tpu.pipeline_mode<synchronous>, transform_indices = @transform_23, window_bounds = array<i64: 1, 32>}, {pipeline_mode = #tpu.pipeline_mode<synchronous>, transform_indices = @transform_24, window_bounds = array<i64: 32, 32>}, {pipeline_mode = #tpu.pipeline_mode<synchronous>, transform_indices = @transform_25, window_bounds = array<i64: 1, 32>}, {pipeline_mode = #tpu.pipeline_mode<synchronous>, transform_indices = @transform_26, window_bounds = array<i64: 32, 32>}, {pipeline_mode = #tpu.pipeline_mode<synchronous>, transform_indices = @transform_27, window_bounds = array<i64: 1, 32>}, {pipeline_mode = #tpu.pipeline_mode<synchronous>, transform_indices = @transform_28, window_bounds = array<i64: 32, 32>}, {pipeline_mode = #tpu.pipeline_mode<synchronous>, transform_indices = @transform_29, window_bounds = array<i64: 1, 32>}, {pipeline_mode = #tpu.pipeline_mode<synchronous>, transform_indices = @transform_30, window_bounds = array<i64: 32, 32>}, {pipeline_mode = #tpu.pipeline_mode<synchronous>, transform_indices = @transform_31, window_bounds = array<i64: 1, 32>}, {pipeline_mode = #tpu.pipeline_mode<synchronous>, transform_indices = @transform_32, window_bounds = array<i64: 32, 32>}, {pipeline_mode = #tpu.pipeline_mode<synchronous>, transform_indices = @transform_33, window_bounds = array<i64: 1, 32>}, {pipeline_mode = #tpu.pipeline_mode<synchronous>, transform_indices = @transform_34, window_bounds = array<i64: 32, 32>}, {pipeline_mode = #tpu.pipeline_mode<synchronous>, transform_indices = @transform_35, window_bounds = array<i64: 1, 32>}, {pipeline_mode = #tpu.pipeline_mode<synchronous>, transform_indices = @transform_36, window_bounds = array<i64: 1, 32>}, {pipeline_mode = #tpu.pipeline_mode<synchronous>, transform_indices = @transform_37, window_bounds = array<i64: 1, 32>}, {pipeline_mode = #tpu.pipeline_mode<synchronous>, transform_indices = @transform_38, window_bounds = array<i64: 1, 32>}, {pipeline_mode = #tpu.pipeline_mode<synchronous>, transform_indices = @transform_39, window_bounds = array<i64: 1, 32>}, {pipeline_mode = #tpu.pipeline_mode<synchronous>, transform_indices = @transform_40, window_bounds = array<i64: 1, 32>}, {pipeline_mode = #tpu.pipeline_mode<synchronous>, transform_indices = @transform_41, window_bounds = array<i64: 1, 32>}, {pipeline_mode = #tpu.pipeline_mode<synchronous>, transform_indices = @transform_42, window_bounds = array<i64: 1, 32>}, {pipeline_mode = #tpu.pipeline_mode<synchronous>, transform_indices = @transform_43, window_bounds = array<i64: 1, 32>}, {pipeline_mode = #tpu.pipeline_mode<synchronous>, transform_indices = @transform_44, window_bounds = array<i64: 32, 128>}, {pipeline_mode = #tpu.pipeline_mode<synchronous>, transform_indices = @transform_45, window_bounds = array<i64: 1, 128>}, {pipeline_mode = #tpu.pipeline_mode<synchronous>, transform_indices = @transform_46, window_bounds = array<i64: 128, 32>}, {pipeline_mode = #tpu.pipeline_mode<synchronous>, transform_indices = @transform_47, window_bounds = array<i64: 1, 32>}, {transform_indices = @transform_48, window_bounds = array<i64: 2, 8, 32>}, {transform_indices = @transform_49, window_bounds = array<i64: 2, 8, 16>}]} {
    %c0 = arith.constant 0 : index
    %c0_0 = arith.constant 0 : index
    %0 = vector.load %arg3[%c0, %c0_0] : memref<32x32xf32, #tpu.memory_space<vmem>>, vector<32x32xf32>
    %c0_1 = arith.constant 0 : index
    %c0_2 = arith.constant 0 : index
    %1 = vector.load %arg4[%c0_1, %c0_2] : memref<1x32xf32, #tpu.memory_space<vmem>>, vector<1x32xf32>
    %c0_3 = arith.constant 0 : index
    %c0_4 = arith.constant 0 : index
    %2 = vector.load %arg5[%c0_3, %c0_4] : memref<32x32xf32, #tpu.memory_space<vmem>>, vector<32x32xf32>
    %c0_5 = arith.constant 0 : index
    %c0_6 = arith.constant 0 : index
    %3 = vector.load %arg6[%c0_5, %c0_6] : memref<1x32xf32, #tpu.memory_space<vmem>>, vector<1x32xf32>
    %c0_7 = arith.constant 0 : index
    %c0_8 = arith.constant 0 : index
    %4 = vector.load %arg7[%c0_7, %c0_8] : memref<32x32xf32, #tpu.memory_space<vmem>>, vector<32x32xf32>
    %c0_9 = arith.constant 0 : index
    %c0_10 = arith.constant 0 : index
    %5 = vector.load %arg8[%c0_9, %c0_10] : memref<1x32xf32, #tpu.memory_space<vmem>>, vector<1x32xf32>
    %c0_11 = arith.constant 0 : index
    %c0_12 = arith.constant 0 : index
    %6 = vector.load %arg9[%c0_11, %c0_12] : memref<32x32xf32, #tpu.memory_space<vmem>>, vector<32x32xf32>
    %c0_13 = arith.constant 0 : index
    %c0_14 = arith.constant 0 : index
    %7 = vector.load %arg10[%c0_13, %c0_14] : memref<1x32xf32, #tpu.memory_space<vmem>>, vector<1x32xf32>
    %c0_15 = arith.constant 0 : index
    %c0_16 = arith.constant 0 : index
    %8 = vector.load %arg11[%c0_15, %c0_16] : memref<32x32xf32, #tpu.memory_space<vmem>>, vector<32x32xf32>
    %c0_17 = arith.constant 0 : index
    %c0_18 = arith.constant 0 : index
    %9 = vector.load %arg12[%c0_17, %c0_18] : memref<1x32xf32, #tpu.memory_space<vmem>>, vector<1x32xf32>
    %c0_19 = arith.constant 0 : index
    %c0_20 = arith.constant 0 : index
    %10 = vector.load %arg13[%c0_19, %c0_20] : memref<32x32xf32, #tpu.memory_space<vmem>>, vector<32x32xf32>
    %c0_21 = arith.constant 0 : index
    %c0_22 = arith.constant 0 : index
    %11 = vector.load %arg14[%c0_21, %c0_22] : memref<1x32xf32, #tpu.memory_space<vmem>>, vector<1x32xf32>
    %c0_23 = arith.constant 0 : index
    %c0_24 = arith.constant 0 : index
    %12 = vector.load %arg15[%c0_23, %c0_24] : memref<32x32xf32, #tpu.memory_space<vmem>>, vector<32x32xf32>
    %c0_25 = arith.constant 0 : index
    %c0_26 = arith.constant 0 : index
    %13 = vector.load %arg16[%c0_25, %c0_26] : memref<1x32xf32, #tpu.memory_space<vmem>>, vector<1x32xf32>
    %c0_27 = arith.constant 0 : index
    %c0_28 = arith.constant 0 : index
    %14 = vector.load %arg17[%c0_27, %c0_28] : memref<32x32xf32, #tpu.memory_space<vmem>>, vector<32x32xf32>
    %c0_29 = arith.constant 0 : index
    %c0_30 = arith.constant 0 : index
    %15 = vector.load %arg18[%c0_29, %c0_30] : memref<1x32xf32, #tpu.memory_space<vmem>>, vector<1x32xf32>
    %c0_31 = arith.constant 0 : index
    %c0_32 = arith.constant 0 : index
    %16 = vector.load %arg19[%c0_31, %c0_32] : memref<32x32xf32, #tpu.memory_space<vmem>>, vector<32x32xf32>
    %c0_33 = arith.constant 0 : index
    %c0_34 = arith.constant 0 : index
    %17 = vector.load %arg20[%c0_33, %c0_34] : memref<1x32xf32, #tpu.memory_space<vmem>>, vector<1x32xf32>
    %c0_35 = arith.constant 0 : index
    %c0_36 = arith.constant 0 : index
    %18 = vector.load %arg21[%c0_35, %c0_36] : memref<32x32xf32, #tpu.memory_space<vmem>>, vector<32x32xf32>
    %c0_37 = arith.constant 0 : index
    %c0_38 = arith.constant 0 : index
    %19 = vector.load %arg22[%c0_37, %c0_38] : memref<1x32xf32, #tpu.memory_space<vmem>>, vector<1x32xf32>
    %c0_39 = arith.constant 0 : index
    %c0_40 = arith.constant 0 : index
    %20 = vector.load %arg23[%c0_39, %c0_40] : memref<32x32xf32, #tpu.memory_space<vmem>>, vector<32x32xf32>
    %c0_41 = arith.constant 0 : index
    %c0_42 = arith.constant 0 : index
    %21 = vector.load %arg24[%c0_41, %c0_42] : memref<1x32xf32, #tpu.memory_space<vmem>>, vector<1x32xf32>
    %c0_43 = arith.constant 0 : index
    %c0_44 = arith.constant 0 : index
    %22 = vector.load %arg25[%c0_43, %c0_44] : memref<32x32xf32, #tpu.memory_space<vmem>>, vector<32x32xf32>
    %c0_45 = arith.constant 0 : index
    %c0_46 = arith.constant 0 : index
    %23 = vector.load %arg26[%c0_45, %c0_46] : memref<1x32xf32, #tpu.memory_space<vmem>>, vector<1x32xf32>
    %c0_47 = arith.constant 0 : index
    %c0_48 = arith.constant 0 : index
    %24 = vector.load %arg27[%c0_47, %c0_48] : memref<32x32xf32, #tpu.memory_space<vmem>>, vector<32x32xf32>
    %c0_49 = arith.constant 0 : index
    %c0_50 = arith.constant 0 : index
    %25 = vector.load %arg28[%c0_49, %c0_50] : memref<1x32xf32, #tpu.memory_space<vmem>>, vector<1x32xf32>
    %c0_51 = arith.constant 0 : index
    %c0_52 = arith.constant 0 : index
    %26 = vector.load %arg29[%c0_51, %c0_52] : memref<32x32xf32, #tpu.memory_space<vmem>>, vector<32x32xf32>
    %c0_53 = arith.constant 0 : index
    %c0_54 = arith.constant 0 : index
    %27 = vector.load %arg30[%c0_53, %c0_54] : memref<1x32xf32, #tpu.memory_space<vmem>>, vector<1x32xf32>
    %c0_55 = arith.constant 0 : index
    %c0_56 = arith.constant 0 : index
    %28 = vector.load %arg31[%c0_55, %c0_56] : memref<32x32xf32, #tpu.memory_space<vmem>>, vector<32x32xf32>
    %c0_57 = arith.constant 0 : index
    %c0_58 = arith.constant 0 : index
    %29 = vector.load %arg32[%c0_57, %c0_58] : memref<1x32xf32, #tpu.memory_space<vmem>>, vector<1x32xf32>
    %c0_59 = arith.constant 0 : index
    %c0_60 = arith.constant 0 : index
    %30 = vector.load %arg33[%c0_59, %c0_60] : memref<32x32xf32, #tpu.memory_space<vmem>>, vector<32x32xf32>
    %c0_61 = arith.constant 0 : index
    %c0_62 = arith.constant 0 : index
    %31 = vector.load %arg34[%c0_61, %c0_62] : memref<1x32xf32, #tpu.memory_space<vmem>>, vector<1x32xf32>
    %c0_63 = arith.constant 0 : index
    %c0_64 = arith.constant 0 : index
    %32 = vector.load %arg35[%c0_63, %c0_64] : memref<32x32xf32, #tpu.memory_space<vmem>>, vector<32x32xf32>
    %c0_65 = arith.constant 0 : index
    %c0_66 = arith.constant 0 : index
    %33 = vector.load %arg36[%c0_65, %c0_66] : memref<1x32xf32, #tpu.memory_space<vmem>>, vector<1x32xf32>
    %c0_67 = arith.constant 0 : index
    %c0_68 = arith.constant 0 : index
    %34 = vector.load %arg37[%c0_67, %c0_68] : memref<1x32xf32, #tpu.memory_space<vmem>>, vector<1x32xf32>
    %c0_69 = arith.constant 0 : index
    %c0_70 = arith.constant 0 : index
    %35 = vector.load %arg38[%c0_69, %c0_70] : memref<1x32xf32, #tpu.memory_space<vmem>>, vector<1x32xf32>
    %c0_71 = arith.constant 0 : index
    %c0_72 = arith.constant 0 : index
    %36 = vector.load %arg39[%c0_71, %c0_72] : memref<1x32xf32, #tpu.memory_space<vmem>>, vector<1x32xf32>
    %c0_73 = arith.constant 0 : index
    %c0_74 = arith.constant 0 : index
    %37 = vector.load %arg40[%c0_73, %c0_74] : memref<1x32xf32, #tpu.memory_space<vmem>>, vector<1x32xf32>
    %c0_75 = arith.constant 0 : index
    %c0_76 = arith.constant 0 : index
    %38 = vector.load %arg41[%c0_75, %c0_76] : memref<1x32xf32, #tpu.memory_space<vmem>>, vector<1x32xf32>
    %c0_77 = arith.constant 0 : index
    %c0_78 = arith.constant 0 : index
    %39 = vector.load %arg42[%c0_77, %c0_78] : memref<1x32xf32, #tpu.memory_space<vmem>>, vector<1x32xf32>
    %c0_79 = arith.constant 0 : index
    %c0_80 = arith.constant 0 : index
    %40 = vector.load %arg43[%c0_79, %c0_80] : memref<1x32xf32, #tpu.memory_space<vmem>>, vector<1x32xf32>
    %c0_81 = arith.constant 0 : index
    %c0_82 = arith.constant 0 : index
    %41 = vector.load %arg44[%c0_81, %c0_82] : memref<1x32xf32, #tpu.memory_space<vmem>>, vector<1x32xf32>
    %c0_83 = arith.constant 0 : index
    %c0_84 = arith.constant 0 : index
    %42 = vector.load %arg45[%c0_83, %c0_84] : memref<32x128xf32, #tpu.memory_space<vmem>>, vector<32x128xf32>
    %c0_85 = arith.constant 0 : index
    %c0_86 = arith.constant 0 : index
    %43 = vector.load %arg46[%c0_85, %c0_86] : memref<1x128xf32, #tpu.memory_space<vmem>>, vector<1x128xf32>
    %c0_87 = arith.constant 0 : index
    %c0_88 = arith.constant 0 : index
    %44 = vector.load %arg47[%c0_87, %c0_88] : memref<128x32xf32, #tpu.memory_space<vmem>>, vector<128x32xf32>
    %c0_89 = arith.constant 0 : index
    %c0_90 = arith.constant 0 : index
    %45 = vector.load %arg48[%c0_89, %c0_90] : memref<1x32xf32, #tpu.memory_space<vmem>>, vector<1x32xf32>
    %c0_91 = arith.constant 0 : index
    %c0_92 = arith.constant 0 : index
    %c0_93 = arith.constant 0 : index
    %46 = vector.load %arg1[%c0_91, %c0_92, %c0_93] : memref<2x8x32xf32, #tpu.memory_space<vmem>>, vector<1x8x32xf32>
    %47 = vector.shape_cast %46 : vector<1x8x32xf32> to vector<8x32xf32>
    %c0_94 = arith.constant 0 : index
    %c0_95 = arith.constant 0 : index
    %c0_96 = arith.constant 0 : index
    %48 = vector.load %arg2[%c0_94, %c0_95, %c0_96] : memref<2x16x32xf32, #tpu.memory_space<vmem>>, vector<1x16x32xf32>
    %49 = vector.shape_cast %48 : vector<1x16x32xf32> to vector<16x32xf32>
    %cst = arith.constant dense<0.000000e+00> : vector<16x32xf32>
    %50 = tpu.matmul %49, %0, %cst {dimension_numbers = #tpu.dot_dimension_numbers<[1], [0], [0], [1], [0, 0, 1, 1], [], []>} : vector<16x32xf32>, vector<32x32xf32>, vector<16x32xf32> -> vector<16x32xf32>
    %51 = vector.broadcast %1 : vector<1x32xf32> to vector<16x32xf32>
    %52 = arith.addf %50, %51 : vector<16x32xf32>
    %cst_97 = arith.constant dense<0.000000e+00> : vector<8x32xf32>
    %53 = tpu.matmul %47, %2, %cst_97 {dimension_numbers = #tpu.dot_dimension_numbers<[1], [0], [0], [1], [0, 0, 1, 1], [], []>} : vector<8x32xf32>, vector<32x32xf32>, vector<8x32xf32> -> vector<8x32xf32>
    %54 = vector.broadcast %3 : vector<1x32xf32> to vector<8x32xf32>
    %55 = arith.addf %53, %54 : vector<8x32xf32>
    %cst_98 = arith.constant dense<0.000000e+00> : vector<8x32xf32>
    %56 = tpu.matmul %47, %4, %cst_98 {dimension_numbers = #tpu.dot_dimension_numbers<[1], [0], [0], [1], [0, 0, 1, 1], [], []>} : vector<8x32xf32>, vector<32x32xf32>, vector<8x32xf32> -> vector<8x32xf32>
    %57 = vector.broadcast %5 : vector<1x32xf32> to vector<8x32xf32>
    %58 = arith.addf %56, %57 : vector<8x32xf32>
    %59 = vector.extract_strided_slice %52 {offsets = [0, 0], sizes = [16, 8], strides = [1, 1]} : vector<16x32xf32> to vector<16x8xf32>
    %60 = vector.extract_strided_slice %55 {offsets = [0, 0], sizes = [8, 8], strides = [1, 1]} : vector<8x32xf32> to vector<8x8xf32>
    %61 = vector.extract_strided_slice %58 {offsets = [0, 0], sizes = [8, 8], strides = [1, 1]} : vector<8x32xf32> to vector<8x8xf32>
    %cst_99 = arith.constant dense<0.000000e+00> : vector<16x8xf32>
    %62 = tpu.matmul %59, %60, %cst_99 {dimension_numbers = #tpu.dot_dimension_numbers<[1], [1], [0], [0], [0, 0, 1, 0], [], []>} : vector<16x8xf32>, vector<8x8xf32>, vector<16x8xf32> -> vector<16x8xf32>
    %cst_100 = arith.constant 0.353553385 : f32
    %63 = vector.broadcast %cst_100 : f32 to vector<16x8xf32>
    %64 = arith.mulf %62, %63 : vector<16x8xf32>
    %cst_101 = arith.constant dense<0xFF800000> : vector<16xf32>
    %65 = vector.multi_reduction <maximumf>, %64, %cst_101 [1] : vector<16x8xf32> to vector<16xf32>
    %66 = vector.shape_cast %65 : vector<16xf32> to vector<16x1xf32>
    %67 = vector.broadcast %66 : vector<16x1xf32> to vector<16x8xf32>
    %68 = arith.subf %64, %67 : vector<16x8xf32>
    %69 = math.exp %68 : vector<16x8xf32>
    %cst_102 = arith.constant dense<0.000000e+00> : vector<16xf32>
    %70 = vector.multi_reduction <add>, %69, %cst_102 [1] : vector<16x8xf32> to vector<16xf32>
    %71 = vector.shape_cast %70 : vector<16xf32> to vector<16x1xf32>
    %72 = vector.broadcast %71 : vector<16x1xf32> to vector<16x8xf32>
    %73 = arith.divf %69, %72 : vector<16x8xf32>
    %cst_103 = arith.constant dense<0.000000e+00> : vector<16x8xf32>
    %74 = tpu.matmul %73, %61, %cst_103 {dimension_numbers = #tpu.dot_dimension_numbers<[1], [0], [0], [1], [0, 0, 1, 1], [], []>} : vector<16x8xf32>, vector<8x8xf32>, vector<16x8xf32> -> vector<16x8xf32>
    %75 = vector.extract_strided_slice %6 {offsets = [0, 0], sizes = [8, 32], strides = [1, 1]} : vector<32x32xf32> to vector<8x32xf32>
    %cst_104 = arith.constant dense<0.000000e+00> : vector<16x32xf32>
    %76 = tpu.matmul %74, %75, %cst_104 {dimension_numbers = #tpu.dot_dimension_numbers<[1], [0], [0], [1], [0, 0, 1, 1], [], []>} : vector<16x8xf32>, vector<8x32xf32>, vector<16x32xf32> -> vector<16x32xf32>
    %77 = vector.extract_strided_slice %52 {offsets = [0, 8], sizes = [16, 8], strides = [1, 1]} : vector<16x32xf32> to vector<16x8xf32>
    %78 = vector.extract_strided_slice %55 {offsets = [0, 8], sizes = [8, 8], strides = [1, 1]} : vector<8x32xf32> to vector<8x8xf32>
    %79 = vector.extract_strided_slice %58 {offsets = [0, 8], sizes = [8, 8], strides = [1, 1]} : vector<8x32xf32> to vector<8x8xf32>
    %cst_105 = arith.constant dense<0.000000e+00> : vector<16x8xf32>
    %80 = tpu.matmul %77, %78, %cst_105 {dimension_numbers = #tpu.dot_dimension_numbers<[1], [1], [0], [0], [0, 0, 1, 0], [], []>} : vector<16x8xf32>, vector<8x8xf32>, vector<16x8xf32> -> vector<16x8xf32>
    %cst_106 = arith.constant 0.353553385 : f32
    %81 = vector.broadcast %cst_106 : f32 to vector<16x8xf32>
    %82 = arith.mulf %80, %81 : vector<16x8xf32>
    %cst_107 = arith.constant dense<0xFF800000> : vector<16xf32>
    %83 = vector.multi_reduction <maximumf>, %82, %cst_107 [1] : vector<16x8xf32> to vector<16xf32>
    %84 = vector.shape_cast %83 : vector<16xf32> to vector<16x1xf32>
    %85 = vector.broadcast %84 : vector<16x1xf32> to vector<16x8xf32>
    %86 = arith.subf %82, %85 : vector<16x8xf32>
    %87 = math.exp %86 : vector<16x8xf32>
    %cst_108 = arith.constant dense<0.000000e+00> : vector<16xf32>
    %88 = vector.multi_reduction <add>, %87, %cst_108 [1] : vector<16x8xf32> to vector<16xf32>
    %89 = vector.shape_cast %88 : vector<16xf32> to vector<16x1xf32>
    %90 = vector.broadcast %89 : vector<16x1xf32> to vector<16x8xf32>
    %91 = arith.divf %87, %90 : vector<16x8xf32>
    %cst_109 = arith.constant dense<0.000000e+00> : vector<16x8xf32>
    %92 = tpu.matmul %91, %79, %cst_109 {dimension_numbers = #tpu.dot_dimension_numbers<[1], [0], [0], [1], [0, 0, 1, 1], [], []>} : vector<16x8xf32>, vector<8x8xf32>, vector<16x8xf32> -> vector<16x8xf32>
    %93 = vector.extract_strided_slice %6 {offsets = [8, 0], sizes = [8, 32], strides = [1, 1]} : vector<32x32xf32> to vector<8x32xf32>
    %cst_110 = arith.constant dense<0.000000e+00> : vector<16x32xf32>
    %94 = tpu.matmul %92, %93, %cst_110 {dimension_numbers = #tpu.dot_dimension_numbers<[1], [0], [0], [1], [0, 0, 1, 1], [], []>} : vector<16x8xf32>, vector<8x32xf32>, vector<16x32xf32> -> vector<16x32xf32>
    %95 = arith.addf %76, %94 : vector<16x32xf32>
    %96 = vector.extract_strided_slice %52 {offsets = [0, 16], sizes = [16, 8], strides = [1, 1]} : vector<16x32xf32> to vector<16x8xf32>
    %97 = vector.extract_strided_slice %55 {offsets = [0, 16], sizes = [8, 8], strides = [1, 1]} : vector<8x32xf32> to vector<8x8xf32>
    %98 = vector.extract_strided_slice %58 {offsets = [0, 16], sizes = [8, 8], strides = [1, 1]} : vector<8x32xf32> to vector<8x8xf32>
    %cst_111 = arith.constant dense<0.000000e+00> : vector<16x8xf32>
    %99 = tpu.matmul %96, %97, %cst_111 {dimension_numbers = #tpu.dot_dimension_numbers<[1], [1], [0], [0], [0, 0, 1, 0], [], []>} : vector<16x8xf32>, vector<8x8xf32>, vector<16x8xf32> -> vector<16x8xf32>
    %cst_112 = arith.constant 0.353553385 : f32
    %100 = vector.broadcast %cst_112 : f32 to vector<16x8xf32>
    %101 = arith.mulf %99, %100 : vector<16x8xf32>
    %cst_113 = arith.constant dense<0xFF800000> : vector<16xf32>
    %102 = vector.multi_reduction <maximumf>, %101, %cst_113 [1] : vector<16x8xf32> to vector<16xf32>
    %103 = vector.shape_cast %102 : vector<16xf32> to vector<16x1xf32>
    %104 = vector.broadcast %103 : vector<16x1xf32> to vector<16x8xf32>
    %105 = arith.subf %101, %104 : vector<16x8xf32>
    %106 = math.exp %105 : vector<16x8xf32>
    %cst_114 = arith.constant dense<0.000000e+00> : vector<16xf32>
    %107 = vector.multi_reduction <add>, %106, %cst_114 [1] : vector<16x8xf32> to vector<16xf32>
    %108 = vector.shape_cast %107 : vector<16xf32> to vector<16x1xf32>
    %109 = vector.broadcast %108 : vector<16x1xf32> to vector<16x8xf32>
    %110 = arith.divf %106, %109 : vector<16x8xf32>
    %cst_115 = arith.constant dense<0.000000e+00> : vector<16x8xf32>
    %111 = tpu.matmul %110, %98, %cst_115 {dimension_numbers = #tpu.dot_dimension_numbers<[1], [0], [0], [1], [0, 0, 1, 1], [], []>} : vector<16x8xf32>, vector<8x8xf32>, vector<16x8xf32> -> vector<16x8xf32>
    %112 = vector.extract_strided_slice %6 {offsets = [16, 0], sizes = [8, 32], strides = [1, 1]} : vector<32x32xf32> to vector<8x32xf32>
    %cst_116 = arith.constant dense<0.000000e+00> : vector<16x32xf32>
    %113 = tpu.matmul %111, %112, %cst_116 {dimension_numbers = #tpu.dot_dimension_numbers<[1], [0], [0], [1], [0, 0, 1, 1], [], []>} : vector<16x8xf32>, vector<8x32xf32>, vector<16x32xf32> -> vector<16x32xf32>
    %114 = arith.addf %95, %113 : vector<16x32xf32>
    %115 = vector.extract_strided_slice %52 {offsets = [0, 24], sizes = [16, 8], strides = [1, 1]} : vector<16x32xf32> to vector<16x8xf32>
    %116 = vector.extract_strided_slice %55 {offsets = [0, 24], sizes = [8, 8], strides = [1, 1]} : vector<8x32xf32> to vector<8x8xf32>
    %117 = vector.extract_strided_slice %58 {offsets = [0, 24], sizes = [8, 8], strides = [1, 1]} : vector<8x32xf32> to vector<8x8xf32>
    %cst_117 = arith.constant dense<0.000000e+00> : vector<16x8xf32>
    %118 = tpu.matmul %115, %116, %cst_117 {dimension_numbers = #tpu.dot_dimension_numbers<[1], [1], [0], [0], [0, 0, 1, 0], [], []>} : vector<16x8xf32>, vector<8x8xf32>, vector<16x8xf32> -> vector<16x8xf32>
    %cst_118 = arith.constant 0.353553385 : f32
    %119 = vector.broadcast %cst_118 : f32 to vector<16x8xf32>
    %120 = arith.mulf %118, %119 : vector<16x8xf32>
    %cst_119 = arith.constant dense<0xFF800000> : vector<16xf32>
    %121 = vector.multi_reduction <maximumf>, %120, %cst_119 [1] : vector<16x8xf32> to vector<16xf32>
    %122 = vector.shape_cast %121 : vector<16xf32> to vector<16x1xf32>
    %123 = vector.broadcast %122 : vector<16x1xf32> to vector<16x8xf32>
    %124 = arith.subf %120, %123 : vector<16x8xf32>
    %125 = math.exp %124 : vector<16x8xf32>
    %cst_120 = arith.constant dense<0.000000e+00> : vector<16xf32>
    %126 = vector.multi_reduction <add>, %125, %cst_120 [1] : vector<16x8xf32> to vector<16xf32>
    %127 = vector.shape_cast %126 : vector<16xf32> to vector<16x1xf32>
    %128 = vector.broadcast %127 : vector<16x1xf32> to vector<16x8xf32>
    %129 = arith.divf %125, %128 : vector<16x8xf32>
    %cst_121 = arith.constant dense<0.000000e+00> : vector<16x8xf32>
    %130 = tpu.matmul %129, %117, %cst_121 {dimension_numbers = #tpu.dot_dimension_numbers<[1], [0], [0], [1], [0, 0, 1, 1], [], []>} : vector<16x8xf32>, vector<8x8xf32>, vector<16x8xf32> -> vector<16x8xf32>
    %131 = vector.extract_strided_slice %6 {offsets = [24, 0], sizes = [8, 32], strides = [1, 1]} : vector<32x32xf32> to vector<8x32xf32>
    %cst_122 = arith.constant dense<0.000000e+00> : vector<16x32xf32>
    %132 = tpu.matmul %130, %131, %cst_122 {dimension_numbers = #tpu.dot_dimension_numbers<[1], [0], [0], [1], [0, 0, 1, 1], [], []>} : vector<16x8xf32>, vector<8x32xf32>, vector<16x32xf32> -> vector<16x32xf32>
    %133 = arith.addf %114, %132 : vector<16x32xf32>
    %134 = vector.broadcast %7 : vector<1x32xf32> to vector<16x32xf32>
    %135 = arith.addf %133, %134 : vector<16x32xf32>
    %136 = arith.addf %49, %135 : vector<16x32xf32>
    %cst_123 = arith.constant dense<0.000000e+00> : vector<16xf32>
    %137 = vector.multi_reduction <add>, %136, %cst_123 [1] : vector<16x32xf32> to vector<16xf32>
    %138 = vector.shape_cast %137 : vector<16xf32> to vector<16x1xf32>
    %cst_124 = arith.constant 3.200000e+01 : f32
    %139 = vector.broadcast %cst_124 : f32 to vector<16x1xf32>
    %140 = arith.divf %138, %139 : vector<16x1xf32>
    %141 = vector.broadcast %140 : vector<16x1xf32> to vector<16x32xf32>
    %142 = arith.subf %136, %141 : vector<16x32xf32>
    %143 = arith.mulf %142, %142 : vector<16x32xf32>
    %cst_125 = arith.constant dense<0.000000e+00> : vector<16xf32>
    %144 = vector.multi_reduction <add>, %143, %cst_125 [1] : vector<16x32xf32> to vector<16xf32>
    %145 = vector.shape_cast %144 : vector<16xf32> to vector<16x1xf32>
    %cst_126 = arith.constant 3.200000e+01 : f32
    %146 = vector.broadcast %cst_126 : f32 to vector<16x1xf32>
    %147 = arith.divf %145, %146 : vector<16x1xf32>
    %148 = vector.broadcast %140 : vector<16x1xf32> to vector<16x32xf32>
    %149 = arith.subf %136, %148 : vector<16x32xf32>
    %cst_127 = arith.constant 9.99999974E-6 : f32
    %150 = vector.broadcast %cst_127 : f32 to vector<16x1xf32>
    %151 = arith.addf %147, %150 : vector<16x1xf32>
    %152 = math.rsqrt %151 : vector<16x1xf32>
    %153 = vector.broadcast %152 : vector<16x1xf32> to vector<16x32xf32>
    %154 = arith.mulf %149, %153 : vector<16x32xf32>
    %155 = vector.broadcast %34 : vector<1x32xf32> to vector<16x32xf32>
    %156 = arith.mulf %154, %155 : vector<16x32xf32>
    %157 = vector.broadcast %35 : vector<1x32xf32> to vector<16x32xf32>
    %158 = arith.addf %156, %157 : vector<16x32xf32>
    %cst_128 = arith.constant dense<0.000000e+00> : vector<8x32xf32>
    %159 = tpu.matmul %47, %8, %cst_128 {dimension_numbers = #tpu.dot_dimension_numbers<[1], [0], [0], [1], [0, 0, 1, 1], [], []>} : vector<8x32xf32>, vector<32x32xf32>, vector<8x32xf32> -> vector<8x32xf32>
    %160 = vector.broadcast %9 : vector<1x32xf32> to vector<8x32xf32>
    %161 = arith.addf %159, %160 : vector<8x32xf32>
    %cst_129 = arith.constant dense<0.000000e+00> : vector<16x32xf32>
    %162 = tpu.matmul %49, %10, %cst_129 {dimension_numbers = #tpu.dot_dimension_numbers<[1], [0], [0], [1], [0, 0, 1, 1], [], []>} : vector<16x32xf32>, vector<32x32xf32>, vector<16x32xf32> -> vector<16x32xf32>
    %163 = vector.broadcast %11 : vector<1x32xf32> to vector<16x32xf32>
    %164 = arith.addf %162, %163 : vector<16x32xf32>
    %cst_130 = arith.constant dense<0.000000e+00> : vector<16x32xf32>
    %165 = tpu.matmul %49, %12, %cst_130 {dimension_numbers = #tpu.dot_dimension_numbers<[1], [0], [0], [1], [0, 0, 1, 1], [], []>} : vector<16x32xf32>, vector<32x32xf32>, vector<16x32xf32> -> vector<16x32xf32>
    %166 = vector.broadcast %13 : vector<1x32xf32> to vector<16x32xf32>
    %167 = arith.addf %165, %166 : vector<16x32xf32>
    %168 = vector.extract_strided_slice %161 {offsets = [0, 0], sizes = [8, 8], strides = [1, 1]} : vector<8x32xf32> to vector<8x8xf32>
    %169 = vector.extract_strided_slice %164 {offsets = [0, 0], sizes = [16, 8], strides = [1, 1]} : vector<16x32xf32> to vector<16x8xf32>
    %170 = vector.extract_strided_slice %167 {offsets = [0, 0], sizes = [16, 8], strides = [1, 1]} : vector<16x32xf32> to vector<16x8xf32>
    %cst_131 = arith.constant dense<0.000000e+00> : vector<8x16xf32>
    %171 = tpu.matmul %168, %169, %cst_131 {dimension_numbers = #tpu.dot_dimension_numbers<[1], [1], [0], [0], [0, 0, 1, 0], [], []>} : vector<8x8xf32>, vector<16x8xf32>, vector<8x16xf32> -> vector<8x16xf32>
    %cst_132 = arith.constant 0.353553385 : f32
    %172 = vector.broadcast %cst_132 : f32 to vector<8x16xf32>
    %173 = arith.mulf %171, %172 : vector<8x16xf32>
    %cst_133 = arith.constant dense<0xFF800000> : vector<8xf32>
    %174 = vector.multi_reduction <maximumf>, %173, %cst_133 [1] : vector<8x16xf32> to vector<8xf32>
    %175 = vector.shape_cast %174 : vector<8xf32> to vector<8x1xf32>
    %176 = vector.broadcast %175 : vector<8x1xf32> to vector<8x16xf32>
    %177 = arith.subf %173, %176 : vector<8x16xf32>
    %178 = math.exp %177 : vector<8x16xf32>
    %cst_134 = arith.constant dense<0.000000e+00> : vector<8xf32>
    %179 = vector.multi_reduction <add>, %178, %cst_134 [1] : vector<8x16xf32> to vector<8xf32>
    %180 = vector.shape_cast %179 : vector<8xf32> to vector<8x1xf32>
    %181 = vector.broadcast %180 : vector<8x1xf32> to vector<8x16xf32>
    %182 = arith.divf %178, %181 : vector<8x16xf32>
    %cst_135 = arith.constant dense<0.000000e+00> : vector<8x8xf32>
    %183 = tpu.matmul %182, %170, %cst_135 {dimension_numbers = #tpu.dot_dimension_numbers<[1], [0], [0], [1], [0, 0, 1, 1], [], []>} : vector<8x16xf32>, vector<16x8xf32>, vector<8x8xf32> -> vector<8x8xf32>
    %184 = vector.extract_strided_slice %14 {offsets = [0, 0], sizes = [8, 32], strides = [1, 1]} : vector<32x32xf32> to vector<8x32xf32>
    %cst_136 = arith.constant dense<0.000000e+00> : vector<8x32xf32>
    %185 = tpu.matmul %183, %184, %cst_136 {dimension_numbers = #tpu.dot_dimension_numbers<[1], [0], [0], [1], [0, 0, 1, 1], [], []>} : vector<8x8xf32>, vector<8x32xf32>, vector<8x32xf32> -> vector<8x32xf32>
    %186 = vector.extract_strided_slice %161 {offsets = [0, 8], sizes = [8, 8], strides = [1, 1]} : vector<8x32xf32> to vector<8x8xf32>
    %187 = vector.extract_strided_slice %164 {offsets = [0, 8], sizes = [16, 8], strides = [1, 1]} : vector<16x32xf32> to vector<16x8xf32>
    %188 = vector.extract_strided_slice %167 {offsets = [0, 8], sizes = [16, 8], strides = [1, 1]} : vector<16x32xf32> to vector<16x8xf32>
    %cst_137 = arith.constant dense<0.000000e+00> : vector<8x16xf32>
    %189 = tpu.matmul %186, %187, %cst_137 {dimension_numbers = #tpu.dot_dimension_numbers<[1], [1], [0], [0], [0, 0, 1, 0], [], []>} : vector<8x8xf32>, vector<16x8xf32>, vector<8x16xf32> -> vector<8x16xf32>
    %cst_138 = arith.constant 0.353553385 : f32
    %190 = vector.broadcast %cst_138 : f32 to vector<8x16xf32>
    %191 = arith.mulf %189, %190 : vector<8x16xf32>
    %cst_139 = arith.constant dense<0xFF800000> : vector<8xf32>
    %192 = vector.multi_reduction <maximumf>, %191, %cst_139 [1] : vector<8x16xf32> to vector<8xf32>
    %193 = vector.shape_cast %192 : vector<8xf32> to vector<8x1xf32>
    %194 = vector.broadcast %193 : vector<8x1xf32> to vector<8x16xf32>
    %195 = arith.subf %191, %194 : vector<8x16xf32>
    %196 = math.exp %195 : vector<8x16xf32>
    %cst_140 = arith.constant dense<0.000000e+00> : vector<8xf32>
    %197 = vector.multi_reduction <add>, %196, %cst_140 [1] : vector<8x16xf32> to vector<8xf32>
    %198 = vector.shape_cast %197 : vector<8xf32> to vector<8x1xf32>
    %199 = vector.broadcast %198 : vector<8x1xf32> to vector<8x16xf32>
    %200 = arith.divf %196, %199 : vector<8x16xf32>
    %cst_141 = arith.constant dense<0.000000e+00> : vector<8x8xf32>
    %201 = tpu.matmul %200, %188, %cst_141 {dimension_numbers = #tpu.dot_dimension_numbers<[1], [0], [0], [1], [0, 0, 1, 1], [], []>} : vector<8x16xf32>, vector<16x8xf32>, vector<8x8xf32> -> vector<8x8xf32>
    %202 = vector.extract_strided_slice %14 {offsets = [8, 0], sizes = [8, 32], strides = [1, 1]} : vector<32x32xf32> to vector<8x32xf32>
    %cst_142 = arith.constant dense<0.000000e+00> : vector<8x32xf32>
    %203 = tpu.matmul %201, %202, %cst_142 {dimension_numbers = #tpu.dot_dimension_numbers<[1], [0], [0], [1], [0, 0, 1, 1], [], []>} : vector<8x8xf32>, vector<8x32xf32>, vector<8x32xf32> -> vector<8x32xf32>
    %204 = arith.addf %185, %203 : vector<8x32xf32>
    %205 = vector.extract_strided_slice %161 {offsets = [0, 16], sizes = [8, 8], strides = [1, 1]} : vector<8x32xf32> to vector<8x8xf32>
    %206 = vector.extract_strided_slice %164 {offsets = [0, 16], sizes = [16, 8], strides = [1, 1]} : vector<16x32xf32> to vector<16x8xf32>
    %207 = vector.extract_strided_slice %167 {offsets = [0, 16], sizes = [16, 8], strides = [1, 1]} : vector<16x32xf32> to vector<16x8xf32>
    %cst_143 = arith.constant dense<0.000000e+00> : vector<8x16xf32>
    %208 = tpu.matmul %205, %206, %cst_143 {dimension_numbers = #tpu.dot_dimension_numbers<[1], [1], [0], [0], [0, 0, 1, 0], [], []>} : vector<8x8xf32>, vector<16x8xf32>, vector<8x16xf32> -> vector<8x16xf32>
    %cst_144 = arith.constant 0.353553385 : f32
    %209 = vector.broadcast %cst_144 : f32 to vector<8x16xf32>
    %210 = arith.mulf %208, %209 : vector<8x16xf32>
    %cst_145 = arith.constant dense<0xFF800000> : vector<8xf32>
    %211 = vector.multi_reduction <maximumf>, %210, %cst_145 [1] : vector<8x16xf32> to vector<8xf32>
    %212 = vector.shape_cast %211 : vector<8xf32> to vector<8x1xf32>
    %213 = vector.broadcast %212 : vector<8x1xf32> to vector<8x16xf32>
    %214 = arith.subf %210, %213 : vector<8x16xf32>
    %215 = math.exp %214 : vector<8x16xf32>
    %cst_146 = arith.constant dense<0.000000e+00> : vector<8xf32>
    %216 = vector.multi_reduction <add>, %215, %cst_146 [1] : vector<8x16xf32> to vector<8xf32>
    %217 = vector.shape_cast %216 : vector<8xf32> to vector<8x1xf32>
    %218 = vector.broadcast %217 : vector<8x1xf32> to vector<8x16xf32>
    %219 = arith.divf %215, %218 : vector<8x16xf32>
    %cst_147 = arith.constant dense<0.000000e+00> : vector<8x8xf32>
    %220 = tpu.matmul %219, %207, %cst_147 {dimension_numbers = #tpu.dot_dimension_numbers<[1], [0], [0], [1], [0, 0, 1, 1], [], []>} : vector<8x16xf32>, vector<16x8xf32>, vector<8x8xf32> -> vector<8x8xf32>
    %221 = vector.extract_strided_slice %14 {offsets = [16, 0], sizes = [8, 32], strides = [1, 1]} : vector<32x32xf32> to vector<8x32xf32>
    %cst_148 = arith.constant dense<0.000000e+00> : vector<8x32xf32>
    %222 = tpu.matmul %220, %221, %cst_148 {dimension_numbers = #tpu.dot_dimension_numbers<[1], [0], [0], [1], [0, 0, 1, 1], [], []>} : vector<8x8xf32>, vector<8x32xf32>, vector<8x32xf32> -> vector<8x32xf32>
    %223 = arith.addf %204, %222 : vector<8x32xf32>
    %224 = vector.extract_strided_slice %161 {offsets = [0, 24], sizes = [8, 8], strides = [1, 1]} : vector<8x32xf32> to vector<8x8xf32>
    %225 = vector.extract_strided_slice %164 {offsets = [0, 24], sizes = [16, 8], strides = [1, 1]} : vector<16x32xf32> to vector<16x8xf32>
    %226 = vector.extract_strided_slice %167 {offsets = [0, 24], sizes = [16, 8], strides = [1, 1]} : vector<16x32xf32> to vector<16x8xf32>
    %cst_149 = arith.constant dense<0.000000e+00> : vector<8x16xf32>
    %227 = tpu.matmul %224, %225, %cst_149 {dimension_numbers = #tpu.dot_dimension_numbers<[1], [1], [0], [0], [0, 0, 1, 0], [], []>} : vector<8x8xf32>, vector<16x8xf32>, vector<8x16xf32> -> vector<8x16xf32>
    %cst_150 = arith.constant 0.353553385 : f32
    %228 = vector.broadcast %cst_150 : f32 to vector<8x16xf32>
    %229 = arith.mulf %227, %228 : vector<8x16xf32>
    %cst_151 = arith.constant dense<0xFF800000> : vector<8xf32>
    %230 = vector.multi_reduction <maximumf>, %229, %cst_151 [1] : vector<8x16xf32> to vector<8xf32>
    %231 = vector.shape_cast %230 : vector<8xf32> to vector<8x1xf32>
    %232 = vector.broadcast %231 : vector<8x1xf32> to vector<8x16xf32>
    %233 = arith.subf %229, %232 : vector<8x16xf32>
    %234 = math.exp %233 : vector<8x16xf32>
    %cst_152 = arith.constant dense<0.000000e+00> : vector<8xf32>
    %235 = vector.multi_reduction <add>, %234, %cst_152 [1] : vector<8x16xf32> to vector<8xf32>
    %236 = vector.shape_cast %235 : vector<8xf32> to vector<8x1xf32>
    %237 = vector.broadcast %236 : vector<8x1xf32> to vector<8x16xf32>
    %238 = arith.divf %234, %237 : vector<8x16xf32>
    %cst_153 = arith.constant dense<0.000000e+00> : vector<8x8xf32>
    %239 = tpu.matmul %238, %226, %cst_153 {dimension_numbers = #tpu.dot_dimension_numbers<[1], [0], [0], [1], [0, 0, 1, 1], [], []>} : vector<8x16xf32>, vector<16x8xf32>, vector<8x8xf32> -> vector<8x8xf32>
    %240 = vector.extract_strided_slice %14 {offsets = [24, 0], sizes = [8, 32], strides = [1, 1]} : vector<32x32xf32> to vector<8x32xf32>
    %cst_154 = arith.constant dense<0.000000e+00> : vector<8x32xf32>
    %241 = tpu.matmul %239, %240, %cst_154 {dimension_numbers = #tpu.dot_dimension_numbers<[1], [0], [0], [1], [0, 0, 1, 1], [], []>} : vector<8x8xf32>, vector<8x32xf32>, vector<8x32xf32> -> vector<8x32xf32>
    %242 = arith.addf %223, %241 : vector<8x32xf32>
    %243 = vector.broadcast %15 : vector<1x32xf32> to vector<8x32xf32>
    %244 = arith.addf %242, %243 : vector<8x32xf32>
    %cst_155 = arith.constant dense<0.000000e+00> : vector<8x32xf32>
    %245 = tpu.matmul %47, %16, %cst_155 {dimension_numbers = #tpu.dot_dimension_numbers<[1], [0], [0], [1], [0, 0, 1, 1], [], []>} : vector<8x32xf32>, vector<32x32xf32>, vector<8x32xf32> -> vector<8x32xf32>
    %246 = vector.broadcast %17 : vector<1x32xf32> to vector<8x32xf32>
    %247 = arith.addf %245, %246 : vector<8x32xf32>
    %cst_156 = arith.constant dense<0.000000e+00> : vector<8x32xf32>
    %248 = tpu.matmul %247, %18, %cst_156 {dimension_numbers = #tpu.dot_dimension_numbers<[1], [0], [0], [1], [0, 0, 1, 1], [], []>} : vector<8x32xf32>, vector<32x32xf32>, vector<8x32xf32> -> vector<8x32xf32>
    %249 = vector.broadcast %19 : vector<1x32xf32> to vector<8x32xf32>
    %250 = arith.addf %248, %249 : vector<8x32xf32>
    %cst_157 = arith.constant dense<0.000000e+00> : vector<16x32xf32>
    %251 = tpu.matmul %49, %20, %cst_157 {dimension_numbers = #tpu.dot_dimension_numbers<[1], [0], [0], [1], [0, 0, 1, 1], [], []>} : vector<16x32xf32>, vector<32x32xf32>, vector<16x32xf32> -> vector<16x32xf32>
    %252 = vector.broadcast %21 : vector<1x32xf32> to vector<16x32xf32>
    %253 = arith.addf %251, %252 : vector<16x32xf32>
    %cst_158 = arith.constant dense<0.000000e+00> : vector<16x32xf32>
    %254 = tpu.matmul %49, %22, %cst_158 {dimension_numbers = #tpu.dot_dimension_numbers<[1], [0], [0], [1], [0, 0, 1, 1], [], []>} : vector<16x32xf32>, vector<32x32xf32>, vector<16x32xf32> -> vector<16x32xf32>
    %255 = vector.broadcast %23 : vector<1x32xf32> to vector<16x32xf32>
    %256 = arith.addf %254, %255 : vector<16x32xf32>
    %cst_159 = arith.constant dense<0.000000e+00> : vector<8x16xf32>
    %257 = tpu.matmul %250, %253, %cst_159 {dimension_numbers = #tpu.dot_dimension_numbers<[1], [1], [0], [0], [0, 0, 1, 0], [], []>} : vector<8x32xf32>, vector<16x32xf32>, vector<8x16xf32> -> vector<8x16xf32>
    %cst_160 = arith.constant 0.176776692 : f32
    %258 = vector.broadcast %cst_160 : f32 to vector<8x16xf32>
    %259 = arith.mulf %257, %258 : vector<8x16xf32>
    %cst_161 = arith.constant dense<0xFF800000> : vector<8xf32>
    %260 = vector.multi_reduction <maximumf>, %259, %cst_161 [1] : vector<8x16xf32> to vector<8xf32>
    %261 = vector.shape_cast %260 : vector<8xf32> to vector<8x1xf32>
    %262 = vector.broadcast %261 : vector<8x1xf32> to vector<8x16xf32>
    %263 = arith.subf %259, %262 : vector<8x16xf32>
    %264 = math.exp %263 : vector<8x16xf32>
    %cst_162 = arith.constant dense<0.000000e+00> : vector<8xf32>
    %265 = vector.multi_reduction <add>, %264, %cst_162 [1] : vector<8x16xf32> to vector<8xf32>
    %266 = vector.shape_cast %265 : vector<8xf32> to vector<8x1xf32>
    %267 = vector.broadcast %266 : vector<8x1xf32> to vector<8x16xf32>
    %268 = arith.divf %264, %267 : vector<8x16xf32>
    %cst_163 = arith.constant dense<0.000000e+00> : vector<8x32xf32>
    %269 = tpu.matmul %268, %256, %cst_163 {dimension_numbers = #tpu.dot_dimension_numbers<[1], [0], [0], [1], [0, 0, 1, 1], [], []>} : vector<8x16xf32>, vector<16x32xf32>, vector<8x32xf32> -> vector<8x32xf32>
    %cst_164 = arith.constant dense<0.000000e+00> : vector<8x32xf32>
    %270 = tpu.matmul %269, %24, %cst_164 {dimension_numbers = #tpu.dot_dimension_numbers<[1], [0], [0], [1], [0, 0, 1, 1], [], []>} : vector<8x32xf32>, vector<32x32xf32>, vector<8x32xf32> -> vector<8x32xf32>
    %271 = vector.broadcast %25 : vector<1x32xf32> to vector<8x32xf32>
    %272 = arith.addf %270, %271 : vector<8x32xf32>
    %cst_165 = arith.constant 1.000000e+00 : f32
    %273 = vector.broadcast %cst_165 : f32 to vector<8x16xf32>
    %274 = arith.mulf %268, %273 : vector<8x16xf32>
    %275 = arith.addf %47, %244 : vector<8x32xf32>
    %276 = arith.addf %275, %272 : vector<8x32xf32>
    %cst_166 = arith.constant dense<0.000000e+00> : vector<8xf32>
    %277 = vector.multi_reduction <add>, %276, %cst_166 [1] : vector<8x32xf32> to vector<8xf32>
    %278 = vector.shape_cast %277 : vector<8xf32> to vector<8x1xf32>
    %cst_167 = arith.constant 3.200000e+01 : f32
    %279 = vector.broadcast %cst_167 : f32 to vector<8x1xf32>
    %280 = arith.divf %278, %279 : vector<8x1xf32>
    %281 = vector.broadcast %280 : vector<8x1xf32> to vector<8x32xf32>
    %282 = arith.subf %276, %281 : vector<8x32xf32>
    %283 = arith.mulf %282, %282 : vector<8x32xf32>
    %cst_168 = arith.constant dense<0.000000e+00> : vector<8xf32>
    %284 = vector.multi_reduction <add>, %283, %cst_168 [1] : vector<8x32xf32> to vector<8xf32>
    %285 = vector.shape_cast %284 : vector<8xf32> to vector<8x1xf32>
    %cst_169 = arith.constant 3.200000e+01 : f32
    %286 = vector.broadcast %cst_169 : f32 to vector<8x1xf32>
    %287 = arith.divf %285, %286 : vector<8x1xf32>
    %288 = vector.broadcast %280 : vector<8x1xf32> to vector<8x32xf32>
    %289 = arith.subf %276, %288 : vector<8x32xf32>
    %cst_170 = arith.constant 9.99999974E-6 : f32
    %290 = vector.broadcast %cst_170 : f32 to vector<8x1xf32>
    %291 = arith.addf %287, %290 : vector<8x1xf32>
    %292 = math.rsqrt %291 : vector<8x1xf32>
    %293 = vector.broadcast %292 : vector<8x1xf32> to vector<8x32xf32>
    %294 = arith.mulf %289, %293 : vector<8x32xf32>
    %295 = vector.broadcast %36 : vector<1x32xf32> to vector<8x32xf32>
    %296 = arith.mulf %294, %295 : vector<8x32xf32>
    %297 = vector.broadcast %37 : vector<1x32xf32> to vector<8x32xf32>
    %298 = arith.addf %296, %297 : vector<8x32xf32>
    %cst_171 = arith.constant dense<0.000000e+00> : vector<8x32xf32>
    %299 = tpu.matmul %298, %26, %cst_171 {dimension_numbers = #tpu.dot_dimension_numbers<[1], [0], [0], [1], [0, 0, 1, 1], [], []>} : vector<8x32xf32>, vector<32x32xf32>, vector<8x32xf32> -> vector<8x32xf32>
    %300 = vector.broadcast %27 : vector<1x32xf32> to vector<8x32xf32>
    %301 = arith.addf %299, %300 : vector<8x32xf32>
    %cst_172 = arith.constant dense<0.000000e+00> : vector<16x32xf32>
    %302 = tpu.matmul %158, %28, %cst_172 {dimension_numbers = #tpu.dot_dimension_numbers<[1], [0], [0], [1], [0, 0, 1, 1], [], []>} : vector<16x32xf32>, vector<32x32xf32>, vector<16x32xf32> -> vector<16x32xf32>
    %303 = vector.broadcast %29 : vector<1x32xf32> to vector<16x32xf32>
    %304 = arith.addf %302, %303 : vector<16x32xf32>
    %cst_173 = arith.constant dense<0.000000e+00> : vector<16x32xf32>
    %305 = tpu.matmul %158, %30, %cst_173 {dimension_numbers = #tpu.dot_dimension_numbers<[1], [0], [0], [1], [0, 0, 1, 1], [], []>} : vector<16x32xf32>, vector<32x32xf32>, vector<16x32xf32> -> vector<16x32xf32>
    %306 = vector.broadcast %31 : vector<1x32xf32> to vector<16x32xf32>
    %307 = arith.addf %305, %306 : vector<16x32xf32>
    %308 = vector.extract_strided_slice %301 {offsets = [0, 0], sizes = [8, 8], strides = [1, 1]} : vector<8x32xf32> to vector<8x8xf32>
    %309 = vector.extract_strided_slice %304 {offsets = [0, 0], sizes = [16, 8], strides = [1, 1]} : vector<16x32xf32> to vector<16x8xf32>
    %310 = vector.extract_strided_slice %307 {offsets = [0, 0], sizes = [16, 8], strides = [1, 1]} : vector<16x32xf32> to vector<16x8xf32>
    %cst_174 = arith.constant dense<0.000000e+00> : vector<8x16xf32>
    %311 = tpu.matmul %308, %309, %cst_174 {dimension_numbers = #tpu.dot_dimension_numbers<[1], [1], [0], [0], [0, 0, 1, 0], [], []>} : vector<8x8xf32>, vector<16x8xf32>, vector<8x16xf32> -> vector<8x16xf32>
    %cst_175 = arith.constant 0.353553385 : f32
    %312 = vector.broadcast %cst_175 : f32 to vector<8x16xf32>
    %313 = arith.mulf %311, %312 : vector<8x16xf32>
    %cst_176 = arith.constant dense<0xFF800000> : vector<8xf32>
    %314 = vector.multi_reduction <maximumf>, %313, %cst_176 [1] : vector<8x16xf32> to vector<8xf32>
    %315 = vector.shape_cast %314 : vector<8xf32> to vector<8x1xf32>
    %316 = vector.broadcast %315 : vector<8x1xf32> to vector<8x16xf32>
    %317 = arith.subf %313, %316 : vector<8x16xf32>
    %318 = math.exp %317 : vector<8x16xf32>
    %cst_177 = arith.constant dense<0.000000e+00> : vector<8xf32>
    %319 = vector.multi_reduction <add>, %318, %cst_177 [1] : vector<8x16xf32> to vector<8xf32>
    %320 = vector.shape_cast %319 : vector<8xf32> to vector<8x1xf32>
    %321 = vector.broadcast %320 : vector<8x1xf32> to vector<8x16xf32>
    %322 = arith.divf %318, %321 : vector<8x16xf32>
    %cst_178 = arith.constant dense<0.000000e+00> : vector<8x8xf32>
    %323 = tpu.matmul %322, %310, %cst_178 {dimension_numbers = #tpu.dot_dimension_numbers<[1], [0], [0], [1], [0, 0, 1, 1], [], []>} : vector<8x16xf32>, vector<16x8xf32>, vector<8x8xf32> -> vector<8x8xf32>
    %324 = vector.extract_strided_slice %32 {offsets = [0, 0], sizes = [8, 32], strides = [1, 1]} : vector<32x32xf32> to vector<8x32xf32>
    %cst_179 = arith.constant dense<0.000000e+00> : vector<8x32xf32>
    %325 = tpu.matmul %323, %324, %cst_179 {dimension_numbers = #tpu.dot_dimension_numbers<[1], [0], [0], [1], [0, 0, 1, 1], [], []>} : vector<8x8xf32>, vector<8x32xf32>, vector<8x32xf32> -> vector<8x32xf32>
    %326 = vector.extract_strided_slice %301 {offsets = [0, 8], sizes = [8, 8], strides = [1, 1]} : vector<8x32xf32> to vector<8x8xf32>
    %327 = vector.extract_strided_slice %304 {offsets = [0, 8], sizes = [16, 8], strides = [1, 1]} : vector<16x32xf32> to vector<16x8xf32>
    %328 = vector.extract_strided_slice %307 {offsets = [0, 8], sizes = [16, 8], strides = [1, 1]} : vector<16x32xf32> to vector<16x8xf32>
    %cst_180 = arith.constant dense<0.000000e+00> : vector<8x16xf32>
    %329 = tpu.matmul %326, %327, %cst_180 {dimension_numbers = #tpu.dot_dimension_numbers<[1], [1], [0], [0], [0, 0, 1, 0], [], []>} : vector<8x8xf32>, vector<16x8xf32>, vector<8x16xf32> -> vector<8x16xf32>
    %cst_181 = arith.constant 0.353553385 : f32
    %330 = vector.broadcast %cst_181 : f32 to vector<8x16xf32>
    %331 = arith.mulf %329, %330 : vector<8x16xf32>
    %cst_182 = arith.constant dense<0xFF800000> : vector<8xf32>
    %332 = vector.multi_reduction <maximumf>, %331, %cst_182 [1] : vector<8x16xf32> to vector<8xf32>
    %333 = vector.shape_cast %332 : vector<8xf32> to vector<8x1xf32>
    %334 = vector.broadcast %333 : vector<8x1xf32> to vector<8x16xf32>
    %335 = arith.subf %331, %334 : vector<8x16xf32>
    %336 = math.exp %335 : vector<8x16xf32>
    %cst_183 = arith.constant dense<0.000000e+00> : vector<8xf32>
    %337 = vector.multi_reduction <add>, %336, %cst_183 [1] : vector<8x16xf32> to vector<8xf32>
    %338 = vector.shape_cast %337 : vector<8xf32> to vector<8x1xf32>
    %339 = vector.broadcast %338 : vector<8x1xf32> to vector<8x16xf32>
    %340 = arith.divf %336, %339 : vector<8x16xf32>
    %cst_184 = arith.constant dense<0.000000e+00> : vector<8x8xf32>
    %341 = tpu.matmul %340, %328, %cst_184 {dimension_numbers = #tpu.dot_dimension_numbers<[1], [0], [0], [1], [0, 0, 1, 1], [], []>} : vector<8x16xf32>, vector<16x8xf32>, vector<8x8xf32> -> vector<8x8xf32>
    %342 = vector.extract_strided_slice %32 {offsets = [8, 0], sizes = [8, 32], strides = [1, 1]} : vector<32x32xf32> to vector<8x32xf32>
    %cst_185 = arith.constant dense<0.000000e+00> : vector<8x32xf32>
    %343 = tpu.matmul %341, %342, %cst_185 {dimension_numbers = #tpu.dot_dimension_numbers<[1], [0], [0], [1], [0, 0, 1, 1], [], []>} : vector<8x8xf32>, vector<8x32xf32>, vector<8x32xf32> -> vector<8x32xf32>
    %344 = arith.addf %325, %343 : vector<8x32xf32>
    %345 = vector.extract_strided_slice %301 {offsets = [0, 16], sizes = [8, 8], strides = [1, 1]} : vector<8x32xf32> to vector<8x8xf32>
    %346 = vector.extract_strided_slice %304 {offsets = [0, 16], sizes = [16, 8], strides = [1, 1]} : vector<16x32xf32> to vector<16x8xf32>
    %347 = vector.extract_strided_slice %307 {offsets = [0, 16], sizes = [16, 8], strides = [1, 1]} : vector<16x32xf32> to vector<16x8xf32>
    %cst_186 = arith.constant dense<0.000000e+00> : vector<8x16xf32>
    %348 = tpu.matmul %345, %346, %cst_186 {dimension_numbers = #tpu.dot_dimension_numbers<[1], [1], [0], [0], [0, 0, 1, 0], [], []>} : vector<8x8xf32>, vector<16x8xf32>, vector<8x16xf32> -> vector<8x16xf32>
    %cst_187 = arith.constant 0.353553385 : f32
    %349 = vector.broadcast %cst_187 : f32 to vector<8x16xf32>
    %350 = arith.mulf %348, %349 : vector<8x16xf32>
    %cst_188 = arith.constant dense<0xFF800000> : vector<8xf32>
    %351 = vector.multi_reduction <maximumf>, %350, %cst_188 [1] : vector<8x16xf32> to vector<8xf32>
    %352 = vector.shape_cast %351 : vector<8xf32> to vector<8x1xf32>
    %353 = vector.broadcast %352 : vector<8x1xf32> to vector<8x16xf32>
    %354 = arith.subf %350, %353 : vector<8x16xf32>
    %355 = math.exp %354 : vector<8x16xf32>
    %cst_189 = arith.constant dense<0.000000e+00> : vector<8xf32>
    %356 = vector.multi_reduction <add>, %355, %cst_189 [1] : vector<8x16xf32> to vector<8xf32>
    %357 = vector.shape_cast %356 : vector<8xf32> to vector<8x1xf32>
    %358 = vector.broadcast %357 : vector<8x1xf32> to vector<8x16xf32>
    %359 = arith.divf %355, %358 : vector<8x16xf32>
    %cst_190 = arith.constant dense<0.000000e+00> : vector<8x8xf32>
    %360 = tpu.matmul %359, %347, %cst_190 {dimension_numbers = #tpu.dot_dimension_numbers<[1], [0], [0], [1], [0, 0, 1, 1], [], []>} : vector<8x16xf32>, vector<16x8xf32>, vector<8x8xf32> -> vector<8x8xf32>
    %361 = vector.extract_strided_slice %32 {offsets = [16, 0], sizes = [8, 32], strides = [1, 1]} : vector<32x32xf32> to vector<8x32xf32>
    %cst_191 = arith.constant dense<0.000000e+00> : vector<8x32xf32>
    %362 = tpu.matmul %360, %361, %cst_191 {dimension_numbers = #tpu.dot_dimension_numbers<[1], [0], [0], [1], [0, 0, 1, 1], [], []>} : vector<8x8xf32>, vector<8x32xf32>, vector<8x32xf32> -> vector<8x32xf32>
    %363 = arith.addf %344, %362 : vector<8x32xf32>
    %364 = vector.extract_strided_slice %301 {offsets = [0, 24], sizes = [8, 8], strides = [1, 1]} : vector<8x32xf32> to vector<8x8xf32>
    %365 = vector.extract_strided_slice %304 {offsets = [0, 24], sizes = [16, 8], strides = [1, 1]} : vector<16x32xf32> to vector<16x8xf32>
    %366 = vector.extract_strided_slice %307 {offsets = [0, 24], sizes = [16, 8], strides = [1, 1]} : vector<16x32xf32> to vector<16x8xf32>
    %cst_192 = arith.constant dense<0.000000e+00> : vector<8x16xf32>
    %367 = tpu.matmul %364, %365, %cst_192 {dimension_numbers = #tpu.dot_dimension_numbers<[1], [1], [0], [0], [0, 0, 1, 0], [], []>} : vector<8x8xf32>, vector<16x8xf32>, vector<8x16xf32> -> vector<8x16xf32>
    %cst_193 = arith.constant 0.353553385 : f32
    %368 = vector.broadcast %cst_193 : f32 to vector<8x16xf32>
    %369 = arith.mulf %367, %368 : vector<8x16xf32>
    %cst_194 = arith.constant dense<0xFF800000> : vector<8xf32>
    %370 = vector.multi_reduction <maximumf>, %369, %cst_194 [1] : vector<8x16xf32> to vector<8xf32>
    %371 = vector.shape_cast %370 : vector<8xf32> to vector<8x1xf32>
    %372 = vector.broadcast %371 : vector<8x1xf32> to vector<8x16xf32>
    %373 = arith.subf %369, %372 : vector<8x16xf32>
    %374 = math.exp %373 : vector<8x16xf32>
    %cst_195 = arith.constant dense<0.000000e+00> : vector<8xf32>
    %375 = vector.multi_reduction <add>, %374, %cst_195 [1] : vector<8x16xf32> to vector<8xf32>
    %376 = vector.shape_cast %375 : vector<8xf32> to vector<8x1xf32>
    %377 = vector.broadcast %376 : vector<8x1xf32> to vector<8x16xf32>
    %378 = arith.divf %374, %377 : vector<8x16xf32>
    %cst_196 = arith.constant dense<0.000000e+00> : vector<8x8xf32>
    %379 = tpu.matmul %378, %366, %cst_196 {dimension_numbers = #tpu.dot_dimension_numbers<[1], [0], [0], [1], [0, 0, 1, 1], [], []>} : vector<8x16xf32>, vector<16x8xf32>, vector<8x8xf32> -> vector<8x8xf32>
    %380 = vector.extract_strided_slice %32 {offsets = [24, 0], sizes = [8, 32], strides = [1, 1]} : vector<32x32xf32> to vector<8x32xf32>
    %cst_197 = arith.constant dense<0.000000e+00> : vector<8x32xf32>
    %381 = tpu.matmul %379, %380, %cst_197 {dimension_numbers = #tpu.dot_dimension_numbers<[1], [0], [0], [1], [0, 0, 1, 1], [], []>} : vector<8x8xf32>, vector<8x32xf32>, vector<8x32xf32> -> vector<8x32xf32>
    %382 = arith.addf %363, %381 : vector<8x32xf32>
    %383 = vector.broadcast %33 : vector<1x32xf32> to vector<8x32xf32>
    %384 = arith.addf %382, %383 : vector<8x32xf32>
    %385 = arith.addf %298, %384 : vector<8x32xf32>
    %cst_198 = arith.constant dense<0.000000e+00> : vector<8xf32>
    %386 = vector.multi_reduction <add>, %385, %cst_198 [1] : vector<8x32xf32> to vector<8xf32>
    %387 = vector.shape_cast %386 : vector<8xf32> to vector<8x1xf32>
    %cst_199 = arith.constant 3.200000e+01 : f32
    %388 = vector.broadcast %cst_199 : f32 to vector<8x1xf32>
    %389 = arith.divf %387, %388 : vector<8x1xf32>
    %390 = vector.broadcast %389 : vector<8x1xf32> to vector<8x32xf32>
    %391 = arith.subf %385, %390 : vector<8x32xf32>
    %392 = arith.mulf %391, %391 : vector<8x32xf32>
    %cst_200 = arith.constant dense<0.000000e+00> : vector<8xf32>
    %393 = vector.multi_reduction <add>, %392, %cst_200 [1] : vector<8x32xf32> to vector<8xf32>
    %394 = vector.shape_cast %393 : vector<8xf32> to vector<8x1xf32>
    %cst_201 = arith.constant 3.200000e+01 : f32
    %395 = vector.broadcast %cst_201 : f32 to vector<8x1xf32>
    %396 = arith.divf %394, %395 : vector<8x1xf32>
    %397 = vector.broadcast %389 : vector<8x1xf32> to vector<8x32xf32>
    %398 = arith.subf %385, %397 : vector<8x32xf32>
    %cst_202 = arith.constant 9.99999974E-6 : f32
    %399 = vector.broadcast %cst_202 : f32 to vector<8x1xf32>
    %400 = arith.addf %396, %399 : vector<8x1xf32>
    %401 = math.rsqrt %400 : vector<8x1xf32>
    %402 = vector.broadcast %401 : vector<8x1xf32> to vector<8x32xf32>
    %403 = arith.mulf %398, %402 : vector<8x32xf32>
    %404 = vector.broadcast %38 : vector<1x32xf32> to vector<8x32xf32>
    %405 = arith.mulf %403, %404 : vector<8x32xf32>
    %406 = vector.broadcast %39 : vector<1x32xf32> to vector<8x32xf32>
    %407 = arith.addf %405, %406 : vector<8x32xf32>
    %cst_203 = arith.constant dense<0.000000e+00> : vector<8x128xf32>
    %408 = tpu.matmul %407, %42, %cst_203 {dimension_numbers = #tpu.dot_dimension_numbers<[1], [0], [0], [1], [0, 0, 1, 1], [], []>} : vector<8x32xf32>, vector<32x128xf32>, vector<8x128xf32> -> vector<8x128xf32>
    %409 = vector.broadcast %43 : vector<1x128xf32> to vector<8x128xf32>
    %410 = arith.addf %408, %409 : vector<8x128xf32>
    %cst_204 = arith.constant 5.000000e-01 : f32
    %411 = vector.broadcast %cst_204 : f32 to vector<8x128xf32>
    %412 = arith.mulf %411, %410 : vector<8x128xf32>
    %cst_205 = arith.constant 4.471500e-02 : f32
    %413 = vector.broadcast %cst_205 : f32 to vector<8x128xf32>
    %414 = arith.mulf %413, %410 : vector<8x128xf32>
    %415 = arith.mulf %414, %410 : vector<8x128xf32>
    %416 = arith.mulf %415, %410 : vector<8x128xf32>
    %417 = arith.addf %410, %416 : vector<8x128xf32>
    %cst_206 = arith.constant 0.797884583 : f32
    %418 = vector.broadcast %cst_206 : f32 to vector<8x128xf32>
    %419 = arith.mulf %418, %417 : vector<8x128xf32>
    %420 = math.tanh %419 : vector<8x128xf32>
    %cst_207 = arith.constant 1.000000e+00 : f32
    %421 = vector.broadcast %cst_207 : f32 to vector<8x128xf32>
    %422 = arith.addf %421, %420 : vector<8x128xf32>
    %423 = arith.mulf %412, %422 : vector<8x128xf32>
    %cst_208 = arith.constant dense<0.000000e+00> : vector<8x32xf32>
    %424 = tpu.matmul %423, %44, %cst_208 {dimension_numbers = #tpu.dot_dimension_numbers<[1], [0], [0], [1], [0, 0, 1, 1], [], []>} : vector<8x128xf32>, vector<128x32xf32>, vector<8x32xf32> -> vector<8x32xf32>
    %425 = vector.broadcast %45 : vector<1x32xf32> to vector<8x32xf32>
    %426 = arith.addf %424, %425 : vector<8x32xf32>
    %427 = arith.addf %385, %426 : vector<8x32xf32>
    %cst_209 = arith.constant dense<0.000000e+00> : vector<8xf32>
    %428 = vector.multi_reduction <add>, %427, %cst_209 [1] : vector<8x32xf32> to vector<8xf32>
    %429 = vector.shape_cast %428 : vector<8xf32> to vector<8x1xf32>
    %cst_210 = arith.constant 3.200000e+01 : f32
    %430 = vector.broadcast %cst_210 : f32 to vector<8x1xf32>
    %431 = arith.divf %429, %430 : vector<8x1xf32>
    %432 = vector.broadcast %431 : vector<8x1xf32> to vector<8x32xf32>
    %433 = arith.subf %427, %432 : vector<8x32xf32>
    %434 = arith.mulf %433, %433 : vector<8x32xf32>
    %cst_211 = arith.constant dense<0.000000e+00> : vector<8xf32>
    %435 = vector.multi_reduction <add>, %434, %cst_211 [1] : vector<8x32xf32> to vector<8xf32>
    %436 = vector.shape_cast %435 : vector<8xf32> to vector<8x1xf32>
    %cst_212 = arith.constant 3.200000e+01 : f32
    %437 = vector.broadcast %cst_212 : f32 to vector<8x1xf32>
    %438 = arith.divf %436, %437 : vector<8x1xf32>
    %439 = vector.broadcast %431 : vector<8x1xf32> to vector<8x32xf32>
    %440 = arith.subf %427, %439 : vector<8x32xf32>
    %cst_213 = arith.constant 9.99999974E-6 : f32
    %441 = vector.broadcast %cst_213 : f32 to vector<8x1xf32>
    %442 = arith.addf %438, %441 : vector<8x1xf32>
    %443 = math.rsqrt %442 : vector<8x1xf32>
    %444 = vector.broadcast %443 : vector<8x1xf32> to vector<8x32xf32>
    %445 = arith.mulf %440, %444 : vector<8x32xf32>
    %446 = vector.broadcast %40 : vector<1x32xf32> to vector<8x32xf32>
    %447 = arith.mulf %445, %446 : vector<8x32xf32>
    %448 = vector.broadcast %41 : vector<1x32xf32> to vector<8x32xf32>
    %449 = arith.addf %447, %448 : vector<8x32xf32>
    %c0_214 = arith.constant 0 : index
    %c0_215 = arith.constant 0 : index
    %c0_216 = arith.constant 0 : index
    %450 = vector.load %arg49[%c0_214, %c0_215, %c0_216] : memref<2x8x32xf32, #tpu.memory_space<vmem>>, vector<1x8x32xf32>
    %451 = vector.shape_cast %450 : vector<1x8x32xf32> to vector<8x32xf32>
    %452 = vector.shape_cast %449 : vector<8x32xf32> to vector<1x8x32xf32>
    tpu.vector_store %arg49[%c0_214, %c0_215, %c0_216], %452 {strides = array<i32>} : memref<2x8x32xf32, #tpu.memory_space<vmem>>, vector<1x8x32xf32>,
    %c0_217 = arith.constant 0 : index
    %c0_218 = arith.constant 0 : index
    %c0_219 = arith.constant 0 : index
    %453 = vector.load %arg50[%c0_217, %c0_218, %c0_219] : memref<2x8x16xf32, #tpu.memory_space<vmem>>, vector<1x8x16xf32>
    %454 = vector.shape_cast %453 : vector<1x8x16xf32> to vector<8x16xf32>
    %455 = vector.shape_cast %274 : vector<8x16xf32> to vector<1x8x16xf32>
    tpu.vector_store %arg50[%c0_217, %c0_218, %c0_219], %455 {strides = array<i32>} : memref<2x8x16xf32, #tpu.memory_space<vmem>>, vector<1x8x16xf32>,
    %c1 = arith.constant 1 : index
    %c0_220 = arith.constant 0 : index
    %c0_221 = arith.constant 0 : index
    %456 = vector.load %arg1[%c1, %c0_220, %c0_221] : memref<2x8x32xf32, #tpu.memory_space<vmem>>, vector<1x8x32xf32>
    %457 = vector.shape_cast %456 : vector<1x8x32xf32> to vector<8x32xf32>
    %c1_222 = arith.constant 1 : index
    %c0_223 = arith.constant 0 : index
    %c0_224 = arith.constant 0 : index
    %458 = vector.load %arg2[%c1_222, %c0_223, %c0_224] : memref<2x16x32xf32, #tpu.memory_space<vmem>>, vector<1x16x32xf32>
    %459 = vector.shape_cast %458 : vector<1x16x32xf32> to vector<16x32xf32>
    %cst_225 = arith.constant dense<0.000000e+00> : vector<16x32xf32>
    %460 = tpu.matmul %459, %0, %cst_225 {dimension_numbers = #tpu.dot_dimension_numbers<[1], [0], [0], [1], [0, 0, 1, 1], [], []>} : vector<16x32xf32>, vector<32x32xf32>, vector<16x32xf32> -> vector<16x32xf32>
    %461 = vector.broadcast %1 : vector<1x32xf32> to vector<16x32xf32>
    %462 = arith.addf %460, %461 : vector<16x32xf32>
    %cst_226 = arith.constant dense<0.000000e+00> : vector<8x32xf32>
    %463 = tpu.matmul %457, %2, %cst_226 {dimension_numbers = #tpu.dot_dimension_numbers<[1], [0], [0], [1], [0, 0, 1, 1], [], []>} : vector<8x32xf32>, vector<32x32xf32>, vector<8x32xf32> -> vector<8x32xf32>
    %464 = vector.broadcast %3 : vector<1x32xf32> to vector<8x32xf32>
    %465 = arith.addf %463, %464 : vector<8x32xf32>
    %cst_227 = arith.constant dense<0.000000e+00> : vector<8x32xf32>
    %466 = tpu.matmul %457, %4, %cst_227 {dimension_numbers = #tpu.dot_dimension_numbers<[1], [0], [0], [1], [0, 0, 1, 1], [], []>} : vector<8x32xf32>, vector<32x32xf32>, vector<8x32xf32> -> vector<8x32xf32>
    %467 = vector.broadcast %5 : vector<1x32xf32> to vector<8x32xf32>
    %468 = arith.addf %466, %467 : vector<8x32xf32>
    %469 = vector.extract_strided_slice %462 {offsets = [0, 0], sizes = [16, 8], strides = [1, 1]} : vector<16x32xf32> to vector<16x8xf32>
    %470 = vector.extract_strided_slice %465 {offsets = [0, 0], sizes = [8, 8], strides = [1, 1]} : vector<8x32xf32> to vector<8x8xf32>
    %471 = vector.extract_strided_slice %468 {offsets = [0, 0], sizes = [8, 8], strides = [1, 1]} : vector<8x32xf32> to vector<8x8xf32>
    %cst_228 = arith.constant dense<0.000000e+00> : vector<16x8xf32>
    %472 = tpu.matmul %469, %470, %cst_228 {dimension_numbers = #tpu.dot_dimension_numbers<[1], [1], [0], [0], [0, 0, 1, 0], [], []>} : vector<16x8xf32>, vector<8x8xf32>, vector<16x8xf32> -> vector<16x8xf32>
    %cst_229 = arith.constant 0.353553385 : f32
    %473 = vector.broadcast %cst_229 : f32 to vector<16x8xf32>
    %474 = arith.mulf %472, %473 : vector<16x8xf32>
    %cst_230 = arith.constant dense<0xFF800000> : vector<16xf32>
    %475 = vector.multi_reduction <maximumf>, %474, %cst_230 [1] : vector<16x8xf32> to vector<16xf32>
    %476 = vector.shape_cast %475 : vector<16xf32> to vector<16x1xf32>
    %477 = vector.broadcast %476 : vector<16x1xf32> to vector<16x8xf32>
    %478 = arith.subf %474, %477 : vector<16x8xf32>
    %479 = math.exp %478 : vector<16x8xf32>
    %cst_231 = arith.constant dense<0.000000e+00> : vector<16xf32>
    %480 = vector.multi_reduction <add>, %479, %cst_231 [1] : vector<16x8xf32> to vector<16xf32>
    %481 = vector.shape_cast %480 : vector<16xf32> to vector<16x1xf32>
    %482 = vector.broadcast %481 : vector<16x1xf32> to vector<16x8xf32>
    %483 = arith.divf %479, %482 : vector<16x8xf32>
    %cst_232 = arith.constant dense<0.000000e+00> : vector<16x8xf32>
    %484 = tpu.matmul %483, %471, %cst_232 {dimension_numbers = #tpu.dot_dimension_numbers<[1], [0], [0], [1], [0, 0, 1, 1], [], []>} : vector<16x8xf32>, vector<8x8xf32>, vector<16x8xf32> -> vector<16x8xf32>
    %485 = vector.extract_strided_slice %6 {offsets = [0, 0], sizes = [8, 32], strides = [1, 1]} : vector<32x32xf32> to vector<8x32xf32>
    %cst_233 = arith.constant dense<0.000000e+00> : vector<16x32xf32>
    %486 = tpu.matmul %484, %485, %cst_233 {dimension_numbers = #tpu.dot_dimension_numbers<[1], [0], [0], [1], [0, 0, 1, 1], [], []>} : vector<16x8xf32>, vector<8x32xf32>, vector<16x32xf32> -> vector<16x32xf32>
    %487 = vector.extract_strided_slice %462 {offsets = [0, 8], sizes = [16, 8], strides = [1, 1]} : vector<16x32xf32> to vector<16x8xf32>
    %488 = vector.extract_strided_slice %465 {offsets = [0, 8], sizes = [8, 8], strides = [1, 1]} : vector<8x32xf32> to vector<8x8xf32>
    %489 = vector.extract_strided_slice %468 {offsets = [0, 8], sizes = [8, 8], strides = [1, 1]} : vector<8x32xf32> to vector<8x8xf32>
    %cst_234 = arith.constant dense<0.000000e+00> : vector<16x8xf32>
    %490 = tpu.matmul %487, %488, %cst_234 {dimension_numbers = #tpu.dot_dimension_numbers<[1], [1], [0], [0], [0, 0, 1, 0], [], []>} : vector<16x8xf32>, vector<8x8xf32>, vector<16x8xf32> -> vector<16x8xf32>
    %cst_235 = arith.constant 0.353553385 : f32
    %491 = vector.broadcast %cst_235 : f32 to vector<16x8xf32>
    %492 = arith.mulf %490, %491 : vector<16x8xf32>
    %cst_236 = arith.constant dense<0xFF800000> : vector<16xf32>
    %493 = vector.multi_reduction <maximumf>, %492, %cst_236 [1] : vector<16x8xf32> to vector<16xf32>
    %494 = vector.shape_cast %493 : vector<16xf32> to vector<16x1xf32>
    %495 = vector.broadcast %494 : vector<16x1xf32> to vector<16x8xf32>
    %496 = arith.subf %492, %495 : vector<16x8xf32>
    %497 = math.exp %496 : vector<16x8xf32>
    %cst_237 = arith.constant dense<0.000000e+00> : vector<16xf32>
    %498 = vector.multi_reduction <add>, %497, %cst_237 [1] : vector<16x8xf32> to vector<16xf32>
    %499 = vector.shape_cast %498 : vector<16xf32> to vector<16x1xf32>
    %500 = vector.broadcast %499 : vector<16x1xf32> to vector<16x8xf32>
    %501 = arith.divf %497, %500 : vector<16x8xf32>
    %cst_238 = arith.constant dense<0.000000e+00> : vector<16x8xf32>
    %502 = tpu.matmul %501, %489, %cst_238 {dimension_numbers = #tpu.dot_dimension_numbers<[1], [0], [0], [1], [0, 0, 1, 1], [], []>} : vector<16x8xf32>, vector<8x8xf32>, vector<16x8xf32> -> vector<16x8xf32>
    %503 = vector.extract_strided_slice %6 {offsets = [8, 0], sizes = [8, 32], strides = [1, 1]} : vector<32x32xf32> to vector<8x32xf32>
    %cst_239 = arith.constant dense<0.000000e+00> : vector<16x32xf32>
    %504 = tpu.matmul %502, %503, %cst_239 {dimension_numbers = #tpu.dot_dimension_numbers<[1], [0], [0], [1], [0, 0, 1, 1], [], []>} : vector<16x8xf32>, vector<8x32xf32>, vector<16x32xf32> -> vector<16x32xf32>
    %505 = arith.addf %486, %504 : vector<16x32xf32>
    %506 = vector.extract_strided_slice %462 {offsets = [0, 16], sizes = [16, 8], strides = [1, 1]} : vector<16x32xf32> to vector<16x8xf32>
    %507 = vector.extract_strided_slice %465 {offsets = [0, 16], sizes = [8, 8], strides = [1, 1]} : vector<8x32xf32> to vector<8x8xf32>
    %508 = vector.extract_strided_slice %468 {offsets = [0, 16], sizes = [8, 8], strides = [1, 1]} : vector<8x32xf32> to vector<8x8xf32>
    %cst_240 = arith.constant dense<0.000000e+00> : vector<16x8xf32>
    %509 = tpu.matmul %506, %507, %cst_240 {dimension_numbers = #tpu.dot_dimension_numbers<[1], [1], [0], [0], [0, 0, 1, 0], [], []>} : vector<16x8xf32>, vector<8x8xf32>, vector<16x8xf32> -> vector<16x8xf32>
    %cst_241 = arith.constant 0.353553385 : f32
    %510 = vector.broadcast %cst_241 : f32 to vector<16x8xf32>
    %511 = arith.mulf %509, %510 : vector<16x8xf32>
    %cst_242 = arith.constant dense<0xFF800000> : vector<16xf32>
    %512 = vector.multi_reduction <maximumf>, %511, %cst_242 [1] : vector<16x8xf32> to vector<16xf32>
    %513 = vector.shape_cast %512 : vector<16xf32> to vector<16x1xf32>
    %514 = vector.broadcast %513 : vector<16x1xf32> to vector<16x8xf32>
    %515 = arith.subf %511, %514 : vector<16x8xf32>
    %516 = math.exp %515 : vector<16x8xf32>
    %cst_243 = arith.constant dense<0.000000e+00> : vector<16xf32>
    %517 = vector.multi_reduction <add>, %516, %cst_243 [1] : vector<16x8xf32> to vector<16xf32>
    %518 = vector.shape_cast %517 : vector<16xf32> to vector<16x1xf32>
    %519 = vector.broadcast %518 : vector<16x1xf32> to vector<16x8xf32>
    %520 = arith.divf %516, %519 : vector<16x8xf32>
    %cst_244 = arith.constant dense<0.000000e+00> : vector<16x8xf32>
    %521 = tpu.matmul %520, %508, %cst_244 {dimension_numbers = #tpu.dot_dimension_numbers<[1], [0], [0], [1], [0, 0, 1, 1], [], []>} : vector<16x8xf32>, vector<8x8xf32>, vector<16x8xf32> -> vector<16x8xf32>
    %522 = vector.extract_strided_slice %6 {offsets = [16, 0], sizes = [8, 32], strides = [1, 1]} : vector<32x32xf32> to vector<8x32xf32>
    %cst_245 = arith.constant dense<0.000000e+00> : vector<16x32xf32>
    %523 = tpu.matmul %521, %522, %cst_245 {dimension_numbers = #tpu.dot_dimension_numbers<[1], [0], [0], [1], [0, 0, 1, 1], [], []>} : vector<16x8xf32>, vector<8x32xf32>, vector<16x32xf32> -> vector<16x32xf32>
    %524 = arith.addf %505, %523 : vector<16x32xf32>
    %525 = vector.extract_strided_slice %462 {offsets = [0, 24], sizes = [16, 8], strides = [1, 1]} : vector<16x32xf32> to vector<16x8xf32>
    %526 = vector.extract_strided_slice %465 {offsets = [0, 24], sizes = [8, 8], strides = [1, 1]} : vector<8x32xf32> to vector<8x8xf32>
    %527 = vector.extract_strided_slice %468 {offsets = [0, 24], sizes = [8, 8], strides = [1, 1]} : vector<8x32xf32> to vector<8x8xf32>
    %cst_246 = arith.constant dense<0.000000e+00> : vector<16x8xf32>
    %528 = tpu.matmul %525, %526, %cst_246 {dimension_numbers = #tpu.dot_dimension_numbers<[1], [1], [0], [0], [0, 0, 1, 0], [], []>} : vector<16x8xf32>, vector<8x8xf32>, vector<16x8xf32> -> vector<16x8xf32>
    %cst_247 = arith.constant 0.353553385 : f32
    %529 = vector.broadcast %cst_247 : f32 to vector<16x8xf32>
    %530 = arith.mulf %528, %529 : vector<16x8xf32>
    %cst_248 = arith.constant dense<0xFF800000> : vector<16xf32>
    %531 = vector.multi_reduction <maximumf>, %530, %cst_248 [1] : vector<16x8xf32> to vector<16xf32>
    %532 = vector.shape_cast %531 : vector<16xf32> to vector<16x1xf32>
    %533 = vector.broadcast %532 : vector<16x1xf32> to vector<16x8xf32>
    %534 = arith.subf %530, %533 : vector<16x8xf32>
    %535 = math.exp %534 : vector<16x8xf32>
    %cst_249 = arith.constant dense<0.000000e+00> : vector<16xf32>
    %536 = vector.multi_reduction <add>, %535, %cst_249 [1] : vector<16x8xf32> to vector<16xf32>
    %537 = vector.shape_cast %536 : vector<16xf32> to vector<16x1xf32>
    %538 = vector.broadcast %537 : vector<16x1xf32> to vector<16x8xf32>
    %539 = arith.divf %535, %538 : vector<16x8xf32>
    %cst_250 = arith.constant dense<0.000000e+00> : vector<16x8xf32>
    %540 = tpu.matmul %539, %527, %cst_250 {dimension_numbers = #tpu.dot_dimension_numbers<[1], [0], [0], [1], [0, 0, 1, 1], [], []>} : vector<16x8xf32>, vector<8x8xf32>, vector<16x8xf32> -> vector<16x8xf32>
    %541 = vector.extract_strided_slice %6 {offsets = [24, 0], sizes = [8, 32], strides = [1, 1]} : vector<32x32xf32> to vector<8x32xf32>
    %cst_251 = arith.constant dense<0.000000e+00> : vector<16x32xf32>
    %542 = tpu.matmul %540, %541, %cst_251 {dimension_numbers = #tpu.dot_dimension_numbers<[1], [0], [0], [1], [0, 0, 1, 1], [], []>} : vector<16x8xf32>, vector<8x32xf32>, vector<16x32xf32> -> vector<16x32xf32>
    %543 = arith.addf %524, %542 : vector<16x32xf32>
    %544 = vector.broadcast %7 : vector<1x32xf32> to vector<16x32xf32>
    %545 = arith.addf %543, %544 : vector<16x32xf32>
    %546 = arith.addf %459, %545 : vector<16x32xf32>
    %cst_252 = arith.constant dense<0.000000e+00> : vector<16xf32>
    %547 = vector.multi_reduction <add>, %546, %cst_252 [1] : vector<16x32xf32> to vector<16xf32>
    %548 = vector.shape_cast %547 : vector<16xf32> to vector<16x1xf32>
    %cst_253 = arith.constant 3.200000e+01 : f32
    %549 = vector.broadcast %cst_253 : f32 to vector<16x1xf32>
    %550 = arith.divf %548, %549 : vector<16x1xf32>
    %551 = vector.broadcast %550 : vector<16x1xf32> to vector<16x32xf32>
    %552 = arith.subf %546, %551 : vector<16x32xf32>
    %553 = arith.mulf %552, %552 : vector<16x32xf32>
    %cst_254 = arith.constant dense<0.000000e+00> : vector<16xf32>
    %554 = vector.multi_reduction <add>, %553, %cst_254 [1] : vector<16x32xf32> to vector<16xf32>
    %555 = vector.shape_cast %554 : vector<16xf32> to vector<16x1xf32>
    %cst_255 = arith.constant 3.200000e+01 : f32
    %556 = vector.broadcast %cst_255 : f32 to vector<16x1xf32>
    %557 = arith.divf %555, %556 : vector<16x1xf32>
    %558 = vector.broadcast %550 : vector<16x1xf32> to vector<16x32xf32>
    %559 = arith.subf %546, %558 : vector<16x32xf32>
    %cst_256 = arith.constant 9.99999974E-6 : f32
    %560 = vector.broadcast %cst_256 : f32 to vector<16x1xf32>
    %561 = arith.addf %557, %560 : vector<16x1xf32>
    %562 = math.rsqrt %561 : vector<16x1xf32>
    %563 = vector.broadcast %562 : vector<16x1xf32> to vector<16x32xf32>
    %564 = arith.mulf %559, %563 : vector<16x32xf32>
    %565 = vector.broadcast %34 : vector<1x32xf32> to vector<16x32xf32>
    %566 = arith.mulf %564, %565 : vector<16x32xf32>
    %567 = vector.broadcast %35 : vector<1x32xf32> to vector<16x32xf32>
    %568 = arith.addf %566, %567 : vector<16x32xf32>
    %cst_257 = arith.constant dense<0.000000e+00> : vector<8x32xf32>
    %569 = tpu.matmul %457, %8, %cst_257 {dimension_numbers = #tpu.dot_dimension_numbers<[1], [0], [0], [1], [0, 0, 1, 1], [], []>} : vector<8x32xf32>, vector<32x32xf32>, vector<8x32xf32> -> vector<8x32xf32>
    %570 = vector.broadcast %9 : vector<1x32xf32> to vector<8x32xf32>
    %571 = arith.addf %569, %570 : vector<8x32xf32>
    %cst_258 = arith.constant dense<0.000000e+00> : vector<16x32xf32>
    %572 = tpu.matmul %459, %10, %cst_258 {dimension_numbers = #tpu.dot_dimension_numbers<[1], [0], [0], [1], [0, 0, 1, 1], [], []>} : vector<16x32xf32>, vector<32x32xf32>, vector<16x32xf32> -> vector<16x32xf32>
    %573 = vector.broadcast %11 : vector<1x32xf32> to vector<16x32xf32>
    %574 = arith.addf %572, %573 : vector<16x32xf32>
    %cst_259 = arith.constant dense<0.000000e+00> : vector<16x32xf32>
    %575 = tpu.matmul %459, %12, %cst_259 {dimension_numbers = #tpu.dot_dimension_numbers<[1], [0], [0], [1], [0, 0, 1, 1], [], []>} : vector<16x32xf32>, vector<32x32xf32>, vector<16x32xf32> -> vector<16x32xf32>
    %576 = vector.broadcast %13 : vector<1x32xf32> to vector<16x32xf32>
    %577 = arith.addf %575, %576 : vector<16x32xf32>
    %578 = vector.extract_strided_slice %571 {offsets = [0, 0], sizes = [8, 8], strides = [1, 1]} : vector<8x32xf32> to vector<8x8xf32>
    %579 = vector.extract_strided_slice %574 {offsets = [0, 0], sizes = [16, 8], strides = [1, 1]} : vector<16x32xf32> to vector<16x8xf32>
    %580 = vector.extract_strided_slice %577 {offsets = [0, 0], sizes = [16, 8], strides = [1, 1]} : vector<16x32xf32> to vector<16x8xf32>
    %cst_260 = arith.constant dense<0.000000e+00> : vector<8x16xf32>
    %581 = tpu.matmul %578, %579, %cst_260 {dimension_numbers = #tpu.dot_dimension_numbers<[1], [1], [0], [0], [0, 0, 1, 0], [], []>} : vector<8x8xf32>, vector<16x8xf32>, vector<8x16xf32> -> vector<8x16xf32>
    %cst_261 = arith.constant 0.353553385 : f32
    %582 = vector.broadcast %cst_261 : f32 to vector<8x16xf32>
    %583 = arith.mulf %581, %582 : vector<8x16xf32>
    %cst_262 = arith.constant dense<0xFF800000> : vector<8xf32>
    %584 = vector.multi_reduction <maximumf>, %583, %cst_262 [1] : vector<8x16xf32> to vector<8xf32>
    %585 = vector.shape_cast %584 : vector<8xf32> to vector<8x1xf32>
    %586 = vector.broadcast %585 : vector<8x1xf32> to vector<8x16xf32>
    %587 = arith.subf %583, %586 : vector<8x16xf32>
    %588 = math.exp %587 : vector<8x16xf32>
    %cst_263 = arith.constant dense<0.000000e+00> : vector<8xf32>
    %589 = vector.multi_reduction <add>, %588, %cst_263 [1] : vector<8x16xf32> to vector<8xf32>
    %590 = vector.shape_cast %589 : vector<8xf32> to vector<8x1xf32>
    %591 = vector.broadcast %590 : vector<8x1xf32> to vector<8x16xf32>
    %592 = arith.divf %588, %591 : vector<8x16xf32>
    %cst_264 = arith.constant dense<0.000000e+00> : vector<8x8xf32>
    %593 = tpu.matmul %592, %580, %cst_264 {dimension_numbers = #tpu.dot_dimension_numbers<[1], [0], [0], [1], [0, 0, 1, 1], [], []>} : vector<8x16xf32>, vector<16x8xf32>, vector<8x8xf32> -> vector<8x8xf32>
    %594 = vector.extract_strided_slice %14 {offsets = [0, 0], sizes = [8, 32], strides = [1, 1]} : vector<32x32xf32> to vector<8x32xf32>
    %cst_265 = arith.constant dense<0.000000e+00> : vector<8x32xf32>
    %595 = tpu.matmul %593, %594, %cst_265 {dimension_numbers = #tpu.dot_dimension_numbers<[1], [0], [0], [1], [0, 0, 1, 1], [], []>} : vector<8x8xf32>, vector<8x32xf32>, vector<8x32xf32> -> vector<8x32xf32>
    %596 = vector.extract_strided_slice %571 {offsets = [0, 8], sizes = [8, 8], strides = [1, 1]} : vector<8x32xf32> to vector<8x8xf32>
    %597 = vector.extract_strided_slice %574 {offsets = [0, 8], sizes = [16, 8], strides = [1, 1]} : vector<16x32xf32> to vector<16x8xf32>
    %598 = vector.extract_strided_slice %577 {offsets = [0, 8], sizes = [16, 8], strides = [1, 1]} : vector<16x32xf32> to vector<16x8xf32>
    %cst_266 = arith.constant dense<0.000000e+00> : vector<8x16xf32>
    %599 = tpu.matmul %596, %597, %cst_266 {dimension_numbers = #tpu.dot_dimension_numbers<[1], [1], [0], [0], [0, 0, 1, 0], [], []>} : vector<8x8xf32>, vector<16x8xf32>, vector<8x16xf32> -> vector<8x16xf32>
    %cst_267 = arith.constant 0.353553385 : f32
    %600 = vector.broadcast %cst_267 : f32 to vector<8x16xf32>
    %601 = arith.mulf %599, %600 : vector<8x16xf32>
    %cst_268 = arith.constant dense<0xFF800000> : vector<8xf32>
    %602 = vector.multi_reduction <maximumf>, %601, %cst_268 [1] : vector<8x16xf32> to vector<8xf32>
    %603 = vector.shape_cast %602 : vector<8xf32> to vector<8x1xf32>
    %604 = vector.broadcast %603 : vector<8x1xf32> to vector<8x16xf32>
    %605 = arith.subf %601, %604 : vector<8x16xf32>
    %606 = math.exp %605 : vector<8x16xf32>
    %cst_269 = arith.constant dense<0.000000e+00> : vector<8xf32>
    %607 = vector.multi_reduction <add>, %606, %cst_269 [1] : vector<8x16xf32> to vector<8xf32>
    %608 = vector.shape_cast %607 : vector<8xf32> to vector<8x1xf32>
    %609 = vector.broadcast %608 : vector<8x1xf32> to vector<8x16xf32>
    %610 = arith.divf %606, %609 : vector<8x16xf32>
    %cst_270 = arith.constant dense<0.000000e+00> : vector<8x8xf32>
    %611 = tpu.matmul %610, %598, %cst_270 {dimension_numbers = #tpu.dot_dimension_numbers<[1], [0], [0], [1], [0, 0, 1, 1], [], []>} : vector<8x16xf32>, vector<16x8xf32>, vector<8x8xf32> -> vector<8x8xf32>
    %612 = vector.extract_strided_slice %14 {offsets = [8, 0], sizes = [8, 32], strides = [1, 1]} : vector<32x32xf32> to vector<8x32xf32>
    %cst_271 = arith.constant dense<0.000000e+00> : vector<8x32xf32>
    %613 = tpu.matmul %611, %612, %cst_271 {dimension_numbers = #tpu.dot_dimension_numbers<[1], [0], [0], [1], [0, 0, 1, 1], [], []>} : vector<8x8xf32>, vector<8x32xf32>, vector<8x32xf32> -> vector<8x32xf32>
    %614 = arith.addf %595, %613 : vector<8x32xf32>
    %615 = vector.extract_strided_slice %571 {offsets = [0, 16], sizes = [8, 8], strides = [1, 1]} : vector<8x32xf32> to vector<8x8xf32>
    %616 = vector.extract_strided_slice %574 {offsets = [0, 16], sizes = [16, 8], strides = [1, 1]} : vector<16x32xf32> to vector<16x8xf32>
    %617 = vector.extract_strided_slice %577 {offsets = [0, 16], sizes = [16, 8], strides = [1, 1]} : vector<16x32xf32> to vector<16x8xf32>
    %cst_272 = arith.constant dense<0.000000e+00> : vector<8x16xf32>
    %618 = tpu.matmul %615, %616, %cst_272 {dimension_numbers = #tpu.dot_dimension_numbers<[1], [1], [0], [0], [0, 0, 1, 0], [], []>} : vector<8x8xf32>, vector<16x8xf32>, vector<8x16xf32> -> vector<8x16xf32>
    %cst_273 = arith.constant 0.353553385 : f32
    %619 = vector.broadcast %cst_273 : f32 to vector<8x16xf32>
    %620 = arith.mulf %618, %619 : vector<8x16xf32>
    %cst_274 = arith.constant dense<0xFF800000> : vector<8xf32>
    %621 = vector.multi_reduction <maximumf>, %620, %cst_274 [1] : vector<8x16xf32> to vector<8xf32>
    %622 = vector.shape_cast %621 : vector<8xf32> to vector<8x1xf32>
    %623 = vector.broadcast %622 : vector<8x1xf32> to vector<8x16xf32>
    %624 = arith.subf %620, %623 : vector<8x16xf32>
    %625 = math.exp %624 : vector<8x16xf32>
    %cst_275 = arith.constant dense<0.000000e+00> : vector<8xf32>
    %626 = vector.multi_reduction <add>, %625, %cst_275 [1] : vector<8x16xf32> to vector<8xf32>
    %627 = vector.shape_cast %626 : vector<8xf32> to vector<8x1xf32>
    %628 = vector.broadcast %627 : vector<8x1xf32> to vector<8x16xf32>
    %629 = arith.divf %625, %628 : vector<8x16xf32>
    %cst_276 = arith.constant dense<0.000000e+00> : vector<8x8xf32>
    %630 = tpu.matmul %629, %617, %cst_276 {dimension_numbers = #tpu.dot_dimension_numbers<[1], [0], [0], [1], [0, 0, 1, 1], [], []>} : vector<8x16xf32>, vector<16x8xf32>, vector<8x8xf32> -> vector<8x8xf32>
    %631 = vector.extract_strided_slice %14 {offsets = [16, 0], sizes = [8, 32], strides = [1, 1]} : vector<32x32xf32> to vector<8x32xf32>
    %cst_277 = arith.constant dense<0.000000e+00> : vector<8x32xf32>
    %632 = tpu.matmul %630, %631, %cst_277 {dimension_numbers = #tpu.dot_dimension_numbers<[1], [0], [0], [1], [0, 0, 1, 1], [], []>} : vector<8x8xf32>, vector<8x32xf32>, vector<8x32xf32> -> vector<8x32xf32>
    %633 = arith.addf %614, %632 : vector<8x32xf32>
    %634 = vector.extract_strided_slice %571 {offsets = [0, 24], sizes = [8, 8], strides = [1, 1]} : vector<8x32xf32> to vector<8x8xf32>
    %635 = vector.extract_strided_slice %574 {offsets = [0, 24], sizes = [16, 8], strides = [1, 1]} : vector<16x32xf32> to vector<16x8xf32>
    %636 = vector.extract_strided_slice %577 {offsets = [0, 24], sizes = [16, 8], strides = [1, 1]} : vector<16x32xf32> to vector<16x8xf32>
    %cst_278 = arith.constant dense<0.000000e+00> : vector<8x16xf32>
    %637 = tpu.matmul %634, %635, %cst_278 {dimension_numbers = #tpu.dot_dimension_numbers<[1], [1], [0], [0], [0, 0, 1, 0], [], []>} : vector<8x8xf32>, vector<16x8xf32>, vector<8x16xf32> -> vector<8x16xf32>
    %cst_279 = arith.constant 0.353553385 : f32
    %638 = vector.broadcast %cst_279 : f32 to vector<8x16xf32>
    %639 = arith.mulf %637, %638 : vector<8x16xf32>
    %cst_280 = arith.constant dense<0xFF800000> : vector<8xf32>
    %640 = vector.multi_reduction <maximumf>, %639, %cst_280 [1] : vector<8x16xf32> to vector<8xf32>
    %641 = vector.shape_cast %640 : vector<8xf32> to vector<8x1xf32>
    %642 = vector.broadcast %641 : vector<8x1xf32> to vector<8x16xf32>
    %643 = arith.subf %639, %642 : vector<8x16xf32>
    %644 = math.exp %643 : vector<8x16xf32>
    %cst_281 = arith.constant dense<0.000000e+00> : vector<8xf32>
    %645 = vector.multi_reduction <add>, %644, %cst_281 [1] : vector<8x16xf32> to vector<8xf32>
    %646 = vector.shape_cast %645 : vector<8xf32> to vector<8x1xf32>
    %647 = vector.broadcast %646 : vector<8x1xf32> to vector<8x16xf32>
    %648 = arith.divf %644, %647 : vector<8x16xf32>
    %cst_282 = arith.constant dense<0.000000e+00> : vector<8x8xf32>
    %649 = tpu.matmul %648, %636, %cst_282 {dimension_numbers = #tpu.dot_dimension_numbers<[1], [0], [0], [1], [0, 0, 1, 1], [], []>} : vector<8x16xf32>, vector<16x8xf32>, vector<8x8xf32> -> vector<8x8xf32>
    %650 = vector.extract_strided_slice %14 {offsets = [24, 0], sizes = [8, 32], strides = [1, 1]} : vector<32x32xf32> to vector<8x32xf32>
    %cst_283 = arith.constant dense<0.000000e+00> : vector<8x32xf32>
    %651 = tpu.matmul %649, %650, %cst_283 {dimension_numbers = #tpu.dot_dimension_numbers<[1], [0], [0], [1], [0, 0, 1, 1], [], []>} : vector<8x8xf32>, vector<8x32xf32>, vector<8x32xf32> -> vector<8x32xf32>
    %652 = arith.addf %633, %651 : vector<8x32xf32>
    %653 = vector.broadcast %15 : vector<1x32xf32> to vector<8x32xf32>
    %654 = arith.addf %652, %653 : vector<8x32xf32>
    %cst_284 = arith.constant dense<0.000000e+00> : vector<8x32xf32>
    %655 = tpu.matmul %457, %16, %cst_284 {dimension_numbers = #tpu.dot_dimension_numbers<[1], [0], [0], [1], [0, 0, 1, 1], [], []>} : vector<8x32xf32>, vector<32x32xf32>, vector<8x32xf32> -> vector<8x32xf32>
    %656 = vector.broadcast %17 : vector<1x32xf32> to vector<8x32xf32>
    %657 = arith.addf %655, %656 : vector<8x32xf32>
    %cst_285 = arith.constant dense<0.000000e+00> : vector<8x32xf32>
    %658 = tpu.matmul %657, %18, %cst_285 {dimension_numbers = #tpu.dot_dimension_numbers<[1], [0], [0], [1], [0, 0, 1, 1], [], []>} : vector<8x32xf32>, vector<32x32xf32>, vector<8x32xf32> -> vector<8x32xf32>
    %659 = vector.broadcast %19 : vector<1x32xf32> to vector<8x32xf32>
    %660 = arith.addf %658, %659 : vector<8x32xf32>
    %cst_286 = arith.constant dense<0.000000e+00> : vector<16x32xf32>
    %661 = tpu.matmul %459, %20, %cst_286 {dimension_numbers = #tpu.dot_dimension_numbers<[1], [0], [0], [1], [0, 0, 1, 1], [], []>} : vector<16x32xf32>, vector<32x32xf32>, vector<16x32xf32> -> vector<16x32xf32>
    %662 = vector.broadcast %21 : vector<1x32xf32> to vector<16x32xf32>
    %663 = arith.addf %661, %662 : vector<16x32xf32>
    %cst_287 = arith.constant dense<0.000000e+00> : vector<16x32xf32>
    %664 = tpu.matmul %459, %22, %cst_287 {dimension_numbers = #tpu.dot_dimension_numbers<[1], [0], [0], [1], [0, 0, 1, 1], [], []>} : vector<16x32xf32>, vector<32x32xf32>, vector<16x32xf32> -> vector<16x32xf32>
    %665 = vector.broadcast %23 : vector<1x32xf32> to vector<16x32xf32>
    %666 = arith.addf %664, %665 : vector<16x32xf32>
    %cst_288 = arith.constant dense<0.000000e+00> : vector<8x16xf32>
    %667 = tpu.matmul %660, %663, %cst_288 {dimension_numbers = #tpu.dot_dimension_numbers<[1], [1], [0], [0], [0, 0, 1, 0], [], []>} : vector<8x32xf32>, vector<16x32xf32>, vector<8x16xf32> -> vector<8x16xf32>
    %cst_289 = arith.constant 0.176776692 : f32
    %668 = vector.broadcast %cst_289 : f32 to vector<8x16xf32>
    %669 = arith.mulf %667, %668 : vector<8x16xf32>
    %cst_290 = arith.constant dense<0xFF800000> : vector<8xf32>
    %670 = vector.multi_reduction <maximumf>, %669, %cst_290 [1] : vector<8x16xf32> to vector<8xf32>
    %671 = vector.shape_cast %670 : vector<8xf32> to vector<8x1xf32>
    %672 = vector.broadcast %671 : vector<8x1xf32> to vector<8x16xf32>
    %673 = arith.subf %669, %672 : vector<8x16xf32>
    %674 = math.exp %673 : vector<8x16xf32>
    %cst_291 = arith.constant dense<0.000000e+00> : vector<8xf32>
    %675 = vector.multi_reduction <add>, %674, %cst_291 [1] : vector<8x16xf32> to vector<8xf32>
    %676 = vector.shape_cast %675 : vector<8xf32> to vector<8x1xf32>
    %677 = vector.broadcast %676 : vector<8x1xf32> to vector<8x16xf32>
    %678 = arith.divf %674, %677 : vector<8x16xf32>
    %cst_292 = arith.constant dense<0.000000e+00> : vector<8x32xf32>
    %679 = tpu.matmul %678, %666, %cst_292 {dimension_numbers = #tpu.dot_dimension_numbers<[1], [0], [0], [1], [0, 0, 1, 1], [], []>} : vector<8x16xf32>, vector<16x32xf32>, vector<8x32xf32> -> vector<8x32xf32>
    %cst_293 = arith.constant dense<0.000000e+00> : vector<8x32xf32>
    %680 = tpu.matmul %679, %24, %cst_293 {dimension_numbers = #tpu.dot_dimension_numbers<[1], [0], [0], [1], [0, 0, 1, 1], [], []>} : vector<8x32xf32>, vector<32x32xf32>, vector<8x32xf32> -> vector<8x32xf32>
    %681 = vector.broadcast %25 : vector<1x32xf32> to vector<8x32xf32>
    %682 = arith.addf %680, %681 : vector<8x32xf32>
    %cst_294 = arith.constant 1.000000e+00 : f32
    %683 = vector.broadcast %cst_294 : f32 to vector<8x16xf32>
    %684 = arith.mulf %678, %683 : vector<8x16xf32>
    %685 = arith.addf %457, %654 : vector<8x32xf32>
    %686 = arith.addf %685, %682 : vector<8x32xf32>
    %cst_295 = arith.constant dense<0.000000e+00> : vector<8xf32>
    %687 = vector.multi_reduction <add>, %686, %cst_295 [1] : vector<8x32xf32> to vector<8xf32>
    %688 = vector.shape_cast %687 : vector<8xf32> to vector<8x1xf32>
    %cst_296 = arith.constant 3.200000e+01 : f32
    %689 = vector.broadcast %cst_296 : f32 to vector<8x1xf32>
    %690 = arith.divf %688, %689 : vector<8x1xf32>
    %691 = vector.broadcast %690 : vector<8x1xf32> to vector<8x32xf32>
    %692 = arith.subf %686, %691 : vector<8x32xf32>
    %693 = arith.mulf %692, %692 : vector<8x32xf32>
    %cst_297 = arith.constant dense<0.000000e+00> : vector<8xf32>
    %694 = vector.multi_reduction <add>, %693, %cst_297 [1] : vector<8x32xf32> to vector<8xf32>
    %695 = vector.shape_cast %694 : vector<8xf32> to vector<8x1xf32>
    %cst_298 = arith.constant 3.200000e+01 : f32
    %696 = vector.broadcast %cst_298 : f32 to vector<8x1xf32>
    %697 = arith.divf %695, %696 : vector<8x1xf32>
    %698 = vector.broadcast %690 : vector<8x1xf32> to vector<8x32xf32>
    %699 = arith.subf %686, %698 : vector<8x32xf32>
    %cst_299 = arith.constant 9.99999974E-6 : f32
    %700 = vector.broadcast %cst_299 : f32 to vector<8x1xf32>
    %701 = arith.addf %697, %700 : vector<8x1xf32>
    %702 = math.rsqrt %701 : vector<8x1xf32>
    %703 = vector.broadcast %702 : vector<8x1xf32> to vector<8x32xf32>
    %704 = arith.mulf %699, %703 : vector<8x32xf32>
    %705 = vector.broadcast %36 : vector<1x32xf32> to vector<8x32xf32>
    %706 = arith.mulf %704, %705 : vector<8x32xf32>
    %707 = vector.broadcast %37 : vector<1x32xf32> to vector<8x32xf32>
    %708 = arith.addf %706, %707 : vector<8x32xf32>
    %cst_300 = arith.constant dense<0.000000e+00> : vector<8x32xf32>
    %709 = tpu.matmul %708, %26, %cst_300 {dimension_numbers = #tpu.dot_dimension_numbers<[1], [0], [0], [1], [0, 0, 1, 1], [], []>} : vector<8x32xf32>, vector<32x32xf32>, vector<8x32xf32> -> vector<8x32xf32>
    %710 = vector.broadcast %27 : vector<1x32xf32> to vector<8x32xf32>
    %711 = arith.addf %709, %710 : vector<8x32xf32>
    %cst_301 = arith.constant dense<0.000000e+00> : vector<16x32xf32>
    %712 = tpu.matmul %568, %28, %cst_301 {dimension_numbers = #tpu.dot_dimension_numbers<[1], [0], [0], [1], [0, 0, 1, 1], [], []>} : vector<16x32xf32>, vector<32x32xf32>, vector<16x32xf32> -> vector<16x32xf32>
    %713 = vector.broadcast %29 : vector<1x32xf32> to vector<16x32xf32>
    %714 = arith.addf %712, %713 : vector<16x32xf32>
    %cst_302 = arith.constant dense<0.000000e+00> : vector<16x32xf32>
    %715 = tpu.matmul %568, %30, %cst_302 {dimension_numbers = #tpu.dot_dimension_numbers<[1], [0], [0], [1], [0, 0, 1, 1], [], []>} : vector<16x32xf32>, vector<32x32xf32>, vector<16x32xf32> -> vector<16x32xf32>
    %716 = vector.broadcast %31 : vector<1x32xf32> to vector<16x32xf32>
    %717 = arith.addf %715, %716 : vector<16x32xf32>
    %718 = vector.extract_strided_slice %711 {offsets = [0, 0], sizes = [8, 8], strides = [1, 1]} : vector<8x32xf32> to vector<8x8xf32>
    %719 = vector.extract_strided_slice %714 {offsets = [0, 0], sizes = [16, 8], strides = [1, 1]} : vector<16x32xf32> to vector<16x8xf32>
    %720 = vector.extract_strided_slice %717 {offsets = [0, 0], sizes = [16, 8], strides = [1, 1]} : vector<16x32xf32> to vector<16x8xf32>
    %cst_303 = arith.constant dense<0.000000e+00> : vector<8x16xf32>
    %721 = tpu.matmul %718, %719, %cst_303 {dimension_numbers = #tpu.dot_dimension_numbers<[1], [1], [0], [0], [0, 0, 1, 0], [], []>} : vector<8x8xf32>, vector<16x8xf32>, vector<8x16xf32> -> vector<8x16xf32>
    %cst_304 = arith.constant 0.353553385 : f32
    %722 = vector.broadcast %cst_304 : f32 to vector<8x16xf32>
    %723 = arith.mulf %721, %722 : vector<8x16xf32>
    %cst_305 = arith.constant dense<0xFF800000> : vector<8xf32>
    %724 = vector.multi_reduction <maximumf>, %723, %cst_305 [1] : vector<8x16xf32> to vector<8xf32>
    %725 = vector.shape_cast %724 : vector<8xf32> to vector<8x1xf32>
    %726 = vector.broadcast %725 : vector<8x1xf32> to vector<8x16xf32>
    %727 = arith.subf %723, %726 : vector<8x16xf32>
    %728 = math.exp %727 : vector<8x16xf32>
    %cst_306 = arith.constant dense<0.000000e+00> : vector<8xf32>
    %729 = vector.multi_reduction <add>, %728, %cst_306 [1] : vector<8x16xf32> to vector<8xf32>
    %730 = vector.shape_cast %729 : vector<8xf32> to vector<8x1xf32>
    %731 = vector.broadcast %730 : vector<8x1xf32> to vector<8x16xf32>
    %732 = arith.divf %728, %731 : vector<8x16xf32>
    %cst_307 = arith.constant dense<0.000000e+00> : vector<8x8xf32>
    %733 = tpu.matmul %732, %720, %cst_307 {dimension_numbers = #tpu.dot_dimension_numbers<[1], [0], [0], [1], [0, 0, 1, 1], [], []>} : vector<8x16xf32>, vector<16x8xf32>, vector<8x8xf32> -> vector<8x8xf32>
    %734 = vector.extract_strided_slice %32 {offsets = [0, 0], sizes = [8, 32], strides = [1, 1]} : vector<32x32xf32> to vector<8x32xf32>
    %cst_308 = arith.constant dense<0.000000e+00> : vector<8x32xf32>
    %735 = tpu.matmul %733, %734, %cst_308 {dimension_numbers = #tpu.dot_dimension_numbers<[1], [0], [0], [1], [0, 0, 1, 1], [], []>} : vector<8x8xf32>, vector<8x32xf32>, vector<8x32xf32> -> vector<8x32xf32>
    %736 = vector.extract_strided_slice %711 {offsets = [0, 8], sizes = [8, 8], strides = [1, 1]} : vector<8x32xf32> to vector<8x8xf32>
    %737 = vector.extract_strided_slice %714 {offsets = [0, 8], sizes = [16, 8], strides = [1, 1]} : vector<16x32xf32> to vector<16x8xf32>
    %738 = vector.extract_strided_slice %717 {offsets = [0, 8], sizes = [16, 8], strides = [1, 1]} : vector<16x32xf32> to vector<16x8xf32>
    %cst_309 = arith.constant dense<0.000000e+00> : vector<8x16xf32>
    %739 = tpu.matmul %736, %737, %cst_309 {dimension_numbers = #tpu.dot_dimension_numbers<[1], [1], [0], [0], [0, 0, 1, 0], [], []>} : vector<8x8xf32>, vector<16x8xf32>, vector<8x16xf32> -> vector<8x16xf32>
    %cst_310 = arith.constant 0.353553385 : f32
    %740 = vector.broadcast %cst_310 : f32 to vector<8x16xf32>
    %741 = arith.mulf %739, %740 : vector<8x16xf32>
    %cst_311 = arith.constant dense<0xFF800000> : vector<8xf32>
    %742 = vector.multi_reduction <maximumf>, %741, %cst_311 [1] : vector<8x16xf32> to vector<8xf32>
    %743 = vector.shape_cast %742 : vector<8xf32> to vector<8x1xf32>
    %744 = vector.broadcast %743 : vector<8x1xf32> to vector<8x16xf32>
    %745 = arith.subf %741, %744 : vector<8x16xf32>
    %746 = math.exp %745 : vector<8x16xf32>
    %cst_312 = arith.constant dense<0.000000e+00> : vector<8xf32>
    %747 = vector.multi_reduction <add>, %746, %cst_312 [1] : vector<8x16xf32> to vector<8xf32>
    %748 = vector.shape_cast %747 : vector<8xf32> to vector<8x1xf32>
    %749 = vector.broadcast %748 : vector<8x1xf32> to vector<8x16xf32>
    %750 = arith.divf %746, %749 : vector<8x16xf32>
    %cst_313 = arith.constant dense<0.000000e+00> : vector<8x8xf32>
    %751 = tpu.matmul %750, %738, %cst_313 {dimension_numbers = #tpu.dot_dimension_numbers<[1], [0], [0], [1], [0, 0, 1, 1], [], []>} : vector<8x16xf32>, vector<16x8xf32>, vector<8x8xf32> -> vector<8x8xf32>
    %752 = vector.extract_strided_slice %32 {offsets = [8, 0], sizes = [8, 32], strides = [1, 1]} : vector<32x32xf32> to vector<8x32xf32>
    %cst_314 = arith.constant dense<0.000000e+00> : vector<8x32xf32>
    %753 = tpu.matmul %751, %752, %cst_314 {dimension_numbers = #tpu.dot_dimension_numbers<[1], [0], [0], [1], [0, 0, 1, 1], [], []>} : vector<8x8xf32>, vector<8x32xf32>, vector<8x32xf32> -> vector<8x32xf32>
    %754 = arith.addf %735, %753 : vector<8x32xf32>
    %755 = vector.extract_strided_slice %711 {offsets = [0, 16], sizes = [8, 8], strides = [1, 1]} : vector<8x32xf32> to vector<8x8xf32>
    %756 = vector.extract_strided_slice %714 {offsets = [0, 16], sizes = [16, 8], strides = [1, 1]} : vector<16x32xf32> to vector<16x8xf32>
    %757 = vector.extract_strided_slice %717 {offsets = [0, 16], sizes = [16, 8], strides = [1, 1]} : vector<16x32xf32> to vector<16x8xf32>
    %cst_315 = arith.constant dense<0.000000e+00> : vector<8x16xf32>
    %758 = tpu.matmul %755, %756, %cst_315 {dimension_numbers = #tpu.dot_dimension_numbers<[1], [1], [0], [0], [0, 0, 1, 0], [], []>} : vector<8x8xf32>, vector<16x8xf32>, vector<8x16xf32> -> vector<8x16xf32>
    %cst_316 = arith.constant 0.353553385 : f32
    %759 = vector.broadcast %cst_316 : f32 to vector<8x16xf32>
    %760 = arith.mulf %758, %759 : vector<8x16xf32>
    %cst_317 = arith.constant dense<0xFF800000> : vector<8xf32>
    %761 = vector.multi_reduction <maximumf>, %760, %cst_317 [1] : vector<8x16xf32> to vector<8xf32>
    %762 = vector.shape_cast %761 : vector<8xf32> to vector<8x1xf32>
    %763 = vector.broadcast %762 : vector<8x1xf32> to vector<8x16xf32>
    %764 = arith.subf %760, %763 : vector<8x16xf32>
    %765 = math.exp %764 : vector<8x16xf32>
    %cst_318 = arith.constant dense<0.000000e+00> : vector<8xf32>
    %766 = vector.multi_reduction <add>, %765, %cst_318 [1] : vector<8x16xf32> to vector<8xf32>
    %767 = vector.shape_cast %766 : vector<8xf32> to vector<8x1xf32>
    %768 = vector.broadcast %767 : vector<8x1xf32> to vector<8x16xf32>
    %769 = arith.divf %765, %768 : vector<8x16xf32>
    %cst_319 = arith.constant dense<0.000000e+00> : vector<8x8xf32>
    %770 = tpu.matmul %769, %757, %cst_319 {dimension_numbers = #tpu.dot_dimension_numbers<[1], [0], [0], [1], [0, 0, 1, 1], [], []>} : vector<8x16xf32>, vector<16x8xf32>, vector<8x8xf32> -> vector<8x8xf32>
    %771 = vector.extract_strided_slice %32 {offsets = [16, 0], sizes = [8, 32], strides = [1, 1]} : vector<32x32xf32> to vector<8x32xf32>
    %cst_320 = arith.constant dense<0.000000e+00> : vector<8x32xf32>
    %772 = tpu.matmul %770, %771, %cst_320 {dimension_numbers = #tpu.dot_dimension_numbers<[1], [0], [0], [1], [0, 0, 1, 1], [], []>} : vector<8x8xf32>, vector<8x32xf32>, vector<8x32xf32> -> vector<8x32xf32>
    %773 = arith.addf %754, %772 : vector<8x32xf32>
    %774 = vector.extract_strided_slice %711 {offsets = [0, 24], sizes = [8, 8], strides = [1, 1]} : vector<8x32xf32> to vector<8x8xf32>
    %775 = vector.extract_strided_slice %714 {offsets = [0, 24], sizes = [16, 8], strides = [1, 1]} : vector<16x32xf32> to vector<16x8xf32>
    %776 = vector.extract_strided_slice %717 {offsets = [0, 24], sizes = [16, 8], strides = [1, 1]} : vector<16x32xf32> to vector<16x8xf32>
    %cst_321 = arith.constant dense<0.000000e+00> : vector<8x16xf32>
    %777 = tpu.matmul %774, %775, %cst_321 {dimension_numbers = #tpu.dot_dimension_numbers<[1], [1], [0], [0], [0, 0, 1, 0], [], []>} : vector<8x8xf32>, vector<16x8xf32>, vector<8x16xf32> -> vector<8x16xf32>
    %cst_322 = arith.constant 0.353553385 : f32
    %778 = vector.broadcast %cst_322 : f32 to vector<8x16xf32>
    %779 = arith.mulf %777, %778 : vector<8x16xf32>
    %cst_323 = arith.constant dense<0xFF800000> : vector<8xf32>
    %780 = vector.multi_reduction <maximumf>, %779, %cst_323 [1] : vector<8x16xf32> to vector<8xf32>
    %781 = vector.shape_cast %780 : vector<8xf32> to vector<8x1xf32>
    %782 = vector.broadcast %781 : vector<8x1xf32> to vector<8x16xf32>
    %783 = arith.subf %779, %782 : vector<8x16xf32>
    %784 = math.exp %783 : vector<8x16xf32>
    %cst_324 = arith.constant dense<0.000000e+00> : vector<8xf32>
    %785 = vector.multi_reduction <add>, %784, %cst_324 [1] : vector<8x16xf32> to vector<8xf32>
    %786 = vector.shape_cast %785 : vector<8xf32> to vector<8x1xf32>
    %787 = vector.broadcast %786 : vector<8x1xf32> to vector<8x16xf32>
    %788 = arith.divf %784, %787 : vector<8x16xf32>
    %cst_325 = arith.constant dense<0.000000e+00> : vector<8x8xf32>
    %789 = tpu.matmul %788, %776, %cst_325 {dimension_numbers = #tpu.dot_dimension_numbers<[1], [0], [0], [1], [0, 0, 1, 1], [], []>} : vector<8x16xf32>, vector<16x8xf32>, vector<8x8xf32> -> vector<8x8xf32>
    %790 = vector.extract_strided_slice %32 {offsets = [24, 0], sizes = [8, 32], strides = [1, 1]} : vector<32x32xf32> to vector<8x32xf32>
    %cst_326 = arith.constant dense<0.000000e+00> : vector<8x32xf32>
    %791 = tpu.matmul %789, %790, %cst_326 {dimension_numbers = #tpu.dot_dimension_numbers<[1], [0], [0], [1], [0, 0, 1, 1], [], []>} : vector<8x8xf32>, vector<8x32xf32>, vector<8x32xf32> -> vector<8x32xf32>
    %792 = arith.addf %773, %791 : vector<8x32xf32>
    %793 = vector.broadcast %33 : vector<1x32xf32> to vector<8x32xf32>
    %794 = arith.addf %792, %793 : vector<8x32xf32>
    %795 = arith.addf %708, %794 : vector<8x32xf32>
    %cst_327 = arith.constant dense<0.000000e+00> : vector<8xf32>
    %796 = vector.multi_reduction <add>, %795, %cst_327 [1] : vector<8x32xf32> to vector<8xf32>
    %797 = vector.shape_cast %796 : vector<8xf32> to vector<8x1xf32>
    %cst_328 = arith.constant 3.200000e+01 : f32
    %798 = vector.broadcast %cst_328 : f32 to vector<8x1xf32>
    %799 = arith.divf %797, %798 : vector<8x1xf32>
    %800 = vector.broadcast %799 : vector<8x1xf32> to vector<8x32xf32>
    %801 = arith.subf %795, %800 : vector<8x32xf32>
    %802 = arith.mulf %801, %801 : vector<8x32xf32>
    %cst_329 = arith.constant dense<0.000000e+00> : vector<8xf32>
    %803 = vector.multi_reduction <add>, %802, %cst_329 [1] : vector<8x32xf32> to vector<8xf32>
    %804 = vector.shape_cast %803 : vector<8xf32> to vector<8x1xf32>
    %cst_330 = arith.constant 3.200000e+01 : f32
    %805 = vector.broadcast %cst_330 : f32 to vector<8x1xf32>
    %806 = arith.divf %804, %805 : vector<8x1xf32>
    %807 = vector.broadcast %799 : vector<8x1xf32> to vector<8x32xf32>
    %808 = arith.subf %795, %807 : vector<8x32xf32>
    %cst_331 = arith.constant 9.99999974E-6 : f32
    %809 = vector.broadcast %cst_331 : f32 to vector<8x1xf32>
    %810 = arith.addf %806, %809 : vector<8x1xf32>
    %811 = math.rsqrt %810 : vector<8x1xf32>
    %812 = vector.broadcast %811 : vector<8x1xf32> to vector<8x32xf32>
    %813 = arith.mulf %808, %812 : vector<8x32xf32>
    %814 = vector.broadcast %38 : vector<1x32xf32> to vector<8x32xf32>
    %815 = arith.mulf %813, %814 : vector<8x32xf32>
    %816 = vector.broadcast %39 : vector<1x32xf32> to vector<8x32xf32>
    %817 = arith.addf %815, %816 : vector<8x32xf32>
    %cst_332 = arith.constant dense<0.000000e+00> : vector<8x128xf32>
    %818 = tpu.matmul %817, %42, %cst_332 {dimension_numbers = #tpu.dot_dimension_numbers<[1], [0], [0], [1], [0, 0, 1, 1], [], []>} : vector<8x32xf32>, vector<32x128xf32>, vector<8x128xf32> -> vector<8x128xf32>
    %819 = vector.broadcast %43 : vector<1x128xf32> to vector<8x128xf32>
    %820 = arith.addf %818, %819 : vector<8x128xf32>
    %cst_333 = arith.constant 5.000000e-01 : f32
    %821 = vector.broadcast %cst_333 : f32 to vector<8x128xf32>
    %822 = arith.mulf %821, %820 : vector<8x128xf32>
    %cst_334 = arith.constant 4.471500e-02 : f32
    %823 = vector.broadcast %cst_334 : f32 to vector<8x128xf32>
    %824 = arith.mulf %823, %820 : vector<8x128xf32>
    %825 = arith.mulf %824, %820 : vector<8x128xf32>
    %826 = arith.mulf %825, %820 : vector<8x128xf32>
    %827 = arith.addf %820, %826 : vector<8x128xf32>
    %cst_335 = arith.constant 0.797884583 : f32
    %828 = vector.broadcast %cst_335 : f32 to vector<8x128xf32>
    %829 = arith.mulf %828, %827 : vector<8x128xf32>
    %830 = math.tanh %829 : vector<8x128xf32>
    %cst_336 = arith.constant 1.000000e+00 : f32
    %831 = vector.broadcast %cst_336 : f32 to vector<8x128xf32>
    %832 = arith.addf %831, %830 : vector<8x128xf32>
    %833 = arith.mulf %822, %832 : vector<8x128xf32>
    %cst_337 = arith.constant dense<0.000000e+00> : vector<8x32xf32>
    %834 = tpu.matmul %833, %44, %cst_337 {dimension_numbers = #tpu.dot_dimension_numbers<[1], [0], [0], [1], [0, 0, 1, 1], [], []>} : vector<8x128xf32>, vector<128x32xf32>, vector<8x32xf32> -> vector<8x32xf32>
    %835 = vector.broadcast %45 : vector<1x32xf32> to vector<8x32xf32>
    %836 = arith.addf %834, %835 : vector<8x32xf32>
    %837 = arith.addf %795, %836 : vector<8x32xf32>
    %cst_338 = arith.constant dense<0.000000e+00> : vector<8xf32>
    %838 = vector.multi_reduction <add>, %837, %cst_338 [1] : vector<8x32xf32> to vector<8xf32>
    %839 = vector.shape_cast %838 : vector<8xf32> to vector<8x1xf32>
    %cst_339 = arith.constant 3.200000e+01 : f32
    %840 = vector.broadcast %cst_339 : f32 to vector<8x1xf32>
    %841 = arith.divf %839, %840 : vector<8x1xf32>
    %842 = vector.broadcast %841 : vector<8x1xf32> to vector<8x32xf32>
    %843 = arith.subf %837, %842 : vector<8x32xf32>
    %844 = arith.mulf %843, %843 : vector<8x32xf32>
    %cst_340 = arith.constant dense<0.000000e+00> : vector<8xf32>
    %845 = vector.multi_reduction <add>, %844, %cst_340 [1] : vector<8x32xf32> to vector<8xf32>
    %846 = vector.shape_cast %845 : vector<8xf32> to vector<8x1xf32>
    %cst_341 = arith.constant 3.200000e+01 : f32
    %847 = vector.broadcast %cst_341 : f32 to vector<8x1xf32>
    %848 = arith.divf %846, %847 : vector<8x1xf32>
    %849 = vector.broadcast %841 : vector<8x1xf32> to vector<8x32xf32>
    %850 = arith.subf %837, %849 : vector<8x32xf32>
    %cst_342 = arith.constant 9.99999974E-6 : f32
    %851 = vector.broadcast %cst_342 : f32 to vector<8x1xf32>
    %852 = arith.addf %848, %851 : vector<8x1xf32>
    %853 = math.rsqrt %852 : vector<8x1xf32>
    %854 = vector.broadcast %853 : vector<8x1xf32> to vector<8x32xf32>
    %855 = arith.mulf %850, %854 : vector<8x32xf32>
    %856 = vector.broadcast %40 : vector<1x32xf32> to vector<8x32xf32>
    %857 = arith.mulf %855, %856 : vector<8x32xf32>
    %858 = vector.broadcast %41 : vector<1x32xf32> to vector<8x32xf32>
    %859 = arith.addf %857, %858 : vector<8x32xf32>
    %c1_343 = arith.constant 1 : index
    %c0_344 = arith.constant 0 : index
    %c0_345 = arith.constant 0 : index
    %860 = vector.load %arg49[%c1_343, %c0_344, %c0_345] : memref<2x8x32xf32, #tpu.memory_space<vmem>>, vector<1x8x32xf32>
    %861 = vector.shape_cast %860 : vector<1x8x32xf32> to vector<8x32xf32>
    %862 = vector.shape_cast %859 : vector<8x32xf32> to vector<1x8x32xf32>
    tpu.vector_store %arg49[%c1_343, %c0_344, %c0_345], %862 {strides = array<i32>} : memref<2x8x32xf32, #tpu.memory_space<vmem>>, vector<1x8x32xf32>,
    %c1_346 = arith.constant 1 : index
    %c0_347 = arith.constant 0 : index
    %c0_348 = arith.constant 0 : index
    %863 = vector.load %arg50[%c1_346, %c0_347, %c0_348] : memref<2x8x16xf32, #tpu.memory_space<vmem>>, vector<1x8x16xf32>
    %864 = vector.shape_cast %863 : vector<1x8x16xf32> to vector<8x16xf32>
    %865 = vector.shape_cast %684 : vector<8x16xf32> to vector<1x8x16xf32>
    tpu.vector_store %arg50[%c1_346, %c0_347, %c0_348], %865 {strides = array<i32>} : memref<2x8x16xf32, #tpu.memory_space<vmem>>, vector<1x8x16xf32>,
    return
  }
  func.func @transform_0(%arg0: i32) -> (i32, i32, i32) {
    %c0_i32 = arith.constant 0 : i32
    %c0_i32_0 = arith.constant 0 : i32
    %c0_i32_1 = arith.constant 0 : i32
    return %arg0, %c0_i32, %c0_i32_0 : i32, i32, i32
  }
  func.func @transform_1(%arg0: i32) -> (i32, i32, i32) {
    %c0_i32 = arith.constant 0 : i32
    %c0_i32_0 = arith.constant 0 : i32
    %c0_i32_1 = arith.constant 0 : i32
    return %arg0, %c0_i32, %c0_i32_0 : i32, i32, i32
  }
  func.func @transform_2(%arg0: i32) -> (i32, i32) {
    %c0_i32 = arith.constant 0 : i32
    %c0_i32_0 = arith.constant 0 : i32
    %c0_i32_1 = arith.constant 0 : i32
    return %c0_i32, %c0_i32_0 : i32, i32
  }
  func.func @transform_3(%arg0: i32) -> (i32, i32) {
    %c0_i32 = arith.constant 0 : i32
    %c0_i32_0 = arith.constant 0 : i32
    %c0_i32_1 = arith.constant 0 : i32
    return %c0_i32, %c0_i32_0 : i32, i32
  }
  func.func @transform_4(%arg0: i32) -> (i32, i32) {
    %c0_i32 = arith.constant 0 : i32
    %c0_i32_0 = arith.constant 0 : i32
    %c0_i32_1 = arith.constant 0 : i32
    return %c0_i32, %c0_i32_0 : i32, i32
  }
  func.func @transform_5(%arg0: i32) -> (i32, i32) {
    %c0_i32 = arith.constant 0 : i32
    %c0_i32_0 = arith.constant 0 : i32
    %c0_i32_1 = arith.constant 0 : i32
    return %c0_i32, %c0_i32_0 : i32, i32
  }
  func.func @transform_6(%arg0: i32) -> (i32, i32) {
    %c0_i32 = arith.constant 0 : i32
    %c0_i32_0 = arith.constant 0 : i32
    %c0_i32_1 = arith.constant 0 : i32
    return %c0_i32, %c0_i32_0 : i32, i32
  }
  func.func @transform_7(%arg0: i32) -> (i32, i32) {
    %c0_i32 = arith.constant 0 : i32
    %c0_i32_0 = arith.constant 0 : i32
    %c0_i32_1 = arith.constant 0 : i32
    return %c0_i32, %c0_i32_0 : i32, i32
  }
  func.func @transform_8(%arg0: i32) -> (i32, i32) {
    %c0_i32 = arith.constant 0 : i32
    %c0_i32_0 = arith.constant 0 : i32
    %c0_i32_1 = arith.constant 0 : i32
    return %c0_i32, %c0_i32_0 : i32, i32
  }
  func.func @transform_9(%arg0: i32) -> (i32, i32) {
    %c0_i32 = arith.constant 0 : i32
    %c0_i32_0 = arith.constant 0 : i32
    %c0_i32_1 = arith.constant 0 : i32
    return %c0_i32, %c0_i32_0 : i32, i32
  }
  func.func @transform_10(%arg0: i32) -> (i32, i32) {
    %c0_i32 = arith.constant 0 : i32
    %c0_i32_0 = arith.constant 0 : i32
    %c0_i32_1 = arith.constant 0 : i32
    return %c0_i32, %c0_i32_0 : i32, i32
  }
  func.func @transform_11(%arg0: i32) -> (i32, i32) {
    %c0_i32 = arith.constant 0 : i32
    %c0_i32_0 = arith.constant 0 : i32
    %c0_i32_1 = arith.constant 0 : i32
    return %c0_i32, %c0_i32_0 : i32, i32
  }
  func.func @transform_12(%arg0: i32) -> (i32, i32) {
    %c0_i32 = arith.constant 0 : i32
    %c0_i32_0 = arith.constant 0 : i32
    %c0_i32_1 = arith.constant 0 : i32
    return %c0_i32, %c0_i32_0 : i32, i32
  }
  func.func @transform_13(%arg0: i32) -> (i32, i32) {
    %c0_i32 = arith.constant 0 : i32
    %c0_i32_0 = arith.constant 0 : i32
    %c0_i32_1 = arith.constant 0 : i32
    return %c0_i32, %c0_i32_0 : i32, i32
  }
  func.func @transform_14(%arg0: i32) -> (i32, i32) {
    %c0_i32 = arith.constant 0 : i32
    %c0_i32_0 = arith.constant 0 : i32
    %c0_i32_1 = arith.constant 0 : i32
    return %c0_i32, %c0_i32_0 : i32, i32
  }
  func.func @transform_15(%arg0: i32) -> (i32, i32) {
    %c0_i32 = arith.constant 0 : i32
    %c0_i32_0 = arith.constant 0 : i32
    %c0_i32_1 = arith.constant 0 : i32
    return %c0_i32, %c0_i32_0 : i32, i32
  }
  func.func @transform_16(%arg0: i32) -> (i32, i32) {
    %c0_i32 = arith.constant 0 : i32
    %c0_i32_0 = arith.constant 0 : i32
    %c0_i32_1 = arith.constant 0 : i32
    return %c0_i32, %c0_i32_0 : i32, i32
  }
  func.func @transform_17(%arg0: i32) -> (i32, i32) {
    %c0_i32 = arith.constant 0 : i32
    %c0_i32_0 = arith.constant 0 : i32
    %c0_i32_1 = arith.constant 0 : i32
    return %c0_i32, %c0_i32_0 : i32, i32
  }
  func.func @transform_18(%arg0: i32) -> (i32, i32) {
    %c0_i32 = arith.constant 0 : i32
    %c0_i32_0 = arith.constant 0 : i32
    %c0_i32_1 = arith.constant 0 : i32
    return %c0_i32, %c0_i32_0 : i32, i32
  }
  func.func @transform_19(%arg0: i32) -> (i32, i32) {
    %c0_i32 = arith.constant 0 : i32
    %c0_i32_0 = arith.constant 0 : i32
    %c0_i32_1 = arith.constant 0 : i32
    return %c0_i32, %c0_i32_0 : i32, i32
  }
  func.func @transform_20(%arg0: i32) -> (i32, i32) {
    %c0_i32 = arith.constant 0 : i32
    %c0_i32_0 = arith.constant 0 : i32
    %c0_i32_1 = arith.constant 0 : i32
    return %c0_i32, %c0_i32_0 : i32, i32
  }
  func.func @transform_21(%arg0: i32) -> (i32, i32) {
    %c0_i32 = arith.constant 0 : i32
    %c0_i32_0 = arith.constant 0 : i32
    %c0_i32_1 = arith.constant 0 : i32
    return %c0_i32, %c0_i32_0 : i32, i32
  }
  func.func @transform_22(%arg0: i32) -> (i32, i32) {
    %c0_i32 = arith.constant 0 : i32
    %c0_i32_0 = arith.constant 0 : i32
    %c0_i32_1 = arith.constant 0 : i32
    return %c0_i32, %c0_i32_0 : i32, i32
  }
  func.func @transform_23(%arg0: i32) -> (i32, i32) {
    %c0_i32 = arith.constant 0 : i32
    %c0_i32_0 = arith.constant 0 : i32
    %c0_i32_1 = arith.constant 0 : i32
    return %c0_i32, %c0_i32_0 : i32, i32
  }
  func.func @transform_24(%arg0: i32) -> (i32, i32) {
    %c0_i32 = arith.constant 0 : i32
    %c0_i32_0 = arith.constant 0 : i32
    %c0_i32_1 = arith.constant 0 : i32
    return %c0_i32, %c0_i32_0 : i32, i32
  }
  func.func @transform_25(%arg0: i32) -> (i32, i32) {
    %c0_i32 = arith.constant 0 : i32
    %c0_i32_0 = arith.constant 0 : i32
    %c0_i32_1 = arith.constant 0 : i32
    return %c0_i32, %c0_i32_0 : i32, i32
  }
  func.func @transform_26(%arg0: i32) -> (i32, i32) {
    %c0_i32 = arith.constant 0 : i32
    %c0_i32_0 = arith.constant 0 : i32
    %c0_i32_1 = arith.constant 0 : i32
    return %c0_i32, %c0_i32_0 : i32, i32
  }
  func.func @transform_27(%arg0: i32) -> (i32, i32) {
    %c0_i32 = arith.constant 0 : i32
    %c0_i32_0 = arith.constant 0 : i32
    %c0_i32_1 = arith.constant 0 : i32
    return %c0_i32, %c0_i32_0 : i32, i32
  }
  func.func @transform_28(%arg0: i32) -> (i32, i32) {
    %c0_i32 = arith.constant 0 : i32
    %c0_i32_0 = arith.constant 0 : i32
    %c0_i32_1 = arith.constant 0 : i32
    return %c0_i32, %c0_i32_0 : i32, i32
  }
  func.func @transform_29(%arg0: i32) -> (i32, i32) {
    %c0_i32 = arith.constant 0 : i32
    %c0_i32_0 = arith.constant 0 : i32
    %c0_i32_1 = arith.constant 0 : i32
    return %c0_i32, %c0_i32_0 : i32, i32
  }
  func.func @transform_30(%arg0: i32) -> (i32, i32) {
    %c0_i32 = arith.constant 0 : i32
    %c0_i32_0 = arith.constant 0 : i32
    %c0_i32_1 = arith.constant 0 : i32
    return %c0_i32, %c0_i32_0 : i32, i32
  }
  func.func @transform_31(%arg0: i32) -> (i32, i32) {
    %c0_i32 = arith.constant 0 : i32
    %c0_i32_0 = arith.constant 0 : i32
    %c0_i32_1 = arith.constant 0 : i32
    return %c0_i32, %c0_i32_0 : i32, i32
  }
  func.func @transform_32(%arg0: i32) -> (i32, i32) {
    %c0_i32 = arith.constant 0 : i32
    %c0_i32_0 = arith.constant 0 : i32
    %c0_i32_1 = arith.constant 0 : i32
    return %c0_i32, %c0_i32_0 : i32, i32
  }
  func.func @transform_33(%arg0: i32) -> (i32, i32) {
    %c0_i32 = arith.constant 0 : i32
    %c0_i32_0 = arith.constant 0 : i32
    %c0_i32_1 = arith.constant 0 : i32
    return %c0_i32, %c0_i32_0 : i32, i32
  }
  func.func @transform_34(%arg0: i32) -> (i32, i32) {
    %c0_i32 = arith.constant 0 : i32
    %c0_i32_0 = arith.constant 0 : i32
    %c0_i32_1 = arith.constant 0 : i32
    return %c0_i32, %c0_i32_0 : i32, i32
  }
  func.func @transform_35(%arg0: i32) -> (i32, i32) {
    %c0_i32 = arith.constant 0 : i32
    %c0_i32_0 = arith.constant 0 : i32
    %c0_i32_1 = arith.constant 0 : i32
    return %c0_i32, %c0_i32_0 : i32, i32
  }
  func.func @transform_36(%arg0: i32) -> (i32, i32) {
    %c0_i32 = arith.constant 0 : i32
    %c0_i32_0 = arith.constant 0 : i32
    %c0_i32_1 = arith.constant 0 : i32
    return %c0_i32, %c0_i32_0 : i32, i32
  }
  func.func @transform_37(%arg0: i32) -> (i32, i32) {
    %c0_i32 = arith.constant 0 : i32
    %c0_i32_0 = arith.constant 0 : i32
    %c0_i32_1 = arith.constant 0 : i32
    return %c0_i32, %c0_i32_0 : i32, i32
  }
  func.func @transform_38(%arg0: i32) -> (i32, i32) {
    %c0_i32 = arith.constant 0 : i32
    %c0_i32_0 = arith.constant 0 : i32
    %c0_i32_1 = arith.constant 0 : i32
    return %c0_i32, %c0_i32_0 : i32, i32
  }
  func.func @transform_39(%arg0: i32) -> (i32, i32) {
    %c0_i32 = arith.constant 0 : i32
    %c0_i32_0 = arith.constant 0 : i32
    %c0_i32_1 = arith.constant 0 : i32
    return %c0_i32, %c0_i32_0 : i32, i32
  }
  func.func @transform_40(%arg0: i32) -> (i32, i32) {
    %c0_i32 = arith.constant 0 : i32
    %c0_i32_0 = arith.constant 0 : i32
    %c0_i32_1 = arith.constant 0 : i32
    return %c0_i32, %c0_i32_0 : i32, i32
  }
  func.func @transform_41(%arg0: i32) -> (i32, i32) {
    %c0_i32 = arith.constant 0 : i32
    %c0_i32_0 = arith.constant 0 : i32
    %c0_i32_1 = arith.constant 0 : i32
    return %c0_i32, %c0_i32_0 : i32, i32
  }
  func.func @transform_42(%arg0: i32) -> (i32, i32) {
    %c0_i32 = arith.constant 0 : i32
    %c0_i32_0 = arith.constant 0 : i32
    %c0_i32_1 = arith.constant 0 : i32
    return %c0_i32, %c0_i32_0 : i32, i32
  }
  func.func @transform_43(%arg0: i32) -> (i32, i32) {
    %c0_i32 = arith.constant 0 : i32
    %c0_i32_0 = arith.constant 0 : i32
    %c0_i32_1 = arith.constant 0 : i32
    return %c0_i32, %c0_i32_0 : i32, i32
  }
  func.func @transform_44(%arg0: i32) -> (i32, i32) {
    %c0_i32 = arith.constant 0 : i32
    %c0_i32_0 = arith.constant 0 : i32
    %c0_i32_1 = arith.constant 0 : i32
    return %c0_i32, %c0_i32_0 : i32, i32
  }
  func.func @transform_45(%arg0: i32) -> (i32, i32) {
    %c0_i32 = arith.constant 0 : i32
    %c0_i32_0 = arith.constant 0 : i32
    %c0_i32_1 = arith.constant 0 : i32
    return %c0_i32, %c0_i32_0 : i32, i32
  }
  func.func @transform_46(%arg0: i32) -> (i32, i32) {
    %c0_i32 = arith.constant 0 : i32
    %c0_i32_0 = arith.constant 0 : i32
    %c0_i32_1 = arith.constant 0 : i32
    return %c0_i32, %c0_i32_0 : i32, i32
  }
  func.func @transform_47(%arg0: i32) -> (i32, i32) {
    %c0_i32 = arith.constant 0 : i32
    %c0_i32_0 = arith.constant 0 : i32
    %c0_i32_1 = arith.constant 0 : i32
    return %c0_i32, %c0_i32_0 : i32, i32
  }
  func.func @transform_48(%arg0: i32) -> (i32, i32, i32) {
    %c0_i32 = arith.constant 0 : i32
    %c0_i32_0 = arith.constant 0 : i32
    %c0_i32_1 = arith.constant 0 : i32
    return %arg0, %c0_i32, %c0_i32_0 : i32, i32, i32
  }
  func.func @transform_49(%arg0: i32) -> (i32, i32, i32) {
    %c0_i32 = arith.constant 0 : i32
    %c0_i32_0 = arith.constant 0 : i32
    %c0_i32_1 = arith.constant 0 : i32
    return %arg0, %c0_i32, %c0_i32_0 : i32, i32, i32
  }
}

</mosaic_0001>

<bundles_post_ra>
// kernel: tpu_custom_call.1
= control target key start
LH: loop header
LB: loop body
LE: loop exit
PB: predicated region body
PF: predicated region fallthrough
CT: control target
= control target key end

     0   :  { %s6471_s6 = smov 1   ;;  %s6472_s10 = smov 2   ;;  %s7821_s0 = inlined_call_operand.smem [shape: u32[50], index: -1, kind: input, shape index: {}] }
   0x1   :  { %s6566_s5 = sld [smem:[%s7821_s0]]   ;;  %s6473_s14 = smov 3  }
   0x2   :  { %s6571_s9 = sld [smem:[%s7821_s0 + %s6471_s6]]   ;;  %s6474_s18 = smov 4  }
   0x3   :  { %s6576_s13 = sld [smem:[%s7821_s0 + %s6472_s10]]   ;;  %s6475_s22 = smov 5  }
   0x4   :  { %s6581_s17 = sld [smem:[%s7821_s0 + %s6473_s14]]   ;;  %s6476_s26 = smov 6  }
   0x5   :  { %s6586_s21 = sld [smem:[%s7821_s0 + %s6474_s18]]   ;;  %s6477_s30 = smov 7  }
   0x6   :  { %s6591_s25 = sld [smem:[%s7821_s0 + %s6475_s22]]   ;;  %s6478_s4 = smov 8  }
   0x7   :  { %7854 = sst [smem:[#allocation70_spill]] %s6566_s5  ;;  %s6479_s10 = smov 9  }
   0x8   :  { %7855 = sst [smem:[#allocation71_spill]] %s6571_s9  ;;  %s6480_s15 = smov 10  }
   0x9   :  { %7856 = sst [smem:[#allocation72_spill]] %s6576_s13  ;;  %s6481_s20 = smov 11  }
   0xa   :  { %7857 = sst [smem:[#allocation73_spill]] %s6581_s17  ;;  %s6483_s1 = smov 13  }
   0xb   :  { %7858 = sst [smem:[#allocation74_spill]] %s6586_s21  ;;  %s6484_s7 = smov 14  }
   0xc   :  { %7859 = sst [smem:[#allocation75_spill]] %s6591_s25  ;;  %s6486_s22 = smov 16  }
   0xd   :  { %s6596_s29 = sld [smem:[%s7821_s0 + %s6476_s26]]   ;;  %s6482_s26 = smov 12  }
   0xe   :  { %s6601_s3 = sld [smem:[%s7821_s0 + %s6477_s30]]   ;;  %s6487_s28 = smov 17  }
   0xf   :  { %s6606_s8 = sld [smem:[%s7821_s0 + %s6478_s4]]  }
  0x10   :  { %s6611_s14 = sld [smem:[%s7821_s0 + %s6479_s10]]  }
  0x11   :  { %s6616_s19 = sld [smem:[%s7821_s0 + %s6480_s15]]   ;;  %s6485_s15 = smov 15  }
  0x12   :  { %s6621_s24 = sld [smem:[%s7821_s0 + %s6481_s20]]  }
  0x13   :  { %7860 = sst [smem:[#allocation76_spill]] %s6596_s29 }
  0x14   :  { %7861 = sst [smem:[#allocation77_spill]] %s6601_s3 }
  0x15   :  { %7862 = sst [smem:[#allocation78_spill]] %s6606_s8 }
  0x16   :  { %7863 = sst [smem:[#allocation79_spill]] %s6611_s14 }
  0x17   :  { %s6626_s30 = sld [smem:[%s7821_s0 + %s6482_s26]]  }
  0x18   :  { %7864 = sst [smem:[#allocation80_spill]] %s6621_s24 }
  0x19   :  { %s6631_s6 = sld [smem:[%s7821_s0 + %s6483_s1]]  }
  0x1a   :  { %s6636_s12 = sld [smem:[%s7821_s0 + %s6484_s7]]   ;;  %s6488_s7 = smov 18  }
  0x1b   :  { %s6641_s20 = sld [smem:[%s7821_s0 + %s6485_s15]]   ;;  %s6489_s15 = smov 19  }
  0x1c   :  { %s6646_s27 = sld [smem:[%s7821_s0 + %s6486_s22]]   ;;  %s6490_s22 = smov 20  }
  0x1d   :  { %7865 = sst [smem:[#allocation81_spill]] %s6626_s30 }
  0x1e   :  { %s6651_s4 = sld [smem:[%s7821_s0 + %s6487_s28]]   ;;  %s6491_s28 = smov 21  }
  0x1f   :  { %7866 = sst [smem:[#allocation82_spill]] %s6631_s6 }
  0x20   :  { %s6656_s14 = sld [smem:[%s7821_s0 + %s6488_s7]]   ;;  %s6492_s7 = smov 22  }
  0x21   :  { %7867 = sst [smem:[#allocation83_spill]] %s6641_s20 }
  0x22   :  { %7868 = sst [smem:[#allocation84_spill]] %s6646_s27 }
  0x23   :  { %s6661_s20 = sld [smem:[%s7821_s0 + %s6489_s15]]   ;;  %s6493_s15 = smov 23  }
  0x24   :  { %7869 = sst [smem:[#allocation85_spill]] %s6651_s4 }
  0x25   :  { %s6666_s24 = sld [smem:[%s7821_s0 + %s6490_s22]]   ;;  %s6494_s22 = smov 24  }
  0x26   :  { %s6671_s4 = sld [smem:[%s7821_s0 + %s6491_s28]]   ;;  %s6495_s28 = smov 25  }
  0x27   :  { %s6676_s6 = sld [smem:[%s7821_s0 + %s6492_s7]]   ;;  %s6496_s7 = smov 26  }
  0x28   :  { %s6686_s8 = sld [smem:[%s7821_s0 + %s6494_s22]]   ;;  %s6498_s22 = smov 28  }
  0x29   :  { %7870 = sst [smem:[#allocation86_spill]] %s6661_s20 }
  0x2a   :  { %s6681_s20 = sld [smem:[%s7821_s0 + %s6493_s15]]   ;;  %s6497_s15 = smov 27  }
  0x2b   :  { %7871 = sst [smem:[#allocation87_spill]] %s6666_s24 }
  0x2c   :  { %7872 = sst [smem:[#allocation88_spill]] %s6671_s4 }
  0x2d   :  { %s6691_s4 = sld [smem:[%s7821_s0 + %s6495_s28]]   ;;  %s6499_s28 = smov 29  }
  0x2e   :  { %7874 = sst [smem:[#allocation90_spill]] %s6686_s8 }
  0x2f   :  { %s6696_s25 = sld [smem:[%s7821_s0 + %s6496_s7]]   ;;  %s6500_s7 = smov 30  }
  0x30   :  { %7873 = sst [smem:[#allocation89_spill]] %s6681_s20 }
  0x31   :  { %s6701_s20 = sld [smem:[%s7821_s0 + %s6497_s15]]   ;;  %s6501_s15 = smov 31  }
  0x32   :  { %s6706_s3 = sld [smem:[%s7821_s0 + %s6498_s22]]   ;;  %s6502_s22 = smov 32  }
  0x33   :  { %7875 = sst [smem:[#allocation91_spill]] %s6691_s4 }
  0x34   :  { %s6711_s4 = sld [smem:[%s7821_s0 + %s6499_s28]]   ;;  %s6503_s28 = smov 33  }
  0x35   :  { %s6716_s17 = sld [smem:[%s7821_s0 + %s6500_s7]]   ;;  %s6504_s7 = smov 34  }
  0x36   :  { %s6721_s21 = sld [smem:[%s7821_s0 + %s6501_s15]]   ;;  %s6505_s15 = smov 35  }
  0x37   :  { %7876 = sst [smem:[#allocation92_spill]] %s6701_s20 }
  0x38   :  { %s6726_s9 = sld [smem:[%s7821_s0 + %s6502_s22]]   ;;  %s6506_s22 = smov 36  }
  0x39   :  { %s6731_s29 = sld [smem:[%s7821_s0 + %s6503_s28]]   ;;  %s6507_s28 = smov 37  }
  0x3a   :  { %7877 = sst [smem:[#allocation93_spill]] %s6711_s4 }
  0x3b   :  { %s6736_s13 = sld [smem:[%s7821_s0 + %s6504_s7]]   ;;  %s6508_s7 = smov 38  }
  0x3c   :  { %7878 = sst [smem:[#allocation94_spill]] %s6721_s21 }
  0x3d   :  { %s6741_s21 = sld [smem:[%s7821_s0 + %s6505_s15]]   ;;  %s6509_s15 = smov 39  }
  0x3e   :  { %s6746_s4 = sld [smem:[%s7821_s0 + %s6506_s22]]   ;;  %s6510_s22 = smov 40  }
  0x3f   :  { %7879 = sst [smem:[#allocation95_spill]] %s6731_s29 }
  0x40   :  { %s6751_s29 = sld [smem:[%s7821_s0 + %s6507_s28]]   ;;  %s6511_s28 = smov 41  }
  0x41   :  { %s6756_s20 = sld [smem:[%s7821_s0 + %s6508_s7]]   ;;  %s6512_s7 = smov 42  }
  0x42   :  { %s6766_s8 = sld [smem:[%s7821_s0 + %s6510_s22]]   ;;  %s6514_s22 = smov 44  }
  0x43   :  { %7880 = sst [smem:[#allocation96_spill]] %s6741_s21 }
  0x44   :  { %s6761_s21 = sld [smem:[%s7821_s0 + %s6509_s15]]   ;;  %s6513_s15 = smov 43  }
  0x45   :  { %s6776_s24 = sld [smem:[%s7821_s0 + %s6512_s7]]   ;;  %s6516_s7 = smov 46  }
  0x46   :  { %7881 = sst [smem:[#allocation97_spill]] %s6751_s29 }
  0x47   :  { %s6771_s29 = sld [smem:[%s7821_s0 + %s6511_s28]]   ;;  %s6515_s28 = smov 45  }
  0x48   :  { %s6786_s27 = sld [smem:[%s7821_s0 + %s6514_s22]]   ;;  %s6518_s22 = smov 48  }
  0x49   :  { %s6796_s30 = sld [smem:[%s7821_s0 + %s6516_s7]]  }
  0x4a   :  { %7882 = sst [smem:[#allocation98_spill]] %s6761_s21 }
  0x4b   :  { %s6781_s21 = sld [smem:[%s7821_s0 + %s6513_s15]]   ;;  %s6517_s15 = smov 47  }
  0x4c   :  { %s6806_s5 = sld [smem:[%s7821_s0 + %s6518_s22]]  }
  0x4d   :  { %7883 = sst [smem:[#allocation99_spill]] %s6771_s29 }
  0x4e   :  { %s6791_s29 = sld [smem:[%s7821_s0 + %s6515_s28]]   ;;  %s6519_s28 = smov 49  }
  0x51   :  { %7884 = sst [smem:[#allocation100_spill]] %s6781_s21 }
  0x52   :  { %s6801_s21 = sld [smem:[%s7821_s0 + %s6517_s15]]  }
  0x54   :  { %7885 = sst [smem:[#allocation101_spill]] %s6791_s29 }
  0x55   :  { %s6811_s29 = sld [smem:[%s7821_s0 + %s6519_s28]]  }
  0x56   :  { %105 = vsyncpa [#allocation3], 0 }
  0x57   :  { %106 = vsyncpa [#allocation6], 0 }
  0x58   :  { %107 = vsyncpa [#allocation9], 0 }
  0x59   :  { %108 = vsyncpa [#allocation12], 0 }
  0x5a   :  { %109 = vsyncpa [#allocation15], 0 }
  0x5b   :  { %110 = vsyncpa [#allocation18], 0 }
  0x5c   :  { %111 = vsyncpa [#allocation21], 0 }
  0x5d   :  { %112 = vsyncpa [#allocation24], 0 }
  0x5e   :  { %113 = vsyncpa [#allocation27], 0 }
  0x5f   :  { %114 = vsyncpa [#allocation30], 0 }
  0x60   :  { %115 = vsyncpa [#allocation33], 0 }
  0x61   :  { %116 = vsyncpa [#allocation36], 0 }
  0x62   :  { %117 = vsyncpa [#allocation39], 0 }
  0x63   :  { %118 = vsyncpa [#allocation42], 0 }
  0x64   :  { %119 = vsyncpa [#allocation45], 0 }
  0x65   :  { %120 = vsyncpa [#allocation48], 0 }
  0x66   :  { %121 = vsyncpa [#allocation4], 0 }
  0x67   :  { %122 = vsyncpa [#allocation51], 0  ;;  %s158_s0 = sshll.u32 %s6616_s19, 4  ;;  %s6520_s7 = smov [#allocation5]   ;;  %s159_s0 = int_to_ptr.hbm [resolvable:$true] %s158_s0 }
  0x68   :  { %s160_s10 = sshll.u32 %s6520_s7, 4  ;;  %s188_s11 = sshll.u32 %s6636_s12, 4  ;;  %s161_s10 = int_to_ptr.vmem [resolvable:$true] %s160_s10  ;;  %s189_s11 = int_to_ptr.hbm [resolvable:$true] %s188_s11 }
  0x69   :  { %s5667_s15 = sshra.s32 %s159_s0, 4  ;;  %s5671_s18 = scalar_lea.hbm %s6616_s19, 32  ;;  %s5668_s15 = int_to_ptr.hbm [resolvable:$true] %s5667_s15 }
  0x6a   :  { %s5669_s16 = scalar_lea.hbm %s5668_s15, 32  ;;  %p5672_p1 = scmp.lt.s32.totalorder %s5668_s15, %s6616_s19 }
  0x6b   :  { %p5670_p0 = scmp.ne.s32.totalorder %s5668_s15, %s5669_s16  ;;  %p5673_p2 = scmp.lt.s32.totalorder %s5671_s18, %s5669_s16 }
  0x6d   :  { %p5674_p3 = por %p5673_p2, %p5672_p1 }
  0x6f   :  { %p5675_p4 = pnand %p5674_p3, %p5670_p0 }
  0x71   :  { %5678 = shalt.err (!%p5675_p4)
}
  0x72   :  { %s6521_s22 = smov 128   ;;  %s6522_s23 = smov 8  }
  0x73   :  { %166 = dma.hbm_to_vmem [thread:$0]  %s159_s0, 512, %s161_s10, [#allocation6], %s6521_s22, %s6521_s22, %s6522_s23  }
  0x74   :  { %s6523_s26 = smov [#allocation8]   ;;  %s218_s1 = sshll.u32 %s6656_s14, 4  ;;  %s6821_s1 = int_to_ptr.hbm [resolvable:$true] %s218_s1 }
  0x75   :  { %s190_s28 = sshll.u32 %s6523_s26, 4  ;;  %s5691_s19 = sshra.s32 %s189_s11, 4  ;;  %s191_s28 = int_to_ptr.vmem [resolvable:$true] %s190_s28  ;;  %s5692_s19 = int_to_ptr.hbm [resolvable:$true] %s5691_s19 }
  0x76   :  { %s5693_s2 = scalar_lea.hbm %s5692_s19, 32  ;;  %s5695_s7 = scalar_lea.hbm %s6636_s12, 32 }
  0x77   :  { %p5694_p5 = scmp.ne.s32.totalorder %s5692_s19, %s5693_s2  ;;  %p5696_p6 = scmp.lt.s32.totalorder %s5692_s19, %s6636_s12 }
  0x78   :  { %p5697_p7 = scmp.lt.s32.totalorder %s5695_s7, %s5693_s2 }
  0x7a   :  { %p5698_p8 = por %p5697_p7, %p5696_p6 }
  0x7c   :  { %p5699_p9 = pnand %p5698_p8, %p5694_p5 }
  0x7e   :  { %5702 = shalt.err (!%p5699_p9)
}
  0x7f   :  { %196 = dma.hbm_to_vmem [thread:$0]  %s189_s11, 512, %s191_s28, [#allocation9], %s6521_s22, %s6521_s22, %s6522_s23  }
  0x80   :  { %s248_s0 = sshll.u32 %s6676_s6, 4  ;;  %s6524_s10 = smov [#allocation11]   ;;  %s6829_s0 = int_to_ptr.hbm [resolvable:$true] %s248_s0 }
  0x81   :  { %s220_s15 = sshll.u32 %s6524_s10, 4  ;;  %s5715_s16 = sshra.s32 %s6821_s1, 4  ;;  %s221_s15 = int_to_ptr.vmem [resolvable:$true] %s220_s15  ;;  %s5716_s16 = int_to_ptr.hbm [resolvable:$true] %s5715_s16 }
  0x82   :  { %s5717_s12 = scalar_lea.hbm %s5716_s16, 32  ;;  %s5719_s18 = scalar_lea.hbm %s6656_s14, 32 }
  0x83   :  { %p5718_p10 = scmp.ne.s32.totalorder %s5716_s16, %s5717_s12  ;;  %p5720_p11 = scmp.lt.s32.totalorder %s5716_s16, %s6656_s14 }
  0x84   :  { %p5721_p12 = scmp.lt.s32.totalorder %s5719_s18, %s5717_s12 }
  0x86   :  { %p5722_p13 = por %p5721_p12, %p5720_p11 }
  0x88   :  { %p5723_p0 = pnand %p5722_p13, %p5718_p10 }
  0x8a   :  { %5726 = shalt.err (!%p5723_p0)
}
  0x8b   :  { %226 = dma.hbm_to_vmem [thread:$0]  %s6821_s1, 512, %s221_s15, [#allocation12], %s6521_s22, %s6521_s22, %s6522_s23  }
  0x8c   :  { %s6525_s11 = smov [#allocation14]   ;;  %s278_s28 = sshll.u32 %s6696_s25, 4  ;;  %s6839_s28 = int_to_ptr.hbm [resolvable:$true] %s278_s28 }
  0x8d   :  { %s250_s26 = sshll.u32 %s6525_s11, 4  ;;  %s5739_s14 = sshra.s32 %s6829_s0, 4  ;;  %s251_s26 = int_to_ptr.vmem [resolvable:$true] %s250_s26  ;;  %s5740_s14 = int_to_ptr.hbm [resolvable:$true] %s5739_s14 }
  0x8e   :  { %s5741_s19 = scalar_lea.hbm %s5740_s14, 32  ;;  %s5743_s2 = scalar_lea.hbm %s6676_s6, 32 }
  0x8f   :  { %p5742_p1 = scmp.ne.s32.totalorder %s5740_s14, %s5741_s19  ;;  %p5744_p2 = scmp.lt.s32.totalorder %s5740_s14, %s6676_s6 }
  0x90   :  { %p5745_p3 = scmp.lt.s32.totalorder %s5743_s2, %s5741_s19 }
  0x92   :  { %p5746_p4 = por %p5745_p3, %p5744_p2 }
  0x94   :  { %p5747_p5 = pnand %p5746_p4, %p5742_p1 }
  0x96   :  { %5750 = shalt.err (!%p5747_p5)
}
  0x97   :  { %256 = dma.hbm_to_vmem [thread:$0]  %s6829_s0, 512, %s251_s26, [#allocation15], %s6521_s22, %s6521_s22, %s6522_s23  }
  0x98   :  { %s302_s1 = sshll.u32 %s6706_s3, 4  ;;  %s6526_s7 = smov [#allocation17]   ;;  %s6849_s1 = int_to_ptr.hbm [resolvable:$true] %s302_s1 }
  0x99   :  { %s280_s10 = sshll.u32 %s6526_s7, 4  ;;  %s5763_s6 = sshra.s32 %s6839_s28, 4  ;;  %s281_s10 = int_to_ptr.vmem [resolvable:$true] %s280_s10  ;;  %s5764_s6 = int_to_ptr.hbm [resolvable:$true] %s5763_s6 }
  0x9a   :  { %s5765_s15 = scalar_lea.hbm %s5764_s6, 32  ;;  %s5767_s16 = scalar_lea.hbm %s6696_s25, 32 }
  0x9b   :  { %p5766_p6 = scmp.ne.s32.totalorder %s5764_s6, %s5765_s15  ;;  %p5768_p7 = scmp.lt.s32.totalorder %s5764_s6, %s6696_s25 }
  0x9c   :  { %p5769_p8 = scmp.lt.s32.totalorder %s5767_s16, %s5765_s15 }
  0x9e   :  { %p5770_p9 = por %p5769_p8, %p5768_p7 }
  0xa0   :  { %p5771_p10 = pnand %p5770_p9, %p5766_p6 }
  0xa2   :  { %5774 = shalt.err (!%p5771_p10)
}
  0xa3   :  { %286 = dma.hbm_to_vmem [thread:$0]  %s6839_s28, 512, %s281_s10, [#allocation18], %s6521_s22, %s6521_s22, %s6522_s23  }
  0xa4   :  { %s6527_s0 = smov [#allocation20]   ;;  %s326_s18 = sshll.u32 %s6716_s17, 4  ;;  %s6859_s18 = int_to_ptr.hbm [resolvable:$true] %s326_s18 }
  0xa5   :  { %s304_s12 = sshll.u32 %s6527_s0, 4  ;;  %s5787_s25 = sshra.s32 %s6849_s1, 4  ;;  %s305_s12 = int_to_ptr.vmem [resolvable:$true] %s304_s12  ;;  %s5788_s25 = int_to_ptr.hbm [resolvable:$true] %s5787_s25 }
  0xa6   :  { %s5789_s11 = scalar_lea.hbm %s5788_s25, 32  ;;  %s5791_s26 = scalar_lea.hbm %s6706_s3, 32 }
  0xa7   :  { %p5790_p11 = scmp.ne.s32.totalorder %s5788_s25, %s5789_s11  ;;  %p5792_p12 = scmp.lt.s32.totalorder %s5788_s25, %s6706_s3 }
  0xa8   :  { %p5793_p13 = scmp.lt.s32.totalorder %s5791_s26, %s5789_s11 }
  0xaa   :  { %p5794_p0 = por %p5793_p13, %p5792_p12 }
  0xac   :  { %p5795_p1 = pnand %p5794_p0, %p5790_p11 }
  0xae   :  { %5798 = shalt.err (!%p5795_p1)
}
  0xaf   :  { %310 = dma.hbm_to_vmem [thread:$0]  %s6849_s1, 512, %s305_s12, [#allocation21], %s6521_s22, %s6521_s22, %s6522_s23  }
  0xb0   :  { %s350_s28 = sshll.u32 %s6726_s9, 4  ;;  %s6528_s14 = smov [#allocation23]   ;;  %s6869_s28 = int_to_ptr.hbm [resolvable:$true] %s350_s28 }
  0xb1   :  { %s328_s19 = sshll.u32 %s6528_s14, 4  ;;  %s5811_s3 = sshra.s32 %s6859_s18, 4  ;;  %s329_s19 = int_to_ptr.vmem [resolvable:$true] %s328_s19  ;;  %s5812_s3 = int_to_ptr.hbm [resolvable:$true] %s5811_s3 }
  0xb2   :  { %s5813_s2 = scalar_lea.hbm %s5812_s3, 32  ;;  %s5815_s7 = scalar_lea.hbm %s6716_s17, 32 }
  0xb3   :  { %p5814_p2 = scmp.ne.s32.totalorder %s5812_s3, %s5813_s2  ;;  %p5816_p3 = scmp.lt.s32.totalorder %s5812_s3, %s6716_s17 }
  0xb4   :  { %p5817_p4 = scmp.lt.s32.totalorder %s5815_s7, %s5813_s2 }
  0xb6   :  { %p5818_p5 = por %p5817_p4, %p5816_p3 }
  0xb8   :  { %p5819_p6 = pnand %p5818_p5, %p5814_p2 }
  0xba   :  { %5822 = shalt.err (!%p5819_p6)
}
  0xbb   :  { %334 = dma.hbm_to_vmem [thread:$0]  %s6859_s18, 512, %s329_s19, [#allocation24], %s6521_s22, %s6521_s22, %s6522_s23  }
  0xbc   :  { %s6529_s1 = smov [#allocation26]   ;;  %s374_s6 = sshll.u32 %s6736_s13, 4  ;;  %s6879_s6 = int_to_ptr.hbm [resolvable:$true] %s374_s6 }
  0xbd   :  { %s352_s10 = sshll.u32 %s6529_s1, 4  ;;  %s5835_s17 = sshra.s32 %s6869_s28, 4  ;;  %s353_s10 = int_to_ptr.vmem [resolvable:$true] %s352_s10  ;;  %s5836_s17 = int_to_ptr.hbm [resolvable:$true] %s5835_s17 }
  0xbe   :  { %s5837_s15 = scalar_lea.hbm %s5836_s17, 32  ;;  %s5839_s16 = scalar_lea.hbm %s6726_s9, 32 }
  0xbf   :  { %p5838_p7 = scmp.ne.s32.totalorder %s5836_s17, %s5837_s15  ;;  %p5840_p8 = scmp.lt.s32.totalorder %s5836_s17, %s6726_s9 }
  0xc0   :  { %p5841_p9 = scmp.lt.s32.totalorder %s5839_s16, %s5837_s15 }
  0xc2   :  { %p5842_p10 = por %p5841_p9, %p5840_p8 }
  0xc4   :  { %p5843_p11 = pnand %p5842_p10, %p5838_p7 }
  0xc6   :  { %5846 = shalt.err (!%p5843_p11)
}
  0xc7   :  { %358 = dma.hbm_to_vmem [thread:$0]  %s6869_s28, 512, %s353_s10, [#allocation27], %s6521_s22, %s6521_s22, %s6522_s23  }
  0xc8   :  { %s399_s0 = sshll.u32 %s6746_s4, 4  ;;  %s6530_s12 = smov [#allocation29]   ;;  %s400_s0 = int_to_ptr.hbm [resolvable:$true] %s399_s0 }
  0xc9   :  { %s376_s18 = sshll.u32 %s6530_s12, 4  ;;  %s5859_s25 = sshra.s32 %s6879_s6, 4  ;;  %s377_s18 = int_to_ptr.vmem [resolvable:$true] %s376_s18  ;;  %s5860_s25 = int_to_ptr.hbm [resolvable:$true] %s5859_s25 }
  0xca   :  { %s5861_s9 = scalar_lea.hbm %s5860_s25, 32  ;;  %s5863_s11 = scalar_lea.hbm %s6736_s13, 32 }
  0xcb   :  { %p5862_p12 = scmp.ne.s32.totalorder %s5860_s25, %s5861_s9  ;;  %p5864_p13 = scmp.lt.s32.totalorder %s5860_s25, %s6736_s13 }
  0xcc   :  { %p5865_p0 = scmp.lt.s32.totalorder %s5863_s11, %s5861_s9 }
  0xce   :  { %p5866_p1 = por %p5865_p0, %p5864_p13 }
  0xd0   :  { %p5867_p2 = pnand %p5866_p1, %p5862_p12 }
  0xd2   :  { %5870 = shalt.err (!%p5867_p2)
}
  0xd3   :  { %382 = dma.hbm_to_vmem [thread:$0]  %s6879_s6, 512, %s377_s18, [#allocation30], %s6521_s22, %s6521_s22, %s6522_s23  }
  0xd4   :  { %s6531_s26 = smov [#allocation32]   ;;  %s421_s14 = sshll.u32 %s6756_s20, 4  ;;  %s422_s14 = int_to_ptr.hbm [resolvable:$true] %s421_s14 }
  0xd5   :  { %s401_s28 = sshll.u32 %s6531_s26, 4  ;;  %s5883_s19 = sshra.s32 %s400_s0, 4  ;;  %s402_s28 = int_to_ptr.vmem [resolvable:$true] %s401_s28  ;;  %s5884_s19 = int_to_ptr.hbm [resolvable:$true] %s5883_s19 }
  0xd6   :  { %s5885_s13 = scalar_lea.hbm %s5884_s19, 1  ;;  %s5887_s3 = scalar_lea.hbm %s6746_s4, 1 }
  0xd7   :  { %p5886_p3 = scmp.ne.s32.totalorder %s5884_s19, %s5885_s13  ;;  %p5888_p4 = scmp.lt.s32.totalorder %s5884_s19, %s6746_s4 }
  0xd8   :  { %p5889_p5 = scmp.lt.s32.totalorder %s5887_s3, %s5885_s13 }
  0xda   :  { %p5890_p6 = por %p5889_p5, %p5888_p4 }
  0xdc   :  { %p5891_p7 = pnand %p5890_p6, %p5886_p3 }
  0xde   :  { %5894 = shalt.err (!%p5891_p7)
}
  0xdf   :  { %404 = dma.hbm_to_vmem [thread:$0]  %s400_s0, 16, %s402_s28, [#allocation33]  }
  0xe0   :  { %s443_s2 = sshll.u32 %s6766_s8, 4  ;;  %s6532_s7 = smov [#allocation35]   ;;  %s444_s2 = int_to_ptr.hbm [resolvable:$true] %s443_s2 }
  0xe1   :  { %s423_s1 = sshll.u32 %s6532_s7, 4  ;;  %s5907_s10 = sshra.s32 %s422_s14, 4  ;;  %s424_s1 = int_to_ptr.vmem [resolvable:$true] %s423_s1  ;;  %s5908_s10 = int_to_ptr.hbm [resolvable:$true] %s5907_s10 }
  0xe2   :  { %s5909_s6 = scalar_lea.hbm %s5908_s10, 1  ;;  %s5911_s17 = scalar_lea.hbm %s6756_s20, 1 }
  0xe3   :  { %p5910_p8 = scmp.ne.s32.totalorder %s5908_s10, %s5909_s6  ;;  %p5912_p9 = scmp.lt.s32.totalorder %s5908_s10, %s6756_s20 }
  0xe4   :  { %p5913_p10 = scmp.lt.s32.totalorder %s5911_s17, %s5909_s6 }
  0xe6   :  { %p5914_p11 = por %p5913_p10, %p5912_p9 }
  0xe8   :  { %p5915_p12 = pnand %p5914_p11, %p5910_p8 }
  0xea   :  { %5918 = shalt.err (!%p5915_p12)
}
  0xeb   :  { %426 = dma.hbm_to_vmem [thread:$0]  %s422_s14, 16, %s424_s1, [#allocation36]  }
  0xec   :  { %s6533_s4 = smov [#allocation38]   ;;  %s465_s16 = sshll.u32 %s6776_s24, 4  ;;  %s466_s16 = int_to_ptr.hbm [resolvable:$true] %s465_s16 }
  0xed   :  { %s445_s15 = sshll.u32 %s6533_s4, 4  ;;  %s5931_s0 = sshra.s32 %s444_s2, 4  ;;  %s446_s15 = int_to_ptr.vmem [resolvable:$true] %s445_s15  ;;  %s5932_s0 = int_to_ptr.hbm [resolvable:$true] %s5931_s0 }
  0xee   :  { %s5933_s12 = scalar_lea.hbm %s5932_s0, 1  ;;  %s5935_s18 = scalar_lea.hbm %s6766_s8, 1 }
  0xef   :  { %p5934_p13 = scmp.ne.s32.totalorder %s5932_s0, %s5933_s12  ;;  %p5936_p0 = scmp.lt.s32.totalorder %s5932_s0, %s6766_s8 }
  0xf0   :  { %p5937_p1 = scmp.lt.s32.totalorder %s5935_s18, %s5933_s12 }
  0xf2   :  { %p5938_p2 = por %p5937_p1, %p5936_p0 }
  0xf4   :  { %p5939_p3 = pnand %p5938_p2, %p5934_p13 }
  0xf6   :  { %5942 = shalt.err (!%p5939_p3)
}
  0xf7   :  { %448 = dma.hbm_to_vmem [thread:$0]  %s444_s2, 16, %s446_s15, [#allocation39]  }
  0xf8   :  { %s486_s20 = sshll.u32 %s6786_s27, 4  ;;  %s6534_s25 = smov [#allocation41]   ;;  %s6906_s20 = int_to_ptr.hbm [resolvable:$true] %s486_s20 }
  0xf9   :  { %s467_s9 = sshll.u32 %s6534_s25, 4  ;;  %s5955_s11 = sshra.s32 %s466_s16, 4  ;;  %s468_s9 = int_to_ptr.vmem [resolvable:$true] %s467_s9  ;;  %s5956_s11 = int_to_ptr.hbm [resolvable:$true] %s5955_s11 }
  0xfa   :  { %s5957_s26 = scalar_lea.hbm %s5956_s11, 1  ;;  %s5959_s28 = scalar_lea.hbm %s6776_s24, 1 }
  0xfb   :  { %p5958_p4 = scmp.ne.s32.totalorder %s5956_s11, %s5957_s26  ;;  %p5960_p5 = scmp.lt.s32.totalorder %s5956_s11, %s6776_s24 }
  0xfc   :  { %p5961_p6 = scmp.lt.s32.totalorder %s5959_s28, %s5957_s26 }
  0xfe   :  { %p5962_p7 = por %p5961_p6, %p5960_p5 }
 0x100   :  { %p5963_p8 = pnand %p5962_p7, %p5958_p4 }
 0x102   :  { %5966 = shalt.err (!%p5963_p8)
}
 0x103   :  { %470 = dma.hbm_to_vmem [thread:$0]  %s466_s16, 16, %s468_s9, [#allocation42]  }
 0x104   :  { %s7886_s8 = sld [smem:[#allocation70_spill]]  ;;  %s6535_s14 = smov [#allocation44]  }
 0x105   :  { %s488_s19 = sshll.u32 %s6535_s14, 4  ;;  %s5979_s3 = sshra.s32 %s6906_s20, 4  ;;  %s489_s19 = int_to_ptr.vmem [resolvable:$true] %s488_s19  ;;  %s5980_s3 = int_to_ptr.hbm [resolvable:$true] %s5979_s3 }
 0x106   :  { %s5981_s2 = scalar_lea.hbm %s5980_s3, 32  ;;  %s5983_s24 = scalar_lea.hbm %s6786_s27, 32 }
 0x107   :  { %p5982_p9 = scmp.ne.s32.totalorder %s5980_s3, %s5981_s2  ;;  %p5984_p10 = scmp.lt.s32.totalorder %s5980_s3, %s6786_s27 }
 0x108   :  { %p5985_p11 = scmp.lt.s32.totalorder %s5983_s24, %s5981_s2 }
 0x10a   :  { %s127_s13 = sshll.u32 %s7886_s8, 4  ;;  %p5986_p12 = por %p5985_p11, %p5984_p10  ;;  %s6911_s13 = int_to_ptr.hbm [resolvable:$true] %s127_s13 }
 0x10c   :  { %p5987_p13 = pnand %p5986_p12, %p5982_p9 }
 0x10e   :  { %5990 = shalt.err (!%p5987_p13)
}
 0x10f   :  { %s7887_s7 = sld [smem:[#allocation81_spill]]  ;;  %s6536_s10 = smov [#allocation2]  }
 0x110   :  { %494 = dma.hbm_to_vmem [thread:$0]  %s6906_s20, 512, %s489_s19, [#allocation45], %s6521_s22, %s6521_s22, %s6522_s23  }
 0x111   :  { %s129_s6 = sshll.u32 %s6536_s10, 4  ;;  %s6003_s27 = sshra.s32 %s6911_s13, 4  ;;  %s130_s6 = int_to_ptr.vmem [resolvable:$true] %s129_s6  ;;  %s6004_s27 = int_to_ptr.hbm [resolvable:$true] %s6003_s27 }
 0x112   :  { %s6005_s17 = scalar_lea.hbm %s6004_s27, 16  ;;  %s6007_s4 = scalar_lea.hbm %s7886_s8, 16 }
 0x113   :  { %p6006_p0 = scmp.ne.s32.totalorder %s6004_s27, %s6005_s17  ;;  %p6008_p1 = scmp.lt.s32.totalorder %s6004_s27, %s7886_s8 }
 0x114   :  { %p6009_p2 = scmp.lt.s32.totalorder %s6007_s4, %s6005_s17 }
 0x115   :  { %s173_s1 = sshll.u32 %s7887_s7, 4  ;;  %s6921_s1 = int_to_ptr.hbm [resolvable:$true] %s173_s1 }
 0x116   :  { %p6010_p3 = por %p6009_p2, %p6008_p1 }
 0x118   :  { %p6011_p4 = pnand %p6010_p3, %p6006_p0 }
 0x11a   :  { %6014 = shalt.err (!%p6011_p4)
}
 0x11b   :  { %s7888_s15 = sld [smem:[#allocation84_spill]]  ;;  %s6537_s16 = smov [#allocation7]  }
 0x11c   :  { %135 = dma.hbm_to_vmem [thread:$0]  %s6911_s13, 256, %s130_s6, [#allocation3], %s6521_s22, %s6521_s22, %s6522_s23  }
 0x11d   :  { %s175_s0 = sshll.u32 %s6537_s16, 4  ;;  %s6027_s18 = sshra.s32 %s6921_s1, 4  ;;  %s176_s0 = int_to_ptr.vmem [resolvable:$true] %s175_s0  ;;  %s6028_s18 = int_to_ptr.hbm [resolvable:$true] %s6027_s18 }
 0x11e   :  { %s6029_s20 = scalar_lea.hbm %s6028_s18, 32  ;;  %s6031_s25 = scalar_lea.hbm %s7887_s7, 32 }
 0x11f   :  { %p6030_p5 = scmp.ne.s32.totalorder %s6028_s18, %s6029_s20  ;;  %p6032_p6 = scmp.lt.s32.totalorder %s6028_s18, %s7887_s7 }
 0x120   :  { %p6033_p7 = scmp.lt.s32.totalorder %s6031_s25, %s6029_s20 }
 0x121   :  { %s203_s12 = sshll.u32 %s7888_s15, 4  ;;  %s6931_s12 = int_to_ptr.hbm [resolvable:$true] %s203_s12 }
 0x122   :  { %p6034_p8 = por %p6033_p7, %p6032_p6 }
 0x124   :  { %p6035_p9 = pnand %p6034_p8, %p6030_p5 }
 0x126   :  { %6038 = shalt.err (!%p6035_p9)
}
 0x127   :  { %s7889_s9 = sld [smem:[#allocation87_spill]]  ;;  %s6538_s26 = smov [#allocation10]  }
 0x128   :  { %181 = dma.hbm_to_vmem [thread:$0]  %s6921_s1, 512, %s176_s0, [#allocation6], %s6521_s22, %s6521_s22, %s6522_s23  }
 0x129   :  { %s205_s28 = sshll.u32 %s6538_s26, 4  ;;  %s6051_s8 = sshra.s32 %s6931_s12, 4  ;;  %s206_s28 = int_to_ptr.vmem [resolvable:$true] %s205_s28  ;;  %s6052_s8 = int_to_ptr.hbm [resolvable:$true] %s6051_s8 }
 0x12a   :  { %s6053_s14 = scalar_lea.hbm %s6052_s8, 32  ;;  %s6055_s19 = scalar_lea.hbm %s7888_s15, 32 }
 0x12b   :  { %p6054_p10 = scmp.ne.s32.totalorder %s6052_s8, %s6053_s14  ;;  %p6056_p11 = scmp.lt.s32.totalorder %s6052_s8, %s7888_s15 }
 0x12c   :  { %p6057_p12 = scmp.lt.s32.totalorder %s6055_s19, %s6053_s14 }
 0x12d   :  { %s233_s11 = sshll.u32 %s7889_s9, 4  ;;  %s6941_s11 = int_to_ptr.hbm [resolvable:$true] %s233_s11 }
 0x12e   :  { %p6058_p13 = por %p6057_p12, %p6056_p11 }
 0x130   :  { %p6059_p0 = pnand %p6058_p13, %p6054_p10 }
 0x132   :  { %6062 = shalt.err (!%p6059_p0)
}
 0x133   :  { %s7890_s13 = sld [smem:[#allocation90_spill]]  ;;  %s6539_s3 = smov [#allocation13]  }
 0x134   :  { %211 = dma.hbm_to_vmem [thread:$0]  %s6931_s12, 512, %s206_s28, [#allocation9], %s6521_s22, %s6521_s22, %s6522_s23  }
 0x135   :  { %s235_s2 = sshll.u32 %s6539_s3, 4  ;;  %s6075_s7 = sshra.s32 %s6941_s11, 4  ;;  %s236_s2 = int_to_ptr.vmem [resolvable:$true] %s235_s2  ;;  %s6076_s7 = int_to_ptr.hbm [resolvable:$true] %s6075_s7 }
 0x136   :  { %s6077_s1 = scalar_lea.hbm %s6076_s7, 32  ;;  %s6079_s10 = scalar_lea.hbm %s7889_s9, 32 }
 0x137   :  { %p6078_p1 = scmp.ne.s32.totalorder %s6076_s7, %s6077_s1  ;;  %p6080_p2 = scmp.lt.s32.totalorder %s6076_s7, %s7889_s9 }
 0x138   :  { %p6081_p3 = scmp.lt.s32.totalorder %s6079_s10, %s6077_s1 }
 0x139   :  { %s263_s24 = sshll.u32 %s7890_s13, 4  ;;  %s6951_s24 = int_to_ptr.hbm [resolvable:$true] %s263_s24 }
 0x13a   :  { %p6082_p4 = por %p6081_p3, %p6080_p2 }
 0x13c   :  { %p6083_p5 = pnand %p6082_p4, %p6078_p1 }
 0x13e   :  { %6086 = shalt.err (!%p6083_p5)
}
 0x13f   :  { %s7891_s6 = sld [smem:[#allocation92_spill]]  ;;  %s6540_s17 = smov [#allocation16]  }
 0x140   :  { %241 = dma.hbm_to_vmem [thread:$0]  %s6941_s11, 512, %s236_s2, [#allocation12], %s6521_s22, %s6521_s22, %s6522_s23  }
 0x141   :  { %s265_s4 = sshll.u32 %s6540_s17, 4  ;;  %s6099_s15 = sshra.s32 %s6951_s24, 4  ;;  %s266_s4 = int_to_ptr.vmem [resolvable:$true] %s265_s4  ;;  %s6100_s15 = int_to_ptr.hbm [resolvable:$true] %s6099_s15 }
 0x142   :  { %s6101_s16 = scalar_lea.hbm %s6100_s15, 32  ;;  %s6103_s0 = scalar_lea.hbm %s7890_s13, 32 }
 0x143   :  { %p6102_p6 = scmp.ne.s32.totalorder %s6100_s15, %s6101_s16  ;;  %p6104_p7 = scmp.lt.s32.totalorder %s6100_s15, %s7890_s13 }
 0x144   :  { %p6105_p8 = scmp.lt.s32.totalorder %s6103_s0, %s6101_s16 }
 0x145   :  { %s292_s27 = sshll.u32 %s7891_s6, 4  ;;  %s293_s27 = int_to_ptr.hbm [resolvable:$true] %s292_s27 }
 0x146   :  { %p6106_p9 = por %p6105_p8, %p6104_p7 }
 0x148   :  { %p6107_p10 = pnand %p6106_p9, %p6102_p6 }
 0x14a   :  { %6110 = shalt.err (!%p6107_p10)
}
 0x14b   :  { %s7892_s12 = sld [smem:[#allocation93_spill]]  ;;  %s6541_s18 = smov [#allocation19]  }
 0x14c   :  { %271 = dma.hbm_to_vmem [thread:$0]  %s6951_s24, 512, %s266_s4, [#allocation15], %s6521_s22, %s6521_s22, %s6522_s23  }
 0x14d   :  { %s294_s20 = sshll.u32 %s6541_s18, 4  ;;  %s6123_s9 = sshra.s32 %s293_s27, 4  ;;  %s295_s20 = int_to_ptr.vmem [resolvable:$true] %s294_s20  ;;  %s6124_s9 = int_to_ptr.hbm [resolvable:$true] %s6123_s9 }
 0x14e   :  { %s6125_s11 = scalar_lea.hbm %s6124_s9, 1  ;;  %s6127_s26 = scalar_lea.hbm %s7891_s6, 1 }
 0x14f   :  { %p6126_p11 = scmp.ne.s32.totalorder %s6124_s9, %s6125_s11  ;;  %p6128_p12 = scmp.lt.s32.totalorder %s6124_s9, %s7891_s6 }
 0x150   :  { %p6129_p13 = scmp.lt.s32.totalorder %s6127_s26, %s6125_s11 }
 0x151   :  { %s316_s25 = sshll.u32 %s7892_s12, 4  ;;  %s317_s25 = int_to_ptr.hbm [resolvable:$true] %s316_s25 }
 0x152   :  { %p6130_p0 = por %p6129_p13, %p6128_p12 }
 0x154   :  { %p6131_p1 = pnand %p6130_p0, %p6126_p11 }
 0x156   :  { %6134 = shalt.err (!%p6131_p1)
}
 0x157   :  { %297 = dma.hbm_to_vmem [thread:$0]  %s293_s27, 16, %s295_s20, [#allocation18]  }
 0x158   :  { %s7893_s28 = sld [smem:[#allocation94_spill]]  ;;  %s6542_s14 = smov [#allocation22]  }
 0x159   :  { %s318_s19 = sshll.u32 %s6542_s14, 4  ;;  %s6147_s13 = sshra.s32 %s317_s25, 4  ;;  %s319_s19 = int_to_ptr.vmem [resolvable:$true] %s318_s19  ;;  %s6148_s13 = int_to_ptr.hbm [resolvable:$true] %s6147_s13 }
 0x15a   :  { %s6149_s3 = scalar_lea.hbm %s6148_s13, 1  ;;  %s6151_s2 = scalar_lea.hbm %s7892_s12, 1 }
 0x15b   :  { %p6150_p2 = scmp.ne.s32.totalorder %s6148_s13, %s6149_s3  ;;  %p6152_p3 = scmp.lt.s32.totalorder %s6148_s13, %s7892_s12 }
 0x15c   :  { %p6153_p4 = scmp.lt.s32.totalorder %s6151_s2, %s6149_s3 }
 0x15e   :  { %s340_s8 = sshll.u32 %s7893_s28, 4  ;;  %p6154_p5 = por %p6153_p4, %p6152_p3  ;;  %s341_s8 = int_to_ptr.hbm [resolvable:$true] %s340_s8 }
 0x160   :  { %p6155_p6 = pnand %p6154_p5, %p6150_p2 }
 0x162   :  { %6158 = shalt.err (!%p6155_p6)
}
 0x163   :  { %321 = dma.hbm_to_vmem [thread:$0]  %s317_s25, 16, %s319_s19, [#allocation21]  }
 0x164   :  { %s7894_s24 = sld [smem:[#allocation95_spill]]  ;;  %s6543_s7 = smov [#allocation25]  }
 0x165   :  { %s342_s1 = sshll.u32 %s6543_s7, 4  ;;  %s6171_s6 = sshra.s32 %s341_s8, 4  ;;  %s343_s1 = int_to_ptr.vmem [resolvable:$true] %s342_s1  ;;  %s6172_s6 = int_to_ptr.hbm [resolvable:$true] %s6171_s6 }
 0x166   :  { %s6173_s27 = scalar_lea.hbm %s6172_s6, 1  ;;  %s6175_s17 = scalar_lea.hbm %s7893_s28, 1 }
 0x167   :  { %p6174_p7 = scmp.ne.s32.totalorder %s6172_s6, %s6173_s27  ;;  %p6176_p8 = scmp.lt.s32.totalorder %s6172_s6, %s7893_s28 }
 0x168   :  { %p6177_p9 = scmp.lt.s32.totalorder %s6175_s17, %s6173_s27 }
 0x16a   :  { %s364_s10 = sshll.u32 %s7894_s24, 4  ;;  %p6178_p10 = por %p6177_p9, %p6176_p8  ;;  %s365_s10 = int_to_ptr.hbm [resolvable:$true] %s364_s10 }
 0x16c   :  { %p6179_p11 = pnand %p6178_p10, %p6174_p7 }
 0x16e   :  { %6182 = shalt.err (!%p6179_p11)
}
 0x16f   :  { %345 = dma.hbm_to_vmem [thread:$0]  %s341_s8, 16, %s343_s1, [#allocation24]  }
 0x170   :  { %s7895_s4 = sld [smem:[#allocation96_spill]]  ;;  %s6544_s16 = smov [#allocation28]  }
 0x171   :  { %s366_s0 = sshll.u32 %s6544_s16, 4  ;;  %s6195_s12 = sshra.s32 %s365_s10, 4  ;;  %s367_s0 = int_to_ptr.vmem [resolvable:$true] %s366_s0  ;;  %s6196_s12 = int_to_ptr.hbm [resolvable:$true] %s6195_s12 }
 0x172   :  { %s6197_s18 = scalar_lea.hbm %s6196_s12, 1  ;;  %s6199_s20 = scalar_lea.hbm %s7894_s24, 1 }
 0x173   :  { %p6198_p12 = scmp.ne.s32.totalorder %s6196_s12, %s6197_s18  ;;  %p6200_p13 = scmp.lt.s32.totalorder %s6196_s12, %s7894_s24 }
 0x174   :  { %p6201_p0 = scmp.lt.s32.totalorder %s6199_s20, %s6197_s18 }
 0x176   :  { %s388_s15 = sshll.u32 %s7895_s4, 4  ;;  %p6202_p1 = por %p6201_p0, %p6200_p13  ;;  %s389_s15 = int_to_ptr.hbm [resolvable:$true] %s388_s15 }
 0x178   :  { %p6203_p2 = pnand %p6202_p1, %p6198_p12 }
 0x17a   :  { %6206 = shalt.err (!%p6203_p2)
}
 0x17b   :  { %369 = dma.hbm_to_vmem [thread:$0]  %s365_s10, 16, %s367_s0, [#allocation27]  }
 0x17c   :  { %s7896_s25 = sld [smem:[#allocation97_spill]]  ;;  %s6545_s9 = smov [#allocation31]  }
 0x17d   :  { %s390_s11 = sshll.u32 %s6545_s9, 4  ;;  %s6219_s28 = sshra.s32 %s389_s15, 4  ;;  %s391_s11 = int_to_ptr.vmem [resolvable:$true] %s390_s11  ;;  %s6220_s28 = int_to_ptr.hbm [resolvable:$true] %s6219_s28 }
 0x17e   :  { %s6221_s8 = scalar_lea.hbm %s6220_s28, 1  ;;  %s6223_s14 = scalar_lea.hbm %s7895_s4, 1 }
 0x17f   :  { %p6222_p3 = scmp.ne.s32.totalorder %s6220_s28, %s6221_s8  ;;  %p6224_p4 = scmp.lt.s32.totalorder %s6220_s28, %s7895_s4 }
 0x180   :  { %p6225_p5 = scmp.lt.s32.totalorder %s6223_s14, %s6221_s8 }
 0x182   :  { %s410_s26 = sshll.u32 %s7896_s25, 4  ;;  %p6226_p6 = por %p6225_p5, %p6224_p4  ;;  %s411_s26 = int_to_ptr.hbm [resolvable:$true] %s410_s26 }
 0x184   :  { %p6227_p7 = pnand %p6226_p6, %p6222_p3 }
 0x186   :  { %6230 = shalt.err (!%p6227_p7)
}
 0x187   :  { %393 = dma.hbm_to_vmem [thread:$0]  %s389_s15, 16, %s391_s11, [#allocation30]  }
 0x188   :  { %s7897_s19 = sld [smem:[#allocation98_spill]]  ;;  %s6546_s3 = smov [#allocation34]  }
 0x189   :  { %s412_s2 = sshll.u32 %s6546_s3, 4  ;;  %s6243_s24 = sshra.s32 %s411_s26, 4  ;;  %s413_s2 = int_to_ptr.vmem [resolvable:$true] %s412_s2  ;;  %s6244_s24 = int_to_ptr.hbm [resolvable:$true] %s6243_s24 }
 0x18a   :  { %s6245_s7 = scalar_lea.hbm %s6244_s24, 1  ;;  %s6247_s1 = scalar_lea.hbm %s7896_s25, 1 }
 0x18b   :  { %p6246_p8 = scmp.ne.s32.totalorder %s6244_s24, %s6245_s7  ;;  %p6248_p9 = scmp.lt.s32.totalorder %s6244_s24, %s7896_s25 }
 0x18c   :  { %p6249_p10 = scmp.lt.s32.totalorder %s6247_s1, %s6245_s7 }
 0x18e   :  { %s432_s13 = sshll.u32 %s7897_s19, 4  ;;  %p6250_p11 = por %p6249_p10, %p6248_p9  ;;  %s433_s13 = int_to_ptr.hbm [resolvable:$true] %s432_s13 }
 0x190   :  { %p6251_p12 = pnand %p6250_p11, %p6246_p8 }
 0x192   :  { %6254 = shalt.err (!%p6251_p12)
}
 0x193   :  { %415 = dma.hbm_to_vmem [thread:$0]  %s411_s26, 16, %s413_s2, [#allocation33]  }
 0x194   :  { %s7898_s10 = sld [smem:[#allocation99_spill]]  ;;  %s6547_s6 = smov [#allocation37]  }
 0x195   :  { %s434_s27 = sshll.u32 %s6547_s6, 4  ;;  %s6267_s4 = sshra.s32 %s433_s13, 4  ;;  %s435_s27 = int_to_ptr.vmem [resolvable:$true] %s434_s27  ;;  %s6268_s4 = int_to_ptr.hbm [resolvable:$true] %s6267_s4 }
 0x196   :  { %s6269_s15 = scalar_lea.hbm %s6268_s4, 1  ;;  %s6271_s16 = scalar_lea.hbm %s7897_s19, 1 }
 0x197   :  { %p6270_p13 = scmp.ne.s32.totalorder %s6268_s4, %s6269_s15  ;;  %p6272_p0 = scmp.lt.s32.totalorder %s6268_s4, %s7897_s19 }
 0x198   :  { %p6273_p1 = scmp.lt.s32.totalorder %s6271_s16, %s6269_s15 }
 0x19a   :  { %s454_s17 = sshll.u32 %s7898_s10, 4  ;;  %p6274_p2 = por %p6273_p1, %p6272_p0  ;;  %s455_s17 = int_to_ptr.hbm [resolvable:$true] %s454_s17 }
 0x19c   :  { %p6275_p3 = pnand %p6274_p2, %p6270_p13 }
 0x19e   :  { %6278 = shalt.err (!%p6275_p3)
}
 0x19f   :  { %437 = dma.hbm_to_vmem [thread:$0]  %s433_s13, 16, %s435_s27, [#allocation36]  }
 0x1a0   :  { %s7899_s0 = sld [smem:[#allocation100_spill]]  ;;  %s6548_s18 = smov [#allocation40]  }
 0x1a1   :  { %s456_s20 = sshll.u32 %s6548_s18, 4  ;;  %s6291_s25 = sshra.s32 %s455_s17, 4  ;;  %s457_s20 = int_to_ptr.vmem [resolvable:$true] %s456_s20  ;;  %s6292_s25 = int_to_ptr.hbm [resolvable:$true] %s6291_s25 }
 0x1a2   :  { %s6293_s9 = scalar_lea.hbm %s6292_s25, 1  ;;  %s6295_s11 = scalar_lea.hbm %s7898_s10, 1 }
 0x1a3   :  { %p6294_p4 = scmp.ne.s32.totalorder %s6292_s25, %s6293_s9  ;;  %p6296_p5 = scmp.lt.s32.totalorder %s6292_s25, %s7898_s10 }
 0x1a4   :  { %p6297_p6 = scmp.lt.s32.totalorder %s6295_s11, %s6293_s9 }
 0x1a6   :  { %s476_s12 = sshll.u32 %s7899_s0, 4  ;;  %p6298_p7 = por %p6297_p6, %p6296_p5  ;;  %s477_s12 = int_to_ptr.hbm [resolvable:$true] %s476_s12 }
 0x1a8   :  { %p6299_p8 = pnand %p6298_p7, %p6294_p4 }
 0x1aa   :  { %6302 = shalt.err (!%p6299_p8)
}
 0x1ab   :  { %459 = dma.hbm_to_vmem [thread:$0]  %s455_s17, 16, %s457_s20, [#allocation39]  }
 0x1ac   :  { %s7900_s26 = sld [smem:[#allocation101_spill]]  ;;  %s6549_s28 = smov [#allocation43]  }
 0x1ad   :  { %s478_s8 = sshll.u32 %s6549_s28, 4  ;;  %s6315_s19 = sshra.s32 %s477_s12, 4  ;;  %s479_s8 = int_to_ptr.vmem [resolvable:$true] %s478_s8  ;;  %s6316_s19 = int_to_ptr.hbm [resolvable:$true] %s6315_s19 }
 0x1ae   :  { %s6317_s13 = scalar_lea.hbm %s6316_s19, 1  ;;  %s6319_s3 = scalar_lea.hbm %s7899_s0, 1 }
 0x1af   :  { %p6318_p9 = scmp.ne.s32.totalorder %s6316_s19, %s6317_s13  ;;  %p6320_p10 = scmp.lt.s32.totalorder %s6316_s19, %s7899_s0 }
 0x1b0   :  { %p6321_p11 = scmp.lt.s32.totalorder %s6319_s3, %s6317_s13 }
 0x1b2   :  { %s500_s14 = sshll.u32 %s7900_s26, 4  ;;  %p6322_p12 = por %p6321_p11, %p6320_p10  ;;  %s501_s14 = int_to_ptr.hbm [resolvable:$true] %s500_s14 }
 0x1b4   :  { %p6323_p13 = pnand %p6322_p12, %p6318_p9 }
 0x1b6   :  { %6326 = shalt.err (!%p6323_p13)
}
 0x1b7   :  { %481 = dma.hbm_to_vmem [thread:$0]  %s477_s12, 16, %s479_s8, [#allocation42]  }
 0x1b8   :  { %s513_s2 = sshll.u32 %s6801_s21, 4  ;;  %s6550_s24 = smov [#allocation46]   ;;  %s514_s2 = int_to_ptr.hbm [resolvable:$true] %s513_s2 }
 0x1b9   :  { %s502_s7 = sshll.u32 %s6550_s24, 4  ;;  %s6339_s1 = sshra.s32 %s501_s14, 4  ;;  %s503_s7 = int_to_ptr.vmem [resolvable:$true] %s502_s7  ;;  %s6340_s1 = int_to_ptr.hbm [resolvable:$true] %s6339_s1 }
 0x1ba   :  { %s6341_s10 = scalar_lea.hbm %s6340_s1, 1  ;;  %s6343_s6 = scalar_lea.hbm %s7900_s26, 1 }
 0x1bb   :  { %p6342_p0 = scmp.ne.s32.totalorder %s6340_s1, %s6341_s10  ;;  %p6344_p1 = scmp.lt.s32.totalorder %s6340_s1, %s7900_s26 }
 0x1bc   :  { %p6345_p2 = scmp.lt.s32.totalorder %s6343_s6, %s6341_s10 }
 0x1be   :  { %p6346_p3 = por %p6345_p2, %p6344_p1 }
 0x1c0   :  { %p6347_p4 = pnand %p6346_p3, %p6342_p0 }
 0x1c2   :  { %6350 = shalt.err (!%p6347_p4)
}
 0x1c3   :  { %505 = dma.hbm_to_vmem [thread:$0]  %s501_s14, 16, %s503_s7, [#allocation45]  }
 0x1c4   :  { %s6551_s27 = smov [#allocation47]   ;;  %s6363_s4 = sshra.s32 %s514_s2, 4  ;;  %s6364_s4 = int_to_ptr.hbm [resolvable:$true] %s6363_s4 }
 0x1c5   :  { %s515_s17 = sshll.u32 %s6551_s27, 4  ;;  %s6365_s15 = scalar_lea.hbm %s6364_s4, 1  ;;  %s516_s17 = int_to_ptr.vmem [resolvable:$true] %s515_s17 }
 0x1c6   :  { %p6366_p5 = scmp.ne.s32.totalorder %s6364_s4, %s6365_s15  ;;  %s6367_s16 = scalar_lea.hbm %s6801_s21, 1 }
 0x1c7   :  { %p6368_p6 = scmp.lt.s32.totalorder %s6364_s4, %s6801_s21  ;;  %p6369_p7 = scmp.lt.s32.totalorder %s6367_s16, %s6365_s15 }
 0x1c9   :  { %p6370_p8 = por %p6369_p7, %p6368_p6 }
 0x1cb   :  { %p6371_p9 = pnand %p6370_p8, %p6366_p5 }
 0x1cd   :  { %6374 = shalt.err (!%p6371_p9)
}
 0x1ce   :  { %518 = dma.hbm_to_vmem [thread:$0]  %s514_s2, 16, %s516_s17, [#allocation48]  }
 0x1cf   :  { %6435 = dma.done.wait [#allocation3], 256  }
 0x1d0   :  { %6436 = vsyncadd [#allocation3], 4294967040 }
 0x1d1   :  { %6437 = dma.done.wait [#allocation6], 1024  }
 0x1d2   :  { %6438 = vsyncadd [#allocation6], 4294966272 }
 0x1d3   :  { %6439 = dma.done.wait [#allocation9], 1024  }
 0x1d4   :  { %6440 = vsyncadd [#allocation9], 4294966272 }
 0x1d5   :  { %6441 = dma.done.wait [#allocation12], 1024  }
 0x1d6   :  { %6442 = vsyncadd [#allocation12], 4294966272 }
 0x1d7   :  { %6443 = dma.done.wait [#allocation15], 1024  }
 0x1d8   :  { %6444 = vsyncadd [#allocation15], 4294966272 }
 0x1d9   :  { %6445 = dma.done.wait [#allocation18], 528  }
 0x1da   :  { %6446 = vsyncadd [#allocation18], 4294966768 }
 0x1db   :  { %6447 = dma.done.wait [#allocation21], 528  }
 0x1dc   :  { %6448 = vsyncadd [#allocation21], 4294966768 }
 0x1dd   :  { %6449 = dma.done.wait [#allocation24], 528  }
 0x1de   :  { %6450 = vsyncadd [#allocation24], 4294966768 }
 0x1df   :  { %6451 = dma.done.wait [#allocation27], 528  }
 0x1e0   :  { %6452 = vsyncadd [#allocation27], 4294966768 }
 0x1e1   :  { %6453 = dma.done.wait [#allocation30], 528  }
 0x1e2   :  { %6454 = vsyncadd [#allocation30], 4294966768 }
 0x1e3   :  { %6455 = dma.done.wait [#allocation33], 32  }
 0x1e4   :  { %6456 = vsyncadd [#allocation33], 4294967264 }
 0x1e5   :  { %6457 = dma.done.wait [#allocation36], 32  }
 0x1e6   :  { %6458 = vsyncadd [#allocation36], 4294967264 }
 0x1e7   :  { %6459 = dma.done.wait [#allocation39], 32  }
 0x1e8   :  { %6460 = vsyncadd [#allocation39], 4294967264 }
 0x1e9   :  { %6461 = dma.done.wait [#allocation42], 32  }
 0x1ea   :  { %6462 = vsyncadd [#allocation42], 4294967264 }
 0x1eb   :  { %6463 = dma.done.wait [#allocation45], 528  }
 0x1ec   :  { %6464 = vsyncadd [#allocation45], 4294966768 }
 0x1ed   :  { %6465 = dma.done.wait [#allocation48], 16  }
 0x1ee   :  { %6466 = vsyncadd [#allocation48], 4294967280  ;;  %s7901_s21 = sld [smem:[#allocation72_spill]]  ;;  %vm760_vm0 = vcmask 261120   ;;  %v7012_v10 = vld [vmem:[#allocation2] sm:$0xff]  ;;  %s6552_s11 = smov 120  }
 0x1ef   :  { %s7902_s0 = sld [smem:[#allocation76_spill]]  ;;  %vm839_vm1 = vcmask 64512   ;;  %s6553_s26 = smov 112  }
 0x1f0   :  { %s7903_s12 = sld [smem:[#allocation71_spill]]  ;;  %s6554_s8 = smov 104  }
 0x1f1   :  { %s7904_s18 = sld [smem:[#allocation74_spill]]  ;;  %s4936_s27 = sshll.u32 %s6811_s29, 4  ;;  %s4937_s27 = int_to_ptr.hbm [resolvable:$true] %s4936_s27 }
 0x1f2   :  { %s7905_s20 = sld [smem:[#allocation73_spill]]  ;;  %s6399_s17 = sshra.s32 %s4937_s27, 4  ;;  %s6400_s17 = int_to_ptr.hbm [resolvable:$true] %s6399_s17 }
 0x1f3   :  { %s7906_s25 = sld [smem:[#allocation77_spill]]  ;;  %s6401_s4 = scalar_lea.hbm %s6400_s17, 16 }
 0x1f4   :  { %v642_v0 = vld [vmem:[%s7901_s21 + $0x18] sm:$0xff]  ;;  %v641_v1 = vld [vmem:[%s7901_s21 + $0x10] sm:$0xff]  ;;  %v640_v4 = vld [vmem:[%s7901_s21 + $0x8] sm:$0xff]  ;;  %s7907_s9 = sld [smem:[#allocation75_spill]]  ;;  %p6402_p10 = scmp.ne.s32.totalorder %s6400_s17, %s6401_s4 }
 0x1f5   :  { %v652_v2 = vld [vmem:[%s7902_s0 + $0x18] sm:$0xff]  ;;  %5208 = vmatpush.msra.mxu1 %v642_v0  ;;  %v651_v3 = vld [vmem:[%s7902_s0 + $0x10] sm:$0xff]  ;;  %v650_v5 = vld [vmem:[%s7902_s0 + $0x8] sm:$0xff]  ;;  %779 = vmatpush.msra.mxu0 %v642_v0  ;;  %s7908_s28 = sld [smem:[#allocation78_spill]]  ;;  %s6403_s15 = scalar_lea.hbm %s6811_s29, 16 }
 0x1f6   :  { %831 = vmatpush.msra.mxu2 %v652_v2  ;;  %v639_v6 = vld [vmem:[%s7901_s21] sm:$0xff]  ;;  %v7008_v7 = vld [vmem:[%s7903_s12 + $0x8] sm:$0xff]  ;;  %s7909_s14 = sld [smem:[#allocation82_spill]]  ;;  %p6404_p11 = scmp.lt.s32.totalorder %s6400_s17, %s6811_s29 }
 0x1f7   :  { %5209 = vmatpush.msra.mxu1 %v641_v1  ;;  %v647_v8 = vld [vmem:[%s7904_s18 + $0x18] sm:$0xff]  ;;  %v649_v9 = vld [vmem:[%s7902_s0] sm:$0xff]  ;;  %780 = vmatpush.msra.mxu0 %v641_v1  ;;  %v646_v11 = vld [vmem:[%s7904_s18 + $0x10] sm:$0xff]  ;;  %s7910_s19 = sld [smem:[#allocation80_spill]]  ;;  %p6405_p12 = scmp.lt.s32.totalorder %s6403_s15, %s6401_s4 }
 0x1f8   :  { %832 = vmatpush.msra.mxu2 %v651_v3  ;;  %v7016_v12 = vld [vmem:[%s7903_s12] sm:$0xff]  ;;  %v645_v13 = vld [vmem:[%s7904_s18 + $0x8] sm:$0xff]  ;;  %s7911_s13 = sld [smem:[#allocation83_spill]] }
 0x1f9   :  { %5210 = vmatpush.msra.mxu1 %v640_v4  ;;  %781 = vmatpush.msra.mxu0 %v640_v4  ;;  %v644_v14 = vld [vmem:[%s7904_s18] sm:$0xff]  ;;  %s7912_s3 = sld [smem:[#allocation79_spill]]  ;;  %p6406_p13 = por %p6405_p12, %p6404_p11 }
 0x1fa   :  { %833 = vmatpush.msra.mxu2 %v650_v5  ;;  %v5360_v15 = vld [vmem:[%s7905_s20] ss:$0 sm:$0xff]  ;;  %s7913_s2 = sld [smem:[#allocation86_spill]] }
 0x1fb   :  { %5211 = vmatpush.msra.mxu1 %v639_v6  ;;  %782 = vmatpush.msra.mxu0 %v639_v6  ;;  %v5362_v18 = vld [vmem:[%s7906_s25] ss:$0 sm:$0xff]  ;;  %s7914_s24 = sld [smem:[#allocation89_spill]]  ;;  %p6407_p0 = pnand %p6406_p13, %p6402_p10 }
 0x1fc   :  { %834 = vmatpush.msra.mxu2 %v649_v9  ;;  %5019 = vmatmul.msk.f32.vlgmr.msra.gmra.mxu1 %vm760_vm0, %v7008_v7  ;;  %v5361_v19 = vld [vmem:[%s7907_s9] ss:$0 sm:$0xff]  ;;  %s7915_s7 = sld [smem:[#allocation88_spill]] }
 0x1fd   :  { %5021 = vmatmul.msk.f32.vlgmr.msra.gmra.mxu2 %vm760_vm0, %v7012_v10  ;;  %808 = vmatpush.msrb.mxu1 %v647_v8  ;;  %s7916_s1 = sld [smem:[#allocation91_spill]] }
 0x1fe   :  { %5018 = vmatmul.msk.f32.vlgmr.msra.gmra.mxu0 %vm760_vm0, %v7016_v12  ;;  %s7917_s10 = sld [smem:[#allocation85_spill]] }
 0x1ff   :  { %809 = vmatpush.msrb.mxu1 %v646_v11 }
 0x201   :  { %810 = vmatpush.msrb.mxu1 %v645_v13 }
 0x203   :  { %811 = vmatpush.msrb.mxu1 %v644_v14 }
 0x204   :  { %5020 = vmatmul.msk.f32.vlgmr.msrb.gmra.mxu1 %vm760_vm0, %v7012_v10 }
 0x279   :  { %v787_v16 = vpop.f32.mrf.mxu1 }
 0x27a   :  { %v7029_v17 = vadd.f32 %v5360_v15, %v787_v16 }
 0x27b   :  { %v784_v23 = vpop.f32.mrf.mxu0 }
 0x27c   :  { %953 = vrot.lane.b32.xlu2 %v7029_v17, %s6552_s11  ;;  %v7044_v25 = vadd.f32 %v5360_v15, %v784_v23 }
 0x280   :  { %v836_v20 = vpop.f32.mrf.mxu2 }
 0x281   :  { %v7035_v21 = vadd.f32 %v5362_v18, %v836_v20  ;;  %v813_v22 = vpop.f32.mrf.mxu1 }
 0x282   :  { %v7037_v24 = vadd.f32 %v5361_v19, %v813_v22 }
 0x283   :  { %943 = vmatpush.msra.mxu1 %v7035_v21 }
 0x284   :  { %955 = vrot.lane.b32.xlu0 %v7037_v24, %s6552_s11  ;;  %1037 = vrot.lane.b32.xlu2 %v7035_v21, %s6552_s11 }
 0x285   :  { %5022 = vmatpush.xpose.msk.msrb.mxu0 %vm839_vm1, %v7037_v24 }
 0x288   :  { %5023 = vmatmul.msk.f32.vlgmr.msrb.gmra.mxu0 %vm839_vm1, %v7044_v25 }
 0x28c   :  { %1129 = vrot.lane.b32.xlu2 %v7029_v17, %s6553_s26  ;;  %951 = vrot.lane.b32.xlu0 %v7044_v25, %s6552_s11 }
 0x290   :  { %5024 = vmatmul.msk.f32.gmra.mxu0 %vm839_vm1, %v7029_v17 }
 0x294   :  { %1131 = vrot.lane.b32.xlu0 %v7037_v24, %s6553_s26 }
 0x2d6   :  { %v954_v26 = vpop.permute.xlu2 %953 }
 0x2de   :  { %v1038_v27 = vpop.permute.xlu2 %1037 }
 0x2df   :  { %5212 = vmatpush.msra.mxu3 %v1038_v27 }
 0x2e6   :  { %v1130_v37 = vpop.permute.xlu2 %1129 }
 0x2f6   :  { %v956_v28 = vpop.permute.xlu0 %955 }
 0x2f7   :  { %5027 = vmatpush.xpose.msk.msrb.mxu2 %vm839_vm1, %v956_v28 }
 0x2fb   :  { %1061 = vmatpush.msra.mxu2 %v1038_v27 }
 0x2fe   :  { %v952_v29 = vpop.permute.xlu0 %951 }
 0x2ff   :  { %5028 = vmatmul.msk.f32.vlgmr.msrb.gmra.mxu2 %vm839_vm1, %v952_v29 }
 0x305   :  { %v866_v30 = vpop.f32.mrf.mxu0 }
 0x306   :  { %v872_v31 = vmul.f32 0.35355338, %v866_v30  ;;  %v1132_v32 = vpop.permute.xlu0 %1131 }
 0x307   :  { %5029 = vmatmul.msk.f32.gmra.mxu2 %vm839_vm1, %v954_v26 }
 0x308   :  { %5036 = vmatpush.xpose.msk.msrb.mxu2 %vm839_vm1, %v1132_v32  ;;  %v874_v33 = vsel %vm839_vm1, %v872_v31, -inf }
 0x309   :  { %875 = vmax.xlane.f32.xlu0 %v874_v33 }
 0x30d   :  { %v869_v34 = vpop.f32.mrf.mxu0 }
 0x30e   :  { %v873_v35 = vmul.f32 0.35355338, %v869_v34 }
 0x310   :  { %v877_v36 = vsel %vm839_vm1, %v873_v35, -inf }
 0x311   :  { %878 = vmax.xlane.f32.xlu2 %v877_v36 }
 0x37c   :  { %v876_v54 = vpop.xlane.xlu0 %875 }
 0x37d   :  { %v880_v55 = vsub.f32 %v872_v31, %v876_v54 }
 0x37f   :  { %v882_v56 = vmul.f32 1.442695, %v880_v55 }
 0x382   :  { %v980_v38 = vpop.f32.mrf.mxu2 }
 0x383   :  { %v986_v39 = vmul.f32 0.35355338, %v980_v38 }
 0x384   :  { %v879_v40 = vpop.xlane.xlu2 %878 }
 0x385   :  { %v881_v41 = vsub.f32 %v873_v35, %v879_v40  ;;  %v988_v42 = vsel %vm839_vm1, %v986_v39, -inf }
 0x386   :  { %989 = vmax.xlane.f32.xlu1 %v988_v42 }
 0x387   :  { %v884_v43 = vmul.f32 1.442695, %v881_v41 }
 0x389   :  { %5387 = vpow2.f32 %v884_v43 }
 0x38a   :  { %v983_v44 = vpop.f32.mrf.mxu2 }
 0x38b   :  { %v7065_v45 = vmul.f32 0.35355338, %v983_v44 }
 0x38d   :  { %v991_v46 = vsel %vm839_vm1, %v7065_v45, -inf }
 0x38e   :  { %992 = vmax.xlane.f32.xlu0 %v991_v46 }
 0x38f   :  { %v7069_v47 = vpop.eup %5387 }
 0x390   :  { %v889_v48 = vsel %vm839_vm1, %v7069_v47, 0.0 }
 0x391   :  { %890 = vadd.xlane.f32.xlu2 %v889_v48 }
 0x3f9   :  { %v990_v49 = vpop.xlane.xlu1 %989 }
 0x3fa   :  { %v994_v50 = vsub.f32 %v986_v39, %v990_v49  ;;  %v655_v39 = vld [vmem:[%s7908_s28 + $0x8] sm:$0xff] }
 0x3fb   :  { %1090 = vmatpush.msra.mxu0 %v655_v39 }
 0x3fc   :  { %v996_v51 = vmul.f32 1.442695, %v994_v50 }
 0x3fe   :  { %5389 = vpow2.f32 %v996_v51 }
 0x3ff   :  { %5391 = vpow2.f32 %v882_v56 }
 0x401   :  { %v993_v40 = vpop.xlane.xlu0 %992 }
 0x402   :  { %v995_v42 = vsub.f32 %v7065_v45, %v993_v40 }
 0x404   :  { %v5390_v52 = vpop.eup %5389  ;;  %v891_v9 = vpop.xlane.xlu2 %890  ;;  %v998_v43 = vmul.f32 1.442695, %v995_v42 }
 0x405   :  { %v1000_v53 = vsel %vm839_vm1, %v5390_v52, 0.0  ;;  %v5392_v57 = vpop.eup %5391  ;;  %v918_v32 = vand.u32 2147483648, %v891_v9  ;;  %vm912_vm11 = vweird.f32 %v891_v9  ;;  %v916_v34 = vand.u32 2147483647, %v891_v9 }
 0x406   :  { %1001 = vadd.xlane.f32.xlu1 %v1000_v53  ;;  %v886_v58 = vsel %vm839_vm1, %v5392_v57, 0.0  ;;  %v654_v53 = vld [vmem:[%s7908_s28] sm:$0xff] }
 0x407   :  { %v919_v36 = vor.u32 1.1754944e-38, %v918_v32  ;;  %vm917_vm13 = vcmp.eq.f32.partialorder %v916_v34, 8.507059e+37  ;;  %1119 = vmatpush.msrb.mxu1 %v654_v53 }
 0x41f   :  { %1127 = vrot.lane.b32.xlu1 %v7044_v25, %s6553_s26 }
 0x449   :  { %887 = vadd.xlane.f32.xlu1 %v886_v58 }
 0x479   :  { %v1002_v59 = vpop.xlane.xlu1 %1001 }
 0x47a   :  { %5393 = vrcp.f32 %v1002_v59  ;;  %v1017_v63 = vand.u32 2147483648, %v1002_v59  ;;  %v1015_v1 = vand.u32 2147483647, %v1002_v59  ;;  %vm1011_vm3 = vweird.f32 %v1002_v59 }
 0x47b   :  { %5395 = vrcp.f32 %v891_v9 }
 0x47c   :  { %v1018_v3 = vor.u32 1.1754944e-38, %v1017_v63  ;;  %vm1016_vm5 = vcmp.eq.f32.partialorder %v1015_v1, 8.507059e+37 }
 0x480   :  { %v5394_v60 = vpop.eup %5393 }
 0x481   :  { %v1007_v61 = vmul.f32 %v5394_v60, %v1002_v59  ;;  %vm1012_vm2 = vweird.f32 %v5394_v60  ;;  %v5396_v13 = vpop.eup %5395 }
 0x482   :  { %vm1013_vm4 = vmor %vm1011_vm3, %vm1012_vm2  ;;  %v908_v14 = vmul.f32 %v5396_v13, %v891_v9  ;;  %vm913_vm10 = vweird.f32 %v5396_v13 }
 0x483   :  { %v1008_v62 = vsub.f32 1.0, %v1007_v61  ;;  %vm914_vm12 = vmor %vm912_vm11, %vm913_vm10 }
 0x484   :  { %v909_v16 = vsub.f32 1.0, %v908_v14 }
 0x485   :  { %v1009_v0 = vmul.f32 %v5394_v60, %v1008_v62 }
 0x486   :  { %v910_v26 = vmul.f32 %v5396_v13, %v909_v16 }
 0x487   :  { %v1010_v2 = vadd.f32 %v5394_v60, %v1009_v0 }
 0x488   :  { %v911_v30 = vadd.f32 %v5396_v13, %v910_v26 }
 0x489   :  { %v1014_v4 = vsel %vm1013_vm4, %v5394_v60, %v1010_v2 }
 0x48a   :  { %v1019_v5 = vsel %vm1016_vm5, %v1018_v3, %v1014_v4  ;;  %v915_v35 = vsel %vm914_vm12, %v5396_v13, %v911_v30 }
 0x48b   :  { %v1020_v6 = vmul.f32 %v5390_v52, %v1019_v5 }
 0x48d   :  { %5030 = vmatmul.msk.f32.vlgmr.msra.gmra.mxu2 %vm839_vm1, %v1020_v6 }
 0x491   :  { %v1128_v8 = vpop.permute.xlu1 %1127 }
 0x495   :  { %5037 = vmatmul.msk.f32.vlgmr.msrb.gmra.mxu2 %vm839_vm1, %v1128_v8 }
 0x49d   :  { %5038 = vmatmul.msk.f32.gmra.mxu2 %vm839_vm1, %v1130_v37  ;;  %v920_v37 = vsel %vm917_vm13, %v919_v36, %v915_v35 }
 0x49e   :  { %v921_v38 = vmul.f32 %v7069_v47, %v920_v37 }
 0x4bc   :  { %v888_v11 = vpop.xlane.xlu1 %887 }
 0x4bd   :  { %5397 = vrcp.f32 %v888_v11  ;;  %v903_v20 = vand.u32 2147483648, %v888_v11  ;;  %v901_v23 = vand.u32 2147483647, %v888_v11  ;;  %vm897_vm7 = vweird.f32 %v888_v11 }
 0x4be   :  { %5399 = vpow2.f32 %v998_v43 }
 0x4bf   :  { %v904_v28 = vor.u32 1.1754944e-38, %v903_v20  ;;  %vm902_vm9 = vcmp.eq.f32.partialorder %v901_v23, 8.507059e+37 }
 0x4c3   :  { %v5398_v15 = vpop.eup %5397 }
 0x4c4   :  { %v893_v18 = vmul.f32 %v5398_v15, %v888_v11  ;;  %vm898_vm6 = vweird.f32 %v5398_v15  ;;  %v5400_v49 = vpop.eup %5399 }
 0x4c5   :  { %vm899_vm8 = vmor %vm897_vm7, %vm898_vm6  ;;  %v1003_v52 = vsel %vm839_vm1, %v5400_v49, 0.0 }
 0x4c6   :  { %v894_v19 = vsub.f32 1.0, %v893_v18 }
 0x4c8   :  { %v895_v22 = vmul.f32 %v5398_v15, %v894_v19 }
 0x4ca   :  { %v896_v27 = vadd.f32 %v5398_v15, %v895_v22 }
 0x4cc   :  { %v900_v29 = vsel %vm899_vm8, %v5398_v15, %v896_v27 }
 0x4cd   :  { %v905_v31 = vsel %vm902_vm9, %v904_v28, %v900_v29 }
 0x4ce   :  { %v906_v33 = vmul.f32 %v5392_v57, %v905_v31 }
 0x4d0   :  { %5025 = vmatmul.msk.f32.vlgmr.msra.gmra.mxu1 %vm839_vm1, %v906_v33 }
 0x4d8   :  { %5026 = vmatmul.msk.f32.gmra.mxu1 %vm839_vm1, %v921_v38 }
 0x510   :  { %v1063_v41 = vpop.f32.mrf.mxu2 }
 0x511   :  { %5032 = vmatmul.msk.f32.vlgmr.msra.gmra.mxu0 %vm839_vm1, %v1063_v41 }
 0x518   :  { %v1156_v44 = vpop.f32.mrf.mxu2 }
 0x519   :  { %v1162_v46 = vmul.f32 0.35355338, %v1156_v44 }
 0x51b   :  { %v1164_v48 = vsel %vm839_vm1, %v1162_v46, -inf }
 0x51c   :  { %1165 = vmax.xlane.f32.xlu2 %v1164_v48  ;;  %v656_v48 = vld [vmem:[%s7908_s28 + $0x10] sm:$0xff] }
 0x51d   :  { %1265 = vmatpush.msrb.mxu0 %v656_v48  ;;  %v671_v48 = vld [vmem:[#allocation8 + $0x10] sm:$0xff] }
 0x520   :  { %v1159_v47 = vpop.f32.mrf.mxu2 }
 0x521   :  { %v1163_v50 = vmul.f32 0.35355338, %v1159_v47  ;;  %v661_v47 = vld [vmem:[#allocation5 + $0x10] sm:$0xff] }
 0x523   :  { %v1167_v51 = vsel %vm839_vm1, %v1163_v50, -inf }
 0x524   :  { %1168 = vmax.xlane.f32.xlu0 %v1167_v51  ;;  %1004 = vadd.xlane.f32.xlu2 %v1003_v52  ;;  %v660_v51 = vld [vmem:[#allocation5 + $0x8] sm:$0xff]  ;;  %v659_v52 = vld [vmem:[#allocation5] sm:$0xff] }
 0x53c   :  { %1212 = vrot.lane.b32.xlu2 %v7035_v21, %s6553_s26 }
 0x54d   :  { %v945_v45 = vpop.f32.mrf.mxu1 }
 0x54e   :  { %5034 = vmatmul.msk.f32.vlgmr.msrb.gmra.mxu1 %vm839_vm1, %v945_v45  ;;  %v667_v45 = vld [vmem:[#allocation7 + $0x18] sm:$0xff] }
 0x555   :  { %v948_v54 = vpop.f32.mrf.mxu1 }
 0x556   :  { %5035 = vmatmul.msk.f32.gmra.mxu1 %vm839_vm1, %v948_v54 }
 0x58f   :  { %v1166_v55 = vpop.xlane.xlu2 %1165 }
 0x590   :  { %v1170_v56 = vsub.f32 %v1162_v46, %v1166_v55  ;;  %v666_v55 = vld [vmem:[#allocation7 + $0x10] sm:$0xff] }
 0x592   :  { %v1172_v57 = vmul.f32 1.442695, %v1170_v56  ;;  %v665_v56 = vld [vmem:[#allocation7 + $0x8] sm:$0xff] }
 0x594   :  { %5401 = vpow2.f32 %v1172_v57  ;;  %v664_v57 = vld [vmem:[#allocation7] sm:$0xff] }
 0x597   :  { %v1169_v58 = vpop.xlane.xlu0 %1168  ;;  %v1005_v59 = vpop.xlane.xlu2 %1004 }
 0x598   :  { %v1171_v60 = vsub.f32 %v1163_v50, %v1169_v58  ;;  %5403 = vrcp.f32 %v1005_v59  ;;  %v1032_v5 = vand.u32 2147483648, %v1005_v59  ;;  %v1030_v9 = vand.u32 2147483647, %v1005_v59 }
 0x599   :  { %vm1026_vm15 = vweird.f32 %v1005_v59 }
 0x59a   :  { %v5402_v61 = vpop.eup %5401  ;;  %v1174_v62 = vmul.f32 1.442695, %v1171_v60  ;;  %v1033_v13 = vor.u32 1.1754944e-38, %v1032_v5  ;;  %vm1031_vm3 = vcmp.eq.f32.partialorder %v1030_v9, 8.507059e+37 }
 0x59b   :  { %v1176_v63 = vsel %vm839_vm1, %v5402_v61, 0.0 }
 0x59c   :  { %5405 = vpow2.f32 %v1174_v62  ;;  %1177 = vadd.xlane.f32.xlu0 %v1176_v63 }
 0x59e   :  { %v5404_v0 = vpop.eup %5403 }
 0x59f   :  { %v1022_v1 = vmul.f32 %v5404_v0, %v1005_v59  ;;  %v1213_v2 = vpop.permute.xlu2 %1212  ;;  %vm1027_vm14 = vweird.f32 %v5404_v0 }
 0x5a0   :  { %1236 = vmatpush.msrb.mxu3 %v1213_v2  ;;  %vm1028_vm2 = vmor %vm1026_vm15, %vm1027_vm14 }
 0x5a1   :  { %v1023_v3 = vsub.f32 1.0, %v1022_v1  ;;  %v7126_v1 = vpop.f32.mrf.mxu0 }
 0x5a2   :  { %v5406_v4 = vpop.eup %5405 }
 0x5a3   :  { %v1024_v6 = vmul.f32 %v5404_v0, %v1023_v3  ;;  %v1179_v8 = vsel %vm839_vm1, %v5406_v4, 0.0 }
 0x5a4   :  { %1180 = vadd.xlane.f32.xlu1 %v1179_v8 }
 0x5a5   :  { %v1025_v11 = vadd.f32 %v5404_v0, %v1024_v6 }
 0x5a7   :  { %v1029_v14 = vsel %vm1028_vm2, %v5404_v0, %v1025_v11 }
 0x5a8   :  { %v1034_v15 = vsel %vm1031_vm3, %v1033_v13, %v1029_v14 }
 0x5a9   :  { %v1035_v16 = vmul.f32 %v5400_v49, %v1034_v15  ;;  %v662_v49 = vld [vmem:[#allocation5 + $0x18] sm:$0xff] }
 0x5aa   :  { %1506 = vmatpush.msra.mxu0 %v662_v49 }
 0x5ab   :  { %5031 = vmatmul.msk.f32.vlgmr.msra.gmra.mxu3 %vm839_vm1, %v1035_v16 }
 0x5ac   :  { %1507 = vmatpush.msra.mxu0 %v661_v47 }
 0x5ae   :  { %1508 = vmatpush.msra.mxu0 %v660_v51  ;;  %v670_v51 = vld [vmem:[#allocation8 + $0x8] sm:$0xff] }
 0x5b0   :  { %1279 = vrot.lane.b32.xlu0 %v7037_v24, %s6554_s8  ;;  %1509 = vmatpush.msra.mxu0 %v659_v52 }
 0x5b8   :  { %1277 = vrot.lane.b32.xlu0 %v7029_v17, %s6554_s8 }
 0x5bd   :  { %1275 = vrot.lane.b32.xlu1 %v7044_v25, %s6554_s8 }
 0x5cb   :  { %v7110_v50 = vpop.f32.mrf.mxu1 }
 0x5d3   :  { %v7112_v53 = vpop.f32.mrf.mxu1 }
 0x60f   :  { %v1178_v18 = vpop.xlane.xlu0 %1177 }
 0x610   :  { %5407 = vrcp.f32 %v1178_v18  ;;  %v1193_v26 = vand.u32 2147483648, %v1178_v18  ;;  %v1191_v28 = vand.u32 2147483647, %v1178_v18  ;;  %vm1187_vm5 = vweird.f32 %v1178_v18 }
 0x612   :  { %v1194_v30 = vor.u32 1.1754944e-38, %v1193_v26  ;;  %vm1192_vm7 = vcmp.eq.f32.partialorder %v1191_v28, 8.507059e+37  ;;  %v5363_v26 = vld [vmem:[%s7910_s19] ss:$0 sm:$0xff] }
 0x616   :  { %v5408_v19 = vpop.eup %5407 }
 0x617   :  { %v1183_v20 = vmul.f32 %v5408_v19, %v1178_v18  ;;  %v1181_v22 = vpop.xlane.xlu1 %1180  ;;  %vm1188_vm4 = vweird.f32 %v5408_v19 }
 0x618   :  { %5409 = vrcp.f32 %v1181_v22  ;;  %vm1189_vm6 = vmor %vm1187_vm5, %vm1188_vm4  ;;  %v1208_v34 = vand.u32 2147483648, %v1181_v22  ;;  %v1206_v37 = vand.u32 2147483647, %v1181_v22  ;;  %vm1202_vm9 = vweird.f32 %v1181_v22 }
 0x619   :  { %v1184_v23 = vsub.f32 1.0, %v1183_v20 }
 0x61a   :  { %v1209_v39 = vor.u32 1.1754944e-38, %v1208_v34  ;;  %vm1207_vm11 = vcmp.eq.f32.partialorder %v1206_v37, 8.507059e+37 }
 0x61b   :  { %v1185_v27 = vmul.f32 %v5408_v19, %v1184_v23 }
 0x61d   :  { %v1186_v29 = vadd.f32 %v5408_v19, %v1185_v27 }
 0x61e   :  { %v5410_v24 = vpop.eup %5409 }
 0x61f   :  { %v1198_v17 = vmul.f32 %v5410_v24, %v1181_v22  ;;  %v1190_v31 = vsel %vm1189_vm6, %v5408_v19, %v1186_v29  ;;  %vm1203_vm8 = vweird.f32 %v5410_v24  ;;  %v5364_v19 = vld [vmem:[%s7909_s14] ss:$0 sm:$0xff]  ;;  %vm1596_vm6 = vcmask 130048  }
 0x620   :  { %v1195_v25 = vsel %vm1192_vm7, %v1194_v30, %v1190_v31  ;;  %vm1204_vm10 = vmor %vm1202_vm9, %vm1203_vm8 }
 0x621   :  { %v1199_v32 = vsub.f32 1.0, %v1198_v17  ;;  %v1196_v33 = vmul.f32 %v5402_v61, %v1195_v25 }
 0x622   :  { %v1280_v35 = vpop.permute.xlu0 %1279 }
 0x623   :  { %v1200_v36 = vmul.f32 %v5410_v24, %v1199_v32  ;;  %5039 = vmatmul.msk.f32.vlgmr.msrb.gmra.mxu3 %vm839_vm1, %v1196_v33  ;;  %5043 = vmatpush.xpose.msk.msra.mxu1 %vm839_vm1, %v1280_v35 }
 0x625   :  { %v1201_v38 = vadd.f32 %v5410_v24, %v1200_v36 }
 0x627   :  { %v1205_v40 = vsel %vm1204_vm10, %v5410_v24, %v1201_v38 }
 0x628   :  { %v1210_v41 = vsel %vm1207_vm11, %v1209_v39, %v1205_v40 }
 0x629   :  { %v1211_v42 = vmul.f32 %v5406_v4, %v1210_v41 }
 0x62a   :  { %v1278_v46 = vpop.permute.xlu0 %1277 }
 0x62b   :  { %5040 = vmatmul.msk.f32.gmra.mxu3 %vm839_vm1, %v1211_v42 }
 0x62e   :  { %v1066_v43 = vpop.f32.mrf.mxu3 }
 0x62f   :  { %v1276_v44 = vpop.permute.xlu1 %1275  ;;  %5033 = vmatmul.msk.f32.gmra.mxu0 %vm839_vm1, %v1066_v43 }
 0x630   :  { %5044 = vmatmul.msk.f32.vlgmr.msra.gmra.mxu1 %vm839_vm1, %v1276_v44 }
 0x638   :  { %5045 = vmatmul.msk.f32.gmra.mxu1 %vm839_vm1, %v1278_v46  ;;  %v672_v46 = vld [vmem:[#allocation8 + $0x18] sm:$0xff] }
 0x639   :  { %1555 = vmatpush.msrb.mxu1 %v672_v46 }
 0x63b   :  { %1556 = vmatpush.msrb.mxu1 %v671_v48 }
 0x63d   :  { %1557 = vmatpush.msrb.mxu1 %v670_v51 }
 0x6a6   :  { %v1238_v54 = vpop.f32.mrf.mxu3 }
 0x6a7   :  { %5041 = vmatmul.msk.f32.vlgmr.msrb.gmra.mxu0 %vm839_vm1, %v1238_v54 }
 0x6a8   :  { %1529 = vmatpush.msrb.mxu0 %v667_v45 }
 0x6aa   :  { %1530 = vmatpush.msrb.mxu0 %v666_v55  ;;  %v669_v55 = vld [vmem:[#allocation8] sm:$0xff] }
 0x6ab   :  { %1558 = vmatpush.msrb.mxu1 %v669_v55 }
 0x6ac   :  { %1531 = vmatpush.msrb.mxu0 %v665_v56  ;;  %v7128_v2 = vpop.f32.mrf.mxu0  ;;  %5053 = vmatmul.msk.f32.vlgmr.msrb.gmra.mxu1 %vm760_vm0, %v7016_v12 }
 0x6ad   :  { %v1304_v58 = vpop.f32.mrf.mxu1 }
 0x6ae   :  { %v1310_v59 = vmul.f32 0.35355338, %v1304_v58  ;;  %v1241_v60 = vpop.f32.mrf.mxu3  ;;  %1532 = vmatpush.msrb.mxu0 %v664_v57 }
 0x6af   :  { %5042 = vmatmul.msk.f32.gmra.mxu0 %vm839_vm1, %v1241_v60 }
 0x6b0   :  { %v1312_v61 = vsel %vm839_vm1, %v1310_v59, -inf }
 0x6b1   :  { %1313 = vmax.xlane.f32.xlu2 %v1312_v61 }
 0x6b4   :  { %5054 = vmatmul.msk.f32.gmra.mxu1 %vm760_vm0, %v7008_v7 }
 0x6b5   :  { %v1307_v62 = vpop.f32.mrf.mxu1 }
 0x6b6   :  { %v1311_v63 = vmul.f32 0.35355338, %v1307_v62 }
 0x6b7   :  { %5050 = vmatmul.msk.f32.vlgmr.msra.gmra.mxu0 %vm760_vm0, %v7012_v10 }
 0x6b8   :  { %v1315_v0 = vsel %vm839_vm1, %v1311_v63, -inf }
 0x6b9   :  { %1316 = vmax.xlane.f32.xlu1 %v1315_v0 }
 0x6bf   :  { %5051 = vmatmul.msk.f32.vlgmr.msrb.gmra.mxu0 %vm760_vm0, %v7016_v12  ;;  %v657_v12 = vld [vmem:[%s7908_s28 + $0x18] sm:$0xff] }
 0x6c0   :  { %1413 = vmatpush.msra.mxu3 %v657_v12 }
 0x6c7   :  { %5052 = vmatmul.msk.f32.gmra.mxu0 %vm760_vm0, %v7008_v7  ;;  %v5365_v7 = vld [vmem:[%s7911_s13] ss:$0 sm:$0xff] }
 0x6d2   :  { %1360 = vrot.lane.b32.xlu1 %v7035_v21, %s6554_s8 }
 0x724   :  { %v7130_v3 = vpop.f32.mrf.mxu0  ;;  %v1314_v4 = vpop.xlane.xlu2 %1313 }
 0x725   :  { %v1318_v10 = vsub.f32 %v1310_v59, %v1314_v4 }
 0x727   :  { %v1320_v5 = vmul.f32 1.442695, %v1318_v10 }
 0x729   :  { %5411 = vpow2.f32 %v1320_v5 }
 0x72c   :  { %v1317_v6 = vpop.xlane.xlu1 %1316  ;;  %v7132_v8 = vpop.f32.mrf.mxu0 }
 0x72d   :  { %v1319_v9 = vsub.f32 %v1311_v63, %v1317_v6  ;;  %v1560_v63 = vpop.f32.mrf.mxu1 }
 0x72f   :  { %v5412_v11 = vpop.eup %5411  ;;  %v1322_v13 = vmul.f32 1.442695, %v1319_v9 }
 0x730   :  { %v1324_v21 = vsel %vm839_vm1, %v5412_v11, 0.0 }
 0x731   :  { %5413 = vpow2.f32 %v1322_v13  ;;  %1325 = vadd.xlane.f32.xlu0 %v1324_v21 }
 0x734   :  { %v1511_v14 = vpop.f32.mrf.mxu0 }
 0x735   :  { %v7151_v28 = vadd.f32 %v5363_v26, %v1511_v14  ;;  %v1563_v10 = vpop.f32.mrf.mxu1 }
 0x736   :  { %v1564_v6 = vadd.f32 %v5365_v7, %v1563_v10 }
 0x737   :  { %v7135_v15 = vpop.eup %5413 }
 0x738   :  { %v1327_v16 = vsel %vm839_vm1, %v7135_v15, 0.0  ;;  %1638 = vmatpush.msrb.mxu3 %v1564_v6 }
 0x739   :  { %1328 = vadd.xlane.f32.xlu2 %v1327_v16 }
 0x73c   :  { %v1534_v18 = vpop.f32.mrf.mxu0 }
 0x73d   :  { %v7149_v27 = vadd.f32 %v5364_v19, %v1534_v18 }
 0x744   :  { %v1361_v20 = vpop.permute.xlu1 %1360  ;;  %v1537_v22 = vpop.f32.mrf.mxu0 }
 0x745   :  { %1384 = vmatpush.msra.mxu2 %v1361_v20  ;;  %v7140_v23 = vadd.f32 %v5364_v19, %v1537_v22 }
 0x747   :  { %1648 = vrot.lane.b32.xlu0 %v7140_v23, %s6552_s11  ;;  %1782 = vrot.lane.b32.xlu1 %v7140_v23, %s6553_s26 }
 0x748   :  { %5055 = vmatpush.xpose.msk.msrb.mxu2 %vm839_vm1, %v7140_v23 }
 0x74c   :  { %5056 = vmatpush.xpose.msk.msrb.mxu2 %vm839_vm1, %v7149_v27 }
 0x74f   :  { %1644 = vrot.lane.b32.xlu0 %v7151_v28, %s6552_s11 }
 0x751   :  { %1646 = vrot.lane.b32.xlu2 %v7149_v27, %s6552_s11 }
 0x757   :  { %1778 = vrot.lane.b32.xlu0 %v7151_v28, %s6553_s26 }
 0x759   :  { %1780 = vrot.lane.b32.xlu2 %v7149_v27, %s6553_s26 }
 0x7a4   :  { %v1326_v29 = vpop.xlane.xlu0 %1325 }
 0x7a5   :  { %5415 = vrcp.f32 %v1326_v29  ;;  %v1341_v25 = vand.u32 2147483648, %v1326_v29  ;;  %v1339_v33 = vand.u32 2147483647, %v1326_v29  ;;  %vm1335_vm13 = vweird.f32 %v1326_v29 }
 0x7a7   :  { %v1342_v36 = vor.u32 1.1754944e-38, %v1341_v25  ;;  %vm1340_vm15 = vcmp.eq.f32.partialorder %v1339_v33, 8.507059e+37 }
 0x7ab   :  { %v5416_v24 = vpop.eup %5415 }
 0x7ac   :  { %v1331_v30 = vmul.f32 %v5416_v24, %v1326_v29  ;;  %v1329_v17 = vpop.xlane.xlu2 %1328  ;;  %vm1336_vm12 = vweird.f32 %v5416_v24 }
 0x7ad   :  { %5417 = vrcp.f32 %v1329_v17  ;;  %vm1337_vm14 = vmor %vm1335_vm13, %vm1336_vm12  ;;  %v1356_v42 = vand.u32 2147483648, %v1329_v17  ;;  %v1354_v44 = vand.u32 2147483647, %v1329_v17  ;;  %vm1350_vm3 = vweird.f32 %v1329_v17 }
 0x7ae   :  { %v1332_v31 = vsub.f32 1.0, %v1331_v30 }
 0x7af   :  { %v1357_v52 = vor.u32 1.1754944e-38, %v1356_v42  ;;  %vm1355_vm5 = vcmp.eq.f32.partialorder %v1354_v44, 8.507059e+37 }
 0x7b0   :  { %v1333_v32 = vmul.f32 %v5416_v24, %v1332_v31 }
 0x7b2   :  { %v1334_v34 = vadd.f32 %v5416_v24, %v1333_v32 }
 0x7b3   :  { %v5418_v35 = vpop.eup %5417 }
 0x7b4   :  { %v1338_v37 = vsel %vm1337_vm14, %v5416_v24, %v1334_v34  ;;  %v1346_v38 = vmul.f32 %v5418_v35, %v1329_v17  ;;  %vm1351_vm2 = vweird.f32 %v5418_v35  ;;  %v1647_v45 = vpop.permute.xlu2 %1646 }
 0x7b5   :  { %v1343_v39 = vsel %vm1340_vm15, %v1342_v36, %v1338_v37  ;;  %vm1352_vm4 = vmor %vm1350_vm3, %vm1351_vm2 }
 0x7b6   :  { %v1347_v40 = vsub.f32 1.0, %v1346_v38  ;;  %v1344_v41 = vmul.f32 %v5412_v11, %v1343_v39  ;;  %v1561_v11 = vadd.f32 %v5365_v7, %v1560_v63  ;;  %v674_v39 = vld [vmem:[#allocation10] sm:$0xff] }
 0x7b7   :  { %1773 = vmatpush.msra.mxu1 %v674_v39  ;;  %v681_v39 = vld [vmem:[#allocation11 + $0x10] sm:$0xff] }
 0x7b8   :  { %v1348_v43 = vmul.f32 %v5418_v35, %v1347_v40  ;;  %5046 = vmatmul.msk.f32.vlgmr.msra.gmra.mxu2 %vm839_vm1, %v1344_v41  ;;  %1639 = vmatpush.msrb.mxu3 %v1561_v11  ;;  %v5300_v19 = vpack.i.bf16 %v1561_v11, %v1564_v6 }
 0x7b9   :  { %v1649_v49 = vpop.permute.xlu0 %1648  ;;  %v1783_v58 = vpop.permute.xlu1 %1782 }
 0x7ba   :  { %v1349_v47 = vadd.f32 %v5418_v35, %v1348_v43  ;;  %5059 = vmatpush.xpose.msk.msra.mxu2 %vm839_vm1, %v1649_v49 }
 0x7bc   :  { %v1353_v54 = vsel %vm1352_vm4, %v5418_v35, %v1349_v47  ;;  %v1781_v59 = vpop.permute.xlu2 %1780 }
 0x7bd   :  { %v1358_v56 = vsel %vm1355_vm5, %v1357_v52, %v1353_v54 }
 0x7be   :  { %v1359_v57 = vmul.f32 %v7135_v15, %v1358_v56  ;;  %5060 = vmatpush.xpose.msk.msra.mxu2 %vm839_vm1, %v1647_v45 }
 0x7c0   :  { %5047 = vmatmul.msk.f32.gmra.mxu2 %vm839_vm1, %v1359_v57 }
 0x7c1   :  { %v1645_v60 = vpop.permute.xlu0 %1644 }
 0x7c8   :  { %5057 = vmatmul.msk.f32.vlgmr.msrb.gmra.mxu2 %vm839_vm1, %v7151_v28 }
 0x7c9   :  { %5065 = vmatpush.xpose.msk.msrb.mxu2 %vm839_vm1, %v1783_v58  ;;  %v1779_v61 = vpop.permute.xlu0 %1778 }
 0x7cd   :  { %5066 = vmatpush.xpose.msk.msrb.mxu2 %vm839_vm1, %v1781_v59 }
 0x7d0   :  { %5061 = vmatmul.msk.f32.vlgmr.msra.gmra.mxu2 %vm839_vm1, %v1645_v60 }
 0x7d8   :  { %5067 = vmatmul.msk.f32.vlgmr.msrb.gmra.mxu2 %vm839_vm1, %v1779_v61 }
 0x83b   :  { %v1386_v62 = vpop.f32.mrf.mxu2 }
 0x83c   :  { %5048 = vmatmul.msk.f32.vlgmr.msra.gmra.mxu3 %vm839_vm1, %v1386_v62 }
 0x843   :  { %v1389_v0 = vpop.f32.mrf.mxu2 }
 0x844   :  { %5049 = vmatmul.msk.f32.gmra.mxu3 %vm839_vm1, %v1389_v0 }
 0x84b   :  { %v1592_v4 = vpop.f32.mrf.mxu2 }
 0x84c   :  { %v1595_v5 = vmul.f32 0.35355338, %v1592_v4 }
 0x84e   :  { %v1597_v9 = vsel %vm1596_vm6, %v1595_v5, -inf }
 0x84f   :  { %1598 = vmax.xlane.f32.xlu1 %v1597_v9 }
 0x853   :  { %v1673_v13 = vpop.f32.mrf.mxu2 }
 0x854   :  { %v1676_v21 = vmul.f32 0.35355338, %v1673_v13 }
 0x856   :  { %v1677_v14 = vsel %vm1596_vm6, %v1676_v21, -inf }
 0x857   :  { %1678 = vmax.xlane.f32.xlu0 %v1677_v14 }
 0x85b   :  { %v1807_v15 = vpop.f32.mrf.mxu2 }
 0x85c   :  { %v1810_v16 = vmul.f32 0.35355338, %v1807_v15 }
 0x85e   :  { %v1811_v18 = vsel %vm1596_vm6, %v1810_v16, -inf }
 0x85f   :  { %1812 = vmax.xlane.f32.xlu1 %v1811_v18 }
 0x86b   :  { %1890 = vrot.lane.b32.xlu0 %v7149_v27, %s6554_s8 }
 0x878   :  { %5301 = vrot.lane.b32.xlu1 %v5300_v19, %s6552_s11 }
 0x880   :  { %1888 = vrot.lane.b32.xlu1 %v7151_v28, %s6554_s8 }
 0x888   :  { %5311 = vrot.lane.b32.xlu1 %v5300_v19, %s6554_s8 }
 0x8c2   :  { %v1599_v20 = vpop.xlane.xlu1 %1598 }
 0x8c3   :  { %v1600_v22 = vsub.f32 %v1595_v5, %v1599_v20 }
 0x8c5   :  { %v1601_v26 = vmul.f32 1.442695, %v1600_v22 }
 0x8c7   :  { %5419 = vpow2.f32 %v1601_v26 }
 0x8ca   :  { %v1679_v29 = vpop.xlane.xlu0 %1678 }
 0x8cb   :  { %v1680_v24 = vsub.f32 %v1676_v21, %v1679_v29 }
 0x8cd   :  { %v5420_v30 = vpop.eup %5419  ;;  %v1681_v17 = vmul.f32 1.442695, %v1680_v24 }
 0x8ce   :  { %v1603_v31 = vsel %vm1596_vm6, %v5420_v30, 0.0 }
 0x8cf   :  { %5421 = vpow2.f32 %v1681_v17  ;;  %1604 = vadd.xlane.f32.xlu2 %v1603_v31  ;;  %v675_v17 = vld [vmem:[#allocation10 + $0x8] sm:$0xff]  ;;  %v1415_v31 = vpop.f32.mrf.mxu3 }
 0x8d0   :  { %1750 = vmatpush.msra.mxu0 %v675_v17  ;;  %v5369_v17 = vld [vmem:[%s7915_s7] ss:$0 sm:$0xff] }
 0x8d2   :  { %v1813_v25 = vpop.xlane.xlu1 %1812 }
 0x8d3   :  { %v1814_v27 = vsub.f32 %v1810_v16, %v1813_v25  ;;  %v676_v25 = vld [vmem:[#allocation10 + $0x10] sm:$0xff] }
 0x8d4   :  { %1882 = vmatpush.msrb.mxu0 %v676_v25 }
 0x8d5   :  { %v5422_v32 = vpop.eup %5421  ;;  %v1815_v33 = vmul.f32 1.442695, %v1814_v27 }
 0x8d6   :  { %v1683_v34 = vsel %vm1596_vm6, %v5422_v32, 0.0 }
 0x8d7   :  { %5423 = vpow2.f32 %v1815_v33  ;;  %1684 = vadd.xlane.f32.xlu2 %v1683_v34  ;;  %v7206_v27 = vpop.f32.mrf.mxu3 }
 0x8dd   :  { %v7192_v28 = vpop.eup %5423  ;;  %v1891_v42 = vpop.permute.xlu0 %1890 }
 0x8de   :  { %v1817_v35 = vsel %vm1596_vm6, %v7192_v28, 0.0 }
 0x8df   :  { %1818 = vadd.xlane.f32.xlu0 %v1817_v35 }
 0x8ea   :  { %v5302_v36 = vpop.permute.xlu1 %5301 }
 0x8eb   :  { %v5304_v37 = vunpack.i.h.bf16 %v5302_v36  ;;  %v5303_v38 = vunpack.i.l.bf16 %v5302_v36 }
 0x8ed   :  { %1726 = vmatpush.msra.mxu3 %v5303_v38  ;;  %v682_v38 = vld [vmem:[#allocation11 + $0x18] sm:$0xff] }
 0x8ef   :  { %1892 = vrot.lane.b32.xlu2 %v7140_v23, %s6554_s8  ;;  %1727 = vmatpush.msra.mxu3 %v5304_v37 }
 0x8f2   :  { %v1889_v26 = vpop.permute.xlu1 %1888 }
 0x8f3   :  { %5306 = vrot.lane.b32.xlu0 %v5300_v19, %s6553_s26 }
 0x8fa   :  { %v5312_v29 = vpop.permute.xlu1 %5311 }
 0x8fb   :  { %v5314_v24 = vunpack.i.h.bf16 %v5312_v29 }
 0x942   :  { %v1605_v40 = vpop.xlane.xlu2 %1604 }
 0x943   :  { %5425 = vrcp.f32 %v1605_v40  ;;  %v1617_v48 = vand.u32 2147483648, %v1605_v40  ;;  %v1615_v47 = vand.u32 2147483647, %v1605_v40  ;;  %vm1611_vm8 = vweird.f32 %v1605_v40 }
 0x945   :  { %v1618_v52 = vor.u32 1.1754944e-38, %v1617_v48  ;;  %vm1616_vm10 = vcmp.eq.f32.partialorder %v1615_v47, 8.507059e+37  ;;  %v1122_v48 = vadd.f32 %v7110_v50, %v7126_v1  ;;  %v692_v1 = vld [vmem:[#allocation14 + $0x18] sm:$0xff] }
 0x949   :  { %v5426_v41 = vpop.eup %5425 }
 0x94a   :  { %v1607_v43 = vmul.f32 %v5426_v41, %v1605_v40  ;;  %v1685_v44 = vpop.xlane.xlu2 %1684  ;;  %vm1612_vm7 = vweird.f32 %v5426_v41  ;;  %v680_v40 = vld [vmem:[#allocation11 + $0x8] sm:$0xff] }
 0x94b   :  { %5427 = vrcp.f32 %v1685_v44  ;;  %vm1613_vm9 = vmor %vm1611_vm8, %vm1612_vm7  ;;  %v1697_v60 = vand.u32 2147483648, %v1685_v44  ;;  %v1695_v12 = vand.u32 2147483647, %v1685_v44  ;;  %vm1691_vm12 = vweird.f32 %v1685_v44 }
 0x94c   :  { %v1608_v46 = vsub.f32 1.0, %v1607_v43 }
 0x94d   :  { %v1698_v0 = vor.u32 1.1754944e-38, %v1697_v60  ;;  %vm1696_vm14 = vcmp.eq.f32.partialorder %v1695_v12, 8.507059e+37  ;;  %v686_v12 = vld [vmem:[#allocation13 + $0x10] sm:$0xff] }
 0x94e   :  { %v1609_v49 = vmul.f32 %v5426_v41, %v1608_v46 }
 0x950   :  { %v1610_v23 = vadd.f32 %v5426_v41, %v1609_v49  ;;  %v1273_v49 = vadd.f32 %v7130_v3, %v1122_v48  ;;  %v691_v3 = vld [vmem:[#allocation14 + $0x10] sm:$0xff] }
 0x951   :  { %v5428_v51 = vpop.eup %5427 }
 0x952   :  { %v1614_v45 = vsel %vm1613_vm9, %v5426_v41, %v1610_v23  ;;  %v1687_v54 = vmul.f32 %v5428_v51, %v1685_v44  ;;  %v1819_v55 = vpop.xlane.xlu0 %1818  ;;  %v1893_v56 = vpop.permute.xlu2 %1892  ;;  %vm1692_vm11 = vweird.f32 %v5428_v51  ;;  %v679_v41 = vld [vmem:[#allocation11] sm:$0xff]  ;;  %v1421_v47 = vadd.f32 %v1415_v31, %v1273_v49  ;;  %v7223_v23 = vld [vmem:[%s7912_s3] ss:$0 sm:$0xff] }
 0x953   :  { %v1619_v57 = vsel %vm1616_vm10, %v1618_v52, %v1614_v45  ;;  %5429 = vrcp.f32 %v1819_v55  ;;  %5070 = vmatpush.xpose.msk.msrb.mxu1 %vm839_vm1, %v1893_v56  ;;  %vm1693_vm13 = vmor %vm1691_vm12, %vm1692_vm11  ;;  %v1831_v13 = vand.u32 2147483648, %v1819_v55  ;;  %vm1825_vm2 = vweird.f32 %v1819_v55 }
 0x954   :  { %v1688_v58 = vsub.f32 1.0, %v1687_v54  ;;  %v1620_v59 = vmul.f32 %v5420_v30, %v1619_v57  ;;  %v1829_v21 = vand.u32 2147483647, %v1819_v55  ;;  %v5313_v30 = vunpack.i.l.bf16 %v5312_v29  ;;  %v7228_v54 = vld [vmem:[%s7903_s12] sm:$0xff]  ;;  %v690_v57 = vld [vmem:[#allocation14 + $0x8] sm:$0xff] }
 0x955   :  { %v1832_v15 = vor.u32 1.1754944e-38, %v1831_v13  ;;  %v1426_v52 = vadd.f32 %v7223_v23, %v1421_v47  ;;  %v5368_v29 = vld [vmem:[%s7914_s24] ss:$0 sm:$0xff] }
 0x956   :  { %v1689_v61 = vmul.f32 %v5428_v51, %v1688_v58  ;;  %5058 = vmatmul.msk.f32.vlgmr.msrb.gmra.mxu3 %vm1596_vm6, %v1620_v59  ;;  %vm1830_vm4 = vcmp.eq.f32.partialorder %v1829_v21, 8.507059e+37  ;;  %1968 = vmatpush.msra.mxu2 %v5313_v30  ;;  %v689_v58 = vld [vmem:[#allocation14] sm:$0xff] }
 0x957   :  { %5071 = vmatpush.xpose.msk.msrb.mxu1 %vm839_vm1, %v1891_v42  ;;  %v7215_v42 = vld [vmem:[#allocation2] sm:$0xff] }
 0x958   :  { %v1690_v62 = vadd.f32 %v5428_v51, %v1689_v61  ;;  %1969 = vmatpush.msra.mxu2 %v5314_v24  ;;  %v687_v61 = vld [vmem:[#allocation13 + $0x18] sm:$0xff] }
 0x959   :  { %v5430_v63 = vpop.eup %5429 }
 0x95a   :  { %v1694_v7 = vsel %vm1693_vm13, %v5428_v51, %v1690_v62  ;;  %v1821_v4 = vmul.f32 %v5430_v63, %v1819_v55  ;;  %vm1826_vm15 = vweird.f32 %v5430_v63  ;;  %v7231_v55 = vadd.f32 %v7228_v54, %v1426_v52  ;;  %2066 = vmatpush.msrb.mxu2 %v692_v1  ;;  %v5367_v62 = vld [vmem:[%s7913_s2] ss:$0 sm:$0xff]  ;;  %v717_v1 = vld [vmem:[#allocation26 + $0x18] sm:$0xff] }
 0x95b   :  { %v1699_v10 = vsel %vm1696_vm14, %v1698_v0, %v1694_v7  ;;  %vm1827_vm3 = vmor %vm1825_vm2, %vm1826_vm15  ;;  %v685_v0 = vld [vmem:[#allocation13 + $0x8] sm:$0xff] }
 0x95c   :  { %v1822_v5 = vsub.f32 1.0, %v1821_v4  ;;  %v1700_v6 = vmul.f32 %v5422_v32, %v1699_v10  ;;  %v1430_v50 = vsel %vm760_vm0, %v7231_v55, 0.0  ;;  %2067 = vmatpush.msrb.mxu2 %v691_v3 }
 0x95e   :  { %v1823_v9 = vmul.f32 %v5430_v63, %v1822_v5  ;;  %5062 = vmatmul.msk.f32.vlgmr.msra.gmra.mxu3 %vm1596_vm6, %v1700_v6  ;;  %2068 = vmatpush.msrb.mxu2 %v690_v57  ;;  %v684_v5 = vld [vmem:[#allocation13] sm:$0xff] }
 0x960   :  { %v1824_v11 = vadd.f32 %v5430_v63, %v1823_v9  ;;  %2069 = vmatpush.msrb.mxu2 %v689_v58  ;;  %v711_v58 = vld [vmem:[#allocation23 + $0x10] sm:$0xff] }
 0x962   :  { %v1828_v14 = vsel %vm1827_vm3, %v5430_v63, %v1824_v11 }
 0x963   :  { %v1833_v18 = vsel %vm1830_vm4, %v1832_v15, %v1828_v14 }
 0x964   :  { %v1834_v22 = vmul.f32 %v7192_v28, %v1833_v18 }
 0x965   :  { %v5307_v16 = vpop.permute.xlu0 %5306 }
 0x966   :  { %v5309_v19 = vunpack.i.h.bf16 %v5307_v16  ;;  %v5308_v20 = vunpack.i.l.bf16 %v5307_v16 }
 0x968   :  { %1858 = vmatpush.msrb.mxu3 %v5308_v20  ;;  %v677_v20 = vld [vmem:[#allocation10 + $0x18] sm:$0xff] }
 0x96a   :  { %1859 = vmatpush.msrb.mxu3 %v5309_v19  ;;  %v7245_v19 = vld [vmem:[%s7903_s12 + $0x8] sm:$0xff] }
 0x96b   :  { %5068 = vmatmul.msk.f32.vlgmr.msrb.gmra.mxu3 %vm1596_vm6, %v1834_v22 }
 0x96c   :  { %1992 = vmatpush.msra.mxu3 %v677_v20 }
 0x9d9   :  { %v1641_v32 = vpop.f32.mrf.mxu3 }
 0x9da   :  { %5064 = vmatmul.msk.f32.vlgmr.msra.gmra.mxu1 %vm839_vm1, %v1641_v32 }
 0x9db   :  { %2043 = vmatpush.msra.mxu1 %v687_v61  ;;  %v710_v61 = vld [vmem:[#allocation23 + $0x8] sm:$0xff] }
 0x9dd   :  { %2044 = vmatpush.msra.mxu1 %v686_v12  ;;  %v715_v12 = vld [vmem:[#allocation26 + $0x8] sm:$0xff] }
 0x9df   :  { %2045 = vmatpush.msra.mxu1 %v685_v0  ;;  %v1125_v0 = vadd.f32 %v7112_v53, %v7128_v2 }
 0x9e1   :  { %v1729_v33 = vpop.f32.mrf.mxu3  ;;  %2046 = vmatpush.msra.mxu1 %v684_v5 }
 0x9e2   :  { %5063 = vmatmul.msk.f32.vlgmr.msra.gmra.mxu0 %vm839_vm1, %v1729_v33  ;;  %5072 = vmatmul.msk.f32.vlgmr.msrb.gmra.mxu1 %vm839_vm1, %v1889_v26  ;;  %v6555_v33 = vmov 32.0  }
 0x9e3   :  { %2017 = vmatpush.msra.mxu0 %v682_v38  ;;  %v695_v38 = vld [vmem:[#allocation16 + $0x8] sm:$0xff] }
 0x9e5   :  { %2018 = vmatpush.msra.mxu0 %v681_v39 }
 0x9e7   :  { %2019 = vmatpush.msra.mxu0 %v680_v40  ;;  %v694_v40 = vld [vmem:[#allocation16] sm:$0xff] }
 0x9e9   :  { %2020 = vmatpush.msra.mxu0 %v679_v41 }
 0x9ee   :  { %v1861_v34 = vpop.f32.mrf.mxu3 }
 0x9ef   :  { %5069 = vmatmul.msk.f32.vlgmr.msrb.gmra.mxu0 %vm839_vm1, %v1861_v34 }
 0x9f7   :  { %5075 = vmatmul.msk.f32.vlgmr.msra.gmra.mxu0 %vm760_vm0, %v7215_v42 }
 0xa57   :  { %v7212_v28 = vpop.f32.mrf.mxu1 }
 0xa5f   :  { %v1917_v35 = vpop.f32.mrf.mxu1  ;;  %v7235_v56 = vpop.f32.mrf.mxu0 }
 0xa60   :  { %v1920_v36 = vmul.f32 0.35355338, %v1917_v35 }
 0xa62   :  { %v1921_v37 = vsel %vm1596_vm6, %v1920_v36, -inf }
 0xa63   :  { %1922 = vmax.xlane.f32.xlu2 %v1921_v37  ;;  %v696_v37 = vld [vmem:[#allocation16 + $0x10] sm:$0xff] }
 0xa6c   :  { %v7237_v59 = vpop.f32.mrf.mxu0 }
 0xa74   :  { %v2022_v63 = vpop.f32.mrf.mxu0 }
 0xa75   :  { %v2023_v10 = vadd.f32 %v5367_v62, %v2022_v63  ;;  %v709_v62 = vld [vmem:[#allocation23] sm:$0xff] }
 0xa76   :  { %v714_v63 = vld [vmem:[#allocation26] sm:$0xff] }
 0xa77   :  { %5076 = vmatmul.msk.f32.vlgmr.msra.gmra.mxu1 %vm760_vm0, %v2023_v10 }
 0xad6   :  { %v1923_v43 = vpop.xlane.xlu2 %1922 }
 0xad7   :  { %v1924_v44 = vsub.f32 %v1920_v36, %v1923_v43  ;;  %v697_v36 = vld [vmem:[#allocation16 + $0x18] sm:$0xff] }
 0xad8   :  { %2092 = vmatpush.msrb.mxu3 %v697_v36 }
 0xad9   :  { %v1925_v46 = vmul.f32 1.442695, %v1924_v44 }
 0xada   :  { %2093 = vmatpush.msrb.mxu3 %v696_v37 }
 0xadb   :  { %5431 = vpow2.f32 %v1925_v46 }
 0xadc   :  { %2094 = vmatpush.msrb.mxu3 %v695_v38 }
 0xade   :  { %2095 = vmatpush.msrb.mxu3 %v694_v40 }
 0xae1   :  { %v5432_v51 = vpop.eup %5431 }
 0xae2   :  { %v1927_v45 = vsel %vm1596_vm6, %v5432_v51, 0.0 }
 0xae3   :  { %1928 = vadd.xlane.f32.xlu0 %v1927_v45 }
 0xaeb   :  { %1431 = vadd.xlane.f32.xlu0 %v1430_v50  ;;  %v712_v50 = vld [vmem:[#allocation23 + $0x18] sm:$0xff] }
 0xaf4   :  { %v2048_v31 = vpop.f32.mrf.mxu1 }
 0xaf5   :  { %v2049_v32 = vadd.f32 %v5369_v17, %v2048_v31 }
 0xb56   :  { %v1929_v60 = vpop.xlane.xlu0 %1928 }
 0xb57   :  { %5433 = vrcp.f32 %v1929_v60  ;;  %v1941_v9 = vand.u32 2147483648, %v1929_v60  ;;  %v1939_v13 = vand.u32 2147483647, %v1929_v60  ;;  %vm1935_vm7 = vweird.f32 %v1929_v60 }
 0xb58   :  { %5435 = vrcp.f32 %v6555_v33 }
 0xb59   :  { %v1942_v14 = vor.u32 1.1754944e-38, %v1941_v9  ;;  %vm1940_vm9 = vcmp.eq.f32.partialorder %v1939_v13, 8.507059e+37 }
 0xb5d   :  { %v5434_v7 = vpop.eup %5433 }
 0xb5e   :  { %v1931_v4 = vmul.f32 %v5434_v7, %v1929_v60  ;;  %vm1936_vm5 = vweird.f32 %v5434_v7  ;;  %v5436_v34 = vpop.eup %5435  ;;  %v1432_v46 = vpop.xlane.xlu0 %1431  ;;  %v716_v60 = vld [vmem:[#allocation26 + $0x10] sm:$0xff] }
 0xb5f   :  { %vm1937_vm8 = vmor %vm1935_vm7, %vm1936_vm5  ;;  %v1437_v35 = vmul.f32 32.0, %v5436_v34  ;;  %vm1441_vm10 = vweird.f32 %v5436_v34 }
 0xb60   :  { %v1932_v6 = vsub.f32 1.0, %v1931_v4 }
 0xb61   :  { %v1438_v39 = vsub.f32 1.0, %v1437_v35 }
 0xb62   :  { %v1933_v11 = vmul.f32 %v5434_v7, %v1932_v6 }
 0xb63   :  { %v1439_v41 = vmul.f32 %v5436_v34, %v1438_v39 }
 0xb64   :  { %v1934_v21 = vadd.f32 %v5434_v7, %v1933_v11 }
 0xb65   :  { %v1440_v43 = vadd.f32 %v5436_v34, %v1439_v41 }
 0xb66   :  { %v1938_v15 = vsel %vm1937_vm8, %v5434_v7, %v1934_v21  ;;  %v1274_v7 = vadd.f32 %v7132_v8, %v1125_v0 }
 0xb67   :  { %v1943_v16 = vsel %vm1940_vm9, %v1942_v14, %v1938_v15  ;;  %v7257_v44 = vsel %vm1441_vm10, %v5436_v34, %v1440_v43 }
 0xb68   :  { %v1944_v18 = vmul.f32 %v5432_v51, %v1943_v16  ;;  %v1443_v48 = vmul.f32 %v7257_v44, %v1432_v46  ;;  %v1422_v4 = vadd.f32 %v7206_v27, %v1274_v7 }
 0xb6a   :  { %5073 = vmatmul.msk.f32.vlgmr.msra.gmra.mxu2 %vm1596_vm6, %v1944_v18  ;;  %v1445_v51 = vsub.f32 %v7231_v55, %v1443_v48  ;;  %v1427_v11 = vadd.f32 %v7223_v23, %v1422_v4  ;;  %v7274_v18 = vld [vmem:[#allocation32] ss:$0 sm:$0xff] }
 0xb6b   :  { %2285 = vmatpush.msra.mxu2 %v712_v50  ;;  %v700_v50 = vld [vmem:[#allocation17 + $0x8] sm:$0xff] }
 0xb6c   :  { %v1447_v45 = vmul.f32 %v1445_v51, %v1445_v51  ;;  %v1429_v53 = vadd.f32 %v7245_v19, %v1427_v11  ;;  %v705_v11 = vld [vmem:[#allocation20 + $0x8] sm:$0xff] }
 0xb6d   :  { %2286 = vmatpush.msra.mxu2 %v711_v58 }
 0xb6e   :  { %v1433_v8 = vsel %vm760_vm0, %v1429_v53, 0.0 }
 0xb6f   :  { %2287 = vmatpush.msra.mxu2 %v710_v61 }
 0xb71   :  { %2288 = vmatpush.msra.mxu2 %v709_v62 }
 0xb72   :  { %5077 = vmatmul.msk.f32.vlgmr.msrb.gmra.mxu2 %vm760_vm0, %v7228_v54 }
 0xb7a   :  { %5078 = vmatmul.msk.f32.gmra.mxu2 %vm760_vm0, %v7245_v19 }
 0xbed   :  { %v1971_v22 = vpop.f32.mrf.mxu2 }
 0xbee   :  { %5074 = vmatmul.msk.f32.vlgmr.msra.gmra.mxu3 %vm839_vm1, %v1971_v22  ;;  %v7276_v22 = vld [vmem:[#allocation34] ss:$0 sm:$0xff] }
 0xbef   :  { %2311 = vmatpush.msra.mxu3 %v717_v1  ;;  %v699_v1 = vld [vmem:[#allocation17] sm:$0xff] }
 0xbf1   :  { %2312 = vmatpush.msra.mxu3 %v716_v60 }
 0xbf3   :  { %2313 = vmatpush.msra.mxu3 %v715_v12 }
 0xbf5   :  { %v2071_v26 = vpop.f32.mrf.mxu2  ;;  %2314 = vmatpush.msra.mxu3 %v714_v63 }
 0xbf6   :  { %v2072_v25 = vadd.f32 %v5368_v29, %v2071_v26  ;;  %5079 = vmatmul.msk.f32.vlgmr.msrb.gmra.mxu3 %vm760_vm0, %v7228_v54  ;;  %v1449_v54 = vsel %vm760_vm0, %v1447_v45, 0.0  ;;  %v702_v45 = vld [vmem:[#allocation17 + $0x18] sm:$0xff] }
 0xbfd   :  { %v2074_v24 = vpop.f32.mrf.mxu2 }
 0xbfe   :  { %v2075_v30 = vadd.f32 %v5368_v29, %v2074_v24  ;;  %5080 = vmatmul.msk.f32.gmra.mxu3 %vm760_vm0, %v7245_v19 }
 0xc00   :  { %5081 = vmatpush.xpose.msk.msrb.mxu0 %vm760_vm0, %v2075_v30  ;;  %v5373_v30 = vld [vmem:[%s7916_s1] ss:$0 sm:$0xff] }
 0xc04   :  { %5082 = vmatpush.xpose.msk.msrb.mxu0 %vm760_vm0, %v2072_v25 }
 0xc07   :  { %5083 = vmatmul.msk.f32.vlgmr.msrb.gmra.mxu0 %vm760_vm0, %v2049_v32 }
 0xc08   :  { %2198 = vmatpush.msra.mxu0 %v702_v45 }
 0xc71   :  { %v7282_v29 = vpop.f32.mrf.mxu3 }
 0xc79   :  { %v2097_v24 = vpop.f32.mrf.mxu3 }
 0xc7a   :  { %v2098_v31 = vadd.f32 %v5373_v30, %v2097_v24 }
 0xc81   :  { %v2100_v17 = vpop.f32.mrf.mxu3 }
 0xc82   :  { %v2101_v25 = vadd.f32 %v5373_v30, %v2100_v17 }
 0xc84   :  { %v2129_v49 = vpop.f32.mrf.mxu0  ;;  %2174 = vmatpush.msrb.mxu1 %v2101_v25 }
 0xc85   :  { %v2132_v47 = vmul.f32 0.17677669, %v2129_v49 }
 0xc86   :  { %2175 = vmatpush.msrb.mxu1 %v2098_v31 }
 0xc87   :  { %v2133_v52 = vsel %vm1596_vm6, %v2132_v47, -inf }
 0xc88   :  { %2134 = vmax.xlane.f32.xlu1 %v2133_v52 }
 0xc90   :  { %1450 = vadd.xlane.f32.xlu1 %v1449_v54  ;;  %v701_v54 = vld [vmem:[#allocation17 + $0x10] sm:$0xff] }
 0xc91   :  { %2199 = vmatpush.msra.mxu0 %v701_v54 }
 0xc93   :  { %2200 = vmatpush.msra.mxu0 %v700_v50  ;;  %v5379_v50 = vld [vmem:[#allocation22] ss:$0 sm:$0xff] }
 0xc95   :  { %2201 = vmatpush.msra.mxu0 %v699_v1 }
 0xcfb   :  { %v2135_v3 = vpop.xlane.xlu1 %2134 }
 0xcfc   :  { %v2136_v57 = vsub.f32 %v2132_v47, %v2135_v3 }
 0xcfe   :  { %v2137_v55 = vmul.f32 1.442695, %v2136_v57 }
 0xd00   :  { %5437 = vpow2.f32 %v2137_v55 }
 0xd03   :  { %v1451_v10 = vpop.xlane.xlu1 %1450 }
 0xd04   :  { %v1455_v5 = vmul.f32 %v1451_v10, %v7257_v44 }
 0xd06   :  { %v5438_v6 = vpop.eup %5437  ;;  %v1457_v9 = vadd.f32 1e-05, %v1455_v5 }
 0xd07   :  { %v2139_v13 = vsel %vm1596_vm6, %v5438_v6, 0.0 }
 0xd08   :  { %5439 = vrsqrt.f32 %v1457_v9  ;;  %2140 = vadd.xlane.f32.xlu2 %v2139_v13  ;;  %vm1465_vm12 = vweird.f32 %v1457_v9  ;;  %v1776_v13 = vadd.f32 %v7212_v28, %v7235_v56  ;;  %v5375_v28 = vld [vmem:[#allocation28] ss:$0 sm:$0xff]  ;;  %v5374_v56 = vld [vmem:[#allocation25] ss:$0 sm:$0xff] }
 0xd0e   :  { %v5440_v2 = vpop.eup %5439 }
 0xd0f   :  { %v1460_v21 = vmul.f32 %v5440_v2, %v1457_v9  ;;  %vm1466_vm11 = vweird.f32 %v5440_v2  ;;  %v706_v9 = vld [vmem:[#allocation20 + $0x10] sm:$0xff] }
 0xd10   :  { %1434 = vadd.xlane.f32.xlu2 %v1433_v8  ;;  %vm1467_vm13 = vmor %vm1465_vm12, %vm1466_vm11  ;;  %v5370_v8 = vld [vmem:[%s7917_s10] ss:$0 sm:$0xff] }
 0xd11   :  { %v1461_v14 = vmul.f32 %v5440_v2, %v1460_v21 }
 0xd13   :  { %v1462_v27 = vmul.f32 0.5, %v1461_v14 }
 0xd15   :  { %v1463_v15 = vsub.f32 1.5, %v1462_v27  ;;  %v5376_v27 = vld [vmem:[#allocation19] ss:$0 sm:$0xff] }
 0xd17   :  { %v1464_v16 = vmul.f32 %v5440_v2, %v1463_v15 }
 0xd19   :  { %v1468_v23 = vsel %vm1467_vm13, %v5440_v2, %v1464_v16  ;;  %v1887_v2 = vadd.f32 %v7237_v59, %v1776_v13 }
 0xd1a   :  { %v1479_v20 = vmul.f32 %v1468_v23, %v1445_v51 }
 0xd1b   :  { %v1997_v21 = vadd.f32 %v7282_v29, %v1887_v2 }
 0xd1c   :  { %v1484_v19 = vmul.f32 %v7274_v18, %v1479_v20 }
 0xd1d   :  { %v2001_v14 = vadd.f32 %v5370_v8, %v1997_v21 }
 0xd1e   :  { %v1489_v26 = vadd.f32 %v7276_v22, %v1484_v19 }
 0xd20   :  { %5087 = vmatmul.msk.f32.vlgmr.msra.gmra.mxu2 %vm760_vm0, %v1489_v26  ;;  %5089 = vmatmul.msk.f32.vlgmr.msra.gmra.mxu3 %vm760_vm0, %v1489_v26 }
 0xd7b   :  { %v2141_v32 = vpop.xlane.xlu2 %2140 }
 0xd7c   :  { %5441 = vrcp.f32 %v2141_v32  ;;  %v2153_v38 = vand.u32 2147483648, %v2141_v32  ;;  %v2151_v41 = vand.u32 2147483647, %v2141_v32  ;;  %vm2147_vm15 = vweird.f32 %v2141_v32 }
 0xd7e   :  { %v2154_v48 = vor.u32 1.1754944e-38, %v2153_v38  ;;  %vm2152_vm3 = vcmp.eq.f32.partialorder %v2151_v41, 8.507059e+37 }
 0xd82   :  { %v5442_v33 = vpop.eup %5441 }
 0xd83   :  { %v2143_v34 = vmul.f32 %v5442_v33, %v2141_v32  ;;  %v1435_v35 = vpop.xlane.xlu2 %1434  ;;  %vm2148_vm14 = vweird.f32 %v5442_v33 }
 0xd84   :  { %v1444_v36 = vmul.f32 %v7257_v44, %v1435_v35  ;;  %vm2149_vm2 = vmor %vm2147_vm15, %vm2148_vm14 }
 0xd85   :  { %v2144_v37 = vsub.f32 1.0, %v2143_v34 }
 0xd86   :  { %v1446_v39 = vsub.f32 %v1429_v53, %v1444_v36  ;;  %v704_v53 = vld [vmem:[#allocation20] sm:$0xff] }
 0xd87   :  { %v2145_v40 = vmul.f32 %v5442_v33, %v2144_v37 }
 0xd88   :  { %v1448_v43 = vmul.f32 %v1446_v39, %v1446_v39 }
 0xd89   :  { %v2146_v46 = vadd.f32 %v5442_v33, %v2145_v40 }
 0xd8a   :  { %v1452_v49 = vsel %vm760_vm0, %v1448_v43, 0.0 }
 0xd8b   :  { %v2150_v47 = vsel %vm2149_vm2, %v5442_v33, %v2146_v46  ;;  %1453 = vadd.xlane.f32.xlu2 %v1452_v49  ;;  %v5377_v49 = vld [vmem:[#allocation35] ss:$0 sm:$0xff] }
 0xd8c   :  { %v2155_v51 = vsel %vm2152_vm3, %v2154_v48, %v2150_v47 }
 0xd8d   :  { %v2156_v52 = vmul.f32 %v5438_v6, %v2155_v51  ;;  %v707_v6 = vld [vmem:[#allocation20 + $0x18] sm:$0xff] }
 0xd8e   :  { %2256 = vmatpush.msra.mxu1 %v707_v6 }
 0xd8f   :  { %5084 = vmatmul.msk.f32.vlgmr.msrb.gmra.mxu1 %vm1596_vm6, %v2156_v52  ;;  %2878 = vst.msk [vmem:[#allocation50] sm:$0xff] %vm1596_vm6, %v2156_v52  ;;  %v5378_v52 = vld [vmem:[#allocation37] ss:$0 sm:$0xff] }
 0xd90   :  { %2257 = vmatpush.msra.mxu1 %v706_v9 }
 0xd92   :  { %2258 = vmatpush.msra.mxu1 %v705_v11 }
 0xd94   :  { %2259 = vmatpush.msra.mxu1 %v704_v53 }
 0xda3   :  { %v2316_v19 = vpop.f32.mrf.mxu3 }
 0xda4   :  { %v2317_v59 = vadd.f32 %v5375_v28, %v2316_v19 }
 0xdfe   :  { %v1454_v3 = vpop.xlane.xlu2 %1453 }
 0xdff   :  { %v1456_v57 = vmul.f32 %v1454_v3, %v7257_v44 }
 0xe01   :  { %v1458_v58 = vadd.f32 1e-05, %v1456_v57 }
 0xe03   :  { %5443 = vrsqrt.f32 %v1458_v58  ;;  %vm1475_vm5 = vweird.f32 %v1458_v58 }
 0xe09   :  { %v5444_v60 = vpop.eup %5443 }
 0xe0a   :  { %v1470_v61 = vmul.f32 %v5444_v60, %v1458_v58  ;;  %vm1476_vm4 = vweird.f32 %v5444_v60 }
 0xe0b   :  { %vm1477_vm7 = vmor %vm1475_vm5, %vm1476_vm4 }
 0xe0c   :  { %v1471_v12 = vmul.f32 %v5444_v60, %v1470_v61  ;;  %v2177_v55 = vpop.f32.mrf.mxu1 }
 0xe0d   :  { %5085 = vmatmul.msk.f32.vlgmr.msra.gmra.mxu0 %vm760_vm0, %v2177_v55 }
 0xe0e   :  { %v1472_v62 = vmul.f32 0.5, %v1471_v12 }
 0xe10   :  { %v1473_v63 = vsub.f32 1.5, %v1472_v62 }
 0xe12   :  { %v1474_v0 = vmul.f32 %v5444_v60, %v1473_v63 }
 0xe14   :  { %v1478_v7 = vsel %vm1477_vm7, %v5444_v60, %v1474_v0 }
 0xe15   :  { %v1480_v4 = vmul.f32 %v1478_v7, %v1446_v39 }
 0xe17   :  { %v1485_v10 = vmul.f32 %v7274_v18, %v1480_v4  ;;  %v2206_v18 = vadd.f32 %v7215_v42, %v2001_v14 }
 0xe19   :  { %v1490_v5 = vadd.f32 %v7276_v22, %v1485_v10  ;;  %v2290_v22 = vpop.f32.mrf.mxu2  ;;  %v719_v10 = vld [vmem:[#allocation29] sm:$0xff] }
 0xe1a   :  { %v2291_v42 = vadd.f32 %v5374_v56, %v2290_v22  ;;  %2528 = vmatpush.msrb.mxu3 %v719_v10 }
 0xe1b   :  { %5088 = vmatmul.msk.f32.gmra.mxu2 %vm760_vm0, %v1490_v5  ;;  %5090 = vmatmul.msk.f32.gmra.mxu3 %vm760_vm0, %v1490_v5 }
 0xe8a   :  { %v2203_v15 = vpop.f32.mrf.mxu0 }
 0xe8b   :  { %v2204_v16 = vadd.f32 %v5376_v27, %v2203_v15 }
 0xe8d   :  { %v2207_v23 = vadd.f32 %v2206_v18, %v2204_v16 }
 0xe8f   :  { %v2208_v20 = vsel %vm760_vm0, %v2207_v23, 0.0 }
 0xe90   :  { %2209 = vadd.xlane.f32.xlu0 %v2208_v20 }
 0xe9e   :  { %v2293_v26 = vpop.f32.mrf.mxu2  ;;  %v2319_v24 = vpop.f32.mrf.mxu3 }
 0xe9f   :  { %v7302_v30 = vadd.f32 %v5374_v56, %v2293_v26  ;;  %v2320_v29 = vadd.f32 %v5375_v28, %v2319_v24 }
 0xea1   :  { %5091 = vmatpush.xpose.msk.msrb.mxu0 %vm839_vm1, %v7302_v30  ;;  %2393 = vmatpush.msrb.mxu1 %v2320_v29  ;;  %v7306_v17 = vpack.i.bf16 %v2317_v59, %v2320_v29 }
 0xea3   :  { %2394 = vmatpush.msrb.mxu1 %v2317_v59 }
 0xea5   :  { %5092 = vmatpush.xpose.msk.msrb.mxu0 %vm839_vm1, %v2291_v42 }
 0xf03   :  { %v2210_v31 = vpop.xlane.xlu0 %2209 }
 0xf04   :  { %v2211_v25 = vmul.f32 %v2210_v31, %v7257_v44 }
 0xf06   :  { %v2212_v32 = vsub.f32 %v2207_v23, %v2211_v25 }
 0xf08   :  { %v2213_v33 = vmul.f32 %v2212_v32, %v2212_v32 }
 0xf0a   :  { %v2214_v34 = vsel %vm760_vm0, %v2213_v33, 0.0 }
 0xf0b   :  { %2215 = vadd.xlane.f32.xlu0 %v2214_v34 }
 0xf1f   :  { %2403 = vrot.lane.b32.xlu0 %v7302_v30, %s6552_s11 }
 0xf27   :  { %2537 = vrot.lane.b32.xlu0 %v7302_v30, %s6553_s26 }
 0xf2f   :  { %2645 = vrot.lane.b32.xlu0 %v2291_v42, %s6554_s8 }
 0xf7e   :  { %v2216_v35 = vpop.xlane.xlu0 %2215 }
 0xf7f   :  { %v2217_v36 = vmul.f32 %v2216_v35, %v7257_v44 }
 0xf81   :  { %v2218_v37 = vadd.f32 1e-05, %v2217_v36 }
 0xf83   :  { %5445 = vrsqrt.f32 %v2218_v37  ;;  %vm2225_vm9 = vweird.f32 %v2218_v37 }
 0xf89   :  { %v5446_v38 = vpop.eup %5445 }
 0xf8a   :  { %v2220_v39 = vmul.f32 %v5446_v38, %v2218_v37  ;;  %vm2226_vm8 = vweird.f32 %v5446_v38 }
 0xf8b   :  { %vm2227_vm10 = vmor %vm2225_vm9, %vm2226_vm8 }
 0xf8c   :  { %v2221_v40 = vmul.f32 %v5446_v38, %v2220_v39 }
 0xf8e   :  { %v2222_v41 = vmul.f32 0.5, %v2221_v40 }
 0xf90   :  { %v2223_v43 = vsub.f32 1.5, %v2222_v41 }
 0xf91   :  { %v2404_v46 = vpop.permute.xlu0 %2403 }
 0xf92   :  { %v2224_v48 = vmul.f32 %v5446_v38, %v2223_v43  ;;  %5095 = vmatpush.xpose.msk.msra.mxu0 %vm839_vm1, %v2404_v46 }
 0xf94   :  { %v2228_v47 = vsel %vm2227_vm10, %v5446_v38, %v2224_v48 }
 0xf95   :  { %v2229_v51 = vmul.f32 %v2228_v47, %v2212_v32 }
 0xf97   :  { %v2233_v45 = vmul.f32 %v5377_v49, %v2229_v51 }
 0xf99   :  { %v7318_v54 = vadd.f32 %v5378_v52, %v2233_v45  ;;  %v2538_v7 = vpop.permute.xlu0 %2537 }
 0xf9b   :  { %5086 = vmatmul.msk.f32.vlgmr.msra.gmra.mxu1 %vm760_vm0, %v7318_v54 }
 0xfa1   :  { %v2646_v23 = vpop.permute.xlu0 %2645 }
0x1018   :  { %v2261_v1 = vpop.f32.mrf.mxu1 }
0x1019   :  { %v2262_v3 = vadd.f32 %v5379_v50, %v2261_v1 }
0x101b   :  { %5093 = vmatmul.msk.f32.vlgmr.msrb.gmra.mxu0 %vm839_vm1, %v2262_v3 }
0x1098   :  { %v2348_v57 = vpop.f32.mrf.mxu0 }
0x1099   :  { %v2351_v58 = vmul.f32 0.35355338, %v2348_v57 }
0x109b   :  { %v2352_v60 = vsel %vm1596_vm6, %v2351_v58, -inf }
0x109c   :  { %2353 = vmax.xlane.f32.xlu1 %v2352_v60 }
0x10b5   :  { %2401 = vrot.lane.b32.xlu1 %v2291_v42, %s6552_s11 }
0x10bd   :  { %2535 = vrot.lane.b32.xlu1 %v2291_v42, %s6553_s26 }
0x10c5   :  { %2643 = vrot.lane.b32.xlu1 %v2262_v3, %s6554_s8 }
0x110f   :  { %v2354_v61 = vpop.xlane.xlu1 %2353 }
0x1110   :  { %v2355_v12 = vsub.f32 %v2351_v58, %v2354_v61 }
0x1112   :  { %v2356_v55 = vmul.f32 1.442695, %v2355_v12 }
0x1114   :  { %5447 = vpow2.f32 %v2356_v55 }
0x111a   :  { %v5448_v62 = vpop.eup %5447 }
0x111b   :  { %v2358_v63 = vsel %vm1596_vm6, %v5448_v62, 0.0 }
0x111c   :  { %2359 = vadd.xlane.f32.xlu2 %v2358_v63 }
0x1127   :  { %v2402_v0 = vpop.permute.xlu1 %2401 }
0x1128   :  { %5096 = vmatpush.xpose.msk.msra.mxu0 %vm839_vm1, %v2402_v0 }
0x112c   :  { %5101 = vmatpush.xpose.msk.msrb.mxu0 %vm839_vm1, %v2538_v7 }
0x112f   :  { %v2536_v4 = vpop.permute.xlu1 %2535 }
0x1130   :  { %5102 = vmatpush.xpose.msk.msrb.mxu0 %vm839_vm1, %v2536_v4 }
0x1134   :  { %2399 = vrot.lane.b32.xlu2 %v2262_v3, %s6552_s11 }
0x1137   :  { %v2644_v59 = vpop.permute.xlu1 %2643 }
0x113c   :  { %2647 = vrot.lane.b32.xlu2 %v7302_v30, %s6554_s8 }
0x1144   :  { %2533 = vrot.lane.b32.xlu2 %v2262_v3, %s6553_s26 }
0x118f   :  { %v2360_v5 = vpop.xlane.xlu2 %2359 }
0x1190   :  { %5449 = vrcp.f32 %v2360_v5  ;;  %v2372_v53 = vand.u32 2147483648, %v2360_v5  ;;  %v2370_v21 = vand.u32 2147483647, %v2360_v5  ;;  %vm2366_vm12 = vweird.f32 %v2360_v5 }
0x1192   :  { %v2373_v14 = vor.u32 1.1754944e-38, %v2372_v53  ;;  %vm2371_vm14 = vcmp.eq.f32.partialorder %v2370_v21, 8.507059e+37 }
0x1196   :  { %v5450_v6 = vpop.eup %5449 }
0x1197   :  { %v2362_v9 = vmul.f32 %v5450_v6, %v2360_v5  ;;  %v2400_v11 = vpop.permute.xlu2 %2399  ;;  %vm2367_vm11 = vweird.f32 %v5450_v6 }
0x1198   :  { %5097 = vmatmul.msk.f32.vlgmr.msra.gmra.mxu0 %vm839_vm1, %v2400_v11  ;;  %vm2368_vm13 = vmor %vm2366_vm12, %vm2367_vm11 }
0x1199   :  { %v2363_v13 = vsub.f32 1.0, %v2362_v9 }
0x119b   :  { %v2364_v2 = vmul.f32 %v5450_v6, %v2363_v13 }
0x119d   :  { %v2365_v8 = vadd.f32 %v5450_v6, %v2364_v2 }
0x119f   :  { %v2369_v27 = vsel %vm2368_vm13, %v5450_v6, %v2365_v8  ;;  %v2648_v15 = vpop.permute.xlu2 %2647 }
0x11a0   :  { %v2374_v16 = vsel %vm2371_vm14, %v2373_v14, %v2369_v27  ;;  %5106 = vmatpush.xpose.msk.msra.mxu3 %vm839_vm1, %v2648_v15 }
0x11a1   :  { %v2375_v18 = vmul.f32 %v5448_v62, %v2374_v16  ;;  %v720_v16 = vld [vmem:[#allocation29 + $0x8] sm:$0xff] }
0x11a2   :  { %2505 = vmatpush.msrb.mxu2 %v720_v16 }
0x11a3   :  { %5094 = vmatmul.msk.f32.vlgmr.msrb.gmra.mxu1 %vm1596_vm6, %v2375_v18  ;;  %v721_v18 = vld [vmem:[#allocation29 + $0x10] sm:$0xff] }
0x11a4   :  { %5107 = vmatpush.xpose.msk.msra.mxu3 %vm839_vm1, %v2646_v23  ;;  %2637 = vmatpush.msra.mxu2 %v721_v18 }
0x11a7   :  { %v2534_v20 = vpop.permute.xlu2 %2533 }
0x11a8   :  { %5103 = vmatmul.msk.f32.vlgmr.msrb.gmra.mxu0 %vm839_vm1, %v2534_v20 }
0x1215   :  { %v2428_v22 = vpop.f32.mrf.mxu0 }
0x1216   :  { %v2431_v19 = vmul.f32 0.35355338, %v2428_v22 }
0x1218   :  { %v2432_v28 = vsel %vm1596_vm6, %v2431_v19, -inf }
0x1219   :  { %2433 = vmax.xlane.f32.xlu0 %v2432_v28 }
0x1220   :  { %v2396_v56 = vpop.f32.mrf.mxu1 }
0x1221   :  { %5100 = vmatmul.msk.f32.vlgmr.msrb.gmra.mxu3 %vm839_vm1, %v2396_v56 }
0x1225   :  { %v2562_v26 = vpop.f32.mrf.mxu0 }
0x1226   :  { %v2565_v24 = vmul.f32 0.35355338, %v2562_v26 }
0x1228   :  { %v2566_v30 = vsel %vm1596_vm6, %v2565_v24, -inf }
0x1229   :  { %2567 = vmax.xlane.f32.xlu2 %v2566_v30  ;;  %5108 = vmatmul.msk.f32.vlgmr.msra.gmra.mxu3 %vm839_vm1, %v2644_v59 }
0x128c   :  { %v2434_v29 = vpop.xlane.xlu0 %2433 }
0x128d   :  { %v2435_v42 = vsub.f32 %v2431_v19, %v2434_v29 }
0x128f   :  { %v2436_v31 = vmul.f32 1.442695, %v2435_v42 }
0x1291   :  { %5451 = vpow2.f32 %v2436_v31 }
0x1297   :  { %v5452_v25 = vpop.eup %5451 }
0x1298   :  { %v2438_v32 = vsel %vm1596_vm6, %v5452_v25, 0.0 }
0x1299   :  { %2439 = vadd.xlane.f32.xlu0 %v2438_v32 }
0x129c   :  { %v2568_v33 = vpop.xlane.xlu2 %2567 }
0x129d   :  { %v2569_v34 = vsub.f32 %v2565_v24, %v2568_v33 }
0x129f   :  { %v2570_v35 = vmul.f32 1.442695, %v2569_v34  ;;  %v5552_v34 = vld [vmem:[%s7901_s21 + $0x18] sm:$0xff] }
0x12a1   :  { %5453 = vpow2.f32 %v2570_v35  ;;  %v5553_v35 = vld [vmem:[%s7901_s21 + $0x10] sm:$0xff] }
0x12a4   :  { %v7345_v36 = vpop.f32.mrf.mxu3 }
0x12a7   :  { %v5454_v37 = vpop.eup %5453 }
0x12a8   :  { %v2572_v38 = vsel %vm1596_vm6, %v5454_v37, 0.0 }
0x12a9   :  { %2573 = vadd.xlane.f32.xlu2 %v2572_v38  ;;  %v5555_v38 = vld [vmem:[%s7901_s21] sm:$0xff] }
0x12ac   :  { %v2672_v39 = vpop.f32.mrf.mxu3 }
0x12ad   :  { %v2675_v40 = vmul.f32 0.35355338, %v2672_v39  ;;  %5316 = vrot.lane.b32.xlu0 %v7306_v17, %s6552_s11  ;;  %v7366_v39 = vld [vmem:[%s7903_s12 + $0x10] sm:$0xff] }
0x12af   :  { %v2676_v41 = vsel %vm1596_vm6, %v2675_v40, -inf }
0x12b0   :  { %2677 = vmax.xlane.f32.xlu1 %v2676_v41  ;;  %v7371_v41 = vld [vmem:[%s7903_s12 + $0x18] sm:$0xff] }
0x12c1   :  { %5321 = vrot.lane.b32.xlu2 %v7306_v17, %s6553_s26 }
0x130c   :  { %v2440_v43 = vpop.xlane.xlu0 %2439 }
0x130d   :  { %5455 = vrcp.f32 %v2440_v43  ;;  %v2452_v52 = vand.u32 2147483648, %v2440_v43  ;;  %vm2446_vm2 = vweird.f32 %v2440_v43  ;;  %v2450_v45 = vand.u32 2147483647, %v2440_v43 }
0x130f   :  { %v2453_v3 = vor.u32 1.1754944e-38, %v2452_v52  ;;  %vm2451_vm4 = vcmp.eq.f32.partialorder %v2450_v45, 8.507059e+37  ;;  %v5560_v45 = vld [vmem:[%s7905_s20] ss:$0 sm:$0xff] }
0x1313   :  { %v5456_v46 = vpop.eup %5455 }
0x1314   :  { %v2442_v48 = vmul.f32 %v5456_v46, %v2440_v43  ;;  %vm2447_vm15 = vweird.f32 %v5456_v46  ;;  %v5556_v43 = vld [vmem:[%s7904_s18 + $0x18] sm:$0xff] }
0x1315   :  { %vm2448_vm3 = vmor %vm2446_vm2, %vm2447_vm15 }
0x1316   :  { %v2443_v49 = vsub.f32 1.0, %v2442_v48  ;;  %v5558_v48 = vld [vmem:[%s7904_s18 + $0x8] sm:$0xff] }
0x1318   :  { %v2444_v47 = vmul.f32 %v5456_v46, %v2443_v49  ;;  %v5559_v49 = vld [vmem:[%s7904_s18] sm:$0xff] }
0x131a   :  { %v2445_v51 = vadd.f32 %v5456_v46, %v2444_v47 }
0x131c   :  { %v2574_v50 = vpop.xlane.xlu2 %2573  ;;  %v2449_v1 = vsel %vm2448_vm3, %v5456_v46, %v2445_v51  ;;  %v5557_v46 = vld [vmem:[%s7904_s18 + $0x10] sm:$0xff]  ;;  %v7380_v51 = vld [vmem:[#allocation2 + $0x8] sm:$0xff] }
0x131d   :  { %5457 = vrcp.f32 %v2574_v50  ;;  %v2454_v58 = vsel %vm2451_vm4, %v2453_v3, %v2449_v1  ;;  %v2586_v6 = vand.u32 2147483648, %v2574_v50  ;;  %v2584_v13 = vand.u32 2147483647, %v2574_v50 }
0x131e   :  { %v2455_v62 = vmul.f32 %v5452_v25, %v2454_v58  ;;  %vm2580_vm7 = vweird.f32 %v2574_v50 }
0x131f   :  { %v5317_v57 = vpop.permute.xlu0 %5316  ;;  %v2587_v2 = vor.u32 1.1754944e-38, %v2586_v6  ;;  %vm2585_vm9 = vcmp.eq.f32.partialorder %v2584_v13, 8.507059e+37 }
0x1320   :  { %v5318_v60 = vunpack.i.l.bf16 %v5317_v57  ;;  %v5319_v61 = vunpack.i.h.bf16 %v5317_v57 }
0x1322   :  { %2481 = vmatpush.msra.mxu1 %v5318_v60 }
0x1323   :  { %v5458_v12 = vpop.eup %5457  ;;  %v2678_v55 = vpop.xlane.xlu1 %2677 }
0x1324   :  { %v2576_v63 = vmul.f32 %v5458_v12, %v2574_v50  ;;  %v2679_v0 = vsub.f32 %v2675_v40, %v2678_v55  ;;  %v5322_v7 = vpop.permute.xlu2 %5321  ;;  %2482 = vmatpush.msra.mxu1 %v5319_v61  ;;  %vm2581_vm5 = vweird.f32 %v5458_v12  ;;  %v722_v40 = vld [vmem:[#allocation29 + $0x18] sm:$0xff] }
0x1325   :  { %v5323_v4 = vunpack.i.l.bf16 %v5322_v7  ;;  %5098 = vmatmul.msk.f32.vlgmr.msra.gmra.mxu1 %vm1596_vm6, %v2455_v62  ;;  %v5324_v9 = vunpack.i.h.bf16 %v5322_v7  ;;  %vm2582_vm8 = vmor %vm2580_vm7, %vm2581_vm5 }
0x1326   :  { %v2577_v10 = vsub.f32 1.0, %v2576_v63  ;;  %v2680_v5 = vmul.f32 1.442695, %v2679_v0 }
0x1327   :  { %2613 = vmatpush.msrb.mxu1 %v5323_v4 }
0x1328   :  { %v2578_v11 = vmul.f32 %v5458_v12, %v2577_v10  ;;  %5459 = vpow2.f32 %v2680_v5  ;;  %v5561_v10 = vld [vmem:[%s7907_s9] ss:$0 sm:$0xff] }
0x1329   :  { %2614 = vmatpush.msrb.mxu1 %v5324_v9 }
0x132a   :  { %v2579_v53 = vadd.f32 %v5458_v12, %v2578_v11 }
0x132b   :  { %2747 = vmatpush.msra.mxu1 %v722_v40 }
0x132c   :  { %v2583_v21 = vsel %vm2582_vm8, %v5458_v12, %v2579_v53  ;;  %v5380_v12 = vld [vmem:[#allocation31] ss:$0 sm:$0xff] }
0x132d   :  { %v2588_v8 = vsel %vm2585_vm9, %v2587_v2, %v2583_v21 }
0x132e   :  { %v5460_v14 = vpop.eup %5459  ;;  %v2589_v27 = vmul.f32 %v5454_v37, %v2588_v8  ;;  %v5554_v37 = vld [vmem:[%s7901_s21 + $0x8] sm:$0xff] }
0x132f   :  { %v2682_v15 = vsel %vm1596_vm6, %v5460_v14, 0.0 }
0x1330   :  { %2683 = vadd.xlane.f32.xlu1 %v2682_v15  ;;  %5104 = vmatmul.msk.f32.vlgmr.msrb.gmra.mxu1 %vm1596_vm6, %v2589_v27 }
0x1331   :  { %2928 = vmatpush.msrb.mxu1 %v5556_v43 }
0x1333   :  { %2929 = vmatpush.msrb.mxu1 %v5557_v46 }
0x1335   :  { %2930 = vmatpush.msrb.mxu1 %v5558_v48 }
0x1337   :  { %2931 = vmatpush.msrb.mxu1 %v5559_v49 }
0x1349   :  { %5326 = vrot.lane.b32.xlu1 %v7306_v17, %s6554_s8 }
0x13a2   :  { %v2484_v23 = vpop.f32.mrf.mxu1 }
0x13a3   :  { %v2684_v20 = vpop.xlane.xlu1 %2683  ;;  %5099 = vmatmul.msk.f32.vlgmr.msrb.gmra.mxu2 %vm839_vm1, %v2484_v23 }
0x13a4   :  { %5461 = vrcp.f32 %v2684_v20  ;;  %v2696_v17 = vand.u32 2147483648, %v2684_v20  ;;  %vm2690_vm11 = vweird.f32 %v2684_v20  ;;  %v2694_v59 = vand.u32 2147483647, %v2684_v20 }
0x13a6   :  { %v2697_v29 = vor.u32 1.1754944e-38, %v2696_v17  ;;  %vm2695_vm13 = vcmp.eq.f32.partialorder %v2694_v59, 8.507059e+37  ;;  %v734_v17 = vld [vmem:[#allocation44 + $0x10] sm:$0xff]  ;;  %v733_v59 = vld [vmem:[#allocation44 + $0x8] sm:$0xff] }
0x13aa   :  { %v5462_v22 = vpop.eup %5461 }
0x13ab   :  { %v2686_v19 = vmul.f32 %v5462_v22, %v2684_v20  ;;  %vm2691_vm10 = vweird.f32 %v5462_v22 }
0x13ac   :  { %vm2692_vm12 = vmor %vm2690_vm11, %vm2691_vm10 }
0x13ad   :  { %v2687_v28 = vsub.f32 1.0, %v2686_v19  ;;  %v2616_v56 = vpop.f32.mrf.mxu1 }
0x13ae   :  { %5105 = vmatmul.msk.f32.vlgmr.msra.gmra.mxu2 %vm839_vm1, %v2616_v56  ;;  %v735_v56 = vld [vmem:[#allocation44 + $0x18] sm:$0xff] }
0x13af   :  { %v2688_v26 = vmul.f32 %v5462_v22, %v2687_v28  ;;  %2806 = vmatpush.msrb.mxu2 %v735_v56 }
0x13b1   :  { %v2689_v24 = vadd.f32 %v5462_v22, %v2688_v26  ;;  %2807 = vmatpush.msrb.mxu2 %v734_v17  ;;  %v748_v17 = vld [vmem:[%s6796_s30 + $0x58] sm:$0xff] }
0x13b3   :  { %v2693_v30 = vsel %vm2692_vm12, %v5462_v22, %v2689_v24  ;;  %2808 = vmatpush.msrb.mxu2 %v733_v59  ;;  %v747_v59 = vld [vmem:[%s6796_s30 + $0x50] sm:$0xff] }
0x13b4   :  { %v2698_v31 = vsel %vm2695_vm13, %v2697_v29, %v2693_v30  ;;  %v732_v29 = vld [vmem:[#allocation44] sm:$0xff] }
0x13b5   :  { %v2699_v33 = vmul.f32 %v5460_v14, %v2698_v31  ;;  %2809 = vmatpush.msrb.mxu2 %v732_v29 }
0x13bb   :  { %v5327_v42 = vpop.permute.xlu1 %5326 }
0x13bc   :  { %v5328_v25 = vunpack.i.l.bf16 %v5327_v42  ;;  %v5329_v32 = vunpack.i.h.bf16 %v5327_v42  ;;  %v5562_v42 = vld [vmem:[%s7902_s0 + $0x18] sm:$0xff] }
0x13bd   :  { %2948 = vmatpush.msra.mxu2 %v5562_v42  ;;  %v745_v42 = vld [vmem:[%s6796_s30 + $0x40] sm:$0xff] }
0x13be   :  { %2723 = vmatpush.msra.mxu0 %v5328_v25 }
0x13c0   :  { %2724 = vmatpush.msra.mxu0 %v5329_v32  ;;  %v5563_v32 = vld [vmem:[%s7902_s0 + $0x10] sm:$0xff] }
0x13c1   :  { %5109 = vmatmul.msk.f32.vlgmr.msra.gmra.mxu0 %vm1596_vm6, %v2699_v33  ;;  %2949 = vmatpush.msra.mxu2 %v5563_v32 }
0x13c2   :  { %2902 = vmatpush.msrb.mxu0 %v5552_v34  ;;  %v5564_v34 = vld [vmem:[%s7902_s0 + $0x8] sm:$0xff] }
0x13c3   :  { %2950 = vmatpush.msra.mxu2 %v5564_v34  ;;  %v743_v34 = vld [vmem:[%s6796_s30 + $0x30] sm:$0xff] }
0x13c4   :  { %2903 = vmatpush.msrb.mxu0 %v5553_v35  ;;  %v5565_v35 = vld [vmem:[%s7902_s0] sm:$0xff] }
0x13c5   :  { %2951 = vmatpush.msra.mxu2 %v5565_v35 }
0x13c6   :  { %2904 = vmatpush.msrb.mxu0 %v5554_v37 }
0x13c8   :  { %2905 = vmatpush.msrb.mxu0 %v5555_v38 }
0x13c9   :  { %5114 = vmatmul.msk.f32.vlgmr.msrb.gmra.mxu0 %vm760_vm0, %v7366_v39 }
0x13d1   :  { %5115 = vmatmul.msk.f32.gmra.mxu0 %vm760_vm0, %v7371_v41 }
0x1426   :  { %v2507_v57 = vpop.f32.mrf.mxu2 }
0x1427   :  { %v2531_v60 = vadd.f32 %v7345_v36, %v2507_v57 }
0x1431   :  { %v2639_v58 = vpop.f32.mrf.mxu2 }
0x1432   :  { %v2642_v61 = vadd.f32 %v2639_v58, %v2531_v60 }
0x143e   :  { %v2726_v47 = vpop.f32.mrf.mxu0 }
0x143f   :  { %5110 = vmatmul.msk.f32.vlgmr.msra.gmra.mxu1 %vm839_vm1, %v2726_v47 }
0x1446   :  { %v2907_v52 = vpop.f32.mrf.mxu0 }
0x1447   :  { %5116 = vmatmul.msk.f32.vlgmr.msrb.gmra.mxu1 %vm760_vm0, %v7380_v51  ;;  %v7385_v50 = vadd.f32 %v5560_v45, %v2907_v52 }
0x1449   :  { %3067 = vrot.lane.b32.xlu1 %v7385_v50, %s6552_s11 }
0x144e   :  { %v2910_v1 = vpop.f32.mrf.mxu0 }
0x144f   :  { %v7389_v3 = vadd.f32 %v5560_v45, %v2910_v1 }
0x1451   :  { %3069 = vrot.lane.b32.xlu2 %v7389_v3, %s6552_s11 }
0x14bb   :  { %v3068_v6 = vpop.permute.xlu1 %3067 }
0x14bc   :  { %v2749_v55 = vpop.f32.mrf.mxu1 }
0x14bd   :  { %v2752_v62 = vadd.f32 %v2749_v55, %v2642_v61 }
0x14bf   :  { %v2756_v63 = vadd.f32 %v5380_v12, %v2752_v62  ;;  %v5381_v12 = vld [vmem:[#allocation38] ss:$0 sm:$0xff] }
0x14c1   :  { %v7395_v0 = vadd.f32 %v2756_v63, %v7318_v54  ;;  %v3070_v54 = vpop.permute.xlu2 %3069 }
0x14c3   :  { %v2758_v7 = vsel %vm760_vm0, %v7395_v0, 0.0 }
0x14c4   :  { %v2933_v4 = vpop.f32.mrf.mxu1  ;;  %2759 = vadd.xlane.f32.xlu0 %v2758_v7 }
0x14c5   :  { %v7400_v5 = vadd.f32 %v5561_v10, %v2933_v4  ;;  %v5382_v4 = vld [vmem:[#allocation40] ss:$0 sm:$0xff] }
0x14c7   :  { %3247 = vrot.lane.b32.xlu1 %v7400_v5, %s6553_s26  ;;  %3071 = vrot.lane.b32.xlu2 %v7400_v5, %s6552_s11 }
0x14c8   :  { %5118 = vmatpush.xpose.msk.msra.mxu1 %vm839_vm1, %v7400_v5 }
0x14cb   :  { %5119 = vmatmul.msk.f32.vlgmr.msra.gmra.mxu1 %vm839_vm1, %v7385_v50 }
0x14cf   :  { %3243 = vrot.lane.b32.xlu2 %v7385_v50, %s6553_s26  ;;  %3245 = vrot.lane.b32.xlu1 %v7389_v3, %s6553_s26 }
0x14d3   :  { %5120 = vmatmul.msk.f32.gmra.mxu1 %vm839_vm1, %v7389_v3 }
0x1521   :  { %v3072_v36 = vpop.permute.xlu2 %3071 }
0x1522   :  { %5123 = vmatpush.xpose.msk.msra.mxu0 %vm839_vm1, %v3072_v36 }
0x1525   :  { %5124 = vmatmul.msk.f32.vlgmr.msra.gmra.mxu0 %vm839_vm1, %v3068_v6 }
0x1529   :  { %v3244_v2 = vpop.permute.xlu2 %3243 }
0x152d   :  { %5125 = vmatmul.msk.f32.gmra.mxu0 %vm839_vm1, %v3070_v54 }
0x1537   :  { %v2760_v9 = vpop.xlane.xlu0 %2759 }
0x1538   :  { %v2761_v11 = vmul.f32 %v2760_v9, %v7257_v44 }
0x1539   :  { %v3248_v13 = vpop.permute.xlu1 %3247 }
0x153a   :  { %v7421_v53 = vsub.f32 %v7395_v0, %v2761_v11  ;;  %5132 = vmatpush.xpose.msk.msrb.mxu0 %vm839_vm1, %v3248_v13 }
0x153c   :  { %v2763_v21 = vmul.f32 %v7421_v53, %v7421_v53 }
0x153d   :  { %5133 = vmatmul.msk.f32.vlgmr.msrb.gmra.mxu0 %vm839_vm1, %v3244_v2 }
0x153e   :  { %v2764_v8 = vsel %vm760_vm0, %v2763_v21, 0.0 }
0x153f   :  { %2765 = vadd.xlane.f32.xlu2 %v2764_v8 }
0x1541   :  { %v3246_v14 = vpop.permute.xlu1 %3245 }
0x1545   :  { %5134 = vmatmul.msk.f32.gmra.mxu0 %vm839_vm1, %v3246_v14 }
0x1548   :  { %v2982_v27 = vpop.f32.mrf.mxu1 }
0x1549   :  { %v2988_v15 = vmul.f32 0.35355338, %v2982_v27 }
0x154b   :  { %v2990_v16 = vsel %vm839_vm1, %v2988_v15, -inf }
0x154c   :  { %2991 = vmax.xlane.f32.xlu1 %v2990_v16 }
0x1550   :  { %v2985_v18 = vpop.f32.mrf.mxu1 }
0x1551   :  { %v2989_v23 = vmul.f32 0.35355338, %v2985_v18 }
0x1553   :  { %v2993_v20 = vsel %vm839_vm1, %v2989_v23, -inf }
0x1554   :  { %2994 = vmax.xlane.f32.xlu0 %v2993_v20 }
0x15a2   :  { %v3096_v22 = vpop.f32.mrf.mxu0 }
0x15a3   :  { %v7431_v19 = vmul.f32 0.35355338, %v3096_v22  ;;  %v751_v22 = vld [vmem:[%s6796_s30 + $0x70] sm:$0xff] }
0x15a5   :  { %v3104_v28 = vsel %vm839_vm1, %v7431_v19, -inf }
0x15a6   :  { %3105 = vmax.xlane.f32.xlu0 %v3104_v28 }
0x15aa   :  { %v3099_v26 = vpop.f32.mrf.mxu0 }
0x15ab   :  { %v7435_v24 = vmul.f32 0.35355338, %v3099_v26  ;;  %v749_v26 = vld [vmem:[%s6796_s30 + $0x60] sm:$0xff] }
0x15ad   :  { %v3107_v30 = vsel %vm839_vm1, %v7435_v24, -inf }
0x15ae   :  { %3108 = vmax.xlane.f32.xlu0 %v3107_v30  ;;  %v746_v30 = vld [vmem:[%s6796_s30 + $0x48] sm:$0xff] }
0x15b2   :  { %v2766_v31 = vpop.xlane.xlu2 %2765 }
0x15b3   :  { %v2767_v25 = vmul.f32 %v2766_v31, %v7257_v44 }
0x15b5   :  { %v2768_v33 = vadd.f32 1e-05, %v2767_v25  ;;  %v744_v25 = vld [vmem:[%s6796_s30 + $0x38] sm:$0xff] }
0x15b7   :  { %5463 = vrsqrt.f32 %v2768_v33  ;;  %vm2775_vm15 = vweird.f32 %v2768_v33 }
0x15ba   :  { %v3272_v37 = vpop.f32.mrf.mxu0 }
0x15bb   :  { %v3278_v38 = vmul.f32 0.35355338, %v3272_v37  ;;  %v742_v37 = vld [vmem:[%s6796_s30 + $0x28] sm:$0xff] }
0x15bd   :  { %v5464_v40 = vpop.eup %5463  ;;  %v3280_v43 = vsel %vm839_vm1, %v3278_v38, -inf }
0x15be   :  { %v2770_v46 = vmul.f32 %v5464_v40, %v2768_v33  ;;  %3281 = vmax.xlane.f32.xlu0 %v3280_v43  ;;  %vm2776_vm14 = vweird.f32 %v5464_v40  ;;  %v740_v43 = vld [vmem:[%s6796_s30 + $0x18] sm:$0xff] }
0x15bf   :  { %v2992_v48 = vpop.xlane.xlu1 %2991  ;;  %vm2777_vm2 = vmor %vm2775_vm15, %vm2776_vm14 }
0x15c0   :  { %v2771_v49 = vmul.f32 %v5464_v40, %v2770_v46  ;;  %v2996_v47 = vsub.f32 %v2988_v15, %v2992_v48  ;;  %v739_v48 = vld [vmem:[%s6796_s30 + $0x10] sm:$0xff] }
0x15c2   :  { %v2772_v52 = vmul.f32 0.5, %v2771_v49  ;;  %v2998_v45 = vmul.f32 1.442695, %v2996_v47  ;;  %v3275_v1 = vpop.f32.mrf.mxu0 }
0x15c3   :  { %v7445_v57 = vmul.f32 0.35355338, %v3275_v1 }
0x15c4   :  { %v2773_v58 = vsub.f32 1.5, %v2772_v52  ;;  %5465 = vpow2.f32 %v2998_v45  ;;  %v738_v52 = vld [vmem:[%s6796_s30 + $0x8] sm:$0xff] }
0x15c5   :  { %v3283_v60 = vsel %vm839_vm1, %v7445_v57, -inf }
0x15c6   :  { %v2774_v61 = vmul.f32 %v5464_v40, %v2773_v58  ;;  %3284 = vmax.xlane.f32.xlu2 %v3283_v60  ;;  %v5566_v60 = vld [vmem:[%s7908_s28] sm:$0xff] }
0x15c7   :  { %v2995_v55 = vpop.xlane.xlu0 %2994 }
0x15c8   :  { %v2778_v62 = vsel %vm2777_vm2, %v5464_v40, %v2774_v61  ;;  %v2997_v63 = vsub.f32 %v2989_v23, %v2995_v55  ;;  %v752_v23 = vld [vmem:[%s6796_s30 + $0x78] sm:$0xff]  ;;  %v741_v40 = vld [vmem:[%s6796_s30 + $0x20] sm:$0xff] }
0x15c9   :  { %v2779_v7 = vmul.f32 %v2778_v62, %v7421_v53  ;;  %2826 = vmatpush.msrb.mxu3 %v752_v23  ;;  %v5383_v62 = vld [vmem:[#allocation46] ss:$0 sm:$0xff] }
0x15ca   :  { %v7450_v10 = vpop.eup %5465  ;;  %v3000_v54 = vmul.f32 1.442695, %v2997_v63 }
0x15cb   :  { %v2783_v36 = vmul.f32 %v5381_v12, %v2779_v7  ;;  %v3002_v6 = vsel %vm839_vm1, %v7450_v10, 0.0  ;;  %2827 = vmatpush.msrb.mxu3 %v751_v22 }
0x15cc   :  { %5467 = vpow2.f32 %v3000_v54  ;;  %3003 = vadd.xlane.f32.xlu0 %v3002_v6 }
0x15cd   :  { %v2787_v9 = vadd.f32 %v5382_v4, %v2783_v36 }
0x15cf   :  { %5111 = vmatmul.msk.f32.vlgmr.msrb.gmra.mxu2 %vm760_vm0, %v2787_v9 }
0x15d2   :  { %v7455_v11 = vpop.eup %5467 }
0x15d3   :  { %v3005_v13 = vsel %vm839_vm1, %v7455_v11, 0.0 }
0x15d4   :  { %3006 = vadd.xlane.f32.xlu1 %v3005_v13 }
0x15d7   :  { %5117 = vmatmul.msk.f32.vlgmr.msra.gmra.mxu2 %vm760_vm0, %v7380_v51 }
0x1619   :  { %v3106_v53 = vpop.xlane.xlu0 %3105 }
0x161a   :  { %v3110_v2 = vsub.f32 %v7431_v19, %v3106_v53  ;;  %v750_v19 = vld [vmem:[%s6796_s30 + $0x68] sm:$0xff] }
0x161b   :  { %2828 = vmatpush.msrb.mxu3 %v750_v19 }
0x161c   :  { %v3112_v21 = vmul.f32 1.442695, %v3110_v2 }
0x161d   :  { %2829 = vmatpush.msrb.mxu3 %v749_v26 }
0x161e   :  { %5469 = vpow2.f32 %v3112_v21 }
0x161f   :  { %2830 = vmatpush.msrb.mxu3 %v748_v17  ;;  %v5568_v17 = vld [vmem:[%s7908_s28 + $0x8] sm:$0xff] }
0x1621   :  { %v3109_v8 = vpop.xlane.xlu0 %3108  ;;  %2831 = vmatpush.msrb.mxu3 %v747_v59 }
0x1622   :  { %v3111_v14 = vsub.f32 %v7435_v24, %v3109_v8 }
0x1623   :  { %2832 = vmatpush.msrb.mxu3 %v746_v30 }
0x1624   :  { %v7463_v27 = vpop.eup %5469  ;;  %v3114_v15 = vmul.f32 1.442695, %v3111_v14 }
0x1625   :  { %v3116_v16 = vsel %vm839_vm1, %v7463_v27, 0.0  ;;  %2833 = vmatpush.msrb.mxu3 %v745_v42 }
0x1626   :  { %5471 = vpow2.f32 %v3114_v15  ;;  %3117 = vadd.xlane.f32.xlu2 %v3116_v16 }
0x1627   :  { %2834 = vmatpush.msrb.mxu3 %v744_v25 }
0x1629   :  { %2835 = vmatpush.msrb.mxu3 %v743_v34 }
0x162b   :  { %2836 = vmatpush.msrb.mxu3 %v742_v37 }
0x162c   :  { %v7467_v18 = vpop.eup %5471 }
0x162d   :  { %v3119_v20 = vsel %vm839_vm1, %v7467_v18, 0.0  ;;  %2837 = vmatpush.msrb.mxu3 %v741_v40 }
0x162e   :  { %3120 = vadd.xlane.f32.xlu0 %v3119_v20  ;;  %v5567_v20 = vld [vmem:[%s7906_s25] ss:$0 sm:$0xff] }
0x162f   :  { %2838 = vmatpush.msrb.mxu3 %v740_v43 }
0x1631   :  { %v3282_v28 = vpop.xlane.xlu0 %3281  ;;  %2839 = vmatpush.msrb.mxu3 %v739_v48 }
0x1632   :  { %v3286_v56 = vsub.f32 %v3278_v38, %v3282_v28 }
0x1633   :  { %2840 = vmatpush.msrb.mxu3 %v738_v52 }
0x1634   :  { %v3288_v24 = vmul.f32 1.442695, %v3286_v56 }
0x1636   :  { %5473 = vpow2.f32 %v3288_v24 }
0x1639   :  { %v3285_v29 = vpop.xlane.xlu2 %3284 }
0x163a   :  { %v3287_v31 = vsub.f32 %v7445_v57, %v3285_v29  ;;  %v737_v57 = vld [vmem:[%s6796_s30] sm:$0xff] }
0x163b   :  { %2841 = vmatpush.msrb.mxu3 %v737_v57 }
0x163c   :  { %v7481_v32 = vpop.eup %5473  ;;  %v3290_v33 = vmul.f32 1.442695, %v3287_v31 }
0x163d   :  { %v3292_v35 = vsel %vm839_vm1, %v7481_v32, 0.0  ;;  %3235 = vmatpush.msra.mxu3 %v5566_v60 }
0x163e   :  { %5475 = vpow2.f32 %v3290_v33  ;;  %3293 = vadd.xlane.f32.xlu1 %v3292_v35 }
0x163f   :  { %v3004_v38 = vpop.xlane.xlu0 %3003 }
0x1640   :  { %5477 = vrcp.f32 %v3004_v38  ;;  %v3019_v54 = vand.u32 2147483648, %v3004_v38  ;;  %vm3013_vm4 = vweird.f32 %v3004_v38  ;;  %v3017_v6 = vand.u32 2147483647, %v3004_v38 }
0x1642   :  { %v3020_v2 = vor.u32 1.1754944e-38, %v3019_v54  ;;  %vm3018_vm7 = vcmp.eq.f32.partialorder %v3017_v6, 8.507059e+37 }
0x1644   :  { %v7489_v46 = vpop.eup %5475 }
0x1645   :  { %v3295_v49 = vsel %vm839_vm1, %v7489_v46, 0.0 }
0x1646   :  { %v5478_v47 = vpop.eup %5477  ;;  %3296 = vadd.xlane.f32.xlu0 %v3295_v49 }
0x1647   :  { %v3009_v45 = vmul.f32 %v5478_v47, %v3004_v38  ;;  %v3007_v1 = vpop.xlane.xlu1 %3006  ;;  %vm3014_vm3 = vweird.f32 %v5478_v47 }
0x1648   :  { %5479 = vrcp.f32 %v3007_v1  ;;  %vm3015_vm5 = vmor %vm3013_vm4, %vm3014_vm3  ;;  %v3034_v23 = vand.u32 2147483648, %v3007_v1  ;;  %vm3028_vm9 = vweird.f32 %v3007_v1  ;;  %v3032_v56 = vand.u32 2147483647, %v3007_v1 }
0x1649   :  { %v3010_v58 = vsub.f32 1.0, %v3009_v45 }
0x164a   :  { %v3035_v24 = vor.u32 1.1754944e-38, %v3034_v23  ;;  %vm3033_vm11 = vcmp.eq.f32.partialorder %v3032_v56, 8.507059e+37 }
0x164b   :  { %v3011_v12 = vmul.f32 %v5478_v47, %v3010_v58 }
0x164d   :  { %v3012_v63 = vadd.f32 %v5478_v47, %v3011_v12 }
0x164e   :  { %v5480_v61 = vpop.eup %5479 }
0x164f   :  { %v3024_v55 = vmul.f32 %v5480_v61, %v3007_v1  ;;  %v3016_v13 = vsel %vm3015_vm5, %v5478_v47, %v3012_v63  ;;  %vm3029_vm8 = vweird.f32 %v5480_v61 }
0x1650   :  { %v3021_v8 = vsel %vm3018_vm7, %v3020_v2, %v3016_v13  ;;  %vm3030_vm10 = vmor %vm3028_vm9, %vm3029_vm8 }
0x1651   :  { %v3025_v7 = vsub.f32 1.0, %v3024_v55  ;;  %v3022_v28 = vmul.f32 %v7450_v10, %v3021_v8  ;;  %v5569_v10 = vld [vmem:[%s7908_s28 + $0x10] sm:$0xff] }
0x1652   :  { %v2811_v4 = vpop.f32.mrf.mxu2 }
0x1653   :  { %v2812_v36 = vadd.f32 %v5383_v62, %v2811_v4  ;;  %v3026_v53 = vmul.f32 %v5480_v61, %v3025_v7 }
0x1655   :  { %v2815_v9 = vmul.f32 0.044715, %v2812_v36  ;;  %v3027_v16 = vadd.f32 %v5480_v61, %v3026_v53  ;;  %v2814_v42 = vmul.f32 0.5, %v2812_v36 }
0x1657   :  { %v2816_v21 = vmul.f32 %v2815_v9, %v2812_v36  ;;  %v3031_v26 = vsel %vm3030_vm10, %v5480_v61, %v3027_v16 }
0x1658   :  { %v3036_v59 = vsel %vm3033_vm11, %v3035_v24, %v3031_v26 }
0x1659   :  { %v2817_v14 = vmul.f32 %v2816_v21, %v2812_v36  ;;  %v3037_v30 = vmul.f32 %v7455_v11, %v3036_v59 }
0x165a   :  { %v2953_v15 = vpop.f32.mrf.mxu2  ;;  %3395 = vrot.lane.b32.xlu0 %v7400_v5, %s6554_s8 }
0x165b   :  { %v7500_v22 = vadd.f32 %v5567_v20, %v2953_v15  ;;  %v2818_v19 = vadd.f32 %v2817_v14, %v2812_v36 }
0x165d   :  { %3059 = vmatpush.msrb.mxu2 %v7500_v22  ;;  %3153 = vrot.lane.b32.xlu2 %v7500_v22, %s6552_s11  ;;  %v2819_v5 = vmul.f32 0.7978846, %v2818_v19 }
0x165e   :  { %3328 = vrot.lane.b32.xlu1 %v7500_v22, %s6553_s26  ;;  %5121 = vmatmul.msk.f32.vlgmr.msrb.gmra.mxu2 %vm839_vm1, %v3022_v28 }
0x165f   :  { %5481 = vtanh.f32 %v2819_v5  ;;  %3206 = vmatpush.msra.mxu2 %v5568_v17 }
0x1661   :  { %3381 = vmatpush.msrb.mxu2 %v5569_v10  ;;  %v5570_v10 = vld [vmem:[%s7908_s28 + $0x18] sm:$0xff] }
0x1665   :  { %v5482_v29 = vpop.eup %5481  ;;  %3391 = vrot.lane.b32.xlu2 %v7385_v50, %s6554_s8 }
0x1666   :  { %3393 = vrot.lane.b32.xlu1 %v7389_v3, %s6554_s8  ;;  %5122 = vmatmul.msk.f32.gmra.mxu2 %vm839_vm1, %v3037_v30  ;;  %v2821_v31 = vadd.f32 1.0, %v5482_v29 }
0x1668   :  { %v2822_v25 = vmul.f32 %v2821_v31, %v2814_v42  ;;  %v5572_v42 = vld [vmem:[#allocation7 + $0x10] sm:$0xff]  ;;  %v5573_v31 = vld [vmem:[#allocation7 + $0x8] sm:$0xff] }
0x166a   :  { %2842 = vmatmul.f32.vlgmr.msrb.gmra.mxu3 %v2822_v25 }
0x1699   :  { %v3118_v33 = vpop.xlane.xlu2 %3117 }
0x169a   :  { %5483 = vrcp.f32 %v3118_v33  ;;  %v3133_v3 = vand.u32 2147483648, %v3118_v33  ;;  %vm3127_vm13 = vweird.f32 %v3118_v33  ;;  %v3131_v49 = vand.u32 2147483647, %v3118_v33 }
0x169c   :  { %v3134_v1 = vor.u32 1.1754944e-38, %v3133_v3  ;;  %vm3132_vm15 = vcmp.eq.f32.partialorder %v3131_v49, 8.507059e+37 }
0x16a0   :  { %v5484_v34 = vpop.eup %5483 }
0x16a1   :  { %v3123_v35 = vmul.f32 %v5484_v34, %v3118_v33  ;;  %v3121_v37 = vpop.xlane.xlu0 %3120  ;;  %vm3128_vm12 = vweird.f32 %v5484_v34  ;;  %v5574_v33 = vld [vmem:[#allocation7] sm:$0xff] }
0x16a2   :  { %5485 = vrcp.f32 %v3121_v37  ;;  %vm3129_vm14 = vmor %vm3127_vm13, %vm3128_vm12  ;;  %v3148_v60 = vand.u32 2147483648, %v3121_v37  ;;  %vm3142_vm3 = vweird.f32 %v3121_v37  ;;  %v3146_v55 = vand.u32 2147483647, %v3121_v37 }
0x16a3   :  { %v3124_v11 = vsub.f32 1.0, %v3123_v35 }
0x16a4   :  { %v3149_v4 = vor.u32 1.1754944e-38, %v3148_v60  ;;  %vm3147_vm5 = vcmp.eq.f32.partialorder %v3146_v55, 8.507059e+37  ;;  %v5579_v55 = vld [vmem:[%s7909_s14] ss:$0 sm:$0xff] }
0x16a5   :  { %v3125_v40 = vmul.f32 %v5484_v34, %v3124_v11  ;;  %v5576_v11 = vld [vmem:[#allocation5 + $0x10] sm:$0xff] }
0x16a7   :  { %v3126_v50 = vadd.f32 %v5484_v34, %v3125_v40 }
0x16a8   :  { %v5486_v38 = vpop.eup %5485 }
0x16a9   :  { %v3138_v43 = vmul.f32 %v5486_v38, %v3121_v37  ;;  %v3130_v47 = vsel %vm3129_vm14, %v5484_v34, %v3126_v50  ;;  %vm3143_vm2 = vweird.f32 %v5486_v38  ;;  %v5575_v37 = vld [vmem:[#allocation5 + $0x18] sm:$0xff] }
0x16aa   :  { %v3135_v57 = vsel %vm3132_vm15, %v3134_v1, %v3130_v47  ;;  %vm3144_vm4 = vmor %vm3142_vm3, %vm3143_vm2 }
0x16ab   :  { %v3139_v48 = vsub.f32 1.0, %v3138_v43  ;;  %v3136_v12 = vmul.f32 %v7463_v27, %v3135_v57  ;;  %v5578_v43 = vld [vmem:[#allocation5] sm:$0xff] }
0x16ad   :  { %v3140_v52 = vmul.f32 %v5486_v38, %v3139_v48 }
0x16af   :  { %v3141_v58 = vadd.f32 %v5486_v38, %v3140_v52 }
0x16b1   :  { %v3294_v45 = vpop.xlane.xlu1 %3293  ;;  %v3145_v7 = vsel %vm3144_vm4, %v5486_v38, %v3141_v58  ;;  %v5577_v38 = vld [vmem:[#allocation5 + $0x8] sm:$0xff] }
0x16b2   :  { %5487 = vrcp.f32 %v3294_v45  ;;  %v3150_v36 = vsel %vm3147_vm5, %v3149_v4, %v3145_v7  ;;  %v3309_v8 = vand.u32 2147483648, %v3294_v45  ;;  %vm3303_vm8 = vweird.f32 %v3294_v45 }
0x16b3   :  { %v3151_v9 = vmul.f32 %v7467_v18, %v3150_v36  ;;  %v3307_v14 = vand.u32 2147483647, %v3294_v45 }
0x16b4   :  { %v3310_v23 = vor.u32 1.1754944e-38, %v3309_v8 }
0x16b5   :  { %vm3308_vm10 = vcmp.eq.f32.partialorder %v3307_v14, 8.507059e+37 }
0x16b7   :  { %v3154_v61 = vpop.permute.xlu2 %3153 }
0x16b8   :  { %v5488_v62 = vpop.eup %5487  ;;  %3177 = vmatpush.msrb.mxu1 %v3154_v61 }
0x16b9   :  { %5126 = vmatmul.msk.f32.vlgmr.msrb.gmra.mxu1 %vm839_vm1, %v3136_v12  ;;  %v3297_v63 = vpop.xlane.xlu0 %3296  ;;  %v3299_v54 = vmul.f32 %v5488_v62, %v3294_v45  ;;  %vm3304_vm7 = vweird.f32 %v5488_v62 }
0x16ba   :  { %5489 = vrcp.f32 %v3297_v63  ;;  %vm3305_vm9 = vmor %vm3303_vm8, %vm3304_vm7  ;;  %v3324_v28 = vand.u32 2147483648, %v3297_v63  ;;  %vm3318_vm12 = vweird.f32 %v3297_v63  ;;  %v3322_v5 = vand.u32 2147483647, %v3297_v63 }
0x16bb   :  { %v3300_v6 = vsub.f32 1.0, %v3299_v54 }
0x16bc   :  { %v3325_v17 = vor.u32 1.1754944e-38, %v3324_v28  ;;  %vm3323_vm14 = vcmp.eq.f32.partialorder %v3322_v5, 8.507059e+37  ;;  %v5582_v5 = vld [vmem:[#allocation8 + $0x10] sm:$0xff] }
0x16bd   :  { %v3301_v27 = vmul.f32 %v5488_v62, %v3300_v6 }
0x16bf   :  { %v3302_v2 = vadd.f32 %v5488_v62, %v3301_v27  ;;  %v3392_v34 = vpop.permute.xlu2 %3391  ;;  %v5580_v27 = vld [vmem:[%s7910_s19] ss:$0 sm:$0xff] }
0x16c0   :  { %v5490_v13 = vpop.eup %5489 }
0x16c1   :  { %5127 = vmatmul.msk.f32.gmra.mxu1 %vm839_vm1, %v3151_v9  ;;  %v3314_v53 = vmul.f32 %v5490_v13, %v3297_v63  ;;  %v3306_v15 = vsel %vm3305_vm9, %v5488_v62, %v3302_v2  ;;  %vm3319_vm11 = vweird.f32 %v5490_v13 }
0x16c2   :  { %v3311_v19 = vsel %vm3308_vm10, %v3310_v23, %v3306_v15  ;;  %vm3320_vm13 = vmor %vm3318_vm12, %vm3319_vm11 }
0x16c3   :  { %v3315_v21 = vsub.f32 1.0, %v3314_v53  ;;  %v3312_v56 = vmul.f32 %v7481_v32, %v3311_v19  ;;  %v5571_v32 = vld [vmem:[#allocation7 + $0x18] sm:$0xff] }
0x16c5   :  { %v3316_v16 = vmul.f32 %v5490_v13, %v3315_v21 }
0x16c7   :  { %v3317_v18 = vadd.f32 %v5490_v13, %v3316_v16 }
0x16c9   :  { %v3321_v24 = vsel %vm3320_vm13, %v5490_v13, %v3317_v18  ;;  %v5581_v18 = vld [vmem:[#allocation8 + $0x18] sm:$0xff] }
0x16ca   :  { %v3326_v59 = vsel %vm3323_vm14, %v3325_v17, %v3321_v24  ;;  %v5584_v24 = vld [vmem:[#allocation8] sm:$0xff] }
0x16cb   :  { %v3327_v30 = vmul.f32 %v7489_v46, %v3326_v59 }
0x16cc   :  { %v3396_v20 = vpop.permute.xlu0 %3395 }
0x16cd   :  { %5139 = vmatpush.xpose.msk.msrb.mxu3 %vm839_vm1, %v3396_v20 }
0x16d0   :  { %v3329_v26 = vpop.permute.xlu1 %3328 }
0x16d1   :  { %3352 = vmatpush.msra.mxu1 %v3329_v26  ;;  %v5583_v26 = vld [vmem:[#allocation8 + $0x8] sm:$0xff] }
0x16d2   :  { %5135 = vmatmul.msk.f32.vlgmr.msra.gmra.mxu1 %vm839_vm1, %v3312_v56 }
0x16d3   :  { %3529 = vmatpush.msrb.mxu1 %v5570_v10 }
0x16d8   :  { %v3394_v46 = vpop.permute.xlu1 %3393 }
0x16da   :  { %5136 = vmatmul.msk.f32.gmra.mxu1 %vm839_vm1, %v3327_v30 }
0x16e1   :  { %v3061_v29 = vpop.f32.mrf.mxu2 }
0x16e2   :  { %5130 = vmatmul.msk.f32.vlgmr.msra.gmra.mxu3 %vm839_vm1, %v3061_v29 }
0x16e3   :  { %3623 = vmatpush.msra.mxu3 %v5571_v32 }
0x16e5   :  { %3624 = vmatpush.msra.mxu3 %v5572_v42 }
0x16e7   :  { %3625 = vmatpush.msra.mxu3 %v5573_v31 }
0x16e9   :  { %v3064_v25 = vpop.f32.mrf.mxu2  ;;  %3626 = vmatpush.msra.mxu3 %v5574_v33 }
0x16ea   :  { %5131 = vmatmul.msk.f32.gmra.mxu3 %vm839_vm1, %v3064_v25 }
0x16ed   :  { %v7539_v3 = vpop.f32.mrf.mxu3 }
0x16f2   :  { %5140 = vmatmul.msk.f32.vlgmr.msrb.gmra.mxu3 %vm839_vm1, %v3392_v34 }
0x16fa   :  { %5141 = vmatmul.msk.f32.gmra.mxu3 %vm839_vm1, %v3394_v46 }
0x1702   :  { %5147 = vmatmul.msk.f32.vlgmr.msra.gmra.mxu3 %vm760_vm0, %v7366_v39 }
0x170a   :  { %5148 = vmatmul.msk.f32.gmra.mxu3 %vm760_vm0, %v7371_v41 }
0x1736   :  { %v3179_v35 = vpop.f32.mrf.mxu1 }
0x1737   :  { %5128 = vmatmul.msk.f32.vlgmr.msra.gmra.mxu2 %vm839_vm1, %v3179_v35 }
0x1738   :  { %3603 = vmatpush.msra.mxu2 %v5575_v37 }
0x173a   :  { %3604 = vmatpush.msra.mxu2 %v5576_v11 }
0x173c   :  { %3605 = vmatpush.msra.mxu2 %v5577_v38 }
0x173e   :  { %v3182_v40 = vpop.f32.mrf.mxu1  ;;  %3606 = vmatpush.msra.mxu2 %v5578_v43 }
0x173f   :  { %5129 = vmatmul.msk.f32.gmra.mxu2 %vm839_vm1, %v3182_v40 }
0x174f   :  { %v3354_v50 = vpop.f32.mrf.mxu1 }
0x1750   :  { %5137 = vmatmul.msk.f32.vlgmr.msrb.gmra.mxu2 %vm839_vm1, %v3354_v50 }
0x1757   :  { %v3357_v48 = vpop.f32.mrf.mxu1 }
0x1758   :  { %5138 = vmatmul.msk.f32.gmra.mxu2 %vm839_vm1, %v3357_v48 }
0x1760   :  { %5146 = vmatmul.msk.f32.vlgmr.msra.gmra.mxu2 %vm760_vm0, %v7380_v51 }
0x1765   :  { %v3237_v49 = vpop.f32.mrf.mxu3 }
0x176d   :  { %v3240_v47 = vpop.f32.mrf.mxu3 }
0x1775   :  { %v3420_v52 = vpop.f32.mrf.mxu3 }
0x1776   :  { %v3426_v45 = vmul.f32 0.35355338, %v3420_v52  ;;  %v5585_v52 = vld [vmem:[#allocation10 + $0x8] sm:$0xff] }
0x1778   :  { %v3428_v1 = vsel %vm839_vm1, %v3426_v45, -inf }
0x1779   :  { %3429 = vmax.xlane.f32.xlu0 %v3428_v1 }
0x177d   :  { %v3423_v57 = vpop.f32.mrf.mxu3 }
0x177e   :  { %v3427_v58 = vmul.f32 0.35355338, %v3423_v57 }
0x1780   :  { %v3431_v60 = vsel %vm839_vm1, %v3427_v58, -inf }
0x1781   :  { %3432 = vmax.xlane.f32.xlu2 %v3431_v60 }
0x1785   :  { %v3628_v61 = vpop.f32.mrf.mxu3 }
0x1786   :  { %v7550_v62 = vadd.f32 %v5579_v55, %v3628_v61 }
0x178d   :  { %v3631_v12 = vpop.f32.mrf.mxu3 }
0x178e   :  { %v7548_v51 = vadd.f32 %v5579_v55, %v3631_v12 }
0x1790   :  { %5151 = vmatpush.xpose.msk.msrb.mxu2 %vm839_vm1, %v7548_v51 }
0x1794   :  { %5152 = vmatpush.xpose.msk.msrb.mxu2 %vm839_vm1, %v7550_v62 }
0x1799   :  { %3476 = vrot.lane.b32.xlu2 %v7500_v22, %s6554_s8 }
0x17ba   :  { %v3208_v63 = vpop.f32.mrf.mxu2 }
0x17bb   :  { %v3238_v4 = vadd.f32 %v3237_v49, %v3208_v63 }
0x17c2   :  { %v3211_v7 = vpop.f32.mrf.mxu2 }
0x17c3   :  { %v3241_v22 = vadd.f32 %v3240_v47, %v3211_v7  ;;  %v5586_v7 = vld [vmem:[#allocation10 + $0x10] sm:$0xff] }
0x17d3   :  { %v3383_v54 = vpop.f32.mrf.mxu2 }
0x17d4   :  { %v7556_v36 = vadd.f32 %v3383_v54, %v3238_v4 }
0x17db   :  { %v3386_v6 = vpop.f32.mrf.mxu2 }
0x17dc   :  { %v7558_v9 = vadd.f32 %v3386_v6, %v3241_v22 }
0x17e3   :  { %v3608_v13 = vpop.f32.mrf.mxu2 }
0x17e4   :  { %v7561_v53 = vadd.f32 %v5580_v27, %v3608_v13 }
0x17e6   :  { %5153 = vmatmul.msk.f32.vlgmr.msrb.gmra.mxu2 %vm839_vm1, %v7561_v53  ;;  %3734 = vrot.lane.b32.xlu2 %v7561_v53, %s6552_s11 }
0x17ec   :  { %v3430_v2 = vpop.xlane.xlu0 %3429 }
0x17ed   :  { %v3434_v21 = vsub.f32 %v3426_v45, %v3430_v2 }
0x17ee   :  { %3868 = vrot.lane.b32.xlu2 %v7561_v53, %s6553_s26 }
0x17ef   :  { %v3436_v8 = vmul.f32 1.442695, %v3434_v21 }
0x17f1   :  { %5491 = vpow2.f32 %v3436_v8 }
0x17f4   :  { %v3433_v14 = vpop.xlane.xlu2 %3432 }
0x17f5   :  { %v3435_v15 = vsub.f32 %v3427_v58, %v3433_v14 }
0x17f7   :  { %v5492_v16 = vpop.eup %5491  ;;  %v3438_v23 = vmul.f32 1.442695, %v3435_v15 }
0x17f8   :  { %v3440_v20 = vsel %vm839_vm1, %v5492_v16, 0.0 }
0x17f9   :  { %5493 = vpow2.f32 %v3438_v23  ;;  %3441 = vadd.xlane.f32.xlu1 %v3440_v20  ;;  %v5587_v23 = vld [vmem:[%s7911_s13] ss:$0 sm:$0xff] }
0x17fc   :  { %v3477_v19 = vpop.permute.xlu2 %3476 }
0x17fd   :  { %3500 = vmatpush.msra.mxu0 %v3477_v19 }
0x17ff   :  { %3646 = vmatpush.msrb.mxu0 %v5581_v18  ;;  %v5494_v28 = vpop.eup %5493 }
0x1800   :  { %v3443_v56 = vsel %vm839_vm1, %v5494_v28, 0.0 }
0x1801   :  { %3647 = vmatpush.msrb.mxu0 %v5582_v5  ;;  %3444 = vadd.xlane.f32.xlu0 %v3443_v56  ;;  %v5588_v56 = vld [vmem:[#allocation10] sm:$0xff] }
0x1803   :  { %3648 = vmatpush.msrb.mxu0 %v5583_v26 }
0x1805   :  { %3649 = vmatpush.msrb.mxu0 %v5584_v24 }
0x1812   :  { %3738 = vrot.lane.b32.xlu1 %v7548_v51, %s6552_s11 }
0x1815   :  { %3736 = vrot.lane.b32.xlu0 %v7550_v62, %s6552_s11 }
0x181a   :  { %3870 = vrot.lane.b32.xlu1 %v7550_v62, %s6553_s26 }
0x181d   :  { %3872 = vrot.lane.b32.xlu0 %v7548_v51, %s6553_s26 }
0x1840   :  { %v3735_v55 = vpop.permute.xlu2 %3734 }
0x1848   :  { %v3869_v54 = vpop.permute.xlu2 %3868 }
0x1869   :  { %v3683_v17 = vpop.f32.mrf.mxu2 }
0x186a   :  { %v3686_v10 = vmul.f32 0.35355338, %v3683_v17 }
0x186c   :  { %v3442_v59 = vpop.xlane.xlu1 %3441  ;;  %v3687_v30 = vsel %vm1596_vm6, %v3686_v10, -inf }
0x186d   :  { %5495 = vrcp.f32 %v3442_v59  ;;  %3688 = vmax.xlane.f32.xlu0 %v3687_v30  ;;  %v3457_v25 = vand.u32 2147483648, %v3442_v59  ;;  %v3455_v34 = vand.u32 2147483647, %v3442_v59  ;;  %vm3451_vm2 = vweird.f32 %v3442_v59 }
0x186f   :  { %v3458_v37 = vor.u32 1.1754944e-38, %v3457_v25  ;;  %vm3456_vm4 = vcmp.eq.f32.partialorder %v3455_v34, 8.507059e+37 }
0x1873   :  { %v5496_v29 = vpop.eup %5495 }
0x1874   :  { %v3447_v32 = vmul.f32 %v5496_v29, %v3442_v59  ;;  %v3445_v42 = vpop.xlane.xlu0 %3444  ;;  %vm3452_vm15 = vweird.f32 %v5496_v29 }
0x1875   :  { %5497 = vrcp.f32 %v3445_v42  ;;  %vm3453_vm3 = vmor %vm3451_vm2, %vm3452_vm15  ;;  %v3472_v48 = vand.u32 2147483648, %v3445_v42  ;;  %v3470_v47 = vand.u32 2147483647, %v3445_v42  ;;  %vm3466_vm7 = vweird.f32 %v3445_v42 }
0x1876   :  { %v3448_v31 = vsub.f32 1.0, %v3447_v32 }
0x1877   :  { %v3473_v1 = vor.u32 1.1754944e-38, %v3472_v48  ;;  %vm3471_vm9 = vcmp.eq.f32.partialorder %v3470_v47, 8.507059e+37 }
0x1878   :  { %v3449_v33 = vmul.f32 %v5496_v29, %v3448_v31 }
0x187a   :  { %v3450_v46 = vadd.f32 %v5496_v29, %v3449_v33 }
0x187b   :  { %v5498_v35 = vpop.eup %5497 }
0x187c   :  { %v3454_v11 = vsel %vm3453_vm3, %v5496_v29, %v3450_v46  ;;  %v3462_v38 = vmul.f32 %v5498_v35, %v3445_v42  ;;  %vm3467_vm5 = vweird.f32 %v5498_v35 }
0x187d   :  { %v3459_v40 = vsel %vm3456_vm4, %v3458_v37, %v3454_v11  ;;  %vm3468_vm8 = vmor %vm3466_vm7, %vm3467_vm5 }
0x187e   :  { %v3460_v43 = vmul.f32 %v5492_v16, %v3459_v40  ;;  %v3463_v50 = vsub.f32 1.0, %v3462_v38 }
0x1880   :  { %v3464_v49 = vmul.f32 %v5498_v35, %v3463_v50  ;;  %5142 = vmatmul.msk.f32.vlgmr.msra.gmra.mxu0 %vm839_vm1, %v3460_v43 }
0x1881   :  { %3840 = vmatpush.msra.mxu0 %v5585_v52 }
0x1882   :  { %v3465_v45 = vadd.f32 %v5498_v35, %v3464_v49 }
0x1884   :  { %v3739_v57 = vpop.permute.xlu1 %3738  ;;  %v3469_v58 = vsel %vm3468_vm8, %v5498_v35, %v3465_v45 }
0x1885   :  { %5155 = vmatpush.xpose.msk.msra.mxu2 %vm839_vm1, %v3739_v57  ;;  %v3474_v60 = vsel %vm3471_vm9, %v3473_v1, %v3469_v58 }
0x1886   :  { %v3475_v61 = vmul.f32 %v5494_v28, %v3474_v60 }
0x1887   :  { %v3737_v12 = vpop.permute.xlu0 %3736 }
0x1888   :  { %5143 = vmatmul.msk.f32.gmra.mxu0 %vm839_vm1, %v3475_v61 }
0x1889   :  { %5156 = vmatpush.xpose.msk.msra.mxu2 %vm839_vm1, %v3737_v12 }
0x188c   :  { %5157 = vmatmul.msk.f32.vlgmr.msra.gmra.mxu2 %vm839_vm1, %v3735_v55  ;;  %v3871_v4 = vpop.permute.xlu1 %3870 }
0x188f   :  { %v3873_v63 = vpop.permute.xlu0 %3872 }
0x1890   :  { %5161 = vmatpush.xpose.msk.msrb.mxu2 %vm839_vm1, %v3873_v63  ;;  %5149 = vmatmul.msk.f32.vlgmr.msrb.gmra.mxu0 %vm760_vm0, %v7366_v39  ;;  %v5589_v63 = vld [vmem:[#allocation14 + $0x18] sm:$0xff] }
0x1891   :  { %3972 = vmatpush.msrb.mxu0 %v5586_v7  ;;  %v5590_v7 = vld [vmem:[#allocation14 + $0x10] sm:$0xff] }
0x1894   :  { %5162 = vmatpush.xpose.msk.msrb.mxu2 %vm839_vm1, %v3871_v4 }
0x1897   :  { %5163 = vmatmul.msk.f32.vlgmr.msrb.gmra.mxu2 %vm839_vm1, %v3869_v54  ;;  %v5592_v54 = vld [vmem:[#allocation14] sm:$0xff] }
0x1898   :  { %5150 = vmatmul.msk.f32.gmra.mxu0 %vm760_vm0, %v7371_v41 }
0x18e0   :  { %v3689_v22 = vpop.xlane.xlu0 %3688 }
0x18e1   :  { %v3690_v6 = vsub.f32 %v3686_v10, %v3689_v22 }
0x18e3   :  { %v3691_v13 = vmul.f32 1.442695, %v3690_v6 }
0x18e5   :  { %5499 = vpow2.f32 %v3691_v13 }
0x18eb   :  { %v5500_v27 = vpop.eup %5499 }
0x18ec   :  { %v3693_v2 = vsel %vm1596_vm6, %v5500_v27, 0.0 }
0x18ed   :  { %3694 = vadd.xlane.f32.xlu1 %v3693_v2 }
0x18fd   :  { %v3502_v39 = vpop.f32.mrf.mxu0 }
0x18fe   :  { %5144 = vmatmul.msk.f32.vlgmr.msrb.gmra.mxu1 %vm839_vm1, %v3502_v39 }
0x1905   :  { %v3505_v21 = vpop.f32.mrf.mxu0 }
0x1906   :  { %5145 = vmatmul.msk.f32.gmra.mxu1 %vm839_vm1, %v3505_v21 }
0x190d   :  { %v3651_v8 = vpop.f32.mrf.mxu0 }
0x190e   :  { %v3652_v19 = vadd.f32 %v5587_v23, %v3651_v8 }
0x190f   :  { %v3763_v14 = vpop.f32.mrf.mxu2 }
0x1910   :  { %v3766_v15 = vmul.f32 0.35355338, %v3763_v14 }
0x1912   :  { %v3767_v41 = vsel %vm1596_vm6, %v3766_v15, -inf }
0x1913   :  { %3768 = vmax.xlane.f32.xlu2 %v3767_v41 }
0x1915   :  { %v3654_v16 = vpop.f32.mrf.mxu0 }
0x1916   :  { %v3655_v20 = vadd.f32 %v5587_v23, %v3654_v16 }
0x1918   :  { %3728 = vmatpush.msra.mxu1 %v3655_v20  ;;  %v5330_v26 = vpack.i.bf16 %v3652_v19, %v3655_v20 }
0x191a   :  { %v3897_v18 = vpop.f32.mrf.mxu2  ;;  %3729 = vmatpush.msra.mxu1 %v3652_v19 }
0x191b   :  { %v3900_v28 = vmul.f32 0.35355338, %v3897_v18 }
0x191c   :  { %3863 = vmatpush.msrb.mxu1 %v5588_v56 }
0x191d   :  { %v3901_v5 = vsel %vm1596_vm6, %v3900_v28, -inf }
0x191e   :  { %3902 = vmax.xlane.f32.xlu0 %v3901_v5 }
0x1932   :  { %5331 = vrot.lane.b32.xlu0 %v5330_v26, %s6552_s11 }
0x193a   :  { %5336 = vrot.lane.b32.xlu0 %v5330_v26, %s6553_s26 }
0x1942   :  { %3978 = vrot.lane.b32.xlu0 %v7561_v53, %s6554_s8 }
0x194a   :  { %5341 = vrot.lane.b32.xlu0 %v5330_v26, %s6554_s8 }
0x1960   :  { %v3695_v24 = vpop.xlane.xlu1 %3694 }
0x1961   :  { %5501 = vrcp.f32 %v3695_v24  ;;  %v3707_v30 = vand.u32 2147483648, %v3695_v24  ;;  %v3705_v32 = vand.u32 2147483647, %v3695_v24  ;;  %vm3701_vm11 = vweird.f32 %v3695_v24 }
0x1963   :  { %v3708_v31 = vor.u32 1.1754944e-38, %v3707_v30  ;;  %vm3706_vm13 = vcmp.eq.f32.partialorder %v3705_v32, 8.507059e+37 }
0x1967   :  { %v5502_v17 = vpop.eup %5501 }
0x1968   :  { %v3697_v10 = vmul.f32 %v5502_v17, %v3695_v24  ;;  %vm3702_vm10 = vweird.f32 %v5502_v17 }
0x1969   :  { %vm3703_vm12 = vmor %vm3701_vm11, %vm3702_vm10 }
0x196a   :  { %v3698_v59 = vsub.f32 1.0, %v3697_v10 }
0x196c   :  { %v3699_v29 = vmul.f32 %v5502_v17, %v3698_v59 }
0x196e   :  { %v3700_v42 = vadd.f32 %v5502_v17, %v3699_v29 }
0x1970   :  { %v3704_v25 = vsel %vm3703_vm12, %v5502_v17, %v3700_v42  ;;  %v5594_v42 = vld [vmem:[#allocation13 + $0x18] sm:$0xff] }
0x1971   :  { %v3709_v33 = vsel %vm3706_vm13, %v3708_v31, %v3704_v25  ;;  %v5595_v31 = vld [vmem:[#allocation16 + $0x18] sm:$0xff]  ;;  %v5596_v25 = vld [vmem:[#allocation13 + $0x10] sm:$0xff] }
0x1972   :  { %v3710_v34 = vmul.f32 %v5500_v27, %v3709_v33  ;;  %v5597_v33 = vld [vmem:[#allocation16 + $0x10] sm:$0xff] }
0x1974   :  { %5154 = vmatmul.msk.f32.vlgmr.msra.gmra.mxu1 %vm1596_vm6, %v3710_v34  ;;  %v5598_v34 = vld [vmem:[#allocation13 + $0x8] sm:$0xff] }
0x197b   :  { %v3531_v53 = vpop.f32.mrf.mxu1 }
0x197c   :  { %v7605_v46 = vadd.f32 %v3531_v53, %v7556_v36  ;;  %v5599_v53 = vld [vmem:[#allocation16 + $0x8] sm:$0xff] }
0x1983   :  { %v7616_v4 = vpop.f32.mrf.mxu1 }
0x1986   :  { %v3769_v35 = vpop.xlane.xlu2 %3768 }
0x1987   :  { %v3770_v37 = vsub.f32 %v3766_v15, %v3769_v35  ;;  %v5600_v35 = vld [vmem:[#allocation13] sm:$0xff] }
0x1989   :  { %v3771_v11 = vmul.f32 1.442695, %v3770_v37  ;;  %v5601_v37 = vld [vmem:[#allocation16] sm:$0xff] }
0x198b   :  { %5503 = vpow2.f32 %v3771_v11 }
0x1991   :  { %v5504_v38 = vpop.eup %5503  ;;  %v3903_v40 = vpop.xlane.xlu0 %3902 }
0x1992   :  { %v3904_v43 = vsub.f32 %v3900_v28, %v3903_v40  ;;  %v3773_v50 = vsel %vm1596_vm6, %v5504_v38, 0.0  ;;  %v5593_v28 = vld [vmem:[#allocation10 + $0x18] sm:$0xff] }
0x1993   :  { %3774 = vadd.xlane.f32.xlu1 %v3773_v50  ;;  %v5602_v40 = vld [vmem:[#allocation11 + $0x18] sm:$0xff] }
0x1994   :  { %v3905_v48 = vmul.f32 1.442695, %v3904_v43  ;;  %v5603_v43 = vld [vmem:[#allocation11 + $0x10] sm:$0xff] }
0x1996   :  { %5505 = vpow2.f32 %v3905_v48  ;;  %v5604_v48 = vld [vmem:[#allocation11 + $0x8] sm:$0xff] }
0x199c   :  { %v7608_v49 = vpop.eup %5505 }
0x199d   :  { %v3907_v47 = vsel %vm1596_vm6, %v7608_v49, 0.0 }
0x199e   :  { %3908 = vadd.xlane.f32.xlu2 %v3907_v47  ;;  %v5605_v47 = vld [vmem:[#allocation11] sm:$0xff] }
0x19a4   :  { %v5332_v36 = vpop.permute.xlu0 %5331 }
0x19a5   :  { %v5334_v52 = vunpack.i.h.bf16 %v5332_v36  ;;  %v5333_v45 = vunpack.i.l.bf16 %v5332_v36 }
0x19a7   :  { %3816 = vmatpush.msrb.mxu3 %v5333_v45  ;;  %v7630_v45 = vld [vmem:[#allocation2 + $0x8] sm:$0xff] }
0x19a9   :  { %3817 = vmatpush.msrb.mxu3 %v5334_v52 }
0x19ac   :  { %v5337_v1 = vpop.permute.xlu0 %5336  ;;  %3982 = vrot.lane.b32.xlu1 %v7548_v51, %s6554_s8  ;;  %v5591_v51 = vld [vmem:[#allocation14 + $0x8] sm:$0xff] }
0x19ad   :  { %v5339_v57 = vunpack.i.h.bf16 %v5337_v1  ;;  %v5338_v58 = vunpack.i.l.bf16 %v5337_v1 }
0x19af   :  { %3948 = vmatpush.msra.mxu3 %v5338_v58 }
0x19b1   :  { %3949 = vmatpush.msra.mxu3 %v5339_v57 }
0x19b4   :  { %v3979_v60 = vpop.permute.xlu0 %3978 }
0x19b6   :  { %3980 = vrot.lane.b32.xlu2 %v7550_v62, %s6554_s8 }
0x19bc   :  { %v5342_v61 = vpop.permute.xlu0 %5341 }
0x19bd   :  { %v5344_v12 = vunpack.i.h.bf16 %v5342_v61  ;;  %v5343_v55 = vunpack.i.l.bf16 %v5342_v61  ;;  %v7635_v61 = vld [vmem:[%s7912_s3] ss:$0 sm:$0xff] }
0x19bf   :  { %4058 = vmatpush.msra.mxu2 %v5343_v55 }
0x19c1   :  { %4059 = vmatpush.msra.mxu2 %v5344_v12  ;;  %v3539_v12 = vadd.f32 %v7635_v61, %v7605_v46 }
0x19c3   :  { %4144 = vmatpush.msrb.mxu2 %v5589_v63  ;;  %v5608_v63 = vld [vmem:[%s7903_s12 + $0x10] sm:$0xff] }
0x19c5   :  { %4145 = vmatpush.msrb.mxu2 %v5590_v7  ;;  %v7641_v7 = vadd.f32 %v5608_v63, %v3539_v12 }
0x19c7   :  { %4146 = vmatpush.msrb.mxu2 %v5591_v51  ;;  %v3543_v51 = vsel %vm760_vm0, %v7641_v7, 0.0 }
0x19c9   :  { %4147 = vmatpush.msrb.mxu2 %v5592_v54 }
0x19f1   :  { %v3731_v22 = vpop.f32.mrf.mxu1 }
0x19f2   :  { %5160 = vmatmul.msk.f32.vlgmr.msrb.gmra.mxu1 %vm839_vm1, %v3731_v22 }
0x1a06   :  { %v3775_v62 = vpop.xlane.xlu1 %3774 }
0x1a07   :  { %5507 = vrcp.f32 %v3775_v62  ;;  %v3787_v2 = vand.u32 2147483648, %v3775_v62  ;;  %v3785_v8 = vand.u32 2147483647, %v3775_v62  ;;  %vm3781_vm15 = vweird.f32 %v3775_v62 }
0x1a09   :  { %v3788_v15 = vor.u32 1.1754944e-38, %v3787_v2  ;;  %vm3786_vm3 = vcmp.eq.f32.partialorder %v3785_v8, 8.507059e+37 }
0x1a0d   :  { %v5508_v6 = vpop.eup %5507 }
0x1a0e   :  { %v3777_v13 = vmul.f32 %v5508_v6, %v3775_v62  ;;  %vm3782_vm14 = vweird.f32 %v5508_v6 }
0x1a0f   :  { %vm3783_vm2 = vmor %vm3781_vm15, %vm3782_vm14 }
0x1a10   :  { %v3778_v27 = vsub.f32 1.0, %v3777_v13  ;;  %v5609_v13 = vld [vmem:[%s7913_s2] ss:$0 sm:$0xff] }
0x1a11   :  { %v3909_v39 = vpop.xlane.xlu2 %3908 }
0x1a12   :  { %v3779_v21 = vmul.f32 %v5508_v6, %v3778_v27  ;;  %5509 = vrcp.f32 %v3909_v39  ;;  %v3921_v56 = vand.u32 2147483648, %v3909_v39  ;;  %v3919_v26 = vand.u32 2147483647, %v3909_v39 }
0x1a13   :  { %vm3915_vm5 = vweird.f32 %v3909_v39 }
0x1a14   :  { %v3780_v14 = vadd.f32 %v5508_v6, %v3779_v21  ;;  %v3922_v10 = vor.u32 1.1754944e-38, %v3921_v56  ;;  %vm3920_vm8 = vcmp.eq.f32.partialorder %v3919_v26, 8.507059e+37  ;;  %v5613_v56 = vld [vmem:[#allocation23] sm:$0xff] }
0x1a15   :  { %v5615_v26 = vld [vmem:[%s7903_s12 + $0x18] sm:$0xff] }
0x1a16   :  { %v3784_v41 = vsel %vm3783_vm2, %v5508_v6, %v3780_v14 }
0x1a17   :  { %v3789_v16 = vsel %vm3786_vm3, %v3788_v15, %v3784_v41 }
0x1a18   :  { %v5510_v23 = vpop.eup %5509  ;;  %v3790_v20 = vmul.f32 %v5504_v38, %v3789_v16 }
0x1a19   :  { %v3911_v19 = vmul.f32 %v5510_v23, %v3909_v39  ;;  %vm3916_vm4 = vweird.f32 %v5510_v23  ;;  %v3981_v29 = vpop.permute.xlu2 %3980 }
0x1a1a   :  { %5158 = vmatmul.msk.f32.vlgmr.msrb.gmra.mxu3 %vm1596_vm6, %v3790_v20  ;;  %vm3917_vm7 = vmor %vm3915_vm5, %vm3916_vm4 }
0x1a1b   :  { %v3912_v18 = vsub.f32 1.0, %v3911_v19  ;;  %4082 = vmatpush.msrb.mxu3 %v5593_v28  ;;  %v5610_v19 = vld [vmem:[#allocation23 + $0x18] sm:$0xff]  ;;  %v5612_v28 = vld [vmem:[#allocation23 + $0x8] sm:$0xff] }
0x1a1d   :  { %v3913_v5 = vmul.f32 %v5510_v23, %v3912_v18  ;;  %v5611_v18 = vld [vmem:[#allocation23 + $0x10] sm:$0xff] }
0x1a1e   :  { %v3983_v24 = vpop.permute.xlu1 %3982 }
0x1a1f   :  { %v3914_v17 = vadd.f32 %v5510_v23, %v3913_v5  ;;  %5166 = vmatpush.xpose.msk.msra.mxu1 %vm839_vm1, %v3983_v24  ;;  %v5614_v5 = vld [vmem:[#allocation29 + $0x8] sm:$0xff] }
0x1a21   :  { %v3918_v59 = vsel %vm3917_vm7, %v5510_v23, %v3914_v17  ;;  %v5616_v17 = vld [vmem:[#allocation26 + $0x18] sm:$0xff] }
0x1a22   :  { %v3923_v30 = vsel %vm3920_vm8, %v3922_v10, %v3918_v59  ;;  %v5617_v10 = vld [vmem:[#allocation26 + $0x10] sm:$0xff]  ;;  %v5618_v59 = vld [vmem:[#allocation26 + $0x8] sm:$0xff] }
0x1a23   :  { %5167 = vmatpush.xpose.msk.msra.mxu1 %vm839_vm1, %v3981_v29  ;;  %v3924_v32 = vmul.f32 %v7608_v49, %v3923_v30  ;;  %v5619_v29 = vld [vmem:[#allocation26] sm:$0xff] }
0x1a25   :  { %5164 = vmatmul.msk.f32.vlgmr.msra.gmra.mxu3 %vm1596_vm6, %v3924_v32  ;;  %v5620_v32 = vld [vmem:[#allocation29] sm:$0xff] }
0x1a26   :  { %5168 = vmatmul.msk.f32.vlgmr.msra.gmra.mxu1 %vm839_vm1, %v3979_v60  ;;  %4167 = vmatpush.msra.mxu3 %v5595_v31  ;;  %v5621_v31 = vld [vmem:[%s7914_s24] ss:$0 sm:$0xff] }
0x1a27   :  { %4124 = vmatpush.msrb.mxu1 %v5594_v42 }
0x1a28   :  { %4168 = vmatpush.msra.mxu3 %v5597_v33 }
0x1a29   :  { %4125 = vmatpush.msrb.mxu1 %v5596_v25 }
0x1a2a   :  { %4169 = vmatpush.msra.mxu3 %v5599_v53  ;;  %v5622_v53 = vld [vmem:[%s7915_s7] ss:$0 sm:$0xff] }
0x1a2b   :  { %4126 = vmatpush.msrb.mxu1 %v5598_v34 }
0x1a2c   :  { %4170 = vmatpush.msra.mxu3 %v5601_v37  ;;  %v5623_v37 = vld [vmem:[#allocation17 + $0x18] sm:$0xff] }
0x1a2d   :  { %4127 = vmatpush.msrb.mxu1 %v5600_v35 }
0x1a6f   :  { %v7625_v11 = vpop.f32.mrf.mxu1 }
0x1a9d   :  { %v3819_v38 = vpop.f32.mrf.mxu3 }
0x1a9e   :  { %5159 = vmatmul.msk.f32.vlgmr.msra.gmra.mxu0 %vm839_vm1, %v3819_v38  ;;  %v5624_v38 = vld [vmem:[#allocation17 + $0x10] sm:$0xff] }
0x1a9f   :  { %4101 = vmatpush.msra.mxu0 %v5602_v40  ;;  %v5625_v40 = vld [vmem:[#allocation17 + $0x8] sm:$0xff] }
0x1aa1   :  { %4102 = vmatpush.msra.mxu0 %v5603_v43  ;;  %v5626_v43 = vld [vmem:[#allocation17] sm:$0xff] }
0x1aa3   :  { %v4007_v50 = vpop.f32.mrf.mxu1  ;;  %4103 = vmatpush.msra.mxu0 %v5604_v48 }
0x1aa4   :  { %v4010_v49 = vmul.f32 0.35355338, %v4007_v50 }
0x1aa5   :  { %4104 = vmatpush.msra.mxu0 %v5605_v47 }
0x1aa6   :  { %v4011_v36 = vsel %vm1596_vm6, %v4010_v49, -inf }
0x1aa7   :  { %4012 = vmax.xlane.f32.xlu2 %v4011_v36 }
0x1aa8   :  { %v3951_v52 = vpop.f32.mrf.mxu3 }
0x1aa9   :  { %5165 = vmatmul.msk.f32.vlgmr.msrb.gmra.mxu0 %vm839_vm1, %v3951_v52 }
0x1ab1   :  { %5171 = vmatmul.msk.f32.vlgmr.msra.gmra.mxu0 %vm760_vm0, %v7630_v45 }
0x1b1a   :  { %v4013_v1 = vpop.xlane.xlu2 %4012 }
0x1b1b   :  { %v4014_v57 = vsub.f32 %v4010_v49, %v4013_v1  ;;  %v7645_v54 = vpop.f32.mrf.mxu0  ;;  %v3538_v1 = vadd.f32 %v7616_v4, %v7558_v9 }
0x1b1d   :  { %v4015_v58 = vmul.f32 1.442695, %v4014_v57 }
0x1b1f   :  { %5511 = vpow2.f32 %v4015_v58  ;;  %v3540_v58 = vadd.f32 %v7635_v61, %v3538_v1 }
0x1b25   :  { %v5512_v60 = vpop.eup %5511 }
0x1b26   :  { %v4017_v55 = vsel %vm1596_vm6, %v5512_v60, 0.0  ;;  %v7647_v22 = vpop.f32.mrf.mxu0 }
0x1b27   :  { %4018 = vadd.xlane.f32.xlu1 %v4017_v55 }
0x1b2e   :  { %v4106_v6 = vpop.f32.mrf.mxu0 }
0x1b2f   :  { %3544 = vadd.xlane.f32.xlu1 %v3543_v51  ;;  %v4107_v27 = vadd.f32 %v5609_v13, %v4106_v6 }
0x1b31   :  { %5172 = vmatmul.msk.f32.vlgmr.msrb.gmra.mxu1 %vm760_vm0, %v4107_v27  ;;  %v5627_v27 = vld [vmem:[%s7916_s1] ss:$0 sm:$0xff] }
0x1b9a   :  { %v4019_v62 = vpop.xlane.xlu1 %4018 }
0x1b9b   :  { %5513 = vrcp.f32 %v4019_v62  ;;  %v4031_v21 = vand.u32 2147483648, %v4019_v62  ;;  %v4029_v14 = vand.u32 2147483647, %v4019_v62  ;;  %vm4025_vm10 = vweird.f32 %v4019_v62 }
0x1b9d   :  { %v4032_v41 = vor.u32 1.1754944e-38, %v4031_v21  ;;  %vm4030_vm12 = vcmp.eq.f32.partialorder %v4029_v14, 8.507059e+37  ;;  %v5629_v21 = vld [vmem:[#allocation20 + $0x10] sm:$0xff] }
0x1ba1   :  { %v5514_v46 = vpop.eup %5513 }
0x1ba2   :  { %v4021_v2 = vmul.f32 %v5514_v46, %v4019_v62  ;;  %vm4026_vm9 = vweird.f32 %v5514_v46  ;;  %v3545_v12 = vpop.xlane.xlu1 %3544 }
0x1ba3   :  { %vm4027_vm11 = vmor %vm4025_vm10, %vm4026_vm9  ;;  %v3549_v55 = vmul.f32 %v3545_v12, %v7257_v44 }
0x1ba4   :  { %v4022_v39 = vsub.f32 1.0, %v4021_v2 }
0x1ba5   :  { %v3551_v51 = vsub.f32 %v7641_v7, %v3549_v55  ;;  %v5630_v7 = vld [vmem:[#allocation20 + $0x8] sm:$0xff] }
0x1ba6   :  { %v4023_v8 = vmul.f32 %v5514_v46, %v4022_v39  ;;  %v5628_v39 = vld [vmem:[#allocation20 + $0x18] sm:$0xff] }
0x1ba7   :  { %v3553_v6 = vmul.f32 %v3551_v51, %v3551_v51 }
0x1ba8   :  { %v4024_v15 = vadd.f32 %v5514_v46, %v4023_v8  ;;  %v5631_v8 = vld [vmem:[#allocation20] sm:$0xff] }
0x1ba9   :  { %v3555_v13 = vsel %vm760_vm0, %v3553_v6, 0.0 }
0x1baa   :  { %v4028_v16 = vsel %vm4027_vm11, %v5514_v46, %v4024_v15 }
0x1bab   :  { %v4033_v23 = vsel %vm4030_vm12, %v4032_v41, %v4028_v16 }
0x1bac   :  { %v4034_v20 = vmul.f32 %v5512_v60, %v4033_v23 }
0x1bae   :  { %5169 = vmatmul.msk.f32.vlgmr.msra.gmra.mxu2 %vm1596_vm6, %v4034_v20  ;;  %v4129_v33 = vpop.f32.mrf.mxu1 }
0x1baf   :  { %4345 = vmatpush.msra.mxu2 %v5610_v19  ;;  %v4130_v35 = vadd.f32 %v5622_v53, %v4129_v33 }
0x1bb1   :  { %4346 = vmatpush.msra.mxu2 %v5611_v18 }
0x1bb3   :  { %4347 = vmatpush.msra.mxu2 %v5612_v28 }
0x1bb5   :  { %4348 = vmatpush.msra.mxu2 %v5613_v56 }
0x1bb6   :  { %5173 = vmatmul.msk.f32.vlgmr.msrb.gmra.mxu2 %vm760_vm0, %v5608_v63 }
0x1bb7   :  { %4562 = vmatpush.msrb.mxu2 %v5614_v5 }
0x1bbe   :  { %5174 = vmatmul.msk.f32.gmra.mxu2 %vm760_vm0, %v5615_v26 }
0x1c31   :  { %v4061_v24 = vpop.f32.mrf.mxu2 }
0x1c32   :  { %5170 = vmatmul.msk.f32.vlgmr.msrb.gmra.mxu3 %vm839_vm1, %v4061_v24 }
0x1c33   :  { %4368 = vmatpush.msrb.mxu3 %v5616_v17 }
0x1c35   :  { %4369 = vmatpush.msrb.mxu3 %v5617_v10 }
0x1c37   :  { %4370 = vmatpush.msrb.mxu3 %v5618_v59 }
0x1c39   :  { %v4149_v30 = vpop.f32.mrf.mxu2  ;;  %4371 = vmatpush.msrb.mxu3 %v5619_v29 }
0x1c3a   :  { %5175 = vmatmul.msk.f32.vlgmr.msra.gmra.mxu3 %vm760_vm0, %v5608_v63  ;;  %v4150_v34 = vadd.f32 %v5621_v31, %v4149_v30  ;;  %v3542_v63 = vadd.f32 %v5615_v26, %v3540_v58 }
0x1c3b   :  { %4585 = vmatpush.msra.mxu3 %v5620_v32 }
0x1c3c   :  { %v3546_v62 = vsel %vm760_vm0, %v3542_v63, 0.0 }
0x1c41   :  { %v4152_v42 = vpop.f32.mrf.mxu2 }
0x1c42   :  { %v4153_v25 = vadd.f32 %v5621_v31, %v4152_v42  ;;  %5176 = vmatmul.msk.f32.gmra.mxu3 %vm760_vm0, %v5615_v26 }
0x1c44   :  { %5177 = vmatpush.xpose.msk.msrb.mxu0 %vm760_vm0, %v4153_v25 }
0x1c48   :  { %5178 = vmatpush.xpose.msk.msrb.mxu0 %vm760_vm0, %v4150_v34 }
0x1c4b   :  { %5179 = vmatmul.msk.f32.vlgmr.msrb.gmra.mxu0 %vm760_vm0, %v4130_v35 }
0x1c4c   :  { %4270 = vmatpush.msra.mxu0 %v5623_v37 }
0x1c4e   :  { %4271 = vmatpush.msra.mxu0 %v5624_v38 }
0x1c50   :  { %4272 = vmatpush.msra.mxu0 %v5625_v40  ;;  %v5632_v40 = vld [vmem:[#allocation32] ss:$0 sm:$0xff] }
0x1c52   :  { %4273 = vmatpush.msra.mxu0 %v5626_v43 }
0x1cb5   :  { %v7672_v9 = vpop.f32.mrf.mxu3 }
0x1cbd   :  { %v4172_v4 = vpop.f32.mrf.mxu3 }
0x1cbe   :  { %v4173_v46 = vadd.f32 %v5627_v27, %v4172_v4  ;;  %v3866_v4 = vadd.f32 %v7625_v11, %v7645_v54  ;;  %v5637_v11 = vld [vmem:[#allocation28] ss:$0 sm:$0xff] }
0x1cc5   :  { %v4175_v61 = vpop.f32.mrf.mxu3 }
0x1cc6   :  { %v4176_v2 = vadd.f32 %v5627_v27, %v4175_v61  ;;  %v3977_v61 = vadd.f32 %v7647_v22, %v3866_v4  ;;  %v5638_v22 = vld [vmem:[#allocation25] ss:$0 sm:$0xff] }
0x1cc8   :  { %v4204_v50 = vpop.f32.mrf.mxu0  ;;  %4249 = vmatpush.msra.mxu1 %v4176_v2  ;;  %v4087_v27 = vadd.f32 %v7672_v9, %v3977_v61 }
0x1cc9   :  { %v4207_v48 = vmul.f32 0.17677669, %v4204_v50  ;;  %v5633_v50 = vld [vmem:[#allocation34] ss:$0 sm:$0xff] }
0x1cca   :  { %4250 = vmatpush.msra.mxu1 %v4173_v46  ;;  %v5635_v46 = vld [vmem:[%s7917_s10] ss:$0 sm:$0xff] }
0x1ccb   :  { %v4208_v49 = vsel %vm1596_vm6, %v4207_v48, -inf  ;;  %v4088_v2 = vadd.f32 %v5635_v46, %v4087_v27 }
0x1ccc   :  { %4209 = vmax.xlane.f32.xlu0 %v4208_v49  ;;  %4319 = vmatpush.msrb.mxu1 %v5628_v39  ;;  %v5634_v49 = vld [vmem:[#allocation29 + $0x10] sm:$0xff] }
0x1cce   :  { %4320 = vmatpush.msrb.mxu1 %v5629_v21  ;;  %v5636_v21 = vld [vmem:[#allocation19] ss:$0 sm:$0xff] }
0x1cd0   :  { %4321 = vmatpush.msrb.mxu1 %v5630_v7 }
0x1cd2   :  { %4322 = vmatpush.msrb.mxu1 %v5631_v8  ;;  %v4278_v8 = vadd.f32 %v7630_v45, %v4088_v2 }
0x1d3f   :  { %v4210_v47 = vpop.xlane.xlu0 %4209 }
0x1d40   :  { %v4211_v36 = vsub.f32 %v4207_v48, %v4210_v47 }
0x1d42   :  { %v4212_v52 = vmul.f32 1.442695, %v4211_v36 }
0x1d44   :  { %5515 = vpow2.f32 %v4212_v52 }
0x1d4a   :  { %v5516_v57 = vpop.eup %5515 }
0x1d4b   :  { %v4214_v60 = vsel %vm1596_vm6, %v5516_v57, 0.0 }
0x1d4c   :  { %4215 = vadd.xlane.f32.xlu2 %v4214_v60 }
0x1d54   :  { %3547 = vadd.xlane.f32.xlu2 %v3546_v62 }
0x1d5c   :  { %3556 = vadd.xlane.f32.xlu2 %v3555_v13 }
0x1dbf   :  { %v4216_v14 = vpop.xlane.xlu2 %4215 }
0x1dc0   :  { %5517 = vrcp.f32 %v4216_v14  ;;  %v4228_v19 = vand.u32 2147483648, %v4216_v14  ;;  %v4226_v56 = vand.u32 2147483647, %v4216_v14  ;;  %vm4222_vm14 = vweird.f32 %v4216_v14 }
0x1dc2   :  { %v4229_v24 = vor.u32 1.1754944e-38, %v4228_v19  ;;  %vm4227_vm2 = vcmp.eq.f32.partialorder %v4226_v56, 8.507059e+37 }
0x1dc6   :  { %v5518_v15 = vpop.eup %5517 }
0x1dc7   :  { %v4218_v41 = vmul.f32 %v5518_v15, %v4216_v14  ;;  %v3548_v16 = vpop.xlane.xlu2 %3547  ;;  %vm4223_vm13 = vweird.f32 %v5518_v15 }
0x1dc8   :  { %v3550_v23 = vmul.f32 %v3548_v16, %v7257_v44  ;;  %vm4224_vm15 = vmor %vm4222_vm14, %vm4223_vm13 }
0x1dc9   :  { %v4219_v20 = vsub.f32 1.0, %v4218_v41 }
0x1dca   :  { %v3552_v18 = vsub.f32 %v3542_v63, %v3550_v23 }
0x1dcb   :  { %v4220_v28 = vmul.f32 %v5518_v15, %v4219_v20 }
0x1dcc   :  { %v3554_v5 = vmul.f32 %v3552_v18, %v3552_v18 }
0x1dcd   :  { %v4221_v26 = vadd.f32 %v5518_v15, %v4220_v28 }
0x1dce   :  { %v3558_v17 = vsel %vm760_vm0, %v3554_v5, 0.0 }
0x1dcf   :  { %v4225_v10 = vsel %vm4224_vm15, %v5518_v15, %v4221_v26  ;;  %3559 = vadd.xlane.f32.xlu0 %v3558_v17  ;;  %v3557_v59 = vpop.xlane.xlu2 %3556 }
0x1dd0   :  { %v4230_v30 = vsel %vm4227_vm2, %v4229_v24, %v4225_v10  ;;  %v3561_v29 = vmul.f32 %v3557_v59, %v7257_v44 }
0x1dd1   :  { %v4231_v32 = vmul.f32 %v5516_v57, %v4230_v30 }
0x1dd2   :  { %v3563_v42 = vadd.f32 1e-05, %v3561_v29 }
0x1dd3   :  { %4916 = vst.msk [vmem:[#allocation50 + $0x8] sm:$0xff] %vm1596_vm6, %v4231_v32  ;;  %5180 = vmatmul.msk.f32.vlgmr.msra.gmra.mxu1 %vm1596_vm6, %v4231_v32 }
0x1dd4   :  { %5519 = vrsqrt.f32 %v3563_v42  ;;  %vm3571_vm4 = vweird.f32 %v3563_v42 }
0x1dda   :  { %v5520_v31 = vpop.eup %5519 }
0x1ddb   :  { %v3566_v25 = vmul.f32 %v5520_v31, %v3563_v42  ;;  %vm3572_vm3 = vweird.f32 %v5520_v31 }
0x1ddc   :  { %vm3573_vm5 = vmor %vm3571_vm4, %vm3572_vm3 }
0x1ddd   :  { %v3567_v33 = vmul.f32 %v5520_v31, %v3566_v25 }
0x1ddf   :  { %v3568_v34 = vmul.f32 0.5, %v3567_v33 }
0x1de1   :  { %v3569_v53 = vsub.f32 1.5, %v3568_v34 }
0x1de3   :  { %v3570_v35 = vmul.f32 %v5520_v31, %v3569_v53 }
0x1de5   :  { %v3574_v37 = vsel %vm3573_vm5, %v5520_v31, %v3570_v35  ;;  %v5639_v35 = vld [vmem:[#allocation35] ss:$0 sm:$0xff] }
0x1de6   :  { %v3585_v38 = vmul.f32 %v3574_v37, %v3551_v51 }
0x1de8   :  { %v3587_v43 = vmul.f32 %v5632_v40, %v3585_v38  ;;  %v5640_v38 = vld [vmem:[#allocation37] ss:$0 sm:$0xff] }
0x1dea   :  { %v3589_v48 = vadd.f32 %v5633_v50, %v3587_v43 }
0x1dec   :  { %5183 = vmatmul.msk.f32.vlgmr.msra.gmra.mxu2 %vm760_vm0, %v3589_v48  ;;  %5185 = vmatmul.msk.f32.vlgmr.msrb.gmra.mxu3 %vm760_vm0, %v3589_v48 }
0x1ded   :  { %4694 = vmatpush.msra.mxu2 %v5634_v49 }
0x1e42   :  { %v3560_v47 = vpop.xlane.xlu0 %3559 }
0x1e43   :  { %v3562_v36 = vmul.f32 %v3560_v47, %v7257_v44 }
0x1e45   :  { %v3564_v52 = vadd.f32 1e-05, %v3562_v36 }
0x1e47   :  { %5521 = vrsqrt.f32 %v3564_v52  ;;  %vm3581_vm8 = vweird.f32 %v3564_v52 }
0x1e4d   :  { %v5522_v1 = vpop.eup %5521 }
0x1e4e   :  { %v3576_v57 = vmul.f32 %v5522_v1, %v3564_v52  ;;  %vm3582_vm7 = vweird.f32 %v5522_v1 }
0x1e4f   :  { %vm3583_vm9 = vmor %vm3581_vm8, %vm3582_vm7 }
0x1e50   :  { %v3577_v58 = vmul.f32 %v5522_v1, %v3576_v57  ;;  %v4252_v60 = vpop.f32.mrf.mxu1 }
0x1e51   :  { %5181 = vmatmul.msk.f32.vlgmr.msra.gmra.mxu0 %vm760_vm0, %v4252_v60 }
0x1e52   :  { %v3578_v12 = vmul.f32 0.5, %v3577_v58 }
0x1e54   :  { %v3579_v55 = vsub.f32 1.5, %v3578_v12 }
0x1e56   :  { %v3580_v63 = vmul.f32 %v5522_v1, %v3579_v55 }
0x1e58   :  { %v3584_v51 = vsel %vm3583_vm9, %v5522_v1, %v3580_v63 }
0x1e59   :  { %v3586_v62 = vmul.f32 %v3584_v51, %v3552_v18 }
0x1e5b   :  { %v3588_v6 = vmul.f32 %v5632_v40, %v3586_v62 }
0x1e5d   :  { %v3590_v13 = vadd.f32 %v5633_v50, %v3588_v6  ;;  %v5641_v50 = vld [vmem:[#allocation22] ss:$0 sm:$0xff] }
0x1e5f   :  { %5184 = vmatmul.msk.f32.gmra.mxu2 %vm760_vm0, %v3590_v13  ;;  %5186 = vmatmul.msk.f32.gmra.mxu3 %vm760_vm0, %v3590_v13 }
0x1e6f   :  { %v4350_v41 = vpop.f32.mrf.mxu2  ;;  %v4373_v16 = vpop.f32.mrf.mxu3 }
0x1e70   :  { %v4374_v54 = vadd.f32 %v5637_v11, %v4373_v16  ;;  %v4351_v45 = vadd.f32 %v5638_v22, %v4350_v41 }
0x1ece   :  { %v4275_v39 = vpop.f32.mrf.mxu0 }
0x1ecf   :  { %v4276_v7 = vadd.f32 %v5636_v21, %v4275_v39 }
0x1ed1   :  { %v4279_v14 = vadd.f32 %v4278_v8, %v4276_v7 }
0x1ed3   :  { %v4280_v15 = vsel %vm760_vm0, %v4279_v14, 0.0 }
0x1ed4   :  { %4281 = vadd.xlane.f32.xlu1 %v4280_v15 }
0x1ee2   :  { %v4353_v23 = vpop.f32.mrf.mxu2  ;;  %v4376_v20 = vpop.f32.mrf.mxu3 }
0x1ee3   :  { %v7693_v19 = vadd.f32 %v5638_v22, %v4353_v23  ;;  %v4377_v9 = vadd.f32 %v5637_v11, %v4376_v20  ;;  %v5642_v11 = vld [vmem:[%s6796_s30 + $0x78] sm:$0xff]  ;;  %v5643_v22 = vld [vmem:[%s6796_s30 + $0x70] sm:$0xff] }
0x1ee5   :  { %5187 = vmatpush.xpose.msk.msrb.mxu0 %vm839_vm1, %v7693_v19  ;;  %4450 = vmatpush.msra.mxu1 %v4377_v9  ;;  %v7697_v18 = vpack.i.bf16 %v4374_v54, %v4377_v9 }
0x1ee7   :  { %4451 = vmatpush.msra.mxu1 %v4374_v54 }
0x1ee9   :  { %5188 = vmatpush.xpose.msk.msrb.mxu0 %vm839_vm1, %v4351_v45 }
0x1f47   :  { %v4282_v28 = vpop.xlane.xlu1 %4281 }
0x1f48   :  { %v4283_v56 = vmul.f32 %v4282_v28, %v7257_v44  ;;  %v5646_v28 = vld [vmem:[%s6796_s30 + $0x58] sm:$0xff] }
0x1f4a   :  { %v4284_v5 = vsub.f32 %v4279_v14, %v4283_v56  ;;  %v5647_v56 = vld [vmem:[%s6796_s30 + $0x50] sm:$0xff] }
0x1f4c   :  { %v4285_v26 = vmul.f32 %v4284_v5, %v4284_v5 }
0x1f4e   :  { %v4286_v24 = vsel %vm760_vm0, %v4285_v26, 0.0 }
0x1f4f   :  { %4287 = vadd.xlane.f32.xlu1 %v4286_v24  ;;  %v5649_v24 = vld [vmem:[%s6796_s30 + $0x40] sm:$0xff] }
0x1f68   :  { %4460 = vrot.lane.b32.xlu1 %v7693_v19, %s6552_s11 }
0x1f70   :  { %4594 = vrot.lane.b32.xlu1 %v7693_v19, %s6553_s26 }
0x1f78   :  { %4702 = vrot.lane.b32.xlu1 %v4351_v45, %s6554_s8 }
0x1fc2   :  { %v4288_v17 = vpop.xlane.xlu1 %4287 }
0x1fc3   :  { %v4289_v10 = vmul.f32 %v4288_v17, %v7257_v44 }
0x1fc5   :  { %v4290_v59 = vadd.f32 1e-05, %v4289_v10  ;;  %v5650_v10 = vld [vmem:[%s6796_s30 + $0x38] sm:$0xff] }
0x1fc7   :  { %5523 = vrsqrt.f32 %v4290_v59  ;;  %vm4297_vm11 = vweird.f32 %v4290_v59 }
0x1fcd   :  { %v5524_v30 = vpop.eup %5523 }
0x1fce   :  { %v4292_v29 = vmul.f32 %v5524_v30, %v4290_v59  ;;  %vm4298_vm10 = vweird.f32 %v5524_v30 }
0x1fcf   :  { %vm4299_vm12 = vmor %vm4297_vm11, %vm4298_vm10 }
0x1fd0   :  { %v4293_v32 = vmul.f32 %v5524_v30, %v4292_v29  ;;  %v5652_v29 = vld [vmem:[%s6796_s30 + $0x28] sm:$0xff] }
0x1fd2   :  { %v4294_v42 = vmul.f32 0.5, %v4293_v32  ;;  %v5653_v32 = vld [vmem:[%s6796_s30 + $0x20] sm:$0xff] }
0x1fd4   :  { %v4295_v31 = vsub.f32 1.5, %v4294_v42  ;;  %v5654_v42 = vld [vmem:[%s6796_s30 + $0x18] sm:$0xff] }
0x1fd6   :  { %v4296_v25 = vmul.f32 %v5524_v30, %v4295_v31  ;;  %v5655_v31 = vld [vmem:[%s6796_s30 + $0x10] sm:$0xff] }
0x1fd8   :  { %v4300_v33 = vsel %vm4299_vm12, %v5524_v30, %v4296_v25  ;;  %v5651_v30 = vld [vmem:[%s6796_s30 + $0x30] sm:$0xff]  ;;  %v5656_v25 = vld [vmem:[%s6796_s30 + $0x8] sm:$0xff] }
0x1fd9   :  { %v4301_v34 = vmul.f32 %v4300_v33, %v4284_v5  ;;  %v5648_v5 = vld [vmem:[%s6796_s30 + $0x48] sm:$0xff]  ;;  %v5657_v33 = vld [vmem:[%s6796_s30] sm:$0xff] }
0x1fda   :  { %v4461_v53 = vpop.permute.xlu1 %4460 }
0x1fdb   :  { %v4302_v37 = vmul.f32 %v5639_v35, %v4301_v34  ;;  %5191 = vmatpush.xpose.msk.msra.mxu0 %vm839_vm1, %v4461_v53 }
0x1fdd   :  { %v7709_v40 = vadd.f32 %v5640_v38, %v4302_v37 }
0x1fdf   :  { %5182 = vmatmul.msk.f32.vlgmr.msrb.gmra.mxu1 %vm760_vm0, %v7709_v40 }
0x1fe2   :  { %v4595_v60 = vpop.permute.xlu1 %4594 }
0x1fea   :  { %v4703_v15 = vpop.permute.xlu1 %4702 }
0x205c   :  { %v4324_v43 = vpop.f32.mrf.mxu1 }
0x205d   :  { %v4325_v48 = vadd.f32 %v5641_v50, %v4324_v43 }
0x205f   :  { %5189 = vmatmul.msk.f32.vlgmr.msrb.gmra.mxu0 %vm839_vm1, %v4325_v48 }
0x20dc   :  { %v4405_v49 = vpop.f32.mrf.mxu0 }
0x20dd   :  { %v4408_v47 = vmul.f32 0.35355338, %v4405_v49 }
0x20df   :  { %v4409_v36 = vsel %vm1596_vm6, %v4408_v47, -inf }
0x20e0   :  { %4410 = vmax.xlane.f32.xlu2 %v4409_v36 }
0x20f8   :  { %4458 = vrot.lane.b32.xlu2 %v4351_v45, %s6552_s11 }
0x2100   :  { %4592 = vrot.lane.b32.xlu2 %v4351_v45, %s6553_s26  ;;  %v5645_v45 = vld [vmem:[%s6796_s30 + $0x60] sm:$0xff] }
0x2108   :  { %4700 = vrot.lane.b32.xlu2 %v4325_v48, %s6554_s8 }
0x2153   :  { %v4411_v52 = vpop.xlane.xlu2 %4410 }
0x2154   :  { %v4412_v1 = vsub.f32 %v4408_v47, %v4411_v52 }
0x2156   :  { %v4413_v57 = vmul.f32 1.442695, %v4412_v1 }
0x2158   :  { %5525 = vpow2.f32 %v4413_v57 }
0x215b   :  { %v4459_v58 = vpop.permute.xlu2 %4458 }
0x215c   :  { %5192 = vmatpush.xpose.msk.msra.mxu0 %vm839_vm1, %v4459_v58 }
0x215e   :  { %v5526_v12 = vpop.eup %5525 }
0x215f   :  { %v4415_v55 = vsel %vm1596_vm6, %v5526_v12, 0.0 }
0x2160   :  { %5197 = vmatpush.xpose.msk.msrb.mxu0 %vm839_vm1, %v4595_v60  ;;  %4416 = vadd.xlane.f32.xlu0 %v4415_v55 }
0x2163   :  { %v4593_v63 = vpop.permute.xlu2 %4592 }
0x2164   :  { %5198 = vmatpush.xpose.msk.msrb.mxu0 %vm839_vm1, %v4593_v63 }
0x216b   :  { %v4701_v9 = vpop.permute.xlu2 %4700 }
0x2174   :  { %4456 = vrot.lane.b32.xlu0 %v4325_v48, %s6552_s11 }
0x217c   :  { %4704 = vrot.lane.b32.xlu0 %v7693_v19, %s6554_s8  ;;  %v5644_v19 = vld [vmem:[%s6796_s30 + $0x68] sm:$0xff]  ;;  %s6556_s30 = smov [#allocation50]  }
0x217d   :  { %s4934_s6 = sshll.u32 %s6556_s30, 4  ;;  %s4935_s6 = int_to_ptr.vmem [resolvable:$true] %s4934_s6 }
0x2184   :  { %4590 = vrot.lane.b32.xlu0 %v4325_v48, %s6553_s26 }
0x21d3   :  { %v4417_v51 = vpop.xlane.xlu0 %4416 }
0x21d4   :  { %5527 = vrcp.f32 %v4417_v51  ;;  %v4429_v4 = vand.u32 2147483648, %v4417_v51  ;;  %v4427_v27 = vand.u32 2147483647, %v4417_v51  ;;  %vm4423_vm14 = vweird.f32 %v4417_v51 }
0x21d6   :  { %v4430_v2 = vor.u32 1.1754944e-38, %v4429_v4  ;;  %vm4428_vm2 = vcmp.eq.f32.partialorder %v4427_v27, 8.507059e+37 }
0x21da   :  { %v5528_v62 = vpop.eup %5527 }
0x21db   :  { %v4419_v6 = vmul.f32 %v5528_v62, %v4417_v51  ;;  %vm4424_vm13 = vweird.f32 %v5528_v62 }
0x21dc   :  { %vm4425_vm15 = vmor %vm4423_vm14, %vm4424_vm13 }
0x21dd   :  { %v4420_v13 = vsub.f32 1.0, %v4419_v6 }
0x21df   :  { %v4421_v61 = vmul.f32 %v5528_v62, %v4420_v13 }
0x21e1   :  { %v4422_v46 = vadd.f32 %v5528_v62, %v4421_v61 }
0x21e3   :  { %v4426_v39 = vsel %vm4425_vm15, %v5528_v62, %v4422_v46 }
0x21e4   :  { %v4431_v21 = vsel %vm4428_vm2, %v4430_v2, %v4426_v39 }
0x21e5   :  { %v4432_v7 = vmul.f32 %v5526_v12, %v4431_v21 }
0x21e6   :  { %v4457_v8 = vpop.permute.xlu0 %4456 }
0x21e7   :  { %5190 = vmatmul.msk.f32.vlgmr.msra.gmra.mxu1 %vm1596_vm6, %v4432_v7  ;;  %5193 = vmatmul.msk.f32.vlgmr.msra.gmra.mxu0 %vm839_vm1, %v4457_v8 }
0x21ee   :  { %v4705_v14 = vpop.permute.xlu0 %4704 }
0x21ef   :  { %5202 = vmatpush.xpose.msk.msrb.mxu3 %vm839_vm1, %v4705_v14 }
0x21f3   :  { %5203 = vmatpush.xpose.msk.msrb.mxu3 %vm839_vm1, %v4703_v15 }
0x21f6   :  { %v4591_v41 = vpop.permute.xlu0 %4590 }
0x21f7   :  { %5199 = vmatmul.msk.f32.vlgmr.msrb.gmra.mxu0 %vm839_vm1, %v4591_v41 }
0x2264   :  { %v4453_v16 = vpop.f32.mrf.mxu1  ;;  %v4485_v23 = vpop.f32.mrf.mxu0 }
0x2265   :  { %v4488_v20 = vmul.f32 0.35355338, %v4485_v23  ;;  %5196 = vmatmul.msk.f32.vlgmr.msra.gmra.mxu3 %vm839_vm1, %v4453_v16 }
0x2266   :  { %4868 = vmatpush.msra.mxu3 %v5642_v11 }
0x2267   :  { %v4489_v54 = vsel %vm1596_vm6, %v4488_v20, -inf }
0x2268   :  { %4490 = vmax.xlane.f32.xlu1 %v4489_v54  ;;  %4869 = vmatpush.msra.mxu3 %v5643_v22 }
0x226a   :  { %4870 = vmatpush.msra.mxu3 %v5644_v19 }
0x226c   :  { %4871 = vmatpush.msra.mxu3 %v5645_v45 }
0x226d   :  { %5204 = vmatmul.msk.f32.vlgmr.msrb.gmra.mxu3 %vm839_vm1, %v4701_v9 }
0x226e   :  { %4872 = vmatpush.msra.mxu3 %v5646_v28 }
0x2270   :  { %4873 = vmatpush.msra.mxu3 %v5647_v56 }
0x2272   :  { %4874 = vmatpush.msra.mxu3 %v5648_v5 }
0x2274   :  { %v4619_v26 = vpop.f32.mrf.mxu0  ;;  %4875 = vmatpush.msra.mxu3 %v5649_v24 }
0x2275   :  { %v4622_v17 = vmul.f32 0.35355338, %v4619_v26 }
0x2276   :  { %4876 = vmatpush.msra.mxu3 %v5650_v10  ;;  %v7768_v10 = vld [vmem:[#allocation47] ss:$0 sm:$0xff] }
0x2277   :  { %v4623_v59 = vsel %vm1596_vm6, %v4622_v17, -inf }
0x2278   :  { %4624 = vmax.xlane.f32.xlu0 %v4623_v59  ;;  %4877 = vmatpush.msra.mxu3 %v5651_v30  ;;  %v2844_v59 = vadd.f32 %v7768_v10, %v7539_v3 }
0x227a   :  { %4878 = vmatpush.msra.mxu3 %v5652_v29  ;;  %v2846_v30 = vadd.f32 %v2844_v59, %v7395_v0 }
0x227c   :  { %4879 = vmatpush.msra.mxu3 %v5653_v32  ;;  %v2847_v29 = vsel %vm760_vm0, %v2846_v30, 0.0 }
0x227e   :  { %4880 = vmatpush.msra.mxu3 %v5654_v42 }
0x2280   :  { %4881 = vmatpush.msra.mxu3 %v5655_v31 }
0x2282   :  { %4882 = vmatpush.msra.mxu3 %v5656_v25 }
0x2284   :  { %4883 = vmatpush.msra.mxu3 %v5657_v33 }
0x22db   :  { %v4491_v34 = vpop.xlane.xlu1 %4490 }
0x22dc   :  { %v4492_v53 = vsub.f32 %v4488_v20, %v4491_v34 }
0x22de   :  { %v4493_v35 = vmul.f32 1.442695, %v4492_v53 }
0x22e0   :  { %5529 = vpow2.f32 %v4493_v35 }
0x22e6   :  { %v5530_v37 = vpop.eup %5529 }
0x22e7   :  { %v4495_v38 = vsel %vm1596_vm6, %v5530_v37, 0.0 }
0x22e8   :  { %v7752_v43 = vpop.f32.mrf.mxu3  ;;  %4496 = vadd.xlane.f32.xlu1 %v4495_v38 }
0x22eb   :  { %v4625_v50 = vpop.xlane.xlu0 %4624 }
0x22ec   :  { %v4626_v48 = vsub.f32 %v4622_v17, %v4625_v50  ;;  %v5658_v17 = vld [vmem:[#allocation29 + $0x18] sm:$0xff] }
0x22ee   :  { %v4627_v49 = vmul.f32 1.442695, %v4626_v48 }
0x22f0   :  { %5531 = vpow2.f32 %v4627_v49  ;;  %v4729_v47 = vpop.f32.mrf.mxu3  ;;  %v5659_v49 = vld [vmem:[#allocation44 + $0x18] sm:$0xff] }
0x22f1   :  { %v4732_v36 = vmul.f32 0.35355338, %v4729_v47 }
0x22f3   :  { %v4733_v52 = vsel %vm1596_vm6, %v4732_v36, -inf }
0x22f4   :  { %4734 = vmax.xlane.f32.xlu2 %v4733_v52  ;;  %v5661_v52 = vld [vmem:[#allocation44 + $0x8] sm:$0xff] }
0x22f6   :  { %v5532_v1 = vpop.eup %5531 }
0x22f7   :  { %v4629_v57 = vsel %vm1596_vm6, %v5532_v1, 0.0 }
0x22f8   :  { %4630 = vadd.xlane.f32.xlu0 %v4629_v57 }
0x2301   :  { %5346 = vrot.lane.b32.xlu1 %v7697_v18, %s6552_s11 }
0x230c   :  { %5351 = vrot.lane.b32.xlu0 %v7697_v18, %s6553_s26 }
0x235b   :  { %v4497_v58 = vpop.xlane.xlu1 %4496 }
0x235c   :  { %5533 = vrcp.f32 %v4497_v58  ;;  %v4509_v61 = vand.u32 2147483648, %v4497_v58  ;;  %vm4503_vm4 = vweird.f32 %v4497_v58  ;;  %v4507_v27 = vand.u32 2147483647, %v4497_v58 }
0x235e   :  { %v4510_v39 = vor.u32 1.1754944e-38, %v4509_v61  ;;  %vm4508_vm7 = vcmp.eq.f32.partialorder %v4507_v27, 8.507059e+37 }
0x2362   :  { %v5534_v60 = vpop.eup %5533 }
0x2363   :  { %v4499_v12 = vmul.f32 %v5534_v60, %v4497_v58  ;;  %vm4504_vm3 = vweird.f32 %v5534_v60 }
0x2364   :  { %vm4505_vm5 = vmor %vm4503_vm4, %vm4504_vm3 }
0x2365   :  { %v4500_v55 = vsub.f32 1.0, %v4499_v12 }
0x2367   :  { %v4735_v63 = vpop.xlane.xlu2 %4734  ;;  %v4501_v62 = vmul.f32 %v5534_v60, %v4500_v55 }
0x2368   :  { %v4736_v51 = vsub.f32 %v4732_v36, %v4735_v63  ;;  %v5660_v36 = vld [vmem:[#allocation44 + $0x10] sm:$0xff] }
0x2369   :  { %v4502_v4 = vadd.f32 %v5534_v60, %v4501_v62 }
0x236a   :  { %v4737_v6 = vmul.f32 1.442695, %v4736_v51 }
0x236b   :  { %v4631_v13 = vpop.xlane.xlu0 %4630  ;;  %v4506_v46 = vsel %vm4505_vm5, %v5534_v60, %v4502_v4  ;;  %v5663_v4 = vld [vmem:[#allocation31] ss:$0 sm:$0xff] }
0x236c   :  { %5535 = vpow2.f32 %v4737_v6  ;;  %v4511_v14 = vsel %vm4508_vm7, %v4510_v39, %v4506_v46  ;;  %v4643_v54 = vand.u32 2147483648, %v4631_v13  ;;  %vm4637_vm9 = vweird.f32 %v4631_v13 }
0x236d   :  { %5537 = vrcp.f32 %v4631_v13  ;;  %v4512_v20 = vmul.f32 %v5530_v37, %v4511_v14  ;;  %v4641_v19 = vand.u32 2147483647, %v4631_v13 }
0x236e   :  { %v4644_v45 = vor.u32 1.1754944e-38, %v4643_v54 }
0x236f   :  { %vm4642_vm11 = vcmp.eq.f32.partialorder %v4641_v19, 8.507059e+37 }
0x2372   :  { %v7760_v2 = vpop.eup %5535 }
0x2373   :  { %v5538_v21 = vpop.eup %5537  ;;  %v5347_v7 = vpop.permute.xlu1 %5346  ;;  %v4739_v8 = vsel %vm1596_vm6, %v7760_v2, 0.0 }
0x2374   :  { %v4633_v15 = vmul.f32 %v5538_v21, %v4631_v13  ;;  %v5348_v41 = vunpack.i.l.bf16 %v5347_v7  ;;  %4740 = vadd.xlane.f32.xlu2 %v4739_v8  ;;  %v5349_v23 = vunpack.i.h.bf16 %v5347_v7  ;;  %vm4638_vm8 = vweird.f32 %v5538_v21 }
0x2375   :  { %vm4639_vm10 = vmor %vm4637_vm9, %vm4638_vm8 }
0x2376   :  { %v4634_v16 = vsub.f32 1.0, %v4633_v15  ;;  %4538 = vmatpush.msrb.mxu1 %v5348_v41 }
0x2378   :  { %v4635_v11 = vmul.f32 %v5538_v21, %v4634_v16  ;;  %4539 = vmatpush.msrb.mxu1 %v5349_v23 }
0x2379   :  { %5194 = vmatmul.msk.f32.vlgmr.msrb.gmra.mxu1 %vm1596_vm6, %v4512_v20 }
0x237a   :  { %v4636_v22 = vadd.f32 %v5538_v21, %v4635_v11 }
0x237c   :  { %v4640_v9 = vsel %vm4639_vm10, %v5538_v21, %v4636_v22 }
0x237d   :  { %v4645_v56 = vsel %vm4642_vm11, %v4644_v45, %v4640_v9  ;;  %v7791_v9 = vld [vmem:[#allocation41] ss:$0 sm:$0xff] }
0x237e   :  { %v5352_v28 = vpop.permute.xlu0 %5351  ;;  %v4646_v24 = vmul.f32 %v5532_v1, %v4645_v56  ;;  %v5662_v1 = vld [vmem:[#allocation44] sm:$0xff]  ;;  %v7793_v56 = vld [vmem:[#allocation43] ss:$0 sm:$0xff] }
0x237f   :  { %v5353_v5 = vunpack.i.l.bf16 %v5352_v28  ;;  %v5354_v26 = vunpack.i.h.bf16 %v5352_v28 }
0x2381   :  { %4670 = vmatpush.msra.mxu1 %v5353_v5 }
0x2383   :  { %4671 = vmatpush.msra.mxu1 %v5354_v26 }
0x2384   :  { %5200 = vmatmul.msk.f32.vlgmr.msra.gmra.mxu1 %vm1596_vm6, %v4646_v24 }
0x2385   :  { %4804 = vmatpush.msrb.mxu1 %v5658_v17 }
0x238c   :  { %5356 = vrot.lane.b32.xlu2 %v7697_v18, %s6554_s8 }
0x23b5   :  { %2848 = vadd.xlane.f32.xlu2 %v2847_v29 }
0x23e7   :  { %v4741_v32 = vpop.xlane.xlu2 %4740 }
0x23e8   :  { %5539 = vrcp.f32 %v4741_v32  ;;  %v4753_v53 = vand.u32 2147483648, %v4741_v32  ;;  %v4751_v37 = vand.u32 2147483647, %v4741_v32  ;;  %vm4747_vm13 = vweird.f32 %v4741_v32 }
0x23ea   :  { %v4754_v0 = vor.u32 1.1754944e-38, %v4753_v53  ;;  %vm4752_vm15 = vcmp.eq.f32.partialorder %v4751_v37, 8.507059e+37  ;;  %v5664_v53 = vld [vmem:[#allocation38] ss:$0 sm:$0xff] }
0x23ee   :  { %v5540_v42 = vpop.eup %5539 }
0x23ef   :  { %v4743_v31 = vmul.f32 %v5540_v42, %v4741_v32  ;;  %v5357_v25 = vpop.permute.xlu2 %5356  ;;  %vm4748_vm12 = vweird.f32 %v5540_v42 }
0x23f0   :  { %v5358_v33 = vunpack.i.l.bf16 %v5357_v25  ;;  %v5359_v35 = vunpack.i.h.bf16 %v5357_v25  ;;  %vm4749_vm14 = vmor %vm4747_vm13, %vm4748_vm12 }
0x23f1   :  { %v4744_v34 = vsub.f32 1.0, %v4743_v31 }
0x23f2   :  { %4780 = vmatpush.msra.mxu0 %v5358_v33 }
0x23f3   :  { %v4745_v18 = vmul.f32 %v5540_v42, %v4744_v34 }
0x23f4   :  { %4781 = vmatpush.msra.mxu0 %v5359_v35 }
0x23f5   :  { %v4746_v3 = vadd.f32 %v5540_v42, %v4745_v18  ;;  %v5665_v18 = vld [vmem:[#allocation40] ss:$0 sm:$0xff] }
0x23f6   :  { %v4541_v38 = vpop.f32.mrf.mxu1 }
0x23f7   :  { %v4750_v50 = vsel %vm4749_vm14, %v5540_v42, %v4746_v3  ;;  %5195 = vmatmul.msk.f32.vlgmr.msrb.gmra.mxu2 %vm839_vm1, %v4541_v38 }
0x23f8   :  { %v4755_v48 = vsel %vm4752_vm15, %v4754_v0, %v4750_v50  ;;  %4851 = vmatpush.msrb.mxu2 %v5659_v49  ;;  %v5666_v0 = vld [vmem:[#allocation46] ss:$0 sm:$0xff] }
0x23f9   :  { %v4756_v47 = vmul.f32 %v7760_v2, %v4755_v48 }
0x23fa   :  { %4852 = vmatpush.msrb.mxu2 %v5660_v36 }
0x23fb   :  { %5205 = vmatmul.msk.f32.vlgmr.msra.gmra.mxu0 %vm1596_vm6, %v4756_v47 }
0x23fc   :  { %4853 = vmatpush.msrb.mxu2 %v5661_v52 }
0x23fe   :  { %4854 = vmatpush.msrb.mxu2 %v5662_v1 }
0x2401   :  { %v4673_v57 = vpop.f32.mrf.mxu1 }
0x2402   :  { %5201 = vmatmul.msk.f32.vlgmr.msra.gmra.mxu2 %vm839_vm1, %v4673_v57 }
0x2428   :  { %v2849_v51 = vpop.xlane.xlu2 %2848 }
0x2429   :  { %v2850_v13 = vmul.f32 %v2849_v51, %v7257_v44 }
0x242b   :  { %v2851_v46 = vsub.f32 %v2846_v30, %v2850_v13 }
0x242d   :  { %v2852_v39 = vmul.f32 %v2851_v46, %v2851_v46 }
0x242f   :  { %v2853_v21 = vsel %vm760_vm0, %v2852_v39, 0.0 }
0x2478   :  { %v4783_v58 = vpop.f32.mrf.mxu0 }
0x2479   :  { %5206 = vmatmul.msk.f32.vlgmr.msrb.gmra.mxu1 %vm839_vm1, %v4783_v58 }
0x247a   :  { %v4564_v60 = vpop.f32.mrf.mxu2 }
0x247b   :  { %v4588_v55 = vadd.f32 %v7752_v43, %v4564_v60 }
0x2485   :  { %v4696_v12 = vpop.f32.mrf.mxu2 }
0x2486   :  { %v4699_v63 = vadd.f32 %v4696_v12, %v4588_v55 }
0x24f6   :  { %v4806_v62 = vpop.f32.mrf.mxu1 }
0x24f7   :  { %v4809_v6 = vadd.f32 %v4806_v62, %v4699_v63 }
0x24f9   :  { %v4810_v61 = vadd.f32 %v5663_v4, %v4809_v6 }
0x24fb   :  { %v7782_v27 = vadd.f32 %v4810_v61, %v7709_v40 }
0x24fd   :  { %v4812_v2 = vsel %vm760_vm0, %v7782_v27, 0.0 }
0x24fe   :  { %4813 = vadd.xlane.f32.xlu0 %v4812_v2 }
0x2506   :  { %2854 = vadd.xlane.f32.xlu0 %v2853_v21 }
0x2571   :  { %v4814_v43 = vpop.xlane.xlu0 %4813 }
0x2572   :  { %v4815_v7 = vmul.f32 %v4814_v43, %v7257_v44 }
0x2574   :  { %v4816_v8 = vsub.f32 %v7782_v27, %v4815_v7 }
0x2576   :  { %v4817_v14 = vmul.f32 %v4816_v8, %v4816_v8 }
0x2578   :  { %v4818_v15 = vsel %vm760_vm0, %v4817_v14, 0.0 }
0x2579   :  { %4819 = vadd.xlane.f32.xlu1 %v4818_v15  ;;  %v2855_v40 = vpop.xlane.xlu0 %2854 }
0x257a   :  { %v2856_v41 = vmul.f32 %v2855_v40, %v7257_v44 }
0x257c   :  { %v2857_v16 = vadd.f32 1e-05, %v2856_v41 }
0x257e   :  { %5541 = vrsqrt.f32 %v2857_v16  ;;  %vm2864_vm6 = vweird.f32 %v2857_v16 }
0x2584   :  { %v5542_v23 = vpop.eup %5541 }
0x2585   :  { %v2859_v20 = vmul.f32 %v5542_v23, %v2857_v16  ;;  %vm2865_vm1 = vweird.f32 %v5542_v23 }
0x2586   :  { %vm2866_vm2 = vmor %vm2864_vm6, %vm2865_vm1 }
0x2587   :  { %v2860_v11 = vmul.f32 %v5542_v23, %v2859_v20 }
0x2589   :  { %v2861_v54 = vmul.f32 0.5, %v2860_v11 }
0x258b   :  { %v2862_v22 = vsub.f32 1.5, %v2861_v54 }
0x258d   :  { %v2863_v19 = vmul.f32 %v5542_v23, %v2862_v22 }
0x258f   :  { %v2867_v45 = vsel %vm2866_vm2, %v5542_v23, %v2863_v19 }
0x2590   :  { %v2868_v28 = vmul.f32 %v2867_v45, %v2851_v46 }
0x2592   :  { %v2872_v5 = vmul.f32 %v7791_v9, %v2868_v28 }
0x2594   :  { %v2876_v26 = vadd.f32 %v7793_v56, %v2872_v5 }
0x2596   :  { %2877 = vst.msk [vmem:[#allocation49] sm:$0xff] %vm760_vm0, %v2876_v26 }
0x25ec   :  { %v4820_v24 = vpop.xlane.xlu1 %4819 }
0x25ed   :  { %v4821_v17 = vmul.f32 %v4820_v24, %v7257_v44 }
0x25ef   :  { %v4822_v59 = vadd.f32 1e-05, %v4821_v17 }
0x25f1   :  { %5543 = vrsqrt.f32 %v4822_v59  ;;  %vm4829_vm4 = vweird.f32 %v4822_v59 }
0x25f7   :  { %v5544_v30 = vpop.eup %5543 }
0x25f8   :  { %v4824_v29 = vmul.f32 %v5544_v30, %v4822_v59  ;;  %vm4830_vm3 = vweird.f32 %v5544_v30 }
0x25f9   :  { %vm4831_vm5 = vmor %vm4829_vm4, %vm4830_vm3 }
0x25fa   :  { %v4825_v32 = vmul.f32 %v5544_v30, %v4824_v29 }
0x25fc   :  { %v4826_v42 = vmul.f32 0.5, %v4825_v32 }
0x25fe   :  { %v4827_v31 = vsub.f32 1.5, %v4826_v42 }
0x2600   :  { %v4828_v25 = vmul.f32 %v5544_v30, %v4827_v31 }
0x2602   :  { %v4832_v33 = vsel %vm4831_vm5, %v5544_v30, %v4828_v25 }
0x2603   :  { %v4833_v34 = vmul.f32 %v4832_v33, %v4816_v8 }
0x2605   :  { %v4834_v35 = vmul.f32 %v5664_v53, %v4833_v34 }
0x2607   :  { %v4835_v37 = vadd.f32 %v5665_v18, %v4834_v35 }
0x2609   :  { %5207 = vmatmul.msk.f32.vlgmr.msrb.gmra.mxu2 %vm760_vm0, %v4835_v37 }
0x268c   :  { %v4856_v3 = vpop.f32.mrf.mxu2 }
0x268d   :  { %v4857_v38 = vadd.f32 %v5666_v0, %v4856_v3 }
0x268f   :  { %v4860_v50 = vmul.f32 0.044715, %v4857_v38  ;;  %v4859_v1 = vmul.f32 0.5, %v4857_v38 }
0x2691   :  { %v4861_v48 = vmul.f32 %v4860_v50, %v4857_v38 }
0x2693   :  { %v4862_v49 = vmul.f32 %v4861_v48, %v4857_v38 }
0x2695   :  { %v4863_v47 = vadd.f32 %v4862_v49, %v4857_v38 }
0x2697   :  { %v4864_v36 = vmul.f32 0.7978846, %v4863_v47 }
0x2699   :  { %5545 = vtanh.f32 %v4864_v36 }
0x269f   :  { %v5546_v52 = vpop.eup %5545 }
0x26a0   :  { %v4866_v57 = vadd.f32 1.0, %v5546_v52 }
0x26a2   :  { %v4867_v58 = vmul.f32 %v4866_v57, %v4859_v1 }
0x26a4   :  { %4884 = vmatmul.f32.vlgmr.msra.gmra.mxu3 %v4867_v58 }
0x2727   :  { %v4885_v60 = vpop.f32.mrf.mxu3 }
0x2728   :  { %v4886_v12 = vadd.f32 %v7768_v10, %v4885_v60 }
0x272a   :  { %v4888_v55 = vadd.f32 %v4886_v12, %v7782_v27 }
0x272c   :  { %v4889_v63 = vsel %vm760_vm0, %v4888_v55, 0.0 }
0x272d   :  { %4890 = vadd.xlane.f32.xlu1 %v4889_v63 }
0x27a0   :  { %v4891_v51 = vpop.xlane.xlu1 %4890 }
0x27a1   :  { %v4892_v62 = vmul.f32 %v4891_v51, %v7257_v44 }
0x27a3   :  { %v4893_v6 = vsub.f32 %v4888_v55, %v4892_v62 }
0x27a5   :  { %v4894_v13 = vmul.f32 %v4893_v6, %v4893_v6 }
0x27a7   :  { %v4895_v4 = vsel %vm760_vm0, %v4894_v13, 0.0 }
0x27a8   :  { %4896 = vadd.xlane.f32.xlu2 %v4895_v4 }
0x27a9   :  { %6410 = shalt.err (!%p6407_p0)
}
0x27aa   :  { %4942 = dma.vmem_to_hbm [thread:$0]  %s4935_s6, 256, %s4937_s27, [#allocation51], %s6521_s22, %s6521_s22, %s6522_s23  }
0x27ab   :  { %s6557_s29 = smov [#allocation49]   ;;  %s4923_s21 = sshll.u32 %s6806_s5, 4  ;;  %s4924_s21 = int_to_ptr.hbm [resolvable:$true] %s4923_s21 }
0x27ac   :  { %s4921_s16 = sshll.u32 %s6557_s29, 4  ;;  %s6423_s0 = sshra.s32 %s4924_s21, 4  ;;  %s4922_s16 = int_to_ptr.vmem [resolvable:$true] %s4921_s16  ;;  %s6424_s0 = int_to_ptr.hbm [resolvable:$true] %s6423_s0 }
0x27ad   :  { %s6425_s12 = scalar_lea.hbm %s6424_s0, 16  ;;  %s6427_s18 = scalar_lea.hbm %s6806_s5, 16 }
0x27ae   :  { %p6426_p1 = scmp.ne.s32.totalorder %s6424_s0, %s6425_s12  ;;  %p6428_p2 = scmp.lt.s32.totalorder %s6424_s0, %s6806_s5 }
0x27af   :  { %p6429_p3 = scmp.lt.s32.totalorder %s6427_s18, %s6425_s12 }
0x27b1   :  { %p6430_p4 = por %p6429_p3, %p6428_p2 }
0x27b3   :  { %p6431_p5 = pnand %p6430_p4, %p6426_p1 }
0x281b   :  { %v4897_v10 = vpop.xlane.xlu2 %4896 }
0x281c   :  { %v4898_v61 = vmul.f32 %v4897_v10, %v7257_v44 }
0x281e   :  { %v4899_v27 = vadd.f32 1e-05, %v4898_v61 }
0x2820   :  { %5547 = vrsqrt.f32 %v4899_v27  ;;  %vm4906_vm8 = vweird.f32 %v4899_v27 }
0x2826   :  { %v5548_v46 = vpop.eup %5547 }
0x2827   :  { %v4901_v2 = vmul.f32 %v5548_v46, %v4899_v27  ;;  %vm4907_vm7 = vweird.f32 %v5548_v46 }
0x2828   :  { %vm4908_vm9 = vmor %vm4906_vm8, %vm4907_vm7 }
0x2829   :  { %v4902_v39 = vmul.f32 %v5548_v46, %v4901_v2 }
0x282b   :  { %v4903_v21 = vmul.f32 0.5, %v4902_v39 }
0x282d   :  { %v4904_v43 = vsub.f32 1.5, %v4903_v21 }
0x282f   :  { %v4905_v7 = vmul.f32 %v5548_v46, %v4904_v43 }
0x2831   :  { %v4909_v8 = vsel %vm4908_vm9, %v5548_v46, %v4905_v7 }
0x2832   :  { %v4910_v14 = vmul.f32 %v4909_v8, %v4893_v6 }
0x2834   :  { %v4911_v44 = vmul.f32 %v7791_v9, %v4910_v14 }
0x2836   :  { %v4912_v15 = vadd.f32 %v7793_v56, %v4911_v44 }
0x2838   :  { %4914 = vst.msk [vmem:[#allocation49 + $0x8] sm:$0xff] %vm760_vm0, %v4912_v15 }
0x2839   :  { %6434 = shalt.err (!%p6431_p5)
}
0x283a   :  { %4929 = dma.vmem_to_hbm [thread:$0]  %s4922_s16, 256, %s4924_s21, [#allocation4], %s6521_s22, %s6521_s22, %s6522_s23  }
0x283b   :  { %6467 = dma.done.wait [#allocation4], 256  }
0x283c   :  { %6468 = vsyncadd [#allocation4], 4294967040 }
0x283d   :  { %6469 = dma.done.wait [#allocation51], 256  }
0x283e   :  { %6470 = vsyncadd [#allocation51], 4294967040 }
0x283f   :  { %4951 = vsyncpa [#allocation3], 1 }
0x2840   :  { %4952 = vsyncpa [#allocation6], 1 }
0x2841   :  { %4953 = vsyncpa [#allocation9], 1 }
0x2842   :  { %4954 = vsyncpa [#allocation12], 1 }
0x2843   :  { %4955 = vsyncpa [#allocation15], 1 }
0x2844   :  { %4956 = vsyncpa [#allocation18], 1 }
0x2845   :  { %4957 = vsyncpa [#allocation21], 1 }
0x2846   :  { %4958 = vsyncpa [#allocation24], 1 }
0x2847   :  { %4959 = vsyncpa [#allocation27], 1 }
0x2848   :  { %4960 = vsyncpa [#allocation30], 1 }
0x2849   :  { %4961 = vsyncpa [#allocation33], 1 }
0x284a   :  { %4962 = vsyncpa [#allocation36], 1 }
0x284b   :  { %4963 = vsyncpa [#allocation39], 1 }
0x284c   :  { %4964 = vsyncpa [#allocation42], 1 }
0x284d   :  { %4965 = vsyncpa [#allocation45], 1 }
0x284e   :  { %4966 = vsyncpa [#allocation48], 1 }
0x284f   :  { %4967 = vsyncpa [#allocation4], 1 }
0x2850   :  { %4968 = vsyncpa [#allocation51], 1 }

</bundles_post_ra>
